<compile_context>
chip_gen: v6e
topology: v6e:2x2x1
jax: 0.10.0
libtpu: 0.0.40
codegen_flags: <defaults>
</compile_context>

<pallas_src>
import functools
import math

import jax
import jax.numpy as jnp
from jax.experimental import pallas as pl
from jax.experimental.pallas import tpu as pltpu

BN_SCALE = 1.0 / math.sqrt(1.0 + 1e-5)  # eval-mode BatchNorm2d, default running stats


# --------------------------------------------------------------------------- #
# Tiling helpers
# --------------------------------------------------------------------------- #
def _row_tile(rows, max_tile=1024):
    """Largest row tile <= max_tile; single block when everything fits."""
    if rows <= max_tile:
        return rows
    for t in (1024, 512, 256, 128, 64, 32, 16, 8):
        if rows % t == 0:
            return t
    return rows  # fallback: one big block (correct, just VMEM-heavier)


def _reduce_row_tile(NR, W2, max_rows=1024):
    """Tile over N*H/2 rows for the reduce kernel (each step covers Tr*W2 matmul rows)."""
    if NR * W2 <= max_rows:
        return NR
    for t in range(NR - 1, 0, -1):
        if NR % t == 0 and t * W2 <= max_rows and (t * W2) % 8 == 0:
            return t
    return NR


def _batch_tile(N, HW, max_rows=2048):
    """Batch tile for gap_linear."""
    if N * HW <= max_rows:
        return N
    for t in range(N - 1, 0, -1):
        if N % t == 0 and t % 8 == 0 and t * HW <= max_rows:
            return t
    return N


# --------------------------------------------------------------------------- #
# Kernel 1: stem — im2col matmul (K = 9*Cin) + BN.  Rows = N*H*W.
# --------------------------------------------------------------------------- #
def _matmul_bn_kernel(x_ref, w_ref, o_ref):
    out = jnp.dot(x_ref[...], w_ref[...], preferred_element_type=jnp.float32)
    o_ref[...] = (out * BN_SCALE).astype(o_ref.dtype)


def stem_conv3x3(x_nhwc, w_flat):
    # x_nhwc: (N, H, W, Cin) f32 ; w_flat: (9*Cin, Cout) bf16
    N, H, W, Cin = x_nhwc.shape
    Cout = w_flat.shape[-1]
    # Build im2col patches in bf16 (halves the HBM materialization vs. f32).
    xb = x_nhwc.astype(jnp.bfloat16)
    xp = jnp.pad(xb, ((0, 0), (1, 1), (1, 1), (0, 0)))
    patches = jnp.concatenate(
        [xp[:, dy:dy + H, dx:dx + W, :] for dy in range(3) for dx in range(3)],
        axis=-1).reshape(N * H * W, 9 * Cin)
    rows = N * H * W
    T = _row_tile(rows)
    return pl.pallas_call(
        _matmul_bn_kernel,
        out_shape=jax.ShapeDtypeStruct((rows, Cout), jnp.bfloat16),
        grid=(rows // T,),
        in_specs=[
            pl.BlockSpec((T, 9 * Cin), lambda r: (r, 0)),
            pl.BlockSpec((9 * Cin, Cout), lambda r: (0, 0)),
        ],
        out_specs=pl.BlockSpec((T, Cout), lambda r: (r, 0)),
        compiler_params=pltpu.CompilerParams(dimension_semantics=("parallel",)),
    )(patches, w_flat)


# --------------------------------------------------------------------------- #
# Kernel 2: fused big-DAG stage.
# One call computes every DAG node (weighted mix -> ReLU -> 1x1 conv -> BN) and the
# two weighted output combinations.  Intermediate states stay in VMEM/vregs; only
# the last `window` states plus the two running output accumulators are live, and
# the (T, 2C) output is written with two lane-block stores (no in-kernel concat).
# --------------------------------------------------------------------------- #
def _dag_stage_kernel(wmix_ref, wcat_ref, x_ref, wconv_ref, o_ref, *,
                      n_nodes, window):
    C = x_ref.shape[-1]
    s = x_ref[...].astype(jnp.float32)          # (T, C)
    states = [s, s]                             # s0 == s1 in this network
    g0 = None
    g1 = None
    for i in range(n_nodes):
        sel = states[-window:]
        while len(sel) < window:                # pad with the earliest state
            sel = [sel[0]] + sel
        mix = sel[0] * wmix_ref[i, 0]
        for k in range(1, window):
            mix = mix + sel[k] * wmix_ref[i, k]
        h = jnp.maximum(mix, 0.0).astype(jnp.bfloat16)
        node = jnp.dot(h, wconv_ref[i],
                       preferred_element_type=jnp.float32) * BN_SCALE
        # incremental weighted-concat accumulation (keeps live tensors bounded)
        if i == 0:
            g0 = node * wcat_ref[0, 0]
            g1 = node * wcat_ref[1, 0]
        else:
            g0 = g0 + node * wcat_ref[0, i]
            g1 = g1 + node * wcat_ref[1, i]
        states.append(node)
        states = states[-window:]               # only last `window` states stay live
    o_ref[:, :C] = g0.astype(o_ref.dtype)
    o_ref[:, C:] = g1.astype(o_ref.dtype)


def dag_stage(x_rows, wmix, wcat, wconv_stack, n_nodes, window):
    # x_rows: (rows, C) bf16 ; wmix: (n_nodes, window) f32 ; wcat: (2, n_nodes) f32
    # wconv_stack: (n_nodes, C, C) bf16
    rows, C = x_rows.shape
    T = _row_tile(rows)
    return pl.pallas_call(
        functools.partial(_dag_stage_kernel, n_nodes=n_nodes, window=window),
        out_shape=jax.ShapeDtypeStruct((rows, 2 * C), jnp.bfloat16),
        grid=(rows // T,),
        in_specs=[
            pl.BlockSpec(memory_space=pltpu.MemorySpace.SMEM),
            pl.BlockSpec(memory_space=pltpu.MemorySpace.SMEM),
            pl.BlockSpec((T, C), lambda r: (r, 0)),
            pl.BlockSpec((n_nodes, C, C), lambda r: (0, 0, 0)),
        ],
        out_specs=pl.BlockSpec((T, 2 * C), lambda r: (r, 0)),
        compiler_params=pltpu.CompilerParams(dimension_semantics=("parallel",)),
    )(wmix, wcat, x_rows, wconv_stack)


# --------------------------------------------------------------------------- #
# Kernel 3: reduction cell — stride-2 subsample, ReLU -> 1x1 conv -> BN.
# The (N*H*W, Cd) rows are viewed (free row-major reshape) as (N*H/2, 2, W/2, 2*Cd):
#  * even-H rows are selected by the input DMA (block size 1 on the "2" axis),
#  * odd-W columns (packed in the upper Cd lanes) are ignored by zero-padding the
#    conv weight to (2*Cd, Cout) — no unaligned in-kernel lane slice.
# N and H/2 fold into the grid so each step has an MXU-sized M = Tr*W2.
# --------------------------------------------------------------------------- #
def _reduce_kernel(x_ref, w_ref, o_ref, *, Tr, W2, Cd2):
    x = x_ref[:, 0, :, :]                        # (Tr, W2, 2*Cd)  even-H rows only
    h = jnp.maximum(x, 0).reshape(Tr * W2, Cd2)  # ReLU in bf16, fold to matmul M
    out = jnp.dot(h, w_ref[...], preferred_element_type=jnp.float32) * BN_SCALE
    o_ref[...] = out.astype(o_ref.dtype)


def reduce_cell(x_rows, N, H, W, w):
    # x_rows: (N*H*W, Cd) bf16 ; w: (Cd, Cout) bf16
    Cd = x_rows.shape[-1]
    Cout = w.shape[-1]
    H2, W2 = H // 2, W // 2
    x4 = x_rows.reshape(N * H2, 2, W2, 2 * Cd)   # free row-major reshape
    # Zero rows for the odd-W half of the packed lane dim.
    w_pad = jnp.concatenate([w, jnp.zeros_like(w)], axis=0)     # (2*Cd, Cout)
    NR = N * H2
    Tr = _reduce_row_tile(NR, W2)
    out = pl.pallas_call(
        functools.partial(_reduce_kernel, Tr=Tr, W2=W2, Cd2=2 * Cd),
        out_shape=jax.ShapeDtypeStruct((NR * W2, Cout), jnp.bfloat16),
        grid=(NR // Tr,),
        in_specs=[
            pl.BlockSpec((Tr, 1, W2, 2 * Cd), lambda r: (r, 0, 0, 0)),
            pl.BlockSpec((2 * Cd, Cout), lambda r: (0, 0)),
        ],
        out_specs=pl.BlockSpec((Tr * W2, Cout), lambda r: (r, 0)),
        compiler_params=pltpu.CompilerParams(dimension_semantics=("parallel",)),
    )(x4, w_pad)
    return out                                    # (N*H2*W2, Cout)


# --------------------------------------------------------------------------- #
# Kernel 4: global average pool + Linear, tiled over the batch.
# Mean and the classifier matmul stay in f32 (tiny matrix; better logits precision).
# --------------------------------------------------------------------------- #
def _gap_linear_kernel(x_ref, w_ref, b_ref, o_ref):
    m = jnp.mean(x_ref[...].astype(jnp.float32), axis=1)       # (Tn, C)
    out = jnp.dot(m, w_ref[...], preferred_element_type=jnp.float32) + b_ref[...]
    o_ref[...] = out.astype(o_ref.dtype)


def gap_linear(x, w, b):
    # x: (N, HW, C) bf16 ; w: (C, ncls) f32 ; b: (1, ncls) f32
    N, HW, C = x.shape
    ncls = w.shape[-1]
    Tn = _batch_tile(N, HW)
    return pl.pallas_call(
        _gap_linear_kernel,
        out_shape=jax.ShapeDtypeStruct((N, ncls), jnp.float32),
        grid=(N // Tn,),
        in_specs=[
            pl.BlockSpec((Tn, HW, C), lambda n: (n, 0, 0)),
            pl.BlockSpec((C, ncls), lambda n: (0, 0)),
            pl.BlockSpec((1, ncls), lambda n: (0, 0)),
        ],
        out_specs=pl.BlockSpec((Tn, ncls), lambda n: (n, 0)),
        compiler_params=pltpu.CompilerParams(dimension_semantics=("parallel",)),
    )(x, w, b)


# --------------------------------------------------------------------------- #
# Model wrapper
# --------------------------------------------------------------------------- #
class SearchDistributionDagPallas:
    def __init__(self, C_in, C, n_classes, n_big_nodes, window=3, seed=42):
        self.C_in, self.C, self.n_classes = C_in, C, n_classes
        self.n_big_nodes, self.window = n_big_nodes, window
        self.stage_C = [4 * C, 8 * C, 16 * C]

        key = jax.random.PRNGKey(seed)
        ks = iter(jax.random.split(key, 64))

        def init(shape, fan_in):
            return (jax.random.normal(next(ks), shape, jnp.float32)
                    / math.sqrt(fan_in))

        # stem weight pre-reshaped for the im2col matmul, bf16 for the MXU.
        self.stem_w = init((3, 3, C_in, 4 * C), 9 * C_in).reshape(
            9 * C_in, 4 * C).astype(jnp.bfloat16)
        # per-stage stacked 1x1-conv weights for the DAG nodes.
        self.node_convs = [
            jnp.stack([init((cs, cs), cs) for _ in range(n_big_nodes)]
                      ).astype(jnp.bfloat16)
            for cs in self.stage_C
        ]
        # reduction cells take the 2x-channel DAG output of the previous stage.
        self.reduce_convs = [
            init((2 * self.stage_C[0], 2 * self.stage_C[0]),
                 2 * self.stage_C[0]).astype(jnp.bfloat16),
            init((2 * self.stage_C[1], 2 * self.stage_C[1]),
                 2 * self.stage_C[1]).astype(jnp.bfloat16),
        ]
        self.lin_w = init((32 * C, n_classes), 32 * C)          # f32 classifier
        self.lin_b = jnp.zeros((1, n_classes), jnp.float32)

    def __call__(self, x_nchw, weights_DAG, weights_concat):
        nb = self.n_big_nodes
        # NCHW -> NHWC
        x = jnp.transpose(x_nchw, (0, 2, 3, 1)).astype(jnp.float32)
        N, H, W, _ = x.shape
        s0 = stem_conv3x3(x, self.stem_w)                 # (N*H*W, 4C) bf16
        h, w = H, W

        feat = None
        for stage in range(3):
            wd = weights_DAG[stage * nb:(stage + 1) * nb].astype(jnp.float32)
            wc = weights_concat[stage].astype(jnp.float32)
            out = dag_stage(s0, wd, wc, self.node_convs[stage],
                            nb, self.window)              # (N*h*w, 2*Cs) bf16
            if stage < 2:
                s0 = reduce_cell(out, N, h, w, self.reduce_convs[stage])
                h, w = h // 2, w // 2
            else:
                feat = out                                # (N*h*w, 32*C)

        feat = feat.reshape(N, h * w, 32 * self.C)
        return gap_linear(feat, self.lin_w, self.lin_b)   # (N, n_classes) f32


if __name__ == "__main__":
    # Small, deterministic example.
    N, C_in, HWs = 2, 4, 16
    C, n_classes = 8, 10
    n_big_nodes, window = 2, 3

    model = SearchDistributionDagPallas(C_in, C, n_classes, n_big_nodes, window)

    k0, k1, k2 = jax.random.split(jax.random.PRNGKey(0), 3)
    x = jax.random.normal(k0, (N, C_in, HWs, HWs), jnp.float32)          # NCHW
    weights_DAG = jax.nn.softmax(
        jax.random.normal(k1, (3 * n_big_nodes, window), jnp.float32), axis=-1)
    weights_concat = jax.nn.softmax(
        jax.random.normal(k2, (3, 2, n_big_nodes), jnp.float32), axis=-1)

    forward = jax.jit(lambda a, b, c: model(a, b, c))
    logits = forward(x, weights_DAG, weights_concat)
    jax.block_until_ready(logits)
    assert logits.shape == (N, n_classes)
    print("KERNEL_OK")
</pallas_src>

<mosaic_0001>
module attributes {stable_mosaic.version = 11 : i64} {
  func.func @_matmul_bn_kernel(%arg0: i32, %arg1: memref<512x36xbf16, #tpu.memory_space<vmem>>, %arg2: memref<36x32xbf16, #tpu.memory_space<vmem>>, %arg3: memref<512x32xbf16, #tpu.memory_space<vmem>>) attributes {dimension_semantics = [#tpu.dimension_semantics<parallel>], iteration_bounds = array<i64: 1>, scalar_prefetch = 0 : i64, scratch_operands = 0 : i64, tpu.core_type = #tpu.core_type<tc>, window_params = [{transform_indices = @transform_0, window_bounds = array<i64: 512, 36>}, {pipeline_mode = #tpu.pipeline_mode<synchronous>, transform_indices = @transform_1, window_bounds = array<i64: 36, 32>}, {transform_indices = @transform_2, window_bounds = array<i64: 512, 32>}]} {
    %c0 = arith.constant 0 : index
    %c0_0 = arith.constant 0 : index
    %0 = vector.load %arg1[%c0, %c0_0] : memref<512x36xbf16, #tpu.memory_space<vmem>>, vector<512x36xbf16>
    %c0_1 = arith.constant 0 : index
    %c0_2 = arith.constant 0 : index
    %1 = vector.load %arg2[%c0_1, %c0_2] : memref<36x32xbf16, #tpu.memory_space<vmem>>, vector<36x32xbf16>
    %cst = arith.constant dense<0.000000e+00> : vector<512x32xf32>
    %2 = tpu.matmul %0, %1, %cst {dimension_numbers = #tpu.dot_dimension_numbers<[1], [0], [0], [1], [0, 0, 1, 1], [], []>} : vector<512x36xbf16>, vector<36x32xbf16>, vector<512x32xf32> -> vector<512x32xf32>
    %cst_3 = arith.constant 0.999994993 : f32
    %3 = vector.broadcast %cst_3 : f32 to vector<512x32xf32>
    %4 = arith.mulf %2, %3 : vector<512x32xf32>
    %5 = arith.truncf %4 : vector<512x32xf32> to vector<512x32xbf16>
    %c0_4 = arith.constant 0 : index
    %c0_5 = arith.constant 0 : index
    %6 = vector.load %arg3[%c0_4, %c0_5] : memref<512x32xbf16, #tpu.memory_space<vmem>>, vector<512x32xbf16>
    tpu.vector_store %arg3[%c0_4, %c0_5], %5 {strides = array<i32>} : memref<512x32xbf16, #tpu.memory_space<vmem>>, vector<512x32xbf16>,
    return
  }
  func.func @transform_0(%arg0: i32) -> (i32, i32) {
    %c0_i32 = arith.constant 0 : i32
    %c0_i32_0 = arith.constant 0 : i32
    return %arg0, %c0_i32 : i32, i32
  }
  func.func @transform_1(%arg0: i32) -> (i32, i32) {
    %c0_i32 = arith.constant 0 : i32
    %c0_i32_0 = arith.constant 0 : i32
    %c0_i32_1 = arith.constant 0 : i32
    return %c0_i32, %c0_i32_0 : i32, i32
  }
  func.func @transform_2(%arg0: i32) -> (i32, i32) {
    %c0_i32 = arith.constant 0 : i32
    %c0_i32_0 = arith.constant 0 : i32
    return %arg0, %c0_i32 : i32, i32
  }
}

module attributes {stable_mosaic.version = 11 : i64} {
  func.func @_dag_stage_kernel(%arg0: i32, %arg1: memref<2x3xf32, #tpu.memory_space<smem>>, %arg2: memref<2x2xf32, #tpu.memory_space<smem>>, %arg3: memref<512x32xbf16, #tpu.memory_space<vmem>>, %arg4: memref<2x32x32xbf16, #tpu.memory_space<vmem>>, %arg5: memref<512x64xbf16, #tpu.memory_space<vmem>>) attributes {dimension_semantics = [#tpu.dimension_semantics<parallel>], iteration_bounds = array<i64: 1>, scalar_prefetch = 0 : i64, scratch_operands = 0 : i64, tpu.core_type = #tpu.core_type<tc>, window_params = [{transform_indices = @transform_0, window_bounds = array<i64: 2, 3>}, {transform_indices = @transform_1, window_bounds = array<i64: 2, 2>}, {transform_indices = @transform_2, window_bounds = array<i64: 512, 32>}, {pipeline_mode = #tpu.pipeline_mode<synchronous>, transform_indices = @transform_3, window_bounds = array<i64: 2, 32, 32>}, {transform_indices = @transform_4, window_bounds = array<i64: 512, 64>}]} {
    %c0 = arith.constant 0 : index
    %c0_0 = arith.constant 0 : index
    %0 = vector.load %arg3[%c0, %c0_0] : memref<512x32xbf16, #tpu.memory_space<vmem>>, vector<512x32xbf16>
    %1 = arith.extf %0 : vector<512x32xbf16> to vector<512x32xf32>
    %c0_1 = arith.constant 0 : index
    %c0_2 = arith.constant 0 : index
    %2 = memref.load %arg1[%c0_1, %c0_2] : memref<2x3xf32, #tpu.memory_space<smem>>
    %3 = vector.broadcast %2 : f32 to vector<512x32xf32>
    %4 = arith.mulf %1, %3 : vector<512x32xf32>
    %c0_3 = arith.constant 0 : index
    %c1 = arith.constant 1 : index
    %5 = memref.load %arg1[%c0_3, %c1] : memref<2x3xf32, #tpu.memory_space<smem>>
    %6 = vector.broadcast %5 : f32 to vector<512x32xf32>
    %7 = arith.mulf %1, %6 : vector<512x32xf32>
    %8 = arith.addf %4, %7 : vector<512x32xf32>
    %c0_4 = arith.constant 0 : index
    %c2 = arith.constant 2 : index
    %9 = memref.load %arg1[%c0_4, %c2] : memref<2x3xf32, #tpu.memory_space<smem>>
    %10 = vector.broadcast %9 : f32 to vector<512x32xf32>
    %11 = arith.mulf %1, %10 : vector<512x32xf32>
    %12 = arith.addf %8, %11 : vector<512x32xf32>
    %cst = arith.constant 0.000000e+00 : f32
    %13 = vector.broadcast %cst : f32 to vector<512x32xf32>
    %14 = arith.maximumf %12, %13 : vector<512x32xf32>
    %15 = arith.truncf %14 : vector<512x32xf32> to vector<512x32xbf16>
    %c0_5 = arith.constant 0 : index
    %c0_6 = arith.constant 0 : index
    %c0_7 = arith.constant 0 : index
    %16 = vector.load %arg4[%c0_5, %c0_6, %c0_7] : memref<2x32x32xbf16, #tpu.memory_space<vmem>>, vector<1x32x32xbf16>
    %17 = vector.shape_cast %16 : vector<1x32x32xbf16> to vector<32x32xbf16>
    %cst_8 = arith.constant dense<0.000000e+00> : vector<512x32xf32>
    %18 = tpu.matmul %15, %17, %cst_8 {dimension_numbers = #tpu.dot_dimension_numbers<[1], [0], [0], [1], [0, 0, 1, 1], [], []>} : vector<512x32xbf16>, vector<32x32xbf16>, vector<512x32xf32> -> vector<512x32xf32>
    %cst_9 = arith.constant 0.999994993 : f32
    %19 = vector.broadcast %cst_9 : f32 to vector<512x32xf32>
    %20 = arith.mulf %18, %19 : vector<512x32xf32>
    %c0_10 = arith.constant 0 : index
    %c0_11 = arith.constant 0 : index
    %21 = memref.load %arg2[%c0_10, %c0_11] : memref<2x2xf32, #tpu.memory_space<smem>>
    %22 = vector.broadcast %21 : f32 to vector<512x32xf32>
    %23 = arith.mulf %20, %22 : vector<512x32xf32>
    %c1_12 = arith.constant 1 : index
    %c0_13 = arith.constant 0 : index
    %24 = memref.load %arg2[%c1_12, %c0_13] : memref<2x2xf32, #tpu.memory_space<smem>>
    %25 = vector.broadcast %24 : f32 to vector<512x32xf32>
    %26 = arith.mulf %20, %25 : vector<512x32xf32>
    %c1_14 = arith.constant 1 : index
    %c0_15 = arith.constant 0 : index
    %27 = memref.load %arg1[%c1_14, %c0_15] : memref<2x3xf32, #tpu.memory_space<smem>>
    %28 = vector.broadcast %27 : f32 to vector<512x32xf32>
    %29 = arith.mulf %1, %28 : vector<512x32xf32>
    %c1_16 = arith.constant 1 : index
    %c1_17 = arith.constant 1 : index
    %30 = memref.load %arg1[%c1_16, %c1_17] : memref<2x3xf32, #tpu.memory_space<smem>>
    %31 = vector.broadcast %30 : f32 to vector<512x32xf32>
    %32 = arith.mulf %1, %31 : vector<512x32xf32>
    %33 = arith.addf %29, %32 : vector<512x32xf32>
    %c1_18 = arith.constant 1 : index
    %c2_19 = arith.constant 2 : index
    %34 = memref.load %arg1[%c1_18, %c2_19] : memref<2x3xf32, #tpu.memory_space<smem>>
    %35 = vector.broadcast %34 : f32 to vector<512x32xf32>
    %36 = arith.mulf %20, %35 : vector<512x32xf32>
    %37 = arith.addf %33, %36 : vector<512x32xf32>
    %cst_20 = arith.constant 0.000000e+00 : f32
    %38 = vector.broadcast %cst_20 : f32 to vector<512x32xf32>
    %39 = arith.maximumf %37, %38 : vector<512x32xf32>
    %40 = arith.truncf %39 : vector<512x32xf32> to vector<512x32xbf16>
    %c1_21 = arith.constant 1 : index
    %c0_22 = arith.constant 0 : index
    %c0_23 = arith.constant 0 : index
    %41 = vector.load %arg4[%c1_21, %c0_22, %c0_23] : memref<2x32x32xbf16, #tpu.memory_space<vmem>>, vector<1x32x32xbf16>
    %42 = vector.shape_cast %41 : vector<1x32x32xbf16> to vector<32x32xbf16>
    %cst_24 = arith.constant dense<0.000000e+00> : vector<512x32xf32>
    %43 = tpu.matmul %40, %42, %cst_24 {dimension_numbers = #tpu.dot_dimension_numbers<[1], [0], [0], [1], [0, 0, 1, 1], [], []>} : vector<512x32xbf16>, vector<32x32xbf16>, vector<512x32xf32> -> vector<512x32xf32>
    %cst_25 = arith.constant 0.999994993 : f32
    %44 = vector.broadcast %cst_25 : f32 to vector<512x32xf32>
    %45 = arith.mulf %43, %44 : vector<512x32xf32>
    %c0_26 = arith.constant 0 : index
    %c1_27 = arith.constant 1 : index
    %46 = memref.load %arg2[%c0_26, %c1_27] : memref<2x2xf32, #tpu.memory_space<smem>>
    %47 = vector.broadcast %46 : f32 to vector<512x32xf32>
    %48 = arith.mulf %45, %47 : vector<512x32xf32>
    %49 = arith.addf %23, %48 : vector<512x32xf32>
    %c1_28 = arith.constant 1 : index
    %c1_29 = arith.constant 1 : index
    %50 = memref.load %arg2[%c1_28, %c1_29] : memref<2x2xf32, #tpu.memory_space<smem>>
    %51 = vector.broadcast %50 : f32 to vector<512x32xf32>
    %52 = arith.mulf %45, %51 : vector<512x32xf32>
    %53 = arith.addf %26, %52 : vector<512x32xf32>
    %54 = arith.truncf %49 : vector<512x32xf32> to vector<512x32xbf16>
    %c0_30 = arith.constant 0 : index
    %c0_31 = arith.constant 0 : index
    %55 = vector.load %arg5[%c0_30, %c0_31] : memref<512x64xbf16, #tpu.memory_space<vmem>>, vector<512x32xbf16>
    tpu.vector_store %arg5[%c0_30, %c0_31], %54 {strides = array<i32>} : memref<512x64xbf16, #tpu.memory_space<vmem>>, vector<512x32xbf16>,
    %56 = arith.truncf %53 : vector<512x32xf32> to vector<512x32xbf16>
    %c0_32 = arith.constant 0 : index
    %c32 = arith.constant 32 : index
    %57 = vector.load %arg5[%c0_32, %c32] : memref<512x64xbf16, #tpu.memory_space<vmem>>, vector<512x32xbf16>
    tpu.vector_store %arg5[%c0_32, %c32], %56 {strides = array<i32>} : memref<512x64xbf16, #tpu.memory_space<vmem>>, vector<512x32xbf16>,
    return
  }
  func.func @transform_0(%arg0: i32) -> (i32, i32) {
    %c0_i32 = arith.constant 0 : i32
    %c0_i32_0 = arith.constant 0 : i32
    %c0_i32_1 = arith.constant 0 : i32
    return %c0_i32, %c0_i32_0 : i32, i32
  }
  func.func @transform_1(%arg0: i32) -> (i32, i32) {
    %c0_i32 = arith.constant 0 : i32
    %c0_i32_0 = arith.constant 0 : i32
    %c0_i32_1 = arith.constant 0 : i32
    return %c0_i32, %c0_i32_0 : i32, i32
  }
  func.func @transform_2(%arg0: i32) -> (i32, i32) {
    %c0_i32 = arith.constant 0 : i32
    %c0_i32_0 = arith.constant 0 : i32
    return %arg0, %c0_i32 : i32, i32
  }
  func.func @transform_3(%arg0: i32) -> (i32, i32, i32) {
    %c0_i32 = arith.constant 0 : i32
    %c0_i32_0 = arith.constant 0 : i32
    %c0_i32_1 = arith.constant 0 : i32
    %c0_i32_2 = arith.constant 0 : i32
    return %c0_i32, %c0_i32_0, %c0_i32_1 : i32, i32, i32
  }
  func.func @transform_4(%arg0: i32) -> (i32, i32) {
    %c0_i32 = arith.constant 0 : i32
    %c0_i32_0 = arith.constant 0 : i32
    return %arg0, %c0_i32 : i32, i32
  }
}

module attributes {stable_mosaic.version = 11 : i64} {
  func.func @_reduce_kernel(%arg0: i32, %arg1: memref<16x1x8x128xbf16, #tpu.memory_space<vmem>>, %arg2: memref<128x64xbf16, #tpu.memory_space<vmem>>, %arg3: memref<128x64xbf16, #tpu.memory_space<vmem>>) attributes {dimension_semantics = [#tpu.dimension_semantics<parallel>], iteration_bounds = array<i64: 1>, scalar_prefetch = 0 : i64, scratch_operands = 0 : i64, tpu.core_type = #tpu.core_type<tc>, window_params = [{transform_indices = @transform_0, window_bounds = array<i64: 16, 1, 8, 128>}, {pipeline_mode = #tpu.pipeline_mode<synchronous>, transform_indices = @transform_1, window_bounds = array<i64: 128, 64>}, {transform_indices = @transform_2, window_bounds = array<i64: 128, 64>}]} {
    %c0 = arith.constant 0 : index
    %c0_0 = arith.constant 0 : index
    %c0_1 = arith.constant 0 : index
    %c0_2 = arith.constant 0 : index
    %0 = vector.load %arg1[%c0, %c0_0, %c0_1, %c0_2] : memref<16x1x8x128xbf16, #tpu.memory_space<vmem>>, vector<16x1x8x128xbf16>
    %1 = vector.shape_cast %0 : vector<16x1x8x128xbf16> to vector<16x8x128xbf16>
    %cst = arith.constant 0.000000e+00 : bf16
    %2 = vector.broadcast %cst : bf16 to vector<16x8x128xbf16>
    %3 = arith.maximumf %1, %2 : vector<16x8x128xbf16>
    %4 = vector.shape_cast %3 : vector<16x8x128xbf16> to vector<128x128xbf16>
    %c0_3 = arith.constant 0 : index
    %c0_4 = arith.constant 0 : index
    %5 = vector.load %arg2[%c0_3, %c0_4] : memref<128x64xbf16, #tpu.memory_space<vmem>>, vector<128x64xbf16>
    %cst_5 = arith.constant dense<0.000000e+00> : vector<128x64xf32>
    %6 = tpu.matmul %4, %5, %cst_5 {dimension_numbers = #tpu.dot_dimension_numbers<[1], [0], [0], [1], [0, 0, 1, 1], [], []>} : vector<128x128xbf16>, vector<128x64xbf16>, vector<128x64xf32> -> vector<128x64xf32>
    %cst_6 = arith.constant 0.999994993 : f32
    %7 = vector.broadcast %cst_6 : f32 to vector<128x64xf32>
    %8 = arith.mulf %6, %7 : vector<128x64xf32>
    %9 = arith.truncf %8 : vector<128x64xf32> to vector<128x64xbf16>
    %c0_7 = arith.constant 0 : index
    %c0_8 = arith.constant 0 : index
    %10 = vector.load %arg3[%c0_7, %c0_8] : memref<128x64xbf16, #tpu.memory_space<vmem>>, vector<128x64xbf16>
    tpu.vector_store %arg3[%c0_7, %c0_8], %9 {strides = array<i32>} : memref<128x64xbf16, #tpu.memory_space<vmem>>, vector<128x64xbf16>,
    return
  }
  func.func @transform_0(%arg0: i32) -> (i32, i32, i32, i32) {
    %c0_i32 = arith.constant 0 : i32
    %c0_i32_0 = arith.constant 0 : i32
    %c0_i32_1 = arith.constant 0 : i32
    %c0_i32_2 = arith.constant 0 : i32
    return %arg0, %c0_i32, %c0_i32_0, %c0_i32_1 : i32, i32, i32, i32
  }
  func.func @transform_1(%arg0: i32) -> (i32, i32) {
    %c0_i32 = arith.constant 0 : i32
    %c0_i32_0 = arith.constant 0 : i32
    %c0_i32_1 = arith.constant 0 : i32
    return %c0_i32, %c0_i32_0 : i32, i32
  }
  func.func @transform_2(%arg0: i32) -> (i32, i32) {
    %c0_i32 = arith.constant 0 : i32
    %c0_i32_0 = arith.constant 0 : i32
    return %arg0, %c0_i32 : i32, i32
  }
}

module attributes {stable_mosaic.version = 11 : i64} {
  func.func @_dag_stage_kernel(%arg0: i32, %arg1: memref<2x3xf32, #tpu.memory_space<smem>>, %arg2: memref<2x2xf32, #tpu.memory_space<smem>>, %arg3: memref<128x64xbf16, #tpu.memory_space<vmem>>, %arg4: memref<2x64x64xbf16, #tpu.memory_space<vmem>>, %arg5: memref<128x128xbf16, #tpu.memory_space<vmem>>) attributes {dimension_semantics = [#tpu.dimension_semantics<parallel>], iteration_bounds = array<i64: 1>, scalar_prefetch = 0 : i64, scratch_operands = 0 : i64, tpu.core_type = #tpu.core_type<tc>, window_params = [{transform_indices = @transform_0, window_bounds = array<i64: 2, 3>}, {transform_indices = @transform_1, window_bounds = array<i64: 2, 2>}, {transform_indices = @transform_2, window_bounds = array<i64: 128, 64>}, {pipeline_mode = #tpu.pipeline_mode<synchronous>, transform_indices = @transform_3, window_bounds = array<i64: 2, 64, 64>}, {transform_indices = @transform_4, window_bounds = array<i64: 128, 128>}]} {
    %c0 = arith.constant 0 : index
    %c0_0 = arith.constant 0 : index
    %0 = vector.load %arg3[%c0, %c0_0] : memref<128x64xbf16, #tpu.memory_space<vmem>>, vector<128x64xbf16>
    %1 = arith.extf %0 : vector<128x64xbf16> to vector<128x64xf32>
    %c0_1 = arith.constant 0 : index
    %c0_2 = arith.constant 0 : index
    %2 = memref.load %arg1[%c0_1, %c0_2] : memref<2x3xf32, #tpu.memory_space<smem>>
    %3 = vector.broadcast %2 : f32 to vector<128x64xf32>
    %4 = arith.mulf %1, %3 : vector<128x64xf32>
    %c0_3 = arith.constant 0 : index
    %c1 = arith.constant 1 : index
    %5 = memref.load %arg1[%c0_3, %c1] : memref<2x3xf32, #tpu.memory_space<smem>>
    %6 = vector.broadcast %5 : f32 to vector<128x64xf32>
    %7 = arith.mulf %1, %6 : vector<128x64xf32>
    %8 = arith.addf %4, %7 : vector<128x64xf32>
    %c0_4 = arith.constant 0 : index
    %c2 = arith.constant 2 : index
    %9 = memref.load %arg1[%c0_4, %c2] : memref<2x3xf32, #tpu.memory_space<smem>>
    %10 = vector.broadcast %9 : f32 to vector<128x64xf32>
    %11 = arith.mulf %1, %10 : vector<128x64xf32>
    %12 = arith.addf %8, %11 : vector<128x64xf32>
    %cst = arith.constant 0.000000e+00 : f32
    %13 = vector.broadcast %cst : f32 to vector<128x64xf32>
    %14 = arith.maximumf %12, %13 : vector<128x64xf32>
    %15 = arith.truncf %14 : vector<128x64xf32> to vector<128x64xbf16>
    %c0_5 = arith.constant 0 : index
    %c0_6 = arith.constant 0 : index
    %c0_7 = arith.constant 0 : index
    %16 = vector.load %arg4[%c0_5, %c0_6, %c0_7] : memref<2x64x64xbf16, #tpu.memory_space<vmem>>, vector<1x64x64xbf16>
    %17 = vector.shape_cast %16 : vector<1x64x64xbf16> to vector<64x64xbf16>
    %cst_8 = arith.constant dense<0.000000e+00> : vector<128x64xf32>
    %18 = tpu.matmul %15, %17, %cst_8 {dimension_numbers = #tpu.dot_dimension_numbers<[1], [0], [0], [1], [0, 0, 1, 1], [], []>} : vector<128x64xbf16>, vector<64x64xbf16>, vector<128x64xf32> -> vector<128x64xf32>
    %cst_9 = arith.constant 0.999994993 : f32
    %19 = vector.broadcast %cst_9 : f32 to vector<128x64xf32>
    %20 = arith.mulf %18, %19 : vector<128x64xf32>
    %c0_10 = arith.constant 0 : index
    %c0_11 = arith.constant 0 : index
    %21 = memref.load %arg2[%c0_10, %c0_11] : memref<2x2xf32, #tpu.memory_space<smem>>
    %22 = vector.broadcast %21 : f32 to vector<128x64xf32>
    %23 = arith.mulf %20, %22 : vector<128x64xf32>
    %c1_12 = arith.constant 1 : index
    %c0_13 = arith.constant 0 : index
    %24 = memref.load %arg2[%c1_12, %c0_13] : memref<2x2xf32, #tpu.memory_space<smem>>
    %25 = vector.broadcast %24 : f32 to vector<128x64xf32>
    %26 = arith.mulf %20, %25 : vector<128x64xf32>
    %c1_14 = arith.constant 1 : index
    %c0_15 = arith.constant 0 : index
    %27 = memref.load %arg1[%c1_14, %c0_15] : memref<2x3xf32, #tpu.memory_space<smem>>
    %28 = vector.broadcast %27 : f32 to vector<128x64xf32>
    %29 = arith.mulf %1, %28 : vector<128x64xf32>
    %c1_16 = arith.constant 1 : index
    %c1_17 = arith.constant 1 : index
    %30 = memref.load %arg1[%c1_16, %c1_17] : memref<2x3xf32, #tpu.memory_space<smem>>
    %31 = vector.broadcast %30 : f32 to vector<128x64xf32>
    %32 = arith.mulf %1, %31 : vector<128x64xf32>
    %33 = arith.addf %29, %32 : vector<128x64xf32>
    %c1_18 = arith.constant 1 : index
    %c2_19 = arith.constant 2 : index
    %34 = memref.load %arg1[%c1_18, %c2_19] : memref<2x3xf32, #tpu.memory_space<smem>>
    %35 = vector.broadcast %34 : f32 to vector<128x64xf32>
    %36 = arith.mulf %20, %35 : vector<128x64xf32>
    %37 = arith.addf %33, %36 : vector<128x64xf32>
    %cst_20 = arith.constant 0.000000e+00 : f32
    %38 = vector.broadcast %cst_20 : f32 to vector<128x64xf32>
    %39 = arith.maximumf %37, %38 : vector<128x64xf32>
    %40 = arith.truncf %39 : vector<128x64xf32> to vector<128x64xbf16>
    %c1_21 = arith.constant 1 : index
    %c0_22 = arith.constant 0 : index
    %c0_23 = arith.constant 0 : index
    %41 = vector.load %arg4[%c1_21, %c0_22, %c0_23] : memref<2x64x64xbf16, #tpu.memory_space<vmem>>, vector<1x64x64xbf16>
    %42 = vector.shape_cast %41 : vector<1x64x64xbf16> to vector<64x64xbf16>
    %cst_24 = arith.constant dense<0.000000e+00> : vector<128x64xf32>
    %43 = tpu.matmul %40, %42, %cst_24 {dimension_numbers = #tpu.dot_dimension_numbers<[1], [0], [0], [1], [0, 0, 1, 1], [], []>} : vector<128x64xbf16>, vector<64x64xbf16>, vector<128x64xf32> -> vector<128x64xf32>
    %cst_25 = arith.constant 0.999994993 : f32
    %44 = vector.broadcast %cst_25 : f32 to vector<128x64xf32>
    %45 = arith.mulf %43, %44 : vector<128x64xf32>
    %c0_26 = arith.constant 0 : index
    %c1_27 = arith.constant 1 : index
    %46 = memref.load %arg2[%c0_26, %c1_27] : memref<2x2xf32, #tpu.memory_space<smem>>
    %47 = vector.broadcast %46 : f32 to vector<128x64xf32>
    %48 = arith.mulf %45, %47 : vector<128x64xf32>
    %49 = arith.addf %23, %48 : vector<128x64xf32>
    %c1_28 = arith.constant 1 : index
    %c1_29 = arith.constant 1 : index
    %50 = memref.load %arg2[%c1_28, %c1_29] : memref<2x2xf32, #tpu.memory_space<smem>>
    %51 = vector.broadcast %50 : f32 to vector<128x64xf32>
    %52 = arith.mulf %45, %51 : vector<128x64xf32>
    %53 = arith.addf %26, %52 : vector<128x64xf32>
    %54 = arith.truncf %49 : vector<128x64xf32> to vector<128x64xbf16>
    %c0_30 = arith.constant 0 : index
    %c0_31 = arith.constant 0 : index
    %55 = vector.load %arg5[%c0_30, %c0_31] : memref<128x128xbf16, #tpu.memory_space<vmem>>, vector<128x64xbf16>
    tpu.vector_store %arg5[%c0_30, %c0_31], %54 {strides = array<i32>} : memref<128x128xbf16, #tpu.memory_space<vmem>>, vector<128x64xbf16>,
    %56 = arith.truncf %53 : vector<128x64xf32> to vector<128x64xbf16>
    %c0_32 = arith.constant 0 : index
    %c64 = arith.constant 64 : index
    %57 = vector.load %arg5[%c0_32, %c64] : memref<128x128xbf16, #tpu.memory_space<vmem>>, vector<128x64xbf16>
    tpu.vector_store %arg5[%c0_32, %c64], %56 {strides = array<i32>} : memref<128x128xbf16, #tpu.memory_space<vmem>>, vector<128x64xbf16>,
    return
  }
  func.func @transform_0(%arg0: i32) -> (i32, i32) {
    %c0_i32 = arith.constant 0 : i32
    %c0_i32_0 = arith.constant 0 : i32
    %c0_i32_1 = arith.constant 0 : i32
    return %c0_i32, %c0_i32_0 : i32, i32
  }
  func.func @transform_1(%arg0: i32) -> (i32, i32) {
    %c0_i32 = arith.constant 0 : i32
    %c0_i32_0 = arith.constant 0 : i32
    %c0_i32_1 = arith.constant 0 : i32
    return %c0_i32, %c0_i32_0 : i32, i32
  }
  func.func @transform_2(%arg0: i32) -> (i32, i32) {
    %c0_i32 = arith.constant 0 : i32
    %c0_i32_0 = arith.constant 0 : i32
    return %arg0, %c0_i32 : i32, i32
  }
  func.func @transform_3(%arg0: i32) -> (i32, i32, i32) {
    %c0_i32 = arith.constant 0 : i32
    %c0_i32_0 = arith.constant 0 : i32
    %c0_i32_1 = arith.constant 0 : i32
    %c0_i32_2 = arith.constant 0 : i32
    return %c0_i32, %c0_i32_0, %c0_i32_1 : i32, i32, i32
  }
  func.func @transform_4(%arg0: i32) -> (i32, i32) {
    %c0_i32 = arith.constant 0 : i32
    %c0_i32_0 = arith.constant 0 : i32
    return %arg0, %c0_i32 : i32, i32
  }
}

module attributes {stable_mosaic.version = 11 : i64} {
  func.func @_reduce_kernel(%arg0: i32, %arg1: memref<8x1x4x256xbf16, #tpu.memory_space<vmem>>, %arg2: memref<256x128xbf16, #tpu.memory_space<vmem>>, %arg3: memref<32x128xbf16, #tpu.memory_space<vmem>>) attributes {dimension_semantics = [#tpu.dimension_semantics<parallel>], iteration_bounds = array<i64: 1>, scalar_prefetch = 0 : i64, scratch_operands = 0 : i64, tpu.core_type = #tpu.core_type<tc>, window_params = [{transform_indices = @transform_0, window_bounds = array<i64: 8, 1, 4, 256>}, {pipeline_mode = #tpu.pipeline_mode<synchronous>, transform_indices = @transform_1, window_bounds = array<i64: 256, 128>}, {transform_indices = @transform_2, window_bounds = array<i64: 32, 128>}]} {
    %c0 = arith.constant 0 : index
    %c0_0 = arith.constant 0 : index
    %c0_1 = arith.constant 0 : index
    %c0_2 = arith.constant 0 : index
    %0 = vector.load %arg1[%c0, %c0_0, %c0_1, %c0_2] : memref<8x1x4x256xbf16, #tpu.memory_space<vmem>>, vector<8x1x4x256xbf16>
    %1 = vector.shape_cast %0 : vector<8x1x4x256xbf16> to vector<8x4x256xbf16>
    %cst = arith.constant 0.000000e+00 : bf16
    %2 = vector.broadcast %cst : bf16 to vector<8x4x256xbf16>
    %3 = arith.maximumf %1, %2 : vector<8x4x256xbf16>
    %4 = vector.shape_cast %3 : vector<8x4x256xbf16> to vector<32x256xbf16>
    %c0_3 = arith.constant 0 : index
    %c0_4 = arith.constant 0 : index
    %5 = vector.load %arg2[%c0_3, %c0_4] : memref<256x128xbf16, #tpu.memory_space<vmem>>, vector<256x128xbf16>
    %cst_5 = arith.constant dense<0.000000e+00> : vector<32x128xf32>
    %6 = tpu.matmul %4, %5, %cst_5 {dimension_numbers = #tpu.dot_dimension_numbers<[1], [0], [0], [1], [0, 0, 1, 1], [], []>} : vector<32x256xbf16>, vector<256x128xbf16>, vector<32x128xf32> -> vector<32x128xf32>
    %cst_6 = arith.constant 0.999994993 : f32
    %7 = vector.broadcast %cst_6 : f32 to vector<32x128xf32>
    %8 = arith.mulf %6, %7 : vector<32x128xf32>
    %9 = arith.truncf %8 : vector<32x128xf32> to vector<32x128xbf16>
    %c0_7 = arith.constant 0 : index
    %c0_8 = arith.constant 0 : index
    %10 = vector.load %arg3[%c0_7, %c0_8] : memref<32x128xbf16, #tpu.memory_space<vmem>>, vector<32x128xbf16>
    tpu.vector_store %arg3[%c0_7, %c0_8], %9 {strides = array<i32>} : memref<32x128xbf16, #tpu.memory_space<vmem>>, vector<32x128xbf16>,
    return
  }
  func.func @transform_0(%arg0: i32) -> (i32, i32, i32, i32) {
    %c0_i32 = arith.constant 0 : i32
    %c0_i32_0 = arith.constant 0 : i32
    %c0_i32_1 = arith.constant 0 : i32
    %c0_i32_2 = arith.constant 0 : i32
    return %arg0, %c0_i32, %c0_i32_0, %c0_i32_1 : i32, i32, i32, i32
  }
  func.func @transform_1(%arg0: i32) -> (i32, i32) {
    %c0_i32 = arith.constant 0 : i32
    %c0_i32_0 = arith.constant 0 : i32
    %c0_i32_1 = arith.constant 0 : i32
    return %c0_i32, %c0_i32_0 : i32, i32
  }
  func.func @transform_2(%arg0: i32) -> (i32, i32) {
    %c0_i32 = arith.constant 0 : i32
    %c0_i32_0 = arith.constant 0 : i32
    return %arg0, %c0_i32 : i32, i32
  }
}

module attributes {stable_mosaic.version = 11 : i64} {
  func.func @_dag_stage_kernel(%arg0: i32, %arg1: memref<2x3xf32, #tpu.memory_space<smem>>, %arg2: memref<2x2xf32, #tpu.memory_space<smem>>, %arg3: memref<32x128xbf16, #tpu.memory_space<vmem>>, %arg4: memref<2x128x128xbf16, #tpu.memory_space<vmem>>, %arg5: memref<32x256xbf16, #tpu.memory_space<vmem>>) attributes {dimension_semantics = [#tpu.dimension_semantics<parallel>], iteration_bounds = array<i64: 1>, scalar_prefetch = 0 : i64, scratch_operands = 0 : i64, tpu.core_type = #tpu.core_type<tc>, window_params = [{transform_indices = @transform_0, window_bounds = array<i64: 2, 3>}, {transform_indices = @transform_1, window_bounds = array<i64: 2, 2>}, {transform_indices = @transform_2, window_bounds = array<i64: 32, 128>}, {pipeline_mode = #tpu.pipeline_mode<synchronous>, transform_indices = @transform_3, window_bounds = array<i64: 2, 128, 128>}, {transform_indices = @transform_4, window_bounds = array<i64: 32, 256>}]} {
    %c0 = arith.constant 0 : index
    %c0_0 = arith.constant 0 : index
    %0 = vector.load %arg3[%c0, %c0_0] : memref<32x128xbf16, #tpu.memory_space<vmem>>, vector<32x128xbf16>
    %1 = arith.extf %0 : vector<32x128xbf16> to vector<32x128xf32>
    %c0_1 = arith.constant 0 : index
    %c0_2 = arith.constant 0 : index
    %2 = memref.load %arg1[%c0_1, %c0_2] : memref<2x3xf32, #tpu.memory_space<smem>>
    %3 = vector.broadcast %2 : f32 to vector<32x128xf32>
    %4 = arith.mulf %1, %3 : vector<32x128xf32>
    %c0_3 = arith.constant 0 : index
    %c1 = arith.constant 1 : index
    %5 = memref.load %arg1[%c0_3, %c1] : memref<2x3xf32, #tpu.memory_space<smem>>
    %6 = vector.broadcast %5 : f32 to vector<32x128xf32>
    %7 = arith.mulf %1, %6 : vector<32x128xf32>
    %8 = arith.addf %4, %7 : vector<32x128xf32>
    %c0_4 = arith.constant 0 : index
    %c2 = arith.constant 2 : index
    %9 = memref.load %arg1[%c0_4, %c2] : memref<2x3xf32, #tpu.memory_space<smem>>
    %10 = vector.broadcast %9 : f32 to vector<32x128xf32>
    %11 = arith.mulf %1, %10 : vector<32x128xf32>
    %12 = arith.addf %8, %11 : vector<32x128xf32>
    %cst = arith.constant 0.000000e+00 : f32
    %13 = vector.broadcast %cst : f32 to vector<32x128xf32>
    %14 = arith.maximumf %12, %13 : vector<32x128xf32>
    %15 = arith.truncf %14 : vector<32x128xf32> to vector<32x128xbf16>
    %c0_5 = arith.constant 0 : index
    %c0_6 = arith.constant 0 : index
    %c0_7 = arith.constant 0 : index
    %16 = vector.load %arg4[%c0_5, %c0_6, %c0_7] : memref<2x128x128xbf16, #tpu.memory_space<vmem>>, vector<1x128x128xbf16>
    %17 = vector.shape_cast %16 : vector<1x128x128xbf16> to vector<128x128xbf16>
    %cst_8 = arith.constant dense<0.000000e+00> : vector<32x128xf32>
    %18 = tpu.matmul %15, %17, %cst_8 {dimension_numbers = #tpu.dot_dimension_numbers<[1], [0], [0], [1], [0, 0, 1, 1], [], []>} : vector<32x128xbf16>, vector<128x128xbf16>, vector<32x128xf32> -> vector<32x128xf32>
    %cst_9 = arith.constant 0.999994993 : f32
    %19 = vector.broadcast %cst_9 : f32 to vector<32x128xf32>
    %20 = arith.mulf %18, %19 : vector<32x128xf32>
    %c0_10 = arith.constant 0 : index
    %c0_11 = arith.constant 0 : index
    %21 = memref.load %arg2[%c0_10, %c0_11] : memref<2x2xf32, #tpu.memory_space<smem>>
    %22 = vector.broadcast %21 : f32 to vector<32x128xf32>
    %23 = arith.mulf %20, %22 : vector<32x128xf32>
    %c1_12 = arith.constant 1 : index
    %c0_13 = arith.constant 0 : index
    %24 = memref.load %arg2[%c1_12, %c0_13] : memref<2x2xf32, #tpu.memory_space<smem>>
    %25 = vector.broadcast %24 : f32 to vector<32x128xf32>
    %26 = arith.mulf %20, %25 : vector<32x128xf32>
    %c1_14 = arith.constant 1 : index
    %c0_15 = arith.constant 0 : index
    %27 = memref.load %arg1[%c1_14, %c0_15] : memref<2x3xf32, #tpu.memory_space<smem>>
    %28 = vector.broadcast %27 : f32 to vector<32x128xf32>
    %29 = arith.mulf %1, %28 : vector<32x128xf32>
    %c1_16 = arith.constant 1 : index
    %c1_17 = arith.constant 1 : index
    %30 = memref.load %arg1[%c1_16, %c1_17] : memref<2x3xf32, #tpu.memory_space<smem>>
    %31 = vector.broadcast %30 : f32 to vector<32x128xf32>
    %32 = arith.mulf %1, %31 : vector<32x128xf32>
    %33 = arith.addf %29, %32 : vector<32x128xf32>
    %c1_18 = arith.constant 1 : index
    %c2_19 = arith.constant 2 : index
    %34 = memref.load %arg1[%c1_18, %c2_19] : memref<2x3xf32, #tpu.memory_space<smem>>
    %35 = vector.broadcast %34 : f32 to vector<32x128xf32>
    %36 = arith.mulf %20, %35 : vector<32x128xf32>
    %37 = arith.addf %33, %36 : vector<32x128xf32>
    %cst_20 = arith.constant 0.000000e+00 : f32
    %38 = vector.broadcast %cst_20 : f32 to vector<32x128xf32>
    %39 = arith.maximumf %37, %38 : vector<32x128xf32>
    %40 = arith.truncf %39 : vector<32x128xf32> to vector<32x128xbf16>
    %c1_21 = arith.constant 1 : index
    %c0_22 = arith.constant 0 : index
    %c0_23 = arith.constant 0 : index
    %41 = vector.load %arg4[%c1_21, %c0_22, %c0_23] : memref<2x128x128xbf16, #tpu.memory_space<vmem>>, vector<1x128x128xbf16>
    %42 = vector.shape_cast %41 : vector<1x128x128xbf16> to vector<128x128xbf16>
    %cst_24 = arith.constant dense<0.000000e+00> : vector<32x128xf32>
    %43 = tpu.matmul %40, %42, %cst_24 {dimension_numbers = #tpu.dot_dimension_numbers<[1], [0], [0], [1], [0, 0, 1, 1], [], []>} : vector<32x128xbf16>, vector<128x128xbf16>, vector<32x128xf32> -> vector<32x128xf32>
    %cst_25 = arith.constant 0.999994993 : f32
    %44 = vector.broadcast %cst_25 : f32 to vector<32x128xf32>
    %45 = arith.mulf %43, %44 : vector<32x128xf32>
    %c0_26 = arith.constant 0 : index
    %c1_27 = arith.constant 1 : index
    %46 = memref.load %arg2[%c0_26, %c1_27] : memref<2x2xf32, #tpu.memory_space<smem>>
    %47 = vector.broadcast %46 : f32 to vector<32x128xf32>
    %48 = arith.mulf %45, %47 : vector<32x128xf32>
    %49 = arith.addf %23, %48 : vector<32x128xf32>
    %c1_28 = arith.constant 1 : index
    %c1_29 = arith.constant 1 : index
    %50 = memref.load %arg2[%c1_28, %c1_29] : memref<2x2xf32, #tpu.memory_space<smem>>
    %51 = vector.broadcast %50 : f32 to vector<32x128xf32>
    %52 = arith.mulf %45, %51 : vector<32x128xf32>
    %53 = arith.addf %26, %52 : vector<32x128xf32>
    %54 = arith.truncf %49 : vector<32x128xf32> to vector<32x128xbf16>
    %c0_30 = arith.constant 0 : index
    %c0_31 = arith.constant 0 : index
    %55 = vector.load %arg5[%c0_30, %c0_31] : memref<32x256xbf16, #tpu.memory_space<vmem>>, vector<32x128xbf16>
    tpu.vector_store %arg5[%c0_30, %c0_31], %54 {strides = array<i32>} : memref<32x256xbf16, #tpu.memory_space<vmem>>, vector<32x128xbf16>,
    %56 = arith.truncf %53 : vector<32x128xf32> to vector<32x128xbf16>
    %c0_32 = arith.constant 0 : index
    %c128 = arith.constant 128 : index
    %57 = vector.load %arg5[%c0_32, %c128] : memref<32x256xbf16, #tpu.memory_space<vmem>>, vector<32x128xbf16>
    tpu.vector_store %arg5[%c0_32, %c128], %56 {strides = array<i32>} : memref<32x256xbf16, #tpu.memory_space<vmem>>, vector<32x128xbf16>,
    return
  }
  func.func @transform_0(%arg0: i32) -> (i32, i32) {
    %c0_i32 = arith.constant 0 : i32
    %c0_i32_0 = arith.constant 0 : i32
    %c0_i32_1 = arith.constant 0 : i32
    return %c0_i32, %c0_i32_0 : i32, i32
  }
  func.func @transform_1(%arg0: i32) -> (i32, i32) {
    %c0_i32 = arith.constant 0 : i32
    %c0_i32_0 = arith.constant 0 : i32
    %c0_i32_1 = arith.constant 0 : i32
    return %c0_i32, %c0_i32_0 : i32, i32
  }
  func.func @transform_2(%arg0: i32) -> (i32, i32) {
    %c0_i32 = arith.constant 0 : i32
    %c0_i32_0 = arith.constant 0 : i32
    return %arg0, %c0_i32 : i32, i32
  }
  func.func @transform_3(%arg0: i32) -> (i32, i32, i32) {
    %c0_i32 = arith.constant 0 : i32
    %c0_i32_0 = arith.constant 0 : i32
    %c0_i32_1 = arith.constant 0 : i32
    %c0_i32_2 = arith.constant 0 : i32
    return %c0_i32, %c0_i32_0, %c0_i32_1 : i32, i32, i32
  }
  func.func @transform_4(%arg0: i32) -> (i32, i32) {
    %c0_i32 = arith.constant 0 : i32
    %c0_i32_0 = arith.constant 0 : i32
    return %arg0, %c0_i32 : i32, i32
  }
}

module attributes {stable_mosaic.version = 11 : i64} {
  func.func @_gap_linear_kernel(%arg0: i32, %arg1: memref<2x16x256xbf16, #tpu.memory_space<vmem>>, %arg2: memref<256x10xf32, #tpu.memory_space<vmem>>, %arg3: memref<1x10xf32, #tpu.memory_space<vmem>>, %arg4: memref<2x10xf32, #tpu.memory_space<vmem>>) attributes {dimension_semantics = [#tpu.dimension_semantics<parallel>], iteration_bounds = array<i64: 1>, scalar_prefetch = 0 : i64, scratch_operands = 0 : i64, tpu.core_type = #tpu.core_type<tc>, window_params = [{transform_indices = @transform_0, window_bounds = array<i64: 2, 16, 256>}, {pipeline_mode = #tpu.pipeline_mode<synchronous>, transform_indices = @transform_1, window_bounds = array<i64: 256, 10>}, {pipeline_mode = #tpu.pipeline_mode<synchronous>, transform_indices = @transform_2, window_bounds = array<i64: 1, 10>}, {transform_indices = @transform_3, window_bounds = array<i64: 2, 10>}]} {
    %c0 = arith.constant 0 : index
    %c0_0 = arith.constant 0 : index
    %c0_1 = arith.constant 0 : index
    %0 = vector.load %arg1[%c0, %c0_0, %c0_1] : memref<2x16x256xbf16, #tpu.memory_space<vmem>>, vector<2x16x256xbf16>
    %1 = arith.extf %0 : vector<2x16x256xbf16> to vector<2x16x256xf32>
    %cst = arith.constant dense<0.000000e+00> : vector<2x256xf32>
    %2 = vector.multi_reduction <add>, %1, %cst [1] : vector<2x16x256xf32> to vector<2x256xf32>
    %cst_2 = arith.constant 1.600000e+01 : f32
    %3 = vector.broadcast %cst_2 : f32 to vector<2x256xf32>
    %4 = arith.divf %2, %3 : vector<2x256xf32>
    %c0_3 = arith.constant 0 : index
    %c0_4 = arith.constant 0 : index
    %5 = vector.load %arg2[%c0_3, %c0_4] : memref<256x10xf32, #tpu.memory_space<vmem>>, vector<256x10xf32>
    %cst_5 = arith.constant dense<0.000000e+00> : vector<2x10xf32>
    %6 = tpu.matmul %4, %5, %cst_5 {dimension_numbers = #tpu.dot_dimension_numbers<[1], [0], [0], [1], [0, 0, 1, 1], [], []>} : vector<2x256xf32>, vector<256x10xf32>, vector<2x10xf32> -> vector<2x10xf32>
    %c0_6 = arith.constant 0 : index
    %c0_7 = arith.constant 0 : index
    %7 = vector.load %arg3[%c0_6, %c0_7] : memref<1x10xf32, #tpu.memory_space<vmem>>, vector<1x10xf32>
    %8 = vector.broadcast %7 : vector<1x10xf32> to vector<2x10xf32>
    %9 = arith.addf %6, %8 : vector<2x10xf32>
    %c0_8 = arith.constant 0 : index
    %c0_9 = arith.constant 0 : index
    %10 = vector.load %arg4[%c0_8, %c0_9] : memref<2x10xf32, #tpu.memory_space<vmem>>, vector<2x10xf32>
    tpu.vector_store %arg4[%c0_8, %c0_9], %9 {strides = array<i32>} : memref<2x10xf32, #tpu.memory_space<vmem>>, vector<2x10xf32>,
    return
  }
  func.func @transform_0(%arg0: i32) -> (i32, i32, i32) {
    %c0_i32 = arith.constant 0 : i32
    %c0_i32_0 = arith.constant 0 : i32
    %c0_i32_1 = arith.constant 0 : i32
    return %arg0, %c0_i32, %c0_i32_0 : i32, i32, i32
  }
  func.func @transform_1(%arg0: i32) -> (i32, i32) {
    %c0_i32 = arith.constant 0 : i32
    %c0_i32_0 = arith.constant 0 : i32
    %c0_i32_1 = arith.constant 0 : i32
    return %c0_i32, %c0_i32_0 : i32, i32
  }
  func.func @transform_2(%arg0: i32) -> (i32, i32) {
    %c0_i32 = arith.constant 0 : i32
    %c0_i32_0 = arith.constant 0 : i32
    %c0_i32_1 = arith.constant 0 : i32
    return %c0_i32, %c0_i32_0 : i32, i32
  }
  func.func @transform_3(%arg0: i32) -> (i32, i32) {
    %c0_i32 = arith.constant 0 : i32
    %c0_i32_0 = arith.constant 0 : i32
    return %arg0, %c0_i32 : i32, i32
  }
}

</mosaic_0001>

<bundles_post_ra>
// kernel: _lambda_.7
= control target key start
LH: loop header
LB: loop body
LE: loop exit
PB: predicated region body
PF: predicated region fallthrough
CT: control target
= control target key end

     0   :  { %vm353_vm0 = vcmask 1041408   ;;  %vm256_vm1 = vcmask 293888   ;;  %vm966_vm2 = vcmask 257024   ;;  %s1786_s1 = inlined_call_operand.vmem [shape: bf16[36,32], index: 1, kind: input, shape index: {}]   ;;  %s1787_s0 = inlined_call_operand.vmem [shape: bf16[512,36], index: 0, kind: input, shape index: {}]   ;;  %s1788_s2 = inlined_call_operand.vmem [shape: bf16[512,32], index: 2, kind: output, shape index: {}]  }
   0x1   :  { %v1343_v0 = vld [vmem:[%s1786_s1 + $0x10] ss:$0 sps:$4 sm:$0x33]   ;;  %v1344_v1 = vld [vmem:[%s1786_s1 + $0x8] sm:$0xff]   ;;  %v1345_v3 = vld [vmem:[%s1786_s1] sm:$0xff]  }
   0x2   :  { %1341 = vmatprep.subr.msk.bf16.mxu0 %vm353_vm0, %v1343_v0  ;;  %1342 = vmatprep.subr.msk.bf16.mxu1 %vm353_vm0, %v1343_v0  ;;  %v355_v2 = vsel %vm353_vm0, %v1343_v0, 0  ;;  %v1346_v4 = vld [vmem:[%s1787_s0] sm:$0xff]   ;;  %v1348_v6 = vld [vmem:[%s1787_s0 + $0x8] sm:$0xff]   ;;  %v1350_v8 = vld [vmem:[%s1787_s0 + $0x10] sm:$0xff]  }
   0x3   :  { %1266 = vmatpush3.bf16.msra.mxu0 %v355_v2  ;;  %1338 = vmatpush3.bf16.msra.mxu1 %v355_v2  ;;  %v1347_v5 = vld [vmem:[%s1787_s0 + $0x80] sm:$0xff]   ;;  %v1349_v7 = vld [vmem:[%s1787_s0 + $0x88] sm:$0xff]   ;;  %v1351_v9 = vld [vmem:[%s1787_s0 + $0x90] sm:$0xff]  }
   0x4   :  { %1267 = vmatprep.subr.bf16.mxu0 %v1344_v1  ;;  %1336 = vmatprep.subr.bf16.mxu1 %v1344_v1  ;;  %v1352_v10 = vld [vmem:[%s1787_s0 + $0x18] sm:$0xff]   ;;  %v1354_v12 = vld [vmem:[%s1787_s0 + $0x20] sm:$0xff]   ;;  %v1356_v14 = vld [vmem:[%s1787_s0 + $0x28] sm:$0xff]  }
   0x5   :  { %1271 = vmatprep.mubr.msk.bf16.mxu0 %vm256_vm1, %v1346_v4  ;;  %1303 = vmatprep.mubr.msk.bf16.mxu1 %vm256_vm1, %v1347_v5  ;;  %v1353_v11 = vld [vmem:[%s1787_s0 + $0x98] sm:$0xff]   ;;  %v1355_v13 = vld [vmem:[%s1787_s0 + $0xa0] sm:$0xff]   ;;  %v1357_v15 = vld [vmem:[%s1787_s0 + $0xa8] sm:$0xff]  }
   0x6   :  { %v1358_v16 = vld [vmem:[%s1787_s0 + $0x30] sm:$0xff]   ;;  %v1360_v18 = vld [vmem:[%s1787_s0 + $0x38] sm:$0xff]   ;;  %v1362_v20 = vld [vmem:[%s1787_s0 + $0x40] sm:$0xff]  }
   0x7   :  { %1268 = vmatpush3.bf16.msra.mxu0 %v1344_v1  ;;  %1339 = vmatpush3.bf16.msra.mxu1 %v1344_v1  ;;  %v1359_v17 = vld [vmem:[%s1787_s0 + $0xb0] sm:$0xff]   ;;  %v1361_v19 = vld [vmem:[%s1787_s0 + $0xb8] sm:$0xff]   ;;  %v1363_v21 = vld [vmem:[%s1787_s0 + $0xc0] sm:$0xff]  }
   0x8   :  { %1269 = vmatprep.subr.bf16.mxu0 %v1345_v3  ;;  %1337 = vmatprep.subr.bf16.mxu1 %v1345_v3  ;;  %v1364_v22 = vld [vmem:[%s1787_s0 + $0x48] sm:$0xff]   ;;  %v1366_v24 = vld [vmem:[%s1787_s0 + $0x50] sm:$0xff]   ;;  %v1368_v26 = vld [vmem:[%s1787_s0 + $0x58] sm:$0xff]  }
   0x9   :  { %v1365_v23 = vld [vmem:[%s1787_s0 + $0xc8] sm:$0xff]   ;;  %v1367_v25 = vld [vmem:[%s1787_s0 + $0xd0] sm:$0xff]   ;;  %v1369_v27 = vld [vmem:[%s1787_s0 + $0xd8] sm:$0xff]  }
   0xa   :  { %v1370_v28 = vld [vmem:[%s1787_s0 + $0x60] sm:$0xff]   ;;  %v1372_v30 = vld [vmem:[%s1787_s0 + $0x68] sm:$0xff]   ;;  %v1374_v32 = vld [vmem:[%s1787_s0 + $0x70] sm:$0xff]  }
   0xb   :  { %1270 = vmatpush3.bf16.msra.mxu0 %v1345_v3  ;;  %1340 = vmatpush3.bf16.msra.mxu1 %v1345_v3  ;;  %v1371_v29 = vld [vmem:[%s1787_s0 + $0xe0] sm:$0xff]   ;;  %v1373_v31 = vld [vmem:[%s1787_s0 + $0xe8] sm:$0xff]   ;;  %v1375_v33 = vld [vmem:[%s1787_s0 + $0xf0] sm:$0xff]  }
   0xc   :  { %v1376_v34 = vld [vmem:[%s1787_s0 + $0x78] sm:$0xff]  }
   0xd   :  { %v1377_v35 = vld [vmem:[%s1787_s0 + $0xf8] sm:$0xff]  }
   0xe   :  { %1272 = vmatmul.mubr.msk.bf16.vlgmr.msra.gmra.mxu0 %vm256_vm1, %v1348_v6  ;;  %1304 = vmatmul.mubr.msk.bf16.vlgmr.msra.gmra.mxu1 %vm256_vm1, %v1349_v7 }
   0xf   :  { %1275 = vmatprep.mubr.msk.bf16.mxu0 %vm256_vm1, %v1350_v8  ;;  %1307 = vmatprep.mubr.msk.bf16.mxu1 %vm256_vm1, %v1351_v9 }
  0x16   :  { %1276 = vmatmul.mubr.msk.bf16.gmra.mxu0 %vm256_vm1, %v1352_v10  ;;  %1308 = vmatmul.mubr.msk.bf16.gmra.mxu1 %vm256_vm1, %v1353_v11 }
  0x17   :  { %1279 = vmatprep.mubr.msk.bf16.mxu0 %vm256_vm1, %v1354_v12  ;;  %1311 = vmatprep.mubr.msk.bf16.mxu1 %vm256_vm1, %v1355_v13 }
  0x1e   :  { %1280 = vmatmul.mubr.msk.bf16.gmra.mxu0 %vm256_vm1, %v1356_v14  ;;  %1312 = vmatmul.mubr.msk.bf16.gmra.mxu1 %vm256_vm1, %v1357_v15 }
  0x1f   :  { %1283 = vmatprep.mubr.msk.bf16.mxu0 %vm256_vm1, %v1358_v16  ;;  %1315 = vmatprep.mubr.msk.bf16.mxu1 %vm256_vm1, %v1359_v17 }
  0x26   :  { %1284 = vmatmul.mubr.msk.bf16.gmra.mxu0 %vm256_vm1, %v1360_v18  ;;  %1316 = vmatmul.mubr.msk.bf16.gmra.mxu1 %vm256_vm1, %v1361_v19 }
  0x27   :  { %1287 = vmatprep.mubr.msk.bf16.mxu0 %vm256_vm1, %v1362_v20  ;;  %1319 = vmatprep.mubr.msk.bf16.mxu1 %vm256_vm1, %v1363_v21 }
  0x2e   :  { %1288 = vmatmul.mubr.msk.bf16.gmra.mxu0 %vm256_vm1, %v1364_v22  ;;  %1320 = vmatmul.mubr.msk.bf16.gmra.mxu1 %vm256_vm1, %v1365_v23 }
  0x2f   :  { %1291 = vmatprep.mubr.msk.bf16.mxu0 %vm256_vm1, %v1366_v24  ;;  %1323 = vmatprep.mubr.msk.bf16.mxu1 %vm256_vm1, %v1367_v25 }
  0x36   :  { %1292 = vmatmul.mubr.msk.bf16.gmra.mxu0 %vm256_vm1, %v1368_v26  ;;  %1324 = vmatmul.mubr.msk.bf16.gmra.mxu1 %vm256_vm1, %v1369_v27 }
  0x37   :  { %1295 = vmatprep.mubr.msk.bf16.mxu0 %vm256_vm1, %v1370_v28  ;;  %1327 = vmatprep.mubr.msk.bf16.mxu1 %vm256_vm1, %v1371_v29 }
  0x3e   :  { %1296 = vmatmul.mubr.msk.bf16.gmra.mxu0 %vm256_vm1, %v1372_v30  ;;  %1328 = vmatmul.mubr.msk.bf16.gmra.mxu1 %vm256_vm1, %v1373_v31 }
  0x3f   :  { %1299 = vmatprep.mubr.msk.bf16.mxu0 %vm256_vm1, %v1374_v32  ;;  %1331 = vmatprep.mubr.msk.bf16.mxu1 %vm256_vm1, %v1375_v33 }
  0x46   :  { %1300 = vmatmul.mubr.msk.bf16.gmra.mxu0 %vm256_vm1, %v1376_v34  ;;  %1332 = vmatmul.mubr.msk.bf16.gmra.mxu1 %vm256_vm1, %v1377_v35 }
  0xce   :  { %v1273_v36 = vpop.f32.mrf.mxu0  ;;  %v1305_v37 = vpop.f32.mrf.mxu1 }
  0xcf   :  { %v648_v38 = vmul.f32 0.999995, %v1273_v36  ;;  %v680_v39 = vmul.f32 0.999995, %v1305_v37 }
  0xd0   :  { %v391_v40 = vpop.f32.mrf.mxu0  ;;  %v519_v41 = vpop.f32.mrf.mxu1 }
  0xd1   :  { %v1168_v42 = vpack.c.bf16 %v648_v38, %v648_v38  ;;  %v1200_v43 = vpack.c.bf16 %v680_v39, %v680_v39  ;;  %v646_v44 = vmul.f32 0.999995, %v391_v40  ;;  %v678_v45 = vmul.f32 0.999995, %v519_v41 }
  0xd2   :  { %v1274_v46 = vpop.f32.mrf.mxu0  ;;  %v1306_v47 = vpop.f32.mrf.mxu1 }
  0xd3   :  { %969 = vst.msk [vmem:[%s1788_s2 + $0x8] sm:$0xf] %vm966_vm2, %v1168_v42  ;;  %1001 = vst.msk [vmem:[%s1788_s2 + $0x88] sm:$0xf] %vm966_vm2, %v1200_v43  ;;  %v1166_v48 = vpack.c.bf16 %v646_v44, %v646_v44  ;;  %v1198_v49 = vpack.c.bf16 %v678_v45, %v678_v45  ;;  %v649_v50 = vmul.f32 0.999995, %v1274_v46 }
  0xd4   :  { %v681_v51 = vmul.f32 0.999995, %v1306_v47  ;;  %v394_v52 = vpop.f32.mrf.mxu0  ;;  %v522_v53 = vpop.f32.mrf.mxu1 }
  0xd5   :  { %967 = vst.msk [vmem:[%s1788_s2] sm:$0xf] %vm966_vm2, %v1166_v48  ;;  %999 = vst.msk [vmem:[%s1788_s2 + $0x80] sm:$0xf] %vm966_vm2, %v1198_v49  ;;  %v1169_v54 = vpack.c.bf16 %v649_v50, %v649_v50  ;;  %v647_v56 = vmul.f32 0.999995, %v394_v52 }
  0xd6   :  { %v1201_v55 = vpack.c.bf16 %v681_v51, %v681_v51  ;;  %v679_v57 = vmul.f32 0.999995, %v522_v53  ;;  %v1277_v58 = vpop.f32.mrf.mxu0  ;;  %v1309_v59 = vpop.f32.mrf.mxu1 }
  0xd7   :  { %970 = vst.msk [vmem:[%s1788_s2 + $0xc] sm:$0xf] %vm966_vm2, %v1169_v54  ;;  %v1167_v60 = vpack.c.bf16 %v647_v56, %v647_v56  ;;  %v652_v62 = vmul.f32 0.999995, %v1277_v58  ;;  %v684_v63 = vmul.f32 0.999995, %v1309_v59 }
  0xd8   :  { %1002 = vst.msk [vmem:[%s1788_s2 + $0x8c] sm:$0xf] %vm966_vm2, %v1201_v55  ;;  %v1199_v61 = vpack.c.bf16 %v679_v57, %v679_v57  ;;  %v407_v0 = vpop.f32.mrf.mxu0  ;;  %v535_v1 = vpop.f32.mrf.mxu1 }
  0xd9   :  { %968 = vst.msk [vmem:[%s1788_s2 + $0x4] sm:$0xf] %vm966_vm2, %v1167_v60  ;;  %v1172_v2 = vpack.c.bf16 %v652_v62, %v652_v62  ;;  %v1204_v3 = vpack.c.bf16 %v684_v63, %v684_v63  ;;  %v650_v4 = vmul.f32 0.999995, %v407_v0  ;;  %v682_v5 = vmul.f32 0.999995, %v535_v1 }
  0xda   :  { %1000 = vst.msk [vmem:[%s1788_s2 + $0x84] sm:$0xf] %vm966_vm2, %v1199_v61  ;;  %v1278_v6 = vpop.f32.mrf.mxu0  ;;  %v1310_v7 = vpop.f32.mrf.mxu1 }
  0xdb   :  { %973 = vst.msk [vmem:[%s1788_s2 + $0x18] sm:$0xf] %vm966_vm2, %v1172_v2  ;;  %1005 = vst.msk [vmem:[%s1788_s2 + $0x98] sm:$0xf] %vm966_vm2, %v1204_v3  ;;  %v1170_v8 = vpack.c.bf16 %v650_v4, %v650_v4  ;;  %v1202_v9 = vpack.c.bf16 %v682_v5, %v682_v5  ;;  %v653_v10 = vmul.f32 0.999995, %v1278_v6 }
  0xdc   :  { %v685_v11 = vmul.f32 0.999995, %v1310_v7  ;;  %v410_v12 = vpop.f32.mrf.mxu0  ;;  %v538_v13 = vpop.f32.mrf.mxu1 }
  0xdd   :  { %971 = vst.msk [vmem:[%s1788_s2 + $0x10] sm:$0xf] %vm966_vm2, %v1170_v8  ;;  %1003 = vst.msk [vmem:[%s1788_s2 + $0x90] sm:$0xf] %vm966_vm2, %v1202_v9  ;;  %v1173_v14 = vpack.c.bf16 %v653_v10, %v653_v10  ;;  %v651_v16 = vmul.f32 0.999995, %v410_v12 }
  0xde   :  { %v1205_v15 = vpack.c.bf16 %v685_v11, %v685_v11  ;;  %v683_v17 = vmul.f32 0.999995, %v538_v13  ;;  %v1281_v18 = vpop.f32.mrf.mxu0  ;;  %v1313_v19 = vpop.f32.mrf.mxu1 }
  0xdf   :  { %974 = vst.msk [vmem:[%s1788_s2 + $0x1c] sm:$0xf] %vm966_vm2, %v1173_v14  ;;  %v1171_v20 = vpack.c.bf16 %v651_v16, %v651_v16  ;;  %v656_v22 = vmul.f32 0.999995, %v1281_v18  ;;  %v688_v23 = vmul.f32 0.999995, %v1313_v19 }
  0xe0   :  { %1006 = vst.msk [vmem:[%s1788_s2 + $0x9c] sm:$0xf] %vm966_vm2, %v1205_v15  ;;  %v1203_v21 = vpack.c.bf16 %v683_v17, %v683_v17  ;;  %v423_v24 = vpop.f32.mrf.mxu0  ;;  %v551_v25 = vpop.f32.mrf.mxu1 }
  0xe1   :  { %972 = vst.msk [vmem:[%s1788_s2 + $0x14] sm:$0xf] %vm966_vm2, %v1171_v20  ;;  %v1176_v26 = vpack.c.bf16 %v656_v22, %v656_v22  ;;  %v1208_v27 = vpack.c.bf16 %v688_v23, %v688_v23  ;;  %v654_v28 = vmul.f32 0.999995, %v423_v24  ;;  %v686_v29 = vmul.f32 0.999995, %v551_v25 }
  0xe2   :  { %1004 = vst.msk [vmem:[%s1788_s2 + $0x94] sm:$0xf] %vm966_vm2, %v1203_v21  ;;  %v1282_v30 = vpop.f32.mrf.mxu0  ;;  %v1314_v31 = vpop.f32.mrf.mxu1 }
  0xe3   :  { %977 = vst.msk [vmem:[%s1788_s2 + $0x28] sm:$0xf] %vm966_vm2, %v1176_v26  ;;  %1009 = vst.msk [vmem:[%s1788_s2 + $0xa8] sm:$0xf] %vm966_vm2, %v1208_v27  ;;  %v1174_v32 = vpack.c.bf16 %v654_v28, %v654_v28  ;;  %v1206_v33 = vpack.c.bf16 %v686_v29, %v686_v29  ;;  %v657_v34 = vmul.f32 0.999995, %v1282_v30 }
  0xe4   :  { %v689_v35 = vmul.f32 0.999995, %v1314_v31  ;;  %v426_v36 = vpop.f32.mrf.mxu0  ;;  %v554_v37 = vpop.f32.mrf.mxu1 }
  0xe5   :  { %975 = vst.msk [vmem:[%s1788_s2 + $0x20] sm:$0xf] %vm966_vm2, %v1174_v32  ;;  %1007 = vst.msk [vmem:[%s1788_s2 + $0xa0] sm:$0xf] %vm966_vm2, %v1206_v33  ;;  %v1177_v38 = vpack.c.bf16 %v657_v34, %v657_v34  ;;  %v655_v40 = vmul.f32 0.999995, %v426_v36 }
  0xe6   :  { %v1209_v39 = vpack.c.bf16 %v689_v35, %v689_v35  ;;  %v687_v41 = vmul.f32 0.999995, %v554_v37  ;;  %v1285_v42 = vpop.f32.mrf.mxu0  ;;  %v1317_v43 = vpop.f32.mrf.mxu1 }
  0xe7   :  { %978 = vst.msk [vmem:[%s1788_s2 + $0x2c] sm:$0xf] %vm966_vm2, %v1177_v38  ;;  %v1175_v44 = vpack.c.bf16 %v655_v40, %v655_v40  ;;  %v660_v46 = vmul.f32 0.999995, %v1285_v42  ;;  %v692_v47 = vmul.f32 0.999995, %v1317_v43 }
  0xe8   :  { %1010 = vst.msk [vmem:[%s1788_s2 + $0xac] sm:$0xf] %vm966_vm2, %v1209_v39  ;;  %v1207_v45 = vpack.c.bf16 %v687_v41, %v687_v41  ;;  %v439_v48 = vpop.f32.mrf.mxu0  ;;  %v567_v49 = vpop.f32.mrf.mxu1 }
  0xe9   :  { %976 = vst.msk [vmem:[%s1788_s2 + $0x24] sm:$0xf] %vm966_vm2, %v1175_v44  ;;  %v1180_v50 = vpack.c.bf16 %v660_v46, %v660_v46  ;;  %v1212_v51 = vpack.c.bf16 %v692_v47, %v692_v47  ;;  %v658_v52 = vmul.f32 0.999995, %v439_v48  ;;  %v690_v53 = vmul.f32 0.999995, %v567_v49 }
  0xea   :  { %1008 = vst.msk [vmem:[%s1788_s2 + $0xa4] sm:$0xf] %vm966_vm2, %v1207_v45  ;;  %v1286_v54 = vpop.f32.mrf.mxu0  ;;  %v1318_v55 = vpop.f32.mrf.mxu1 }
  0xeb   :  { %981 = vst.msk [vmem:[%s1788_s2 + $0x38] sm:$0xf] %vm966_vm2, %v1180_v50  ;;  %1013 = vst.msk [vmem:[%s1788_s2 + $0xb8] sm:$0xf] %vm966_vm2, %v1212_v51  ;;  %v1178_v56 = vpack.c.bf16 %v658_v52, %v658_v52  ;;  %v1210_v57 = vpack.c.bf16 %v690_v53, %v690_v53  ;;  %v661_v58 = vmul.f32 0.999995, %v1286_v54 }
  0xec   :  { %v693_v59 = vmul.f32 0.999995, %v1318_v55  ;;  %v442_v60 = vpop.f32.mrf.mxu0  ;;  %v570_v61 = vpop.f32.mrf.mxu1 }
  0xed   :  { %979 = vst.msk [vmem:[%s1788_s2 + $0x30] sm:$0xf] %vm966_vm2, %v1178_v56  ;;  %1011 = vst.msk [vmem:[%s1788_s2 + $0xb0] sm:$0xf] %vm966_vm2, %v1210_v57  ;;  %v1181_v62 = vpack.c.bf16 %v661_v58, %v661_v58  ;;  %v659_v0 = vmul.f32 0.999995, %v442_v60 }
  0xee   :  { %v1213_v63 = vpack.c.bf16 %v693_v59, %v693_v59  ;;  %v691_v1 = vmul.f32 0.999995, %v570_v61  ;;  %v1289_v2 = vpop.f32.mrf.mxu0  ;;  %v1321_v3 = vpop.f32.mrf.mxu1 }
  0xef   :  { %982 = vst.msk [vmem:[%s1788_s2 + $0x3c] sm:$0xf] %vm966_vm2, %v1181_v62  ;;  %v1179_v4 = vpack.c.bf16 %v659_v0, %v659_v0  ;;  %v664_v6 = vmul.f32 0.999995, %v1289_v2  ;;  %v696_v7 = vmul.f32 0.999995, %v1321_v3 }
  0xf0   :  { %1014 = vst.msk [vmem:[%s1788_s2 + $0xbc] sm:$0xf] %vm966_vm2, %v1213_v63  ;;  %v1211_v5 = vpack.c.bf16 %v691_v1, %v691_v1  ;;  %v455_v8 = vpop.f32.mrf.mxu0  ;;  %v583_v9 = vpop.f32.mrf.mxu1 }
  0xf1   :  { %980 = vst.msk [vmem:[%s1788_s2 + $0x34] sm:$0xf] %vm966_vm2, %v1179_v4  ;;  %v1184_v10 = vpack.c.bf16 %v664_v6, %v664_v6  ;;  %v1216_v11 = vpack.c.bf16 %v696_v7, %v696_v7  ;;  %v662_v12 = vmul.f32 0.999995, %v455_v8  ;;  %v694_v13 = vmul.f32 0.999995, %v583_v9 }
  0xf2   :  { %1012 = vst.msk [vmem:[%s1788_s2 + $0xb4] sm:$0xf] %vm966_vm2, %v1211_v5  ;;  %v1290_v14 = vpop.f32.mrf.mxu0  ;;  %v1322_v15 = vpop.f32.mrf.mxu1 }
  0xf3   :  { %985 = vst.msk [vmem:[%s1788_s2 + $0x48] sm:$0xf] %vm966_vm2, %v1184_v10  ;;  %1017 = vst.msk [vmem:[%s1788_s2 + $0xc8] sm:$0xf] %vm966_vm2, %v1216_v11  ;;  %v1182_v16 = vpack.c.bf16 %v662_v12, %v662_v12  ;;  %v1214_v17 = vpack.c.bf16 %v694_v13, %v694_v13  ;;  %v665_v18 = vmul.f32 0.999995, %v1290_v14 }
  0xf4   :  { %v697_v19 = vmul.f32 0.999995, %v1322_v15  ;;  %v458_v20 = vpop.f32.mrf.mxu0  ;;  %v586_v21 = vpop.f32.mrf.mxu1 }
  0xf5   :  { %983 = vst.msk [vmem:[%s1788_s2 + $0x40] sm:$0xf] %vm966_vm2, %v1182_v16  ;;  %1015 = vst.msk [vmem:[%s1788_s2 + $0xc0] sm:$0xf] %vm966_vm2, %v1214_v17  ;;  %v1185_v22 = vpack.c.bf16 %v665_v18, %v665_v18  ;;  %v663_v24 = vmul.f32 0.999995, %v458_v20 }
  0xf6   :  { %v1217_v23 = vpack.c.bf16 %v697_v19, %v697_v19  ;;  %v695_v25 = vmul.f32 0.999995, %v586_v21  ;;  %v1293_v26 = vpop.f32.mrf.mxu0  ;;  %v1325_v27 = vpop.f32.mrf.mxu1 }
  0xf7   :  { %986 = vst.msk [vmem:[%s1788_s2 + $0x4c] sm:$0xf] %vm966_vm2, %v1185_v22  ;;  %v1183_v28 = vpack.c.bf16 %v663_v24, %v663_v24  ;;  %v668_v30 = vmul.f32 0.999995, %v1293_v26  ;;  %v700_v31 = vmul.f32 0.999995, %v1325_v27 }
  0xf8   :  { %1018 = vst.msk [vmem:[%s1788_s2 + $0xcc] sm:$0xf] %vm966_vm2, %v1217_v23  ;;  %v1215_v29 = vpack.c.bf16 %v695_v25, %v695_v25  ;;  %v471_v32 = vpop.f32.mrf.mxu0  ;;  %v599_v33 = vpop.f32.mrf.mxu1 }
  0xf9   :  { %984 = vst.msk [vmem:[%s1788_s2 + $0x44] sm:$0xf] %vm966_vm2, %v1183_v28  ;;  %v1188_v34 = vpack.c.bf16 %v668_v30, %v668_v30  ;;  %v1220_v35 = vpack.c.bf16 %v700_v31, %v700_v31  ;;  %v666_v36 = vmul.f32 0.999995, %v471_v32  ;;  %v698_v37 = vmul.f32 0.999995, %v599_v33 }
  0xfa   :  { %1016 = vst.msk [vmem:[%s1788_s2 + $0xc4] sm:$0xf] %vm966_vm2, %v1215_v29  ;;  %v1294_v38 = vpop.f32.mrf.mxu0  ;;  %v1326_v39 = vpop.f32.mrf.mxu1 }
  0xfb   :  { %989 = vst.msk [vmem:[%s1788_s2 + $0x58] sm:$0xf] %vm966_vm2, %v1188_v34  ;;  %1021 = vst.msk [vmem:[%s1788_s2 + $0xd8] sm:$0xf] %vm966_vm2, %v1220_v35  ;;  %v1186_v40 = vpack.c.bf16 %v666_v36, %v666_v36  ;;  %v1218_v41 = vpack.c.bf16 %v698_v37, %v698_v37  ;;  %v669_v42 = vmul.f32 0.999995, %v1294_v38 }
  0xfc   :  { %v701_v43 = vmul.f32 0.999995, %v1326_v39  ;;  %v474_v44 = vpop.f32.mrf.mxu0  ;;  %v602_v45 = vpop.f32.mrf.mxu1 }
  0xfd   :  { %987 = vst.msk [vmem:[%s1788_s2 + $0x50] sm:$0xf] %vm966_vm2, %v1186_v40  ;;  %1019 = vst.msk [vmem:[%s1788_s2 + $0xd0] sm:$0xf] %vm966_vm2, %v1218_v41  ;;  %v1189_v46 = vpack.c.bf16 %v669_v42, %v669_v42  ;;  %v667_v48 = vmul.f32 0.999995, %v474_v44 }
  0xfe   :  { %v1221_v47 = vpack.c.bf16 %v701_v43, %v701_v43  ;;  %v699_v49 = vmul.f32 0.999995, %v602_v45  ;;  %v1297_v50 = vpop.f32.mrf.mxu0  ;;  %v1329_v51 = vpop.f32.mrf.mxu1 }
  0xff   :  { %990 = vst.msk [vmem:[%s1788_s2 + $0x5c] sm:$0xf] %vm966_vm2, %v1189_v46  ;;  %v1187_v52 = vpack.c.bf16 %v667_v48, %v667_v48  ;;  %v672_v54 = vmul.f32 0.999995, %v1297_v50  ;;  %v704_v55 = vmul.f32 0.999995, %v1329_v51 }
 0x100   :  { %1022 = vst.msk [vmem:[%s1788_s2 + $0xdc] sm:$0xf] %vm966_vm2, %v1221_v47  ;;  %v1219_v53 = vpack.c.bf16 %v699_v49, %v699_v49  ;;  %v487_v56 = vpop.f32.mrf.mxu0  ;;  %v615_v57 = vpop.f32.mrf.mxu1 }
 0x101   :  { %988 = vst.msk [vmem:[%s1788_s2 + $0x54] sm:$0xf] %vm966_vm2, %v1187_v52  ;;  %v1192_v58 = vpack.c.bf16 %v672_v54, %v672_v54  ;;  %v1224_v59 = vpack.c.bf16 %v704_v55, %v704_v55  ;;  %v670_v60 = vmul.f32 0.999995, %v487_v56  ;;  %v702_v61 = vmul.f32 0.999995, %v615_v57 }
 0x102   :  { %1020 = vst.msk [vmem:[%s1788_s2 + $0xd4] sm:$0xf] %vm966_vm2, %v1219_v53  ;;  %v1298_v62 = vpop.f32.mrf.mxu0  ;;  %v1330_v63 = vpop.f32.mrf.mxu1 }
 0x103   :  { %993 = vst.msk [vmem:[%s1788_s2 + $0x68] sm:$0xf] %vm966_vm2, %v1192_v58  ;;  %1025 = vst.msk [vmem:[%s1788_s2 + $0xe8] sm:$0xf] %vm966_vm2, %v1224_v59  ;;  %v1190_v0 = vpack.c.bf16 %v670_v60, %v670_v60  ;;  %v1222_v1 = vpack.c.bf16 %v702_v61, %v702_v61  ;;  %v673_v2 = vmul.f32 0.999995, %v1298_v62 }
 0x104   :  { %v705_v3 = vmul.f32 0.999995, %v1330_v63  ;;  %v490_v4 = vpop.f32.mrf.mxu0  ;;  %v618_v5 = vpop.f32.mrf.mxu1 }
 0x105   :  { %991 = vst.msk [vmem:[%s1788_s2 + $0x60] sm:$0xf] %vm966_vm2, %v1190_v0  ;;  %1023 = vst.msk [vmem:[%s1788_s2 + $0xe0] sm:$0xf] %vm966_vm2, %v1222_v1  ;;  %v1193_v6 = vpack.c.bf16 %v673_v2, %v673_v2  ;;  %v671_v8 = vmul.f32 0.999995, %v490_v4 }
 0x106   :  { %v1225_v7 = vpack.c.bf16 %v705_v3, %v705_v3  ;;  %v703_v9 = vmul.f32 0.999995, %v618_v5  ;;  %v1301_v10 = vpop.f32.mrf.mxu0  ;;  %v1333_v11 = vpop.f32.mrf.mxu1 }
 0x107   :  { %994 = vst.msk [vmem:[%s1788_s2 + $0x6c] sm:$0xf] %vm966_vm2, %v1193_v6  ;;  %v1191_v12 = vpack.c.bf16 %v671_v8, %v671_v8  ;;  %v676_v14 = vmul.f32 0.999995, %v1301_v10  ;;  %v708_v15 = vmul.f32 0.999995, %v1333_v11 }
 0x108   :  { %1026 = vst.msk [vmem:[%s1788_s2 + $0xec] sm:$0xf] %vm966_vm2, %v1225_v7  ;;  %v1223_v13 = vpack.c.bf16 %v703_v9, %v703_v9  ;;  %v503_v16 = vpop.f32.mrf.mxu0  ;;  %v631_v17 = vpop.f32.mrf.mxu1 }
 0x109   :  { %992 = vst.msk [vmem:[%s1788_s2 + $0x64] sm:$0xf] %vm966_vm2, %v1191_v12  ;;  %v1196_v18 = vpack.c.bf16 %v676_v14, %v676_v14  ;;  %v1228_v19 = vpack.c.bf16 %v708_v15, %v708_v15  ;;  %v674_v20 = vmul.f32 0.999995, %v503_v16  ;;  %v706_v21 = vmul.f32 0.999995, %v631_v17 }
 0x10a   :  { %1024 = vst.msk [vmem:[%s1788_s2 + $0xe4] sm:$0xf] %vm966_vm2, %v1223_v13  ;;  %v1302_v22 = vpop.f32.mrf.mxu0  ;;  %v1334_v23 = vpop.f32.mrf.mxu1 }
 0x10b   :  { %997 = vst.msk [vmem:[%s1788_s2 + $0x78] sm:$0xf] %vm966_vm2, %v1196_v18  ;;  %1029 = vst.msk [vmem:[%s1788_s2 + $0xf8] sm:$0xf] %vm966_vm2, %v1228_v19  ;;  %v1194_v24 = vpack.c.bf16 %v674_v20, %v674_v20  ;;  %v1226_v25 = vpack.c.bf16 %v706_v21, %v706_v21  ;;  %v677_v26 = vmul.f32 0.999995, %v1302_v22 }
 0x10c   :  { %v709_v27 = vmul.f32 0.999995, %v1334_v23  ;;  %v506_v28 = vpop.f32.mrf.mxu0  ;;  %v634_v29 = vpop.f32.mrf.mxu1 }
 0x10d   :  { %995 = vst.msk [vmem:[%s1788_s2 + $0x70] sm:$0xf] %vm966_vm2, %v1194_v24  ;;  %1027 = vst.msk [vmem:[%s1788_s2 + $0xf0] sm:$0xf] %vm966_vm2, %v1226_v25  ;;  %v1197_v30 = vpack.c.bf16 %v677_v26, %v677_v26  ;;  %v675_v32 = vmul.f32 0.999995, %v506_v28 }
 0x10e   :  { %v1229_v31 = vpack.c.bf16 %v709_v27, %v709_v27  ;;  %v707_v33 = vmul.f32 0.999995, %v634_v29 }
 0x10f   :  { %998 = vst.msk [vmem:[%s1788_s2 + $0x7c] sm:$0xf] %vm966_vm2, %v1197_v30  ;;  %v1195_v34 = vpack.c.bf16 %v675_v32, %v675_v32 }
 0x110   :  { %1030 = vst.msk [vmem:[%s1788_s2 + $0xfc] sm:$0xf] %vm966_vm2, %v1229_v31  ;;  %v1227_v35 = vpack.c.bf16 %v707_v33, %v707_v33 }
 0x111   :  { %996 = vst.msk [vmem:[%s1788_s2 + $0x74] sm:$0xf] %vm966_vm2, %v1195_v34 }
 0x112   :  { %1028 = vst.msk [vmem:[%s1788_s2 + $0xf4] sm:$0xf] %vm966_vm2, %v1227_v35 }

// kernel: _lambda_.9
= control target key start
LH: loop header
LB: loop body
LE: loop exit
PB: predicated region body
PF: predicated region fallthrough
CT: control target
= control target key end

     0   :  { %v582_v25 = vmov 0   ;;  %vm436_vm0 = vcmask 519168   ;;  %s734_s0 = inlined_call_operand.vmem [shape: bf16[16,2,8,128], index: 0, kind: input, shape index: {}]   ;;  %s735_s1 = inlined_call_operand.vmem [shape: bf16[128,64], index: 1, kind: input, shape index: {}]   ;;  %s736_s2 = inlined_call_operand.vmem [shape: bf16[128,64], index: 2, kind: output, shape index: {}]  }
   0x1   :  { %v574_v0 = vld [vmem:[%s735_s1 + $0x38] sm:$0xff]   ;;  %v575_v1 = vld [vmem:[%s735_s1 + $0x30] sm:$0xff]   ;;  %v576_v2 = vld [vmem:[%s735_s1 + $0x28] sm:$0xff]  }
   0x2   :  { %525 = vmatprep.subr.bf16.mxu0 %v574_v0  ;;  %557 = vmatprep.subr.bf16.mxu1 %v574_v0  ;;  %v577_v3 = vld [vmem:[%s735_s1 + $0x20] sm:$0xff]   ;;  %v27_v5 = vld [vmem:[%s734_s0 + $0x8] sm:$0xf]  ;;  %v29_v8 = vld [vmem:[%s734_s0 + $0x10] sm:$0xf] }
   0x3   :  { %526 = vmatpush3.bf16.msra.mxu0 %v574_v0  ;;  %565 = vmatpush3.bf16.msra.mxu1 %v574_v0  ;;  %v25_v4 = vld [vmem:[%s734_s0] sm:$0xf]  ;;  %28 = vst [vmem:[#allocation2 + $0x4] sm:$0xf] %v27_v5  ;;  %v43_v7 = vld [vmem:[%s734_s0 + $0x48] sm:$0xf] }
   0x4   :  { %527 = vmatprep.subr.bf16.mxu0 %v575_v1  ;;  %558 = vmatprep.subr.bf16.mxu1 %v575_v1  ;;  %v41_v6 = vld [vmem:[%s734_s0 + $0x40] sm:$0xf]  ;;  %26 = vst [vmem:[#allocation2] sm:$0xf] %v25_v4  ;;  %v31_v9 = vld [vmem:[%s734_s0 + $0x18] sm:$0xf] }
   0x5   :  { %42 = vst [vmem:[#allocation2 + $0x20] sm:$0xf] %v41_v6  ;;  %v578_v10 = vld [vmem:[%s735_s1 + $0x18] sm:$0xff]   ;;  %44 = vst [vmem:[#allocation2 + $0x24] sm:$0xf] %v43_v7  ;;  %v579_v21 = vld [vmem:[%s735_s1 + $0x10] sm:$0xff]  }
   0x6   :  { %30 = vst [vmem:[#allocation2 + $0x8] sm:$0xf] %v29_v8  ;;  %32 = vst [vmem:[#allocation2 + $0xc] sm:$0xf] %v31_v9  ;;  %v45_v11 = vld [vmem:[%s734_s0 + $0x50] sm:$0xf] }
   0x7   :  { %528 = vmatpush3.bf16.msra.mxu0 %v575_v1  ;;  %566 = vmatpush3.bf16.msra.mxu1 %v575_v1  ;;  %v47_v12 = vld [vmem:[%s734_s0 + $0x58] sm:$0xf]  ;;  %v33_v13 = vld [vmem:[%s734_s0 + $0x20] sm:$0xf]  ;;  %46 = vst [vmem:[#allocation2 + $0x28] sm:$0xf] %v45_v11 }
   0x8   :  { %529 = vmatprep.subr.bf16.mxu0 %v576_v2  ;;  %559 = vmatprep.subr.bf16.mxu1 %v576_v2  ;;  %48 = vst [vmem:[#allocation2 + $0x2c] sm:$0xf] %v47_v12  ;;  %34 = vst [vmem:[#allocation2 + $0x10] sm:$0xf] %v33_v13  ;;  %v35_v14 = vld [vmem:[%s734_s0 + $0x28] sm:$0xf] }
   0x9   :  { %v49_v15 = vld [vmem:[%s734_s0 + $0x60] sm:$0xf]  ;;  %v51_v16 = vld [vmem:[%s734_s0 + $0x68] sm:$0xf]  ;;  %36 = vst [vmem:[#allocation2 + $0x14] sm:$0xf] %v35_v14 }
   0xa   :  { %50 = vst [vmem:[#allocation2 + $0x30] sm:$0xf] %v49_v15  ;;  %52 = vst [vmem:[#allocation2 + $0x34] sm:$0xf] %v51_v16  ;;  %v37_v17 = vld [vmem:[%s734_s0 + $0x30] sm:$0xf] }
   0xb   :  { %530 = vmatpush3.bf16.msra.mxu0 %v576_v2  ;;  %567 = vmatpush3.bf16.msra.mxu1 %v576_v2  ;;  %v39_v18 = vld [vmem:[%s734_s0 + $0x38] sm:$0xf]  ;;  %v53_v19 = vld [vmem:[%s734_s0 + $0x70] sm:$0xf]  ;;  %38 = vst [vmem:[#allocation2 + $0x18] sm:$0xf] %v37_v17 }
   0xc   :  { %531 = vmatprep.subr.bf16.mxu0 %v577_v3  ;;  %560 = vmatprep.subr.bf16.mxu1 %v577_v3  ;;  %40 = vst [vmem:[#allocation2 + $0x1c] sm:$0xf] %v39_v18  ;;  %54 = vst [vmem:[#allocation2 + $0x38] sm:$0xf] %v53_v19  ;;  %v55_v20 = vld [vmem:[%s734_s0 + $0x78] sm:$0xf] }
   0xd   :  { %56 = vst [vmem:[#allocation2 + $0x3c] sm:$0xf] %v55_v20  ;;  %v115_v22 = vld [vmem:[#allocation2] sm:$0xf]  ;;  %v116_v23 = vld [vmem:[#allocation2 + $0x4] sm:$0xf] }
   0xe   :  { %v123_v24 = vld [vmem:[#allocation2 + $0x20] sm:$0xf]  ;;  %v131_v26 = vmax.bf16 %v582_v25, %v115_v22  ;;  %v132_v27 = vmax.bf16 %v582_v25, %v116_v23  ;;  %v124_v28 = vld [vmem:[#allocation2 + $0x24] sm:$0xf]  ;;  %v580_v32 = vld [vmem:[%s735_s1 + $0x8] sm:$0xff]  }
   0xf   :  { %532 = vmatpush3.bf16.msra.mxu0 %v577_v3  ;;  %568 = vmatpush3.bf16.msra.mxu1 %v577_v3  ;;  %v139_v29 = vmax.bf16 %v582_v25, %v123_v24  ;;  %v140_v30 = vmax.bf16 %v582_v25, %v124_v28  ;;  %v581_v34 = vld [vmem:[%s735_s1] sm:$0xff]   ;;  %v117_v35 = vld [vmem:[#allocation2 + $0x8] sm:$0xf]  ;;  %v118_v36 = vld [vmem:[#allocation2 + $0xc] sm:$0xf] }
  0x10   :  { %533 = vmatprep.subr.bf16.mxu0 %v578_v10  ;;  %561 = vmatprep.subr.bf16.mxu1 %v578_v10  ;;  %v461_v31 = vcombine.low %v131_v26, %v132_v27  ;;  %v125_v37 = vld [vmem:[#allocation2 + $0x28] sm:$0xf]  ;;  %v126_v38 = vld [vmem:[#allocation2 + $0x2c] sm:$0xf]  ;;  %v119_v39 = vld [vmem:[#allocation2 + $0x10] sm:$0xf]  ;;  %v133_v43 = vmax.bf16 %v582_v25, %v117_v35  ;;  %v134_v44 = vmax.bf16 %v582_v25, %v118_v36 }
  0x11   :  { %v465_v33 = vcombine.low %v139_v29, %v140_v30  ;;  %v120_v40 = vld [vmem:[#allocation2 + $0x14] sm:$0xf]  ;;  %v127_v41 = vld [vmem:[#allocation2 + $0x30] sm:$0xf]  ;;  %v141_v45 = vmax.bf16 %v582_v25, %v125_v37  ;;  %v142_v46 = vmax.bf16 %v582_v25, %v126_v38  ;;  %v135_v47 = vmax.bf16 %v582_v25, %v119_v39 }
  0x12   :  { %541 = vmatprep.mubr.bf16.mxu0 %v461_v31  ;;  %v128_v42 = vld [vmem:[#allocation2 + $0x34] sm:$0xf]  ;;  %v136_v48 = vmax.bf16 %v582_v25, %v120_v40  ;;  %v143_v49 = vmax.bf16 %v582_v25, %v127_v41  ;;  %v462_v51 = vcombine.low %v133_v43, %v134_v44  ;;  %v121_v53 = vld [vmem:[#allocation2 + $0x18] sm:$0xf] }
  0x13   :  { %534 = vmatpush3.bf16.msra.mxu0 %v578_v10  ;;  %569 = vmatpush3.bf16.msra.mxu1 %v578_v10  ;;  %v144_v50 = vmax.bf16 %v582_v25, %v128_v42  ;;  %v466_v52 = vcombine.low %v141_v45, %v142_v46  ;;  %v122_v56 = vld [vmem:[#allocation2 + $0x1c] sm:$0xf]  ;;  %v129_v57 = vld [vmem:[#allocation2 + $0x38] sm:$0xf]  ;;  %v137_v59 = vmax.bf16 %v582_v25, %v121_v53 }
  0x14   :  { %535 = vmatprep.subr.bf16.mxu0 %v579_v21  ;;  %562 = vmatprep.subr.bf16.mxu1 %v579_v21  ;;  %v463_v54 = vcombine.low %v135_v47, %v136_v48  ;;  %v130_v58 = vld [vmem:[#allocation2 + $0x3c] sm:$0xf]  ;;  %v138_v60 = vmax.bf16 %v582_v25, %v122_v56  ;;  %v145_v61 = vmax.bf16 %v582_v25, %v129_v57 }
  0x15   :  { %549 = vmatprep.mubr.bf16.mxu1 %v465_v33  ;;  %v467_v55 = vcombine.low %v143_v49, %v144_v50  ;;  %v146_v62 = vmax.bf16 %v582_v25, %v130_v58 }
  0x16   :  { %v464_v63 = vcombine.low %v137_v59, %v138_v60 }
  0x17   :  { %536 = vmatpush3.bf16.msra.mxu0 %v579_v21  ;;  %570 = vmatpush3.bf16.msra.mxu1 %v579_v21  ;;  %v468_v0 = vcombine.low %v145_v61, %v146_v62 }
  0x18   :  { %537 = vmatprep.subr.bf16.mxu0 %v580_v32  ;;  %563 = vmatprep.subr.bf16.mxu1 %v580_v32 }
  0x1b   :  { %538 = vmatpush3.bf16.msra.mxu0 %v580_v32  ;;  %571 = vmatpush3.bf16.msra.mxu1 %v580_v32 }
  0x1c   :  { %539 = vmatprep.subr.bf16.mxu0 %v581_v34  ;;  %564 = vmatprep.subr.bf16.mxu1 %v581_v34 }
  0x1f   :  { %540 = vmatpush3.bf16.msra.mxu0 %v581_v34  ;;  %572 = vmatpush3.bf16.msra.mxu1 %v581_v34 }
  0x22   :  { %542 = vmatmul.mubr.bf16.vlgmr.msra.gmra.mxu0 %v462_v51  ;;  %550 = vmatmul.mubr.bf16.vlgmr.msra.gmra.mxu1 %v466_v52 }
  0x23   :  { %545 = vmatprep.mubr.bf16.mxu0 %v463_v54  ;;  %553 = vmatprep.mubr.bf16.mxu1 %v467_v55 }
  0x2a   :  { %546 = vmatmul.mubr.bf16.gmra.mxu0 %v464_v63  ;;  %554 = vmatmul.mubr.bf16.gmra.mxu1 %v468_v0 }
  0xe2   :  { %v543_v1 = vpop.f32.mrf.mxu0  ;;  %v551_v2 = vpop.f32.mrf.mxu1 }
  0xe3   :  { %v358_v3 = vmul.f32 0.999995, %v543_v1  ;;  %v366_v4 = vmul.f32 0.999995, %v551_v2 }
  0xe4   :  { %v293_v5 = vpop.f32.mrf.mxu0  ;;  %v325_v6 = vpop.f32.mrf.mxu1 }
  0xe5   :  { %v495_v7 = vpack.c.bf16 %v358_v3, %v358_v3  ;;  %v503_v8 = vpack.c.bf16 %v366_v4, %v366_v4  ;;  %v356_v9 = vmul.f32 0.999995, %v293_v5  ;;  %v364_v10 = vmul.f32 0.999995, %v325_v6 }
  0xe6   :  { %v544_v11 = vpop.f32.mrf.mxu0  ;;  %v552_v12 = vpop.f32.mrf.mxu1 }
  0xe7   :  { %439 = vst.msk [vmem:[%s736_s2 + $0x8] sm:$0xf] %vm436_vm0, %v495_v7  ;;  %447 = vst.msk [vmem:[%s736_s2 + $0x28] sm:$0xf] %vm436_vm0, %v503_v8  ;;  %v493_v13 = vpack.c.bf16 %v356_v9, %v356_v9  ;;  %v501_v14 = vpack.c.bf16 %v364_v10, %v364_v10  ;;  %v359_v15 = vmul.f32 0.999995, %v544_v11 }
  0xe8   :  { %v367_v16 = vmul.f32 0.999995, %v552_v12  ;;  %v296_v17 = vpop.f32.mrf.mxu0  ;;  %v328_v18 = vpop.f32.mrf.mxu1 }
  0xe9   :  { %437 = vst.msk [vmem:[%s736_s2] sm:$0xf] %vm436_vm0, %v493_v13  ;;  %445 = vst.msk [vmem:[%s736_s2 + $0x20] sm:$0xf] %vm436_vm0, %v501_v14  ;;  %v496_v19 = vpack.c.bf16 %v359_v15, %v359_v15  ;;  %v357_v21 = vmul.f32 0.999995, %v296_v17 }
  0xea   :  { %v504_v20 = vpack.c.bf16 %v367_v16, %v367_v16  ;;  %v365_v22 = vmul.f32 0.999995, %v328_v18  ;;  %v547_v23 = vpop.f32.mrf.mxu0  ;;  %v555_v24 = vpop.f32.mrf.mxu1 }
  0xeb   :  { %440 = vst.msk [vmem:[%s736_s2 + $0xc] sm:$0xf] %vm436_vm0, %v496_v19  ;;  %v494_v25 = vpack.c.bf16 %v357_v21, %v357_v21  ;;  %v362_v27 = vmul.f32 0.999995, %v547_v23  ;;  %v370_v28 = vmul.f32 0.999995, %v555_v24 }
  0xec   :  { %448 = vst.msk [vmem:[%s736_s2 + $0x2c] sm:$0xf] %vm436_vm0, %v504_v20  ;;  %v502_v26 = vpack.c.bf16 %v365_v22, %v365_v22  ;;  %v309_v29 = vpop.f32.mrf.mxu0  ;;  %v341_v30 = vpop.f32.mrf.mxu1 }
  0xed   :  { %438 = vst.msk [vmem:[%s736_s2 + $0x4] sm:$0xf] %vm436_vm0, %v494_v25  ;;  %v499_v31 = vpack.c.bf16 %v362_v27, %v362_v27  ;;  %v507_v32 = vpack.c.bf16 %v370_v28, %v370_v28  ;;  %v360_v33 = vmul.f32 0.999995, %v309_v29  ;;  %v368_v34 = vmul.f32 0.999995, %v341_v30 }
  0xee   :  { %446 = vst.msk [vmem:[%s736_s2 + $0x24] sm:$0xf] %vm436_vm0, %v502_v26  ;;  %v548_v35 = vpop.f32.mrf.mxu0  ;;  %v556_v36 = vpop.f32.mrf.mxu1 }
  0xef   :  { %443 = vst.msk [vmem:[%s736_s2 + $0x18] sm:$0xf] %vm436_vm0, %v499_v31  ;;  %451 = vst.msk [vmem:[%s736_s2 + $0x38] sm:$0xf] %vm436_vm0, %v507_v32  ;;  %v497_v37 = vpack.c.bf16 %v360_v33, %v360_v33  ;;  %v505_v38 = vpack.c.bf16 %v368_v34, %v368_v34  ;;  %v363_v39 = vmul.f32 0.999995, %v548_v35 }
  0xf0   :  { %v371_v40 = vmul.f32 0.999995, %v556_v36  ;;  %v312_v41 = vpop.f32.mrf.mxu0  ;;  %v344_v42 = vpop.f32.mrf.mxu1 }
  0xf1   :  { %441 = vst.msk [vmem:[%s736_s2 + $0x10] sm:$0xf] %vm436_vm0, %v497_v37  ;;  %449 = vst.msk [vmem:[%s736_s2 + $0x30] sm:$0xf] %vm436_vm0, %v505_v38  ;;  %v500_v43 = vpack.c.bf16 %v363_v39, %v363_v39  ;;  %v361_v45 = vmul.f32 0.999995, %v312_v41 }
  0xf2   :  { %v508_v44 = vpack.c.bf16 %v371_v40, %v371_v40  ;;  %v369_v46 = vmul.f32 0.999995, %v344_v42 }
  0xf3   :  { %444 = vst.msk [vmem:[%s736_s2 + $0x1c] sm:$0xf] %vm436_vm0, %v500_v43  ;;  %v498_v47 = vpack.c.bf16 %v361_v45, %v361_v45 }
  0xf4   :  { %452 = vst.msk [vmem:[%s736_s2 + $0x3c] sm:$0xf] %vm436_vm0, %v508_v44  ;;  %v506_v48 = vpack.c.bf16 %v369_v46, %v369_v46 }
  0xf5   :  { %442 = vst.msk [vmem:[%s736_s2 + $0x14] sm:$0xf] %vm436_vm0, %v498_v47 }
  0xf6   :  { %450 = vst.msk [vmem:[%s736_s2 + $0x34] sm:$0xf] %vm436_vm0, %v506_v48 }

// kernel: _lambda_.11
= control target key start
LH: loop header
LB: loop body
LE: loop exit
PB: predicated region body
PF: predicated region fallthrough
CT: control target
= control target key end

     0   :  { %v144_v15 = vlaneseq  ;;  %v453_v17 = vmov 1983009808   ;;  %v454_v32 = vmov 0   ;;  %s548_s0 = inlined_call_operand.vmem [shape: bf16[8,2,4,256], index: 0, kind: input, shape index: {}]   ;;  %s549_s1 = inlined_call_operand.vmem [shape: bf16[256,128], index: 1, kind: input, shape index: {}]   ;;  %s550_s2 = inlined_call_operand.vmem [shape: bf16[32,128], index: 2, kind: output, shape index: {}]  }
   0x1   :  { %v437_v0 = vld [vmem:[%s549_s1 + $0x78] sm:$0xff]   ;;  %v439_v2 = vld [vmem:[%s549_s1 + $0x70] sm:$0xff]   ;;  %v441_v4 = vld [vmem:[%s549_s1 + $0x68] sm:$0xff]   ;;  %v142_v18 = vunpack.c.l.s4 %v453_v17 }
   0x2   :  { %v438_v1 = vld [vmem:[%s549_s1 + $0x38] sm:$0xff]   ;;  %391 = vmatprep.subr.bf16.mxu0 %v437_v0  ;;  %419 = vmatprep.subr.bf16.mxu1 %v437_v0  ;;  %v440_v3 = vld [vmem:[%s549_s1 + $0x30] sm:$0xff]   ;;  %v442_v5 = vld [vmem:[%s549_s1 + $0x28] sm:$0xff]   ;;  %v145_v25 = vshrl.u32 %v144_v15, 7 }
   0x3   :  { %392 = vmatpush3.bf16.msra.mxu0 %v438_v1  ;;  %427 = vmatpush3.bf16.msra.mxu1 %v438_v1  ;;  %v443_v6 = vld [vmem:[%s549_s1 + $0x60] sm:$0xff]   ;;  %v445_v8 = vld [vmem:[%s549_s1 + $0x58] sm:$0xff]   ;;  %v447_v10 = vld [vmem:[%s549_s1 + $0x50] sm:$0xff]   ;;  %v143_v24 = vunpack.c.0.s8 %v142_v18 }
   0x4   :  { %393 = vmatprep.subr.bf16.mxu0 %v439_v2  ;;  %420 = vmatprep.subr.bf16.mxu1 %v439_v2  ;;  %v444_v7 = vld [vmem:[%s549_s1 + $0x20] sm:$0xff]   ;;  %v446_v9 = vld [vmem:[%s549_s1 + $0x18] sm:$0xff]   ;;  %v27_v12 = vld [vmem:[%s548_s0 + $0x8] sm:$0xf] }
   0x5   :  { %v25_v11 = vld [vmem:[%s548_s0] sm:$0xf]  ;;  %v29_v13 = vld [vmem:[%s548_s0 + $0x10] sm:$0xf]  ;;  %28 = vst [vmem:[#allocation2 + $0x4] sm:$0xf] %v27_v12  ;;  %v146_v36 = vsub.s32 %v143_v24, %v145_v25 }
   0x6   :  { %26 = vst [vmem:[#allocation2] sm:$0xf] %v25_v11  ;;  %30 = vst [vmem:[#allocation2 + $0x8] sm:$0xf] %v29_v13  ;;  %v31_v14 = vld [vmem:[%s548_s0 + $0x18] sm:$0xf] }
   0x7   :  { %394 = vmatpush3.bf16.msra.mxu0 %v440_v3  ;;  %428 = vmatpush3.bf16.msra.mxu1 %v440_v3  ;;  %v33_v16 = vld [vmem:[%s548_s0 + $0x20] sm:$0xf]  ;;  %32 = vst [vmem:[#allocation2 + $0xc] sm:$0xf] %v31_v14  ;;  %v35_v19 = vld [vmem:[%s548_s0 + $0x28] sm:$0xf] }
   0x8   :  { %395 = vmatprep.subr.bf16.mxu0 %v441_v4  ;;  %421 = vmatprep.subr.bf16.mxu1 %v441_v4  ;;  %34 = vst [vmem:[#allocation2 + $0x10] sm:$0xf] %v33_v16  ;;  %v37_v20 = vld [vmem:[%s548_s0 + $0x30] sm:$0xf]  ;;  %v39_v21 = vld [vmem:[%s548_s0 + $0x38] sm:$0xf] }
   0x9   :  { %v448_v22 = vld [vmem:[%s549_s1 + $0x10] sm:$0xff]   ;;  %36 = vst [vmem:[#allocation2 + $0x14] sm:$0xf] %v35_v19  ;;  %38 = vst [vmem:[#allocation2 + $0x18] sm:$0xf] %v37_v20  ;;  %v449_v23 = vld [vmem:[%s549_s1 + $0x48] sm:$0xff]  }
   0xa   :  { %40 = vst [vmem:[#allocation2 + $0x1c] sm:$0xf] %v39_v21  ;;  %v450_v26 = vld [vmem:[%s549_s1 + $0x8] sm:$0xff]   ;;  %v451_v27 = vld [vmem:[%s549_s1 + $0x40] sm:$0xff]  }
   0xb   :  { %396 = vmatpush3.bf16.msra.mxu0 %v442_v5  ;;  %429 = vmatpush3.bf16.msra.mxu1 %v442_v5  ;;  %v452_v43 = vld [vmem:[%s549_s1] sm:$0xff]  }
   0xc   :  { %397 = vmatprep.subr.bf16.mxu0 %v443_v6  ;;  %422 = vmatprep.subr.bf16.mxu1 %v443_v6  ;;  %v84_v29 = vld [vmem:[#allocation2 + $0x4] sm:$0xf] }
   0xd   :  { %v83_v28 = vld [vmem:[#allocation2] sm:$0xf]  ;;  %v85_v30 = vld [vmem:[#allocation2 + $0x8] sm:$0xf]  ;;  %v92_v34 = vmax.bf16 %v454_v32, %v84_v29 }
   0xe   :  { %v86_v31 = vld [vmem:[#allocation2 + $0xc] sm:$0xf]  ;;  %v91_v33 = vmax.bf16 %v454_v32, %v83_v28  ;;  %v93_v35 = vmax.bf16 %v454_v32, %v85_v30 }
   0xf   :  { %398 = vmatpush3.bf16.msra.mxu0 %v444_v7  ;;  %430 = vmatpush3.bf16.msra.mxu1 %v444_v7  ;;  %v87_v37 = vld [vmem:[#allocation2 + $0x10] sm:$0xf]  ;;  %v94_v38 = vmax.bf16 %v454_v32, %v86_v31 }
  0x10   :  { %399 = vmatprep.subr.bf16.mxu0 %v445_v8  ;;  %423 = vmatprep.subr.bf16.mxu1 %v445_v8  ;;  %v88_v39 = vld [vmem:[#allocation2 + $0x14] sm:$0xf]  ;;  %v89_v40 = vld [vmem:[#allocation2 + $0x18] sm:$0xf]  ;;  %v95_v42 = vmax.bf16 %v454_v32, %v87_v37  ;;  %v139_v44 = vcombine.low %v91_v33, %v92_v34 }
  0x11   :  { %v90_v41 = vld [vmem:[#allocation2 + $0x1c] sm:$0xf]  ;;  %v96_v45 = vmax.bf16 %v454_v32, %v88_v39  ;;  %v97_v46 = vmax.bf16 %v454_v32, %v89_v40  ;;  %v140_v47 = vcombine.low %v93_v35, %v94_v38 }
  0x12   :  { %v98_v48 = vmax.bf16 %v454_v32, %v90_v41  ;;  %v147_v49 = vrot.slane %v139_v44, %v146_v36 }
  0x13   :  { %400 = vmatpush3.bf16.msra.mxu0 %v446_v9  ;;  %431 = vmatpush3.bf16.msra.mxu1 %v446_v9  ;;  %v157_v50 = vcombine.low %v95_v42, %v96_v45  ;;  %v154_v51 = vrot.slane %v140_v47, %v146_v36 }
  0x14   :  { %401 = vmatprep.subr.bf16.mxu0 %v447_v10  ;;  %424 = vmatprep.subr.bf16.mxu1 %v447_v10  ;;  %v158_v52 = vcombine.low %v97_v46, %v98_v48 }
  0x15   :  { %v165_v53 = vrot.slane %v157_v50, %v146_v36  ;;  %v156_v54 = vcombine.high %v147_v49, %v154_v51  ;;  %v155_v56 = vcombine.low %v147_v49, %v154_v51 }
  0x16   :  { %v172_v55 = vrot.slane %v158_v52, %v146_v36 }
  0x17   :  { %402 = vmatpush3.bf16.msra.mxu0 %v448_v22  ;;  %432 = vmatpush3.bf16.msra.mxu1 %v448_v22 }
  0x18   :  { %403 = vmatprep.subr.bf16.mxu0 %v449_v23  ;;  %425 = vmatprep.subr.bf16.mxu1 %v449_v23  ;;  %v174_v57 = vcombine.high %v165_v53, %v172_v55  ;;  %v173_v58 = vcombine.low %v165_v53, %v172_v55 }
  0x19   :  { %307 = vmatprep.mubr.bf16.mxu0 %v156_v54 }
  0x1a   :  { %315 = vmatprep.mubr.bf16.mxu1 %v174_v57 }
  0x1b   :  { %404 = vmatpush3.bf16.msra.mxu0 %v450_v26  ;;  %433 = vmatpush3.bf16.msra.mxu1 %v450_v26 }
  0x1c   :  { %405 = vmatprep.subr.bf16.mxu0 %v451_v27  ;;  %426 = vmatprep.subr.bf16.mxu1 %v451_v27 }
  0x1f   :  { %406 = vmatpush3.bf16.msra.mxu0 %v452_v43  ;;  %434 = vmatpush3.bf16.msra.mxu1 %v452_v43 }
  0x22   :  { %308 = vmatmul.mubr.bf16.vlgmr.msra.gmra.mxu0 %v155_v56  ;;  %316 = vmatmul.mubr.bf16.vlgmr.msra.gmra.mxu1 %v173_v58 }
  0xe2   :  { %v407_v59 = vpop.f32.mrf.mxu0  ;;  %v413_v60 = vpop.f32.mrf.mxu1 }
  0xe4   :  { %v408_v61 = vpop.f32.mrf.mxu0  ;;  %v414_v62 = vpop.f32.mrf.mxu1 }
  0xe5   :  { %v409_v0 = vadd.f32 %v408_v61, %v407_v59  ;;  %v415_v3 = vadd.f32 %v414_v62, %v413_v60 }
  0xe6   :  { %v410_v63 = vpop.f32.mrf.mxu0  ;;  %v416_v1 = vpop.f32.mrf.mxu1 }
  0xe7   :  { %v324_v6 = vmul.f32 0.999995, %v409_v0  ;;  %v326_v9 = vmul.f32 0.999995, %v415_v3 }
  0xe8   :  { %v411_v2 = vpop.f32.mrf.mxu0  ;;  %v417_v5 = vpop.f32.mrf.mxu1 }
  0xe9   :  { %v412_v4 = vadd.f32 %v411_v2, %v410_v63  ;;  %v418_v8 = vadd.f32 %v417_v5, %v416_v1 }
  0xeb   :  { %v325_v7 = vmul.f32 0.999995, %v412_v4  ;;  %v327_v11 = vmul.f32 0.999995, %v418_v8 }
  0xed   :  { %v383_v10 = vpack.c.bf16 %v325_v7, %v324_v6  ;;  %v388_v12 = vpack.c.bf16 %v327_v11, %v326_v9 }
  0xef   :  { %384 = vst [vmem:[%s550_s2] sm:$0xff] %v383_v10   ;;  %390 = vst [vmem:[%s550_s2 + $0x8] sm:$0xff] %v388_v12  }

// kernel: _lambda_.8
= control target key start
LH: loop header
LB: loop body
LE: loop exit
PB: predicated region body
PF: predicated region fallthrough
CT: control target
= control target key end

     0   :  { %9 = vsyncpa [#allocation3], 0  ;;  %s6423_s0 = inlined_call_operand.vmem [shape: f32[2,3], index: 0, kind: input, shape index: {}]   ;;  %s6424_s1 = inlined_call_operand.vmem [shape: f32[2,2], index: 1, kind: input, shape index: {}]   ;;  %s6425_s2 = inlined_call_operand.vmem [shape: bf16[512,32], index: 2, kind: input, shape index: {}]   ;;  %s6426_s3 = inlined_call_operand.vmem [shape: bf16[2,32,32], index: 3, kind: input, shape index: {}]   ;;  %s6427_s4 = inlined_call_operand.vmem [shape: bf16[512,64], index: 4, kind: output, shape index: {}]  }
   0x1   :  { %s17_s17 = sshll.u32 %s6423_s0, 4  ;;  %s18_s17 = int_to_ptr.vmem [resolvable:$true] %s17_s17 }
   0x2   :  { %10 = vsyncpa [#allocation5], 0  ;;  %s27_s20 = sshll.u32 %s6424_s1, 4  ;;  %s3821_s21 = scalar_lea.vmem %s18_s17, 32  ;;  %s28_s20 = int_to_ptr.vmem [resolvable:$true] %s27_s20 }
   0x3   :  { %p3822_p0 = scmp.ne.s32.totalorder %s18_s17, %s3821_s21  ;;  %p3826_p1 = scmp.lt.s32.totalorder %s18_s17, %s18_s17 }
   0x4   :  { %p3827_p2 = scmp.lt.s32.totalorder %s3821_s21, %s3821_s21 }
   0x6   :  { %p3828_p3 = por %p3827_p2, %p3826_p1 }
   0x8   :  { %p3829_p4 = pnand %p3828_p3, %p3822_p0 }
   0xa   :  { %3832 = shalt.err (!%p3829_p4)
}
   0xb   :  { %s3849_s22 = smov [#allocation2]   ;;  %s3833_s23 = scalar_lea.vmem %s28_s20, 32 }
   0xc   :  { %20 = dma.vmem_to_smem %s18_s17, 32, %s3849_s22, [#allocation3]  }
   0xd   :  { %p3834_p5 = scmp.ne.s32.totalorder %s28_s20, %s3833_s23  ;;  %p3838_p6 = scmp.lt.s32.totalorder %s28_s20, %s28_s20 }
   0xe   :  { %p3839_p7 = scmp.lt.s32.totalorder %s3833_s23, %s3833_s23 }
  0x10   :  { %p3840_p8 = por %p3839_p7, %p3838_p6 }
  0x12   :  { %p3841_p9 = pnand %p3840_p8, %p3834_p5 }
  0x14   :  { %3844 = shalt.err (!%p3841_p9)
}
  0x15   :  { %s3850_s0 = smov [#allocation4]  }
  0x16   :  { %30 = dma.vmem_to_smem %s28_s20, 32, %s3850_s0, [#allocation5]  }
  0x17   :  { %3845 = dma.done.wait [#allocation3], 32  }
  0x18   :  { %3846 = vsyncadd [#allocation3], 4294967264 }
  0x19   :  { %3847 = dma.done.wait [#allocation5], 32  }
  0x1a   :  { %3848 = vsyncadd [#allocation5], 4294967264 }
  0x1b   :  { %41 = sfence }
  0x1c   :  { %v3817_v0 = vld [vmem:[%s6426_s3 + $0x8] sm:$0xff]   ;;  %v3818_v1 = vld [vmem:[%s6426_s3] sm:$0xff]   ;;  %s3892_s29 = sld [smem:[#allocation2]]  ;;  %v3580_v4 = vld [vmem:[%s6425_s2 + $0x10] sm:$0xff]   ;;  %vm609_vm0 = vcmask 261120   ;;  %vm2595_vm1 = vcmask 257024  }
  0x1d   :  { %3678 = vmatprep.subr.bf16.mxu0 %v3817_v0  ;;  %v3452_v2 = vld [vmem:[%s6425_s2] sm:$0xff]   ;;  %v3579_v3 = vld [vmem:[%s6425_s2 + $0x8] sm:$0xff]   ;;  %s3904_s8 = sld [smem:[#allocation2 + $0x1]]  ;;  %v3581_v9 = vld [vmem:[%s6425_s2 + $0x18] sm:$0xff]   ;;  %v3921_v12 = vunpack.c.l.bf16 %v3580_v4  ;;  %v3923_v13 = vunpack.c.h.bf16 %v3580_v4  ;;  %s3851_s23 = smov 32   ;;  %vm3044_vm2 = vcmask 519424  }
  0x1e   :  { %3679 = vmatpush3.bf16.msra.mxu0 %v3817_v0  ;;  %v3900_v5 = vunpack.c.l.bf16 %v3452_v2  ;;  %v3902_v6 = vunpack.c.h.bf16 %v3452_v2  ;;  %v3906_v7 = vunpack.c.l.bf16 %v3579_v3  ;;  %v3908_v8 = vunpack.c.h.bf16 %v3579_v3  ;;  %v3582_v10 = vld [vmem:[%s6425_s2 + $0x20] sm:$0xff]   ;;  %v3583_v11 = vld [vmem:[%s6425_s2 + $0x28] sm:$0xff]   ;;  %s3919_s15 = sld [smem:[#allocation2 + $0x2]]  ;;  %v3584_v16 = vld [vmem:[%s6425_s2 + $0x30] sm:$0xff]  }
  0x1f   :  { %3680 = vmatprep.subr.bf16.mxu0 %v3818_v1  ;;  %v3925_v14 = vunpack.c.l.bf16 %v3581_v9  ;;  %v3927_v15 = vunpack.c.h.bf16 %v3581_v9  ;;  %v3585_v17 = vld [vmem:[%s6425_s2 + $0x38] sm:$0xff]   ;;  %v3586_v18 = vld [vmem:[%s6425_s2 + $0x40] sm:$0xff]   ;;  %v3938_v19 = vunpack.c.l.bf16 %v3582_v10  ;;  %v3940_v20 = vunpack.c.h.bf16 %v3582_v10  ;;  %v3587_v23 = vld [vmem:[%s6425_s2 + $0x48] sm:$0xff]   ;;  %s3154_s16 = sld [smem:[#allocation2 + $0x82]] }
  0x20   :  { %v3942_v21 = vunpack.c.l.bf16 %v3583_v11  ;;  %v3944_v22 = vunpack.c.h.bf16 %v3583_v11  ;;  %v3588_v24 = vld [vmem:[%s6425_s2 + $0x50] sm:$0xff]   ;;  %v3955_v25 = vld [vmem:[%s6425_s2 + $0x58] sm:$0xff]   ;;  %v3957_v26 = vunpack.c.l.bf16 %v3584_v16  ;;  %v3959_v27 = vunpack.c.h.bf16 %v3584_v16  ;;  %s1059_s17 = sld [smem:[#allocation4]] }
  0x21   :  { %v3961_v28 = vunpack.c.l.bf16 %v3585_v17  ;;  %v3963_v29 = vunpack.c.h.bf16 %v3585_v17  ;;  %v3965_v30 = vunpack.c.l.bf16 %v3586_v18  ;;  %v3967_v31 = vunpack.c.h.bf16 %v3586_v18  ;;  %s3151_s18 = sld [smem:[#allocation4 + $0x80]] }
  0x22   :  { %3681 = vmatpush3.bf16.msra.mxu0 %v3818_v1  ;;  %v3969_v32 = vunpack.c.l.bf16 %v3587_v23  ;;  %v3971_v33 = vunpack.c.h.bf16 %v3587_v23  ;;  %v3974_v34 = vstv %s3892_s29  ;;  %v3976_v35 = vunpack.c.l.bf16 %v3588_v24  ;;  %s5168_s19 = sld [smem:[#allocation4 + $0x1]] }
  0x23   :  { %v3978_v36 = vunpack.c.h.bf16 %v3588_v24  ;;  %v3981_v37 = vunpack.c.l.bf16 %v3955_v25  ;;  %v173_v38 = vmul.f32 %v3900_v5, %v3974_v34  ;;  %v174_v39 = vmul.f32 %v3902_v6, %v3974_v34  ;;  %s5186_s20 = sld [smem:[#allocation4 + $0x81]] }
  0x24   :  { %v3988_v40 = vstv %s3904_s8  ;;  %v175_v41 = vmul.f32 %v3906_v7, %v3974_v34  ;;  %v3997_v44 = vstv %s3919_s15  ;;  %v176_v45 = vmul.f32 %v3908_v8, %v3974_v34  ;;  %s3153_s15 = sld [smem:[#allocation2 + $0x81]] }
  0x25   :  { %v239_v42 = vmul.f32 %v3900_v5, %v3988_v40  ;;  %v240_v43 = vmul.f32 %v3902_v6, %v3988_v40  ;;  %v369_v46 = vmul.f32 %v3900_v5, %v3997_v44  ;;  %v370_v47 = vmul.f32 %v3902_v6, %v3997_v44 }
  0x26   :  { %v241_v48 = vmul.f32 %v3906_v7, %v3988_v40  ;;  %v242_v49 = vmul.f32 %v3908_v8, %v3988_v40  ;;  %v371_v52 = vmul.f32 %v3906_v7, %v3997_v44  ;;  %v372_v53 = vmul.f32 %v3908_v8, %v3997_v44 }
  0x27   :  { %v303_v50 = vadd.f32 %v239_v42, %v173_v38  ;;  %v304_v51 = vadd.f32 %v240_v43, %v174_v39  ;;  %v177_v56 = vmul.f32 %v3921_v12, %v3974_v34  ;;  %v178_v57 = vmul.f32 %v3923_v13, %v3974_v34 }
  0x28   :  { %v305_v54 = vadd.f32 %v241_v48, %v175_v41  ;;  %v306_v55 = vadd.f32 %v242_v49, %v176_v45  ;;  %v243_v60 = vmul.f32 %v3921_v12, %v3988_v40  ;;  %v244_v61 = vmul.f32 %v3923_v13, %v3988_v40 }
  0x29   :  { %v433_v58 = vadd.f32 %v369_v46, %v303_v50  ;;  %v434_v59 = vadd.f32 %v370_v47, %v304_v51  ;;  %v373_v0 = vmul.f32 %v3921_v12, %v3997_v44  ;;  %v374_v1 = vmul.f32 %v3923_v13, %v3997_v44 }
  0x2a   :  { %v435_v62 = vadd.f32 %v371_v52, %v305_v54  ;;  %v436_v63 = vadd.f32 %v372_v53, %v306_v55  ;;  %v307_v4 = vadd.f32 %v243_v60, %v177_v56  ;;  %v308_v9 = vadd.f32 %v244_v61, %v178_v57 }
  0x2b   :  { %v497_v2 = vmax.f32 %v433_v58, 0.0  ;;  %v498_v3 = vmax.f32 %v434_v59, 0.0  ;;  %v179_v16 = vmul.f32 %v3925_v14, %v3974_v34  ;;  %v180_v17 = vmul.f32 %v3927_v15, %v3974_v34 }
  0x2c   :  { %v499_v10 = vmax.f32 %v435_v62, 0.0  ;;  %v500_v11 = vmax.f32 %v436_v63, 0.0  ;;  %v437_v23 = vadd.f32 %v373_v0, %v307_v4  ;;  %v438_v24 = vadd.f32 %v374_v1, %v308_v9 }
  0x2d   :  { %v561_v18 = vpack.c.bf16 %v498_v3, %v497_v2  ;;  %v245_v38 = vmul.f32 %v3925_v14, %v3988_v40  ;;  %v246_v41 = vmul.f32 %v3927_v15, %v3988_v40  ;;  %v375_v42 = vmul.f32 %v3925_v14, %v3997_v44 }
  0x2e   :  { %v562_v39 = vpack.c.bf16 %v500_v11, %v499_v10  ;;  %v376_v43 = vmul.f32 %v3927_v15, %v3997_v44  ;;  %v501_v45 = vmax.f32 %v437_v23, 0.0  ;;  %v502_v46 = vmax.f32 %v438_v24, 0.0 }
  0x2f   :  { %3682 = vmatprep.mubr.msk.bf16.mxu0 %vm609_vm0, %v561_v18  ;;  %v309_v47 = vadd.f32 %v245_v38, %v179_v16  ;;  %v181_v48 = vmul.f32 %v3938_v19, %v3974_v34  ;;  %v310_v49 = vadd.f32 %v246_v41, %v180_v17  ;;  %v182_v50 = vmul.f32 %v3940_v20, %v3974_v34 }
  0x30   :  { %3683 = vmatmul.mubr.msk.bf16.vlgmr.msra.gmra.mxu0 %vm609_vm0, %v562_v39  ;;  %v247_v51 = vmul.f32 %v3938_v19, %v3988_v40  ;;  %v248_v52 = vmul.f32 %v3940_v20, %v3988_v40  ;;  %v563_v53 = vpack.c.bf16 %v502_v46, %v501_v45  ;;  %v377_v55 = vmul.f32 %v3938_v19, %v3997_v44 }
  0x31   :  { %v439_v54 = vadd.f32 %v375_v42, %v309_v47  ;;  %v378_v56 = vmul.f32 %v3940_v20, %v3997_v44  ;;  %v440_v57 = vadd.f32 %v376_v43, %v310_v49  ;;  %v183_v60 = vmul.f32 %v3942_v21, %v3974_v34 }
  0x32   :  { %v311_v58 = vadd.f32 %v247_v51, %v181_v48  ;;  %v312_v59 = vadd.f32 %v248_v52, %v182_v50  ;;  %3686 = vmatprep.mubr.msk.bf16.mxu0 %vm609_vm0, %v563_v53  ;;  %v184_v62 = vmul.f32 %v3944_v22, %v3974_v34  ;;  %v249_v63 = vmul.f32 %v3942_v21, %v3988_v40 }
  0x33   :  { %v503_v61 = vmax.f32 %v439_v54, 0.0  ;;  %v250_v0 = vmul.f32 %v3944_v22, %v3988_v40  ;;  %v504_v1 = vmax.f32 %v440_v57, 0.0  ;;  %v379_v4 = vmul.f32 %v3942_v21, %v3997_v44 }
  0x34   :  { %v441_v2 = vadd.f32 %v377_v55, %v311_v58  ;;  %v442_v3 = vadd.f32 %v378_v56, %v312_v59  ;;  %v313_v9 = vadd.f32 %v249_v63, %v183_v60  ;;  %v380_v11 = vmul.f32 %v3944_v22, %v3997_v44 }
  0x35   :  { %v314_v10 = vadd.f32 %v250_v0, %v184_v62  ;;  %v185_v16 = vmul.f32 %v3957_v26, %v3974_v34  ;;  %v564_v17 = vpack.c.bf16 %v504_v1, %v503_v61  ;;  %v186_v24 = vmul.f32 %v3959_v27, %v3974_v34 }
  0x36   :  { %v505_v18 = vmax.f32 %v441_v2, 0.0  ;;  %v506_v23 = vmax.f32 %v442_v3, 0.0  ;;  %v443_v38 = vadd.f32 %v379_v4, %v313_v9  ;;  %v251_v41 = vmul.f32 %v3957_v26, %v3988_v40 }
  0x37   :  { %v444_v39 = vadd.f32 %v380_v11, %v314_v10  ;;  %v252_v42 = vmul.f32 %v3959_v27, %v3988_v40  ;;  %v381_v45 = vmul.f32 %v3957_v26, %v3997_v44  ;;  %v382_v46 = vmul.f32 %v3959_v27, %v3997_v44 }
  0x38   :  { %3687 = vmatmul.mubr.msk.bf16.gmra.mxu0 %vm609_vm0, %v564_v17  ;;  %v565_v43 = vpack.c.bf16 %v506_v23, %v505_v18  ;;  %v187_v47 = vmul.f32 %v3961_v28, %v3974_v34  ;;  %v507_v48 = vmax.f32 %v443_v38, 0.0  ;;  %v315_v50 = vadd.f32 %v251_v41, %v185_v16 }
  0x39   :  { %v508_v49 = vmax.f32 %v444_v39, 0.0  ;;  %v316_v51 = vadd.f32 %v252_v42, %v186_v24  ;;  %v188_v52 = vmul.f32 %v3963_v29, %v3974_v34  ;;  %v253_v53 = vmul.f32 %v3961_v28, %v3988_v40 }
  0x3a   :  { %3690 = vmatprep.mubr.msk.bf16.mxu0 %vm609_vm0, %v565_v43  ;;  %v254_v54 = vmul.f32 %v3963_v29, %v3988_v40  ;;  %v383_v55 = vmul.f32 %v3961_v28, %v3997_v44  ;;  %v445_v57 = vadd.f32 %v381_v45, %v315_v50  ;;  %v384_v59 = vmul.f32 %v3963_v29, %v3997_v44 }
  0x3b   :  { %v566_v56 = vpack.c.bf16 %v508_v49, %v507_v48  ;;  %v446_v58 = vadd.f32 %v382_v46, %v316_v51  ;;  %v317_v60 = vadd.f32 %v253_v53, %v187_v47  ;;  %v189_v62 = vmul.f32 %v3965_v30, %v3974_v34 }
  0x3c   :  { %v318_v61 = vadd.f32 %v254_v54, %v188_v52  ;;  %v190_v63 = vmul.f32 %v3967_v31, %v3974_v34  ;;  %v509_v0 = vmax.f32 %v445_v57, 0.0  ;;  %v255_v2 = vmul.f32 %v3965_v30, %v3988_v40 }
  0x3d   :  { %v510_v1 = vmax.f32 %v446_v58, 0.0  ;;  %v256_v3 = vmul.f32 %v3967_v31, %v3988_v40  ;;  %v447_v4 = vadd.f32 %v383_v55, %v317_v60  ;;  %v385_v10 = vmul.f32 %v3965_v30, %v3997_v44 }
  0x3e   :  { %v448_v9 = vadd.f32 %v384_v59, %v318_v61  ;;  %v386_v11 = vmul.f32 %v3967_v31, %v3997_v44  ;;  %v319_v17 = vadd.f32 %v255_v2, %v189_v62  ;;  %v191_v23 = vmul.f32 %v3969_v32, %v3974_v34 }
  0x3f   :  { %v567_v16 = vpack.c.bf16 %v510_v1, %v509_v0  ;;  %v320_v18 = vadd.f32 %v256_v3, %v190_v63  ;;  %v511_v24 = vmax.f32 %v447_v4, 0.0  ;;  %v192_v39 = vmul.f32 %v3971_v33, %v3974_v34  ;;  %v3590_v3 = vld [vmem:[%s6425_s2 + $0x60] sm:$0xff]  }
  0x40   :  { %3691 = vmatmul.mubr.msk.bf16.gmra.mxu0 %vm609_vm0, %v566_v56  ;;  %v512_v38 = vmax.f32 %v448_v9, 0.0  ;;  %v257_v41 = vmul.f32 %v3969_v32, %v3988_v40  ;;  %v449_v42 = vadd.f32 %v385_v10, %v319_v17  ;;  %v258_v45 = vmul.f32 %v3971_v33, %v3988_v40 }
  0x41   :  { %3694 = vmatprep.mubr.msk.bf16.mxu0 %vm609_vm0, %v567_v16  ;;  %v450_v43 = vadd.f32 %v386_v11, %v320_v18  ;;  %v387_v46 = vmul.f32 %v3969_v32, %v3997_v44  ;;  %v388_v49 = vmul.f32 %v3971_v33, %v3997_v44  ;;  %v193_v50 = vmul.f32 %v3976_v35, %v3974_v34  ;;  %v3591_v11 = vld [vmem:[%s6425_s2 + $0x68] sm:$0xff]  }
  0x42   :  { %v568_v47 = vpack.c.bf16 %v512_v38, %v511_v24  ;;  %v321_v48 = vadd.f32 %v257_v41, %v191_v23  ;;  %v513_v51 = vmax.f32 %v449_v42, 0.0  ;;  %v322_v53 = vadd.f32 %v258_v45, %v192_v39 }
  0x43   :  { %v514_v52 = vmax.f32 %v450_v43, 0.0  ;;  %v194_v54 = vmul.f32 %v3978_v36, %v3974_v34  ;;  %v259_v56 = vmul.f32 %v3976_v35, %v3988_v40  ;;  %v260_v57 = vmul.f32 %v3978_v36, %v3988_v40 }
  0x44   :  { %v451_v55 = vadd.f32 %v387_v46, %v321_v48  ;;  %v389_v58 = vmul.f32 %v3976_v35, %v3997_v44  ;;  %v452_v60 = vadd.f32 %v388_v49, %v322_v53  ;;  %v390_v61 = vmul.f32 %v3978_v36, %v3997_v44 }
  0x45   :  { %v569_v59 = vpack.c.bf16 %v514_v52, %v513_v51  ;;  %v4129_v62 = vunpack.c.h.bf16 %v3955_v25  ;;  %v323_v0 = vadd.f32 %v259_v56, %v193_v50  ;;  %v324_v1 = vadd.f32 %v260_v57, %v194_v54 }
  0x46   :  { %v515_v63 = vmax.f32 %v451_v55, 0.0  ;;  %v195_v2 = vmul.f32 %v3981_v37, %v3974_v34  ;;  %v516_v4 = vmax.f32 %v452_v60, 0.0  ;;  %v261_v10 = vmul.f32 %v3981_v37, %v3988_v40  ;;  %v3592_v55 = vld [vmem:[%s6425_s2 + $0x70] sm:$0xff]  }
  0x47   :  { %v196_v9 = vmul.f32 %v4129_v62, %v3974_v34  ;;  %v262_v25 = vmul.f32 %v4129_v62, %v3988_v40  ;;  %v453_v16 = vadd.f32 %v389_v58, %v323_v0  ;;  %v454_v17 = vadd.f32 %v390_v61, %v324_v1 }
  0x48   :  { %3695 = vmatmul.mubr.msk.bf16.gmra.mxu0 %vm609_vm0, %v568_v47  ;;  %v391_v18 = vmul.f32 %v3981_v37, %v3997_v44  ;;  %v392_v23 = vmul.f32 %v4129_v62, %v3997_v44  ;;  %v570_v24 = vpack.c.bf16 %v516_v4, %v515_v63  ;;  %v325_v38 = vadd.f32 %v261_v10, %v195_v2 }
  0x49   :  { %3698 = vmatprep.mubr.msk.bf16.mxu0 %vm609_vm0, %v569_v59  ;;  %v326_v39 = vadd.f32 %v262_v25, %v196_v9  ;;  %v4151_v41 = vunpack.c.l.bf16 %v3590_v3  ;;  %v517_v42 = vmax.f32 %v453_v16, 0.0  ;;  %v518_v43 = vmax.f32 %v454_v17, 0.0 }
  0x4a   :  { %v4153_v45 = vunpack.c.h.bf16 %v3590_v3  ;;  %v4155_v46 = vunpack.c.l.bf16 %v3591_v11  ;;  %v455_v47 = vadd.f32 %v391_v18, %v325_v38  ;;  %v4172_v61 = vunpack.c.h.bf16 %v3591_v11 }
  0x4b   :  { %v456_v48 = vadd.f32 %v392_v23, %v326_v39  ;;  %v197_v49 = vmul.f32 %v4151_v41, %v3974_v34  ;;  %v263_v50 = vmul.f32 %v4151_v41, %v3988_v40  ;;  %v571_v51 = vpack.c.bf16 %v518_v43, %v517_v42  ;;  %v3593_v43 = vld [vmem:[%s6425_s2 + $0x78] sm:$0xff]  }
  0x4c   :  { %v198_v52 = vmul.f32 %v4153_v45, %v3974_v34  ;;  %v264_v53 = vmul.f32 %v4153_v45, %v3988_v40  ;;  %v393_v54 = vmul.f32 %v4151_v41, %v3997_v44  ;;  %v519_v56 = vmax.f32 %v455_v47, 0.0  ;;  %v3594_v47 = vld [vmem:[%s6425_s2 + $0x80] sm:$0xff]  }
  0x4d   :  { %v520_v57 = vmax.f32 %v456_v48, 0.0  ;;  %v327_v58 = vadd.f32 %v263_v50, %v197_v49  ;;  %v394_v59 = vmul.f32 %v4153_v45, %v3997_v44  ;;  %v199_v63 = vmul.f32 %v4155_v46, %v3974_v34 }
  0x4e   :  { %v328_v60 = vadd.f32 %v264_v53, %v198_v52  ;;  %v265_v0 = vmul.f32 %v4155_v46, %v3988_v40  ;;  %v395_v3 = vmul.f32 %v4155_v46, %v3997_v44  ;;  %v4180_v4 = vunpack.c.l.bf16 %v3592_v55  ;;  %v3595_v52 = vld [vmem:[%s6425_s2 + $0x88] sm:$0xff]  }
  0x4f   :  { %v572_v1 = vpack.c.bf16 %v520_v57, %v519_v56  ;;  %v457_v2 = vadd.f32 %v393_v54, %v327_v58  ;;  %v200_v10 = vmul.f32 %v4172_v61, %v3974_v34  ;;  %v266_v25 = vmul.f32 %v4172_v61, %v3988_v40 }
  0x50   :  { %3699 = vmatmul.mubr.msk.bf16.gmra.mxu0 %vm609_vm0, %v570_v24  ;;  %v458_v9 = vadd.f32 %v394_v59, %v328_v60  ;;  %v329_v11 = vadd.f32 %v265_v0, %v199_v63  ;;  %v396_v17 = vmul.f32 %v4172_v61, %v3997_v44  ;;  %v4190_v18 = vunpack.c.h.bf16 %v3592_v55 }
  0x51   :  { %3702 = vmatprep.mubr.msk.bf16.mxu0 %vm609_vm0, %v571_v51  ;;  %v521_v16 = vmax.f32 %v457_v2, 0.0  ;;  %v201_v23 = vmul.f32 %v4180_v4, %v3974_v34  ;;  %v330_v38 = vadd.f32 %v266_v25, %v200_v10  ;;  %v267_v42 = vmul.f32 %v4180_v4, %v3988_v40 }
  0x52   :  { %v522_v24 = vmax.f32 %v458_v9, 0.0  ;;  %v459_v39 = vadd.f32 %v395_v3, %v329_v11  ;;  %v202_v48 = vmul.f32 %v4190_v18, %v3974_v34  ;;  %v268_v49 = vmul.f32 %v4190_v18, %v3988_v40 }
  0x53   :  { %v397_v50 = vmul.f32 %v4180_v4, %v3997_v44  ;;  %v398_v51 = vmul.f32 %v4190_v18, %v3997_v44  ;;  %v460_v54 = vadd.f32 %v396_v17, %v330_v38  ;;  %v331_v56 = vadd.f32 %v267_v42, %v201_v23 }
  0x54   :  { %v573_v53 = vpack.c.bf16 %v522_v24, %v521_v16  ;;  %v523_v55 = vmax.f32 %v459_v39, 0.0  ;;  %v332_v57 = vadd.f32 %v268_v49, %v202_v48  ;;  %v4213_v58 = vunpack.c.l.bf16 %v3593_v43 }
  0x55   :  { %v4215_v59 = vunpack.c.h.bf16 %v3593_v43  ;;  %v4217_v60 = vunpack.c.l.bf16 %v3594_v47  ;;  %v524_v63 = vmax.f32 %v460_v54, 0.0  ;;  %v461_v0 = vadd.f32 %v397_v50, %v331_v56 }
  0x56   :  { %v4219_v2 = vunpack.c.h.bf16 %v3594_v47  ;;  %v4221_v3 = vunpack.c.l.bf16 %v3595_v52  ;;  %v462_v9 = vadd.f32 %v398_v51, %v332_v57  ;;  %v203_v10 = vmul.f32 %v4213_v58, %v3974_v34 }
  0x57   :  { %6554 = vst [vmem:[#allocation8_spill] sm:$0xff] %v4217_v60  ;;  %v204_v25 = vmul.f32 %v4215_v59, %v3974_v34  ;;  %v269_v11 = vmul.f32 %v4213_v58, %v3988_v40  ;;  %v574_v16 = vpack.c.bf16 %v524_v63, %v523_v55  ;;  %v525_v17 = vmax.f32 %v461_v0, 0.0  ;;  %v3596_v0 = vld [vmem:[%s6425_s2 + $0x90] sm:$0xff]  }
  0x58   :  { %6555 = vst [vmem:[#allocation9_spill] sm:$0xff] %v4219_v2  ;;  %6556 = vst [vmem:[#allocation10_spill] sm:$0xff] %v4221_v3  ;;  %3703 = vmatmul.mubr.msk.bf16.gmra.mxu0 %vm609_vm0, %v572_v1  ;;  %v270_v23 = vmul.f32 %v4215_v59, %v3988_v40  ;;  %v399_v24 = vmul.f32 %v4213_v58, %v3997_v44  ;;  %v526_v38 = vmax.f32 %v462_v9, 0.0  ;;  %v4249_v63 = vunpack.c.h.bf16 %v3595_v52 }
  0x59   :  { %3706 = vmatprep.mubr.msk.bf16.mxu0 %vm609_vm0, %v573_v53  ;;  %v333_v39 = vadd.f32 %v269_v11, %v203_v10  ;;  %v400_v42 = vmul.f32 %v4215_v59, %v3997_v44  ;;  %v205_v43 = vmul.f32 %v4217_v60, %v3974_v34  ;;  %v206_v1 = vmul.f32 %v4219_v2, %v3974_v34 }
  0x5a   :  { %v334_v47 = vadd.f32 %v270_v23, %v204_v25  ;;  %v271_v48 = vmul.f32 %v4217_v60, %v3988_v40  ;;  %v272_v49 = vmul.f32 %v4219_v2, %v3988_v40  ;;  %v575_v50 = vpack.c.bf16 %v526_v38, %v525_v17  ;;  %6557 = vst [vmem:[#allocation11_spill] sm:$0xff] %v4249_v63 }
  0x5b   :  { %v463_v51 = vadd.f32 %v399_v24, %v333_v39  ;;  %v401_v53 = vmul.f32 %v4217_v60, %v3997_v44  ;;  %v402_v54 = vmul.f32 %v4219_v2, %v3997_v44  ;;  %v207_v10 = vmul.f32 %v4221_v3, %v3974_v34 }
  0x5c   :  { %v464_v55 = vadd.f32 %v400_v42, %v334_v47  ;;  %v335_v56 = vadd.f32 %v271_v48, %v205_v43  ;;  %v336_v57 = vadd.f32 %v272_v49, %v206_v1  ;;  %v273_v25 = vmul.f32 %v4221_v3, %v3988_v40 }
  0x5d   :  { %v527_v9 = vmax.f32 %v463_v51, 0.0  ;;  %v403_v11 = vmul.f32 %v4221_v3, %v3997_v44  ;;  %v208_v52 = vmul.f32 %v4249_v63, %v3974_v34  ;;  %v274_v38 = vmul.f32 %v4249_v63, %v3988_v40 }
  0x5e   :  { %v528_v17 = vmax.f32 %v464_v55, 0.0  ;;  %v465_v23 = vadd.f32 %v401_v53, %v335_v56  ;;  %v466_v24 = vadd.f32 %v402_v54, %v336_v57  ;;  %v337_v39 = vadd.f32 %v273_v25, %v207_v10  ;;  %v3597_v56 = vld [vmem:[%s6425_s2 + $0x98] sm:$0xff]   ;;  %v3599_v10 = vld [vmem:[%s6425_s2 + $0xa8] sm:$0xff]  }
  0x5f   :  { %v404_v42 = vmul.f32 %v4249_v63, %v3997_v44  ;;  %v4266_v43 = vunpack.c.l.bf16 %v3596_v0  ;;  %v4269_v49 = vunpack.c.h.bf16 %v3596_v0  ;;  %v338_v51 = vadd.f32 %v274_v38, %v208_v52 }
  0x60   :  { %3707 = vmatmul.mubr.msk.bf16.gmra.mxu0 %vm609_vm0, %v574_v16  ;;  %v576_v47 = vpack.c.bf16 %v528_v17, %v527_v9  ;;  %v529_v1 = vmax.f32 %v465_v23, 0.0  ;;  %v530_v48 = vmax.f32 %v466_v24, 0.0  ;;  %v467_v53 = vadd.f32 %v403_v11, %v337_v39  ;;  %v3598_v16 = vld [vmem:[%s6425_s2 + $0xa0] sm:$0xff]  }
  0x61   :  { %6558 = vst [vmem:[#allocation12_spill] sm:$0xff] %v4266_v43  ;;  %6559 = vst [vmem:[#allocation13_spill] sm:$0xff] %v4269_v49  ;;  %3710 = vmatprep.mubr.msk.bf16.mxu0 %vm609_vm0, %v575_v50  ;;  %v209_v54 = vmul.f32 %v4266_v43, %v3974_v34  ;;  %v275_v55 = vmul.f32 %v4266_v43, %v3988_v40  ;;  %v210_v50 = vmul.f32 %v4269_v49, %v3974_v34 }
  0x62   :  { %v577_v57 = vpack.c.bf16 %v530_v48, %v529_v1  ;;  %v276_v0 = vmul.f32 %v4269_v49, %v3988_v40  ;;  %v405_v9 = vmul.f32 %v4266_v43, %v3997_v44  ;;  %v468_v25 = vadd.f32 %v404_v42, %v338_v51 }
  0x63   :  { %v531_v11 = vmax.f32 %v467_v53, 0.0  ;;  %v339_v17 = vadd.f32 %v275_v55, %v209_v54  ;;  %v406_v23 = vmul.f32 %v4269_v49, %v3997_v44  ;;  %v4293_v52 = vunpack.c.l.bf16 %v3597_v56 }
  0x64   :  { %v340_v24 = vadd.f32 %v276_v0, %v210_v50  ;;  %v4295_v38 = vunpack.c.h.bf16 %v3597_v56  ;;  %v4297_v39 = vunpack.c.l.bf16 %v3598_v16  ;;  %v532_v1 = vmax.f32 %v468_v25, 0.0 }
  0x65   :  { %6560 = vst [vmem:[#allocation14_spill] sm:$0xff] %v4293_v52  ;;  %v469_v48 = vadd.f32 %v405_v9, %v339_v17  ;;  %v4299_v43 = vunpack.c.h.bf16 %v3598_v16  ;;  %v4301_v2 = vunpack.c.l.bf16 %v3599_v10  ;;  %v211_v42 = vmul.f32 %v4293_v52, %v3974_v34 }
  0x66   :  { %6561 = vst [vmem:[#allocation15_spill] sm:$0xff] %v4295_v38  ;;  %6562 = vst [vmem:[#allocation16_spill] sm:$0xff] %v4297_v39  ;;  %v470_v3 = vadd.f32 %v406_v23, %v340_v24  ;;  %v212_v51 = vmul.f32 %v4295_v38, %v3974_v34  ;;  %v277_v53 = vmul.f32 %v4293_v52, %v3988_v40 }
  0x67   :  { %6563 = vst [vmem:[#allocation17_spill] sm:$0xff] %v4299_v43  ;;  %6564 = vst [vmem:[#allocation18_spill] sm:$0xff] %v4301_v2  ;;  %v578_v54 = vpack.c.bf16 %v532_v1, %v531_v11  ;;  %v533_v55 = vmax.f32 %v469_v48, 0.0  ;;  %v278_v56 = vmul.f32 %v4295_v38, %v3988_v40  ;;  %v407_v16 = vmul.f32 %v4293_v52, %v3997_v44 }
  0x68   :  { %3711 = vmatmul.mubr.msk.bf16.gmra.mxu0 %vm609_vm0, %v576_v47  ;;  %v534_v50 = vmax.f32 %v470_v3, 0.0  ;;  %v341_v0 = vadd.f32 %v277_v53, %v211_v42  ;;  %v408_v9 = vmul.f32 %v4295_v38, %v3997_v44  ;;  %v213_v25 = vmul.f32 %v4297_v39, %v3974_v34 }
  0x69   :  { %3714 = vmatprep.mubr.msk.bf16.mxu0 %vm609_vm0, %v577_v57  ;;  %v342_v11 = vadd.f32 %v278_v56, %v212_v51  ;;  %v214_v17 = vmul.f32 %v4299_v43, %v3974_v34  ;;  %v279_v23 = vmul.f32 %v4297_v39, %v3988_v40  ;;  %v280_v47 = vmul.f32 %v4299_v43, %v3988_v40  ;;  %v3600_v56 = vld [vmem:[%s6425_s2 + $0xb0] sm:$0xff]  }
  0x6a   :  { %v579_v3 = vpack.c.bf16 %v534_v50, %v533_v55  ;;  %v471_v24 = vadd.f32 %v407_v16, %v341_v0  ;;  %v409_v1 = vmul.f32 %v4297_v39, %v3997_v44  ;;  %v410_v48 = vmul.f32 %v4299_v43, %v3997_v44 }
  0x6b   :  { %v472_v42 = vadd.f32 %v408_v9, %v342_v11  ;;  %v343_v57 = vadd.f32 %v279_v23, %v213_v25  ;;  %v344_v51 = vadd.f32 %v280_v47, %v214_v17  ;;  %v4329_v53 = vunpack.c.h.bf16 %v3599_v10 }
  0x6c   :  { %v535_v49 = vmax.f32 %v471_v24, 0.0  ;;  %v215_v55 = vmul.f32 %v4301_v2, %v3974_v34  ;;  %v281_v16 = vmul.f32 %v4301_v2, %v3988_v40  ;;  %v411_v50 = vmul.f32 %v4301_v2, %v3997_v44 }
  0x6d   :  { %6565 = vst [vmem:[#allocation19_spill] sm:$0xff] %v4329_v53  ;;  %v536_v0 = vmax.f32 %v472_v42, 0.0  ;;  %v473_v9 = vadd.f32 %v409_v1, %v343_v57  ;;  %v474_v25 = vadd.f32 %v410_v48, %v344_v51  ;;  %v216_v10 = vmul.f32 %v4329_v53, %v3974_v34  ;;  %v3601_v51 = vld [vmem:[%s6425_s2 + $0xb8] sm:$0xff]  }
  0x6e   :  { %v282_v11 = vmul.f32 %v4329_v53, %v3988_v40  ;;  %v345_v17 = vadd.f32 %v281_v16, %v215_v55  ;;  %v412_v23 = vmul.f32 %v4329_v53, %v3997_v44  ;;  %v4346_v47 = vunpack.c.l.bf16 %v3600_v56  ;;  %v3602_v55 = vld [vmem:[%s6425_s2 + $0xc0] sm:$0xff]  }
  0x6f   :  { %v537_v24 = vmax.f32 %v473_v9, 0.0  ;;  %v538_v43 = vmax.f32 %v474_v25, 0.0  ;;  %v4348_v39 = vunpack.c.h.bf16 %v3600_v56  ;;  %v580_v56 = vpack.c.bf16 %v536_v0, %v535_v49  ;;  %v3603_v0 = vld [vmem:[%s6425_s2 + $0xc8] sm:$0xff]  }
  0x70   :  { %6566 = vst [vmem:[#allocation20_spill] sm:$0xff] %v4346_v47  ;;  %3715 = vmatmul.mubr.msk.bf16.gmra.mxu0 %vm609_vm0, %v578_v54  ;;  %v346_v1 = vadd.f32 %v282_v11, %v216_v10  ;;  %v475_v48 = vadd.f32 %v411_v50, %v345_v17  ;;  %v217_v42 = vmul.f32 %v4346_v47, %v3974_v34  ;;  %v4370_v2 = vunpack.c.l.bf16 %v3601_v51 }
  0x71   :  { %6567 = vst [vmem:[#allocation21_spill] sm:$0xff] %v4348_v39  ;;  %v283_v57 = vmul.f32 %v4346_v47, %v3988_v40  ;;  %3718 = vmatprep.mubr.msk.bf16.mxu0 %vm609_vm0, %v579_v3  ;;  %v218_v54 = vmul.f32 %v4348_v39, %v3974_v34  ;;  %v284_v16 = vmul.f32 %v4348_v39, %v3988_v40  ;;  %v4372_v3 = vunpack.c.h.bf16 %v3601_v51 }
  0x72   :  { %v413_v50 = vmul.f32 %v4346_v47, %v3997_v44  ;;  %v581_v9 = vpack.c.bf16 %v538_v43, %v537_v24  ;;  %v476_v25 = vadd.f32 %v412_v23, %v346_v1  ;;  %v414_v11 = vmul.f32 %v4348_v39, %v3997_v44  ;;  %6568 = vst [vmem:[#allocation22_spill] sm:$0xff] %v4370_v2 }
  0x73   :  { %v347_v10 = vadd.f32 %v283_v57, %v217_v42  ;;  %v348_v17 = vadd.f32 %v284_v16, %v218_v54  ;;  %6569 = vst [vmem:[#allocation23_spill] sm:$0xff] %v4372_v3  ;;  %v4374_v49 = vunpack.c.l.bf16 %v3602_v55  ;;  %v539_v53 = vmax.f32 %v475_v48, 0.0 }
  0x74   :  { %v540_v52 = vmax.f32 %v476_v25, 0.0  ;;  %v4379_v43 = vunpack.c.h.bf16 %v3602_v55  ;;  %v219_v24 = vmul.f32 %v4370_v2, %v3974_v34  ;;  %v220_v1 = vmul.f32 %v4372_v3, %v3974_v34 }
  0x75   :  { %6570 = vst [vmem:[#allocation24_spill] sm:$0xff] %v4374_v49  ;;  %v477_v47 = vadd.f32 %v413_v50, %v347_v10  ;;  %v478_v23 = vadd.f32 %v414_v11, %v348_v17  ;;  %v285_v42 = vmul.f32 %v4370_v2, %v3988_v40  ;;  %v286_v51 = vmul.f32 %v4372_v3, %v3988_v40 }
  0x76   :  { %6571 = vst [vmem:[#allocation25_spill] sm:$0xff] %v4379_v43  ;;  %v415_v48 = vmul.f32 %v4370_v2, %v3997_v44  ;;  %v4391_v54 = vunpack.c.l.bf16 %v3603_v0  ;;  %v416_v50 = vmul.f32 %v4372_v3, %v3997_v44  ;;  %v221_v25 = vmul.f32 %v4374_v49, %v3974_v34 }
  0x77   :  { %v541_v57 = vmax.f32 %v477_v47, 0.0  ;;  %v542_v55 = vmax.f32 %v478_v23, 0.0  ;;  %v349_v16 = vadd.f32 %v285_v42, %v219_v24  ;;  %v350_v10 = vadd.f32 %v286_v51, %v220_v1 }
  0x78   :  { %6572 = vst [vmem:[#allocation26_spill] sm:$0xff] %v4391_v54  ;;  %3719 = vmatmul.mubr.msk.bf16.gmra.mxu0 %vm609_vm0, %v580_v56  ;;  %v222_v47 = vmul.f32 %v4379_v43, %v3974_v34  ;;  %v287_v11 = vmul.f32 %v4374_v49, %v3988_v40  ;;  %v288_v17 = vmul.f32 %v4379_v43, %v3988_v40  ;;  %v3819_v56 = vld [vmem:[%s6426_s3 + $0x18] sm:$0xff]   ;;  %v4412_v2 = vunpack.c.h.bf16 %v3603_v0 }
  0x79   :  { %3722 = vmatprep.mubr.msk.bf16.mxu0 %vm609_vm0, %v581_v9  ;;  %v479_v23 = vadd.f32 %v415_v48, %v349_v16  ;;  %v417_v24 = vmul.f32 %v4374_v49, %v3997_v44  ;;  %v418_v42 = vmul.f32 %v4379_v43, %v3997_v44  ;;  %v480_v1 = vadd.f32 %v416_v50, %v350_v10  ;;  %v3604_v9 = vld [vmem:[%s6425_s2 + $0xd0] sm:$0xff]  }
  0x7a   :  { %v351_v51 = vadd.f32 %v287_v11, %v221_v25  ;;  %v352_v39 = vadd.f32 %v288_v17, %v222_v47  ;;  %6573 = vst [vmem:[#allocation27_spill] sm:$0xff] %v4412_v2  ;;  %v582_v48 = vpack.c.bf16 %v540_v52, %v539_v53  ;;  %v583_v16 = vpack.c.bf16 %v542_v55, %v541_v57 }
  0x7b   :  { %v223_v49 = vmul.f32 %v4391_v54, %v3974_v34  ;;  %v289_v43 = vmul.f32 %v4391_v54, %v3988_v40  ;;  %3746 = vmatprep.subr.bf16.mxu1 %v3819_v56  ;;  %v224_v50 = vmul.f32 %v4412_v2, %v3974_v34  ;;  %v419_v0 = vmul.f32 %v4391_v54, %v3997_v44 }
  0x7c   :  { %v481_v3 = vadd.f32 %v417_v24, %v351_v51  ;;  %v482_v38 = vadd.f32 %v418_v42, %v352_v39  ;;  %3747 = vmatpush3.bf16.msra.mxu1 %v3819_v56  ;;  %v290_v52 = vmul.f32 %v4412_v2, %v3988_v40  ;;  %v420_v57 = vmul.f32 %v4412_v2, %v3997_v44  ;;  %v3820_v39 = vld [vmem:[%s6426_s3 + $0x10] sm:$0xff]  }
  0x7d   :  { %v353_v53 = vadd.f32 %v289_v43, %v223_v49  ;;  %v4429_v55 = vunpack.c.l.bf16 %v3604_v9  ;;  %v543_v25 = vmax.f32 %v479_v23, 0.0  ;;  %v544_v10 = vmax.f32 %v480_v1, 0.0  ;;  %v3605_v43 = vld [vmem:[%s6425_s2 + $0xd8] sm:$0xff]   ;;  %v3606_v23 = vld [vmem:[%s6425_s2 + $0xe0] sm:$0xff]   ;;  %3748 = vmatprep.subr.bf16.mxu1 %v3820_v39 }
  0x7e   :  { %v545_v47 = vmax.f32 %v481_v3, 0.0  ;;  %v4434_v11 = vunpack.c.h.bf16 %v3604_v9  ;;  %v546_v17 = vmax.f32 %v482_v38, 0.0  ;;  %v354_v24 = vadd.f32 %v290_v52, %v224_v50 }
  0x7f   :  { %6574 = vst [vmem:[#allocation28_spill] sm:$0xff] %v4429_v55  ;;  %v225_v42 = vmul.f32 %v4429_v55, %v3974_v34  ;;  %v291_v49 = vmul.f32 %v4429_v55, %v3988_v40  ;;  %v483_v3 = vadd.f32 %v419_v0, %v353_v53  ;;  %v421_v1 = vmul.f32 %v4429_v55, %v3997_v44 }
  0x80   :  { %6575 = vst [vmem:[#allocation29_spill] sm:$0xff] %v4434_v11  ;;  %3723 = vmatmul.mubr.msk.bf16.gmra.mxu0 %vm609_vm0, %v582_v48  ;;  %v226_v38 = vmul.f32 %v4434_v11, %v3974_v34  ;;  %v292_v56 = vmul.f32 %v4434_v11, %v3988_v40  ;;  %v484_v51 = vadd.f32 %v420_v57, %v354_v24  ;;  %v4456_v48 = vunpack.c.l.bf16 %v3605_v43 }
  0x81   :  { %3726 = vmatprep.mubr.msk.bf16.mxu0 %vm609_vm0, %v583_v16  ;;  %v355_v9 = vadd.f32 %v291_v49, %v225_v42  ;;  %v422_v50 = vmul.f32 %v4434_v11, %v3997_v44  ;;  %3749 = vmatpush3.bf16.msra.mxu1 %v3820_v39  ;;  %v4458_v0 = vunpack.c.h.bf16 %v3605_v43  ;;  %v4460_v53 = vunpack.c.l.bf16 %v3606_v23  ;;  %v3607_v16 = vld [vmem:[%s6425_s2 + $0xe8] sm:$0xff]  }
  0x82   :  { %v356_v52 = vadd.f32 %v292_v56, %v226_v38  ;;  %6576 = vst [vmem:[#allocation30_spill] sm:$0xff] %v4456_v48  ;;  %v584_v54 = vpack.c.bf16 %v544_v10, %v543_v25  ;;  %v585_v2 = vpack.c.bf16 %v546_v17, %v545_v47  ;;  %v4462_v63 = vunpack.c.h.bf16 %v3606_v23 }
  0x83   :  { %6577 = vst [vmem:[#allocation31_spill] sm:$0xff] %v4460_v53  ;;  %v485_v60 = vadd.f32 %v421_v1, %v355_v9  ;;  %v227_v39 = vmul.f32 %v4456_v48, %v3974_v34  ;;  %v228_v24 = vmul.f32 %v4458_v0, %v3974_v34  ;;  %v293_v42 = vmul.f32 %v4456_v48, %v3988_v40 }
  0x84   :  { %6578 = vst [vmem:[#allocation32_spill] sm:$0xff] %v4462_v63  ;;  %v486_v57 = vadd.f32 %v422_v50, %v356_v52  ;;  %v547_v49 = vmax.f32 %v483_v3, 0.0  ;;  %v548_v25 = vmax.f32 %v484_v51, 0.0  ;;  %v294_v10 = vmul.f32 %v4458_v0, %v3988_v40 }
  0x85   :  { %v423_v47 = vmul.f32 %v4456_v48, %v3997_v44  ;;  %v357_v17 = vadd.f32 %v293_v42, %v227_v39  ;;  %v424_v43 = vmul.f32 %v4458_v0, %v3997_v44  ;;  %v229_v23 = vmul.f32 %v4460_v53, %v3974_v34  ;;  %v3608_v48 = vld [vmem:[%s6425_s2 + $0xf0] sm:$0xff]  }
  0x86   :  { %v4481_v38 = vunpack.c.l.bf16 %v3607_v16  ;;  %v358_v56 = vadd.f32 %v294_v10, %v228_v24  ;;  %v230_v3 = vmul.f32 %v4462_v63, %v3974_v34  ;;  %v295_v1 = vmul.f32 %v4460_v53, %v3988_v40 }
  0x87   :  { %v296_v51 = vmul.f32 %v4462_v63, %v3988_v40  ;;  %v549_v9 = vmax.f32 %v485_v60, 0.0  ;;  %v550_v50 = vmax.f32 %v486_v57, 0.0  ;;  %v425_v52 = vmul.f32 %v4460_v53, %v3997_v44 }
  0x88   :  { %6579 = vst [vmem:[#allocation33_spill] sm:$0xff] %v4481_v38  ;;  %3727 = vmatmul.mubr.msk.bf16.gmra.mxu0 %vm609_vm0, %v584_v54  ;;  %v426_v39 = vmul.f32 %v4462_v63, %v3997_v44  ;;  %v487_v24 = vadd.f32 %v423_v47, %v357_v17  ;;  %v359_v42 = vadd.f32 %v295_v1, %v229_v23  ;;  %v4495_v11 = vunpack.c.h.bf16 %v3607_v16 }
  0x89   :  { %3730 = vmatprep.mubr.msk.bf16.mxu0 %vm609_vm0, %v585_v2  ;;  %v360_v10 = vadd.f32 %v296_v51, %v230_v3  ;;  %v488_v54 = vadd.f32 %v424_v43, %v358_v56  ;;  %v231_v60 = vmul.f32 %v4481_v38, %v3974_v34  ;;  %v297_v57 = vmul.f32 %v4481_v38, %v3988_v40 }
  0x8a   :  { %6580 = vst [vmem:[#allocation34_spill] sm:$0xff] %v4495_v11  ;;  %v586_v53 = vpack.c.bf16 %v548_v25, %v547_v49  ;;  %v232_v2 = vmul.f32 %v4495_v11, %v3974_v34  ;;  %v489_v47 = vadd.f32 %v425_v52, %v359_v42  ;;  %v298_v16 = vmul.f32 %v4495_v11, %v3988_v40  ;;  %v3609_v52 = vld [vmem:[%s6425_s2 + $0xf8] sm:$0xff]   ;;  %s3152_s2 = sld [smem:[#allocation2 + $0x80]] }
  0x8b   :  { %v490_v17 = vadd.f32 %v426_v39, %v360_v10  ;;  %v4508_v23 = vunpack.c.l.bf16 %v3608_v48  ;;  %v587_v3 = vpack.c.bf16 %v550_v50, %v549_v9  ;;  %v551_v1 = vmax.f32 %v487_v24, 0.0 }
  0x8c   :  { %v427_v43 = vmul.f32 %v4481_v38, %v3997_v44  ;;  %v4512_v56 = vunpack.c.h.bf16 %v3608_v48  ;;  %v552_v51 = vmax.f32 %v488_v54, 0.0  ;;  %v361_v63 = vadd.f32 %v297_v57, %v231_v60 }
  0x8d   :  { %v233_v49 = vmul.f32 %v4508_v23, %v3974_v34  ;;  %v299_v25 = vmul.f32 %v4508_v23, %v3988_v40  ;;  %v362_v39 = vadd.f32 %v298_v16, %v232_v2  ;;  %v428_v9 = vmul.f32 %v4495_v11, %v3997_v44 }
  0x8e   :  { %v234_v48 = vmul.f32 %v4512_v56, %v3974_v34  ;;  %v300_v50 = vmul.f32 %v4512_v56, %v3988_v40  ;;  %v553_v24 = vmax.f32 %v489_v47, 0.0  ;;  %v554_v42 = vmax.f32 %v490_v17, 0.0 }
  0x8f   :  { %v363_v10 = vadd.f32 %v299_v25, %v233_v49  ;;  %v429_v54 = vmul.f32 %v4508_v23, %v3997_v44  ;;  %v430_v57 = vmul.f32 %v4512_v56, %v3997_v44  ;;  %v4533_v2 = vunpack.c.l.bf16 %v3609_v52 }
  0x90   :  { %3731 = vmatmul.mubr.msk.bf16.gmra.mxu0 %vm609_vm0, %v586_v53  ;;  %v364_v60 = vadd.f32 %v300_v50, %v234_v48  ;;  %v4535_v16 = vunpack.c.h.bf16 %v3609_v52  ;;  %v588_v38 = vpack.c.bf16 %v552_v51, %v551_v1  ;;  %v491_v11 = vadd.f32 %v427_v43, %v361_v63 }
  0x91   :  { %3734 = vmatprep.mubr.msk.bf16.mxu0 %vm609_vm0, %v587_v3  ;;  %v492_v55 = vadd.f32 %v428_v9, %v362_v39  ;;  %v235_v53 = vmul.f32 %v4533_v2, %v3974_v34  ;;  %v301_v17 = vmul.f32 %v4533_v2, %v3988_v40  ;;  %v589_v49 = vpack.c.bf16 %v554_v42, %v553_v24 }
  0x92   :  { %v236_v47 = vmul.f32 %v4535_v16, %v3974_v34  ;;  %v302_v3 = vmul.f32 %v4535_v16, %v3988_v40  ;;  %v493_v25 = vadd.f32 %v429_v54, %v363_v10  ;;  %v494_v48 = vadd.f32 %v430_v57, %v364_v60 }
  0x93   :  { %v555_v52 = vmax.f32 %v491_v11, 0.0  ;;  %v556_v50 = vmax.f32 %v492_v55, 0.0  ;;  %v365_v63 = vadd.f32 %v301_v17, %v235_v53  ;;  %v431_v43 = vmul.f32 %v4533_v2, %v3997_v44 }
  0x94   :  { %v366_v1 = vadd.f32 %v302_v3, %v236_v47  ;;  %v432_v34 = vmul.f32 %v4535_v16, %v3997_v44  ;;  %v557_v51 = vmax.f32 %v493_v25, 0.0  ;;  %v558_v39 = vmax.f32 %v494_v48, 0.0 }
  0x95   :  { %v590_v40 = vpack.c.bf16 %v556_v50, %v555_v52  ;;  %v495_v9 = vadd.f32 %v431_v43, %v365_v63  ;;  %v4554_v10 = vstv %s3152_s2  ;;  %v4556_v54 = vstv %s3153_s15 }
  0x96   :  { %v496_v24 = vadd.f32 %v432_v34, %v366_v1  ;;  %v591_v42 = vpack.c.bf16 %v558_v39, %v557_v51  ;;  %v1196_v60 = vmul.f32 %v3908_v8, %v4554_v10  ;;  %v1262_v57 = vmul.f32 %v3908_v8, %v4556_v54 }
  0x97   :  { %v559_v55 = vmax.f32 %v495_v9, 0.0  ;;  %v1193_v47 = vmul.f32 %v3900_v5, %v4554_v10  ;;  %v1259_v17 = vmul.f32 %v3900_v5, %v4556_v54  ;;  %v1261_v25 = vmul.f32 %v3906_v7, %v4556_v54 }
  0x98   :  { %3735 = vmatmul.mubr.msk.bf16.gmra.mxu0 %vm609_vm0, %v588_v38  ;;  %v560_v11 = vmax.f32 %v496_v24, 0.0  ;;  %v4574_v52 = vstv %s3154_s16  ;;  %v1194_v50 = vmul.f32 %v3902_v6, %v4554_v10  ;;  %v1260_v63 = vmul.f32 %v3902_v6, %v4556_v54 }
  0x99   :  { %3738 = vmatprep.mubr.msk.bf16.mxu0 %vm609_vm0, %v589_v49  ;;  %v1195_v49 = vmul.f32 %v3906_v7, %v4554_v10  ;;  %v1326_v1 = vadd.f32 %v1262_v57, %v1196_v60  ;;  %v1323_v51 = vadd.f32 %v1259_v17, %v1193_v47  ;;  %v1197_v60 = vmul.f32 %v3921_v12, %v4554_v10 }
  0x9a   :  { %v592_v38 = vpack.c.bf16 %v560_v11, %v559_v55  ;;  %v1200_v55 = vmul.f32 %v3927_v15, %v4554_v10  ;;  %v1266_v11 = vmul.f32 %v3927_v15, %v4556_v54  ;;  %v1263_v57 = vmul.f32 %v3921_v12, %v4556_v54 }
  0x9b   :  { %v1325_v7 = vadd.f32 %v1261_v25, %v1195_v49  ;;  %v1199_v49 = vmul.f32 %v3925_v14, %v4554_v10  ;;  %v1265_v15 = vmul.f32 %v3925_v14, %v4556_v54 }
  0xa0   :  { %3739 = vmatmul.mubr.msk.bf16.gmra.mxu0 %vm609_vm0, %v590_v40 }
  0xa1   :  { %3742 = vmatprep.mubr.msk.bf16.mxu0 %vm609_vm0, %v591_v42  ;;  %v1324_v42 = vadd.f32 %v1260_v63, %v1194_v50  ;;  %v1198_v50 = vmul.f32 %v3923_v13, %v4554_v10  ;;  %v1264_v63 = vmul.f32 %v3923_v13, %v4556_v54 }
  0xa8   :  { %3743 = vmatmul.mubr.msk.bf16.gmra.mxu0 %vm609_vm0, %v592_v38 }
  0xf0   :  { %v3684_v44 = vpop.f32.mrf.mxu0 }
  0xf1   :  { %v4566_v3 = vmul.f32 0.999995, %v3684_v44 }
  0xf2   :  { %v740_v53 = vpop.f32.mrf.mxu0 }
  0xf3   :  { %v4572_v48 = vmul.f32 0.999995, %v740_v53  ;;  %v1391_v39 = vmul.f32 %v4574_v52, %v4566_v3 }
  0xf4   :  { %v3685_v8 = vpop.f32.mrf.mxu0 }
  0xf5   :  { %v4580_v5 = vmul.f32 0.999995, %v3685_v8  ;;  %v1389_v43 = vmul.f32 %v4574_v52, %v4572_v48  ;;  %v1455_v47 = vadd.f32 %v1391_v39, %v1325_v7 }
  0xf6   :  { %v743_v34 = vpop.f32.mrf.mxu0 }
  0xf7   :  { %v1392_v40 = vmul.f32 %v4574_v52, %v4580_v5  ;;  %v4588_v9 = vmul.f32 0.999995, %v743_v34  ;;  %v1453_v53 = vadd.f32 %v1389_v43, %v1323_v51  ;;  %v1330_v34 = vadd.f32 %v1266_v11, %v1200_v55 }
  0xf8   :  { %v3688_v24 = vpop.f32.mrf.mxu0  ;;  %v1327_v51 = vadd.f32 %v1263_v57, %v1197_v60  ;;  %v1204_v57 = vmul.f32 %v3944_v22, %v4554_v10 }
  0xf9   :  { %6581 = vst [vmem:[#allocation35_spill] sm:$0xff] %v4588_v9  ;;  %v1456_v6 = vadd.f32 %v1392_v40, %v1326_v1  ;;  %v1390_v38 = vmul.f32 %v4574_v52, %v4588_v9  ;;  %v4600_v17 = vmul.f32 0.999995, %v3688_v24  ;;  %v1517_v14 = vmax.f32 %v1453_v53, 0.0 }
  0xfa   :  { %v756_v44 = vpop.f32.mrf.mxu0  ;;  %v1519_v24 = vmax.f32 %v1455_v47, 0.0  ;;  %v1270_v53 = vmul.f32 %v3944_v22, %v4556_v54  ;;  %v1269_v22 = vmul.f32 %v3942_v21, %v4556_v54 }
  0xfb   :  { %v4606_v25 = vmul.f32 0.999995, %v756_v44  ;;  %v1454_v12 = vadd.f32 %v1390_v38, %v1324_v42  ;;  %v1520_v1 = vmax.f32 %v1456_v6, 0.0  ;;  %v1329_v44 = vadd.f32 %v1265_v15, %v1199_v49 }
  0xfc   :  { %v3689_v8 = vpop.f32.mrf.mxu0  ;;  %v1395_v9 = vmul.f32 %v4574_v52, %v4600_v17  ;;  %v1328_v6 = vadd.f32 %v1264_v63, %v1198_v50  ;;  %v1267_v50 = vmul.f32 %v3938_v19, %v4556_v54 }
  0xfd   :  { %v4612_v43 = vmul.f32 0.999995, %v3689_v8  ;;  %v1393_v7 = vmul.f32 %v4574_v52, %v4606_v25  ;;  %v1518_v40 = vmax.f32 %v1454_v12, 0.0  ;;  %v1582_v60 = vpack.c.bf16 %v1520_v1, %v1519_v24 }
  0xfe   :  { %v759_v39 = vpop.f32.mrf.mxu0  ;;  %v1201_v8 = vmul.f32 %v3938_v19, %v4554_v10  ;;  %v1459_v63 = vadd.f32 %v1395_v9, %v1329_v44  ;;  %v1203_v1 = vmul.f32 %v3942_v21, %v4554_v10  ;;  %v1268_v19 = vmul.f32 %v3940_v20, %v4556_v54 }
  0xff   :  { %v1396_v13 = vmul.f32 %v4574_v52, %v4612_v43  ;;  %v4620_v42 = vmul.f32 0.999995, %v759_v39  ;;  %v1581_v55 = vpack.c.bf16 %v1518_v40, %v1517_v14  ;;  %v1457_v47 = vadd.f32 %v1393_v7, %v1327_v51 }
 0x100   :  { %v3692_v38 = vpop.f32.mrf.mxu0  ;;  %v1202_v39 = vmul.f32 %v3940_v20, %v4554_v10  ;;  %v1334_v40 = vadd.f32 %v1270_v53, %v1204_v57 }
 0x101   :  { %v1460_v11 = vadd.f32 %v1396_v13, %v1330_v34  ;;  %v1394_v49 = vmul.f32 %v4574_v52, %v4620_v42  ;;  %3750 = vmatprep.mubr.msk.bf16.mxu1 %vm609_vm0, %v1581_v55  ;;  %v4633_v12 = vmul.f32 0.999995, %v3692_v38  ;;  %v1521_v24 = vmax.f32 %v1457_v47, 0.0 }
 0x102   :  { %v772_v15 = vpop.f32.mrf.mxu0  ;;  %3751 = vmatmul.mubr.msk.bf16.vlgmr.msra.gmra.mxu1 %vm609_vm0, %v1582_v60  ;;  %v1331_v13 = vadd.f32 %v1267_v50, %v1201_v8  ;;  %v1523_v38 = vmax.f32 %v1459_v63, 0.0  ;;  %v1333_v55 = vadd.f32 %v1269_v22, %v1203_v1  ;;  %v1208_v8 = vmul.f32 %v3963_v29, %v4554_v10 }
 0x103   :  { %v1458_v34 = vadd.f32 %v1394_v49, %v1328_v6  ;;  %v4640_v51 = vmul.f32 0.999995, %v772_v15  ;;  %v1524_v9 = vmax.f32 %v1460_v11, 0.0  ;;  %v1399_v60 = vmul.f32 %v4574_v52, %v4633_v12 }
 0x104   :  { %v3693_v7 = vpop.f32.mrf.mxu0  ;;  %v1332_v11 = vadd.f32 %v1268_v19, %v1202_v39  ;;  %v1274_v50 = vmul.f32 %v3963_v29, %v4556_v54  ;;  %v1273_v29 = vmul.f32 %v3961_v28, %v4556_v54 }
 0x105   :  { %v4646_v14 = vmul.f32 0.999995, %v3693_v7  ;;  %v1522_v44 = vmax.f32 %v1458_v34, 0.0  ;;  %v1397_v21 = vmul.f32 %v4574_v52, %v4640_v51  ;;  %v1584_v47 = vpack.c.bf16 %v1524_v9, %v1523_v38 }
 0x106   :  { %v775_v6 = vpop.f32.mrf.mxu0  ;;  %v1205_v34 = vmul.f32 %v3957_v26, %v4554_v10  ;;  %v1271_v7 = vmul.f32 %v3957_v26, %v4556_v54  ;;  %v1463_v39 = vadd.f32 %v1399_v60, %v1333_v55  ;;  %v1207_v9 = vmul.f32 %v3961_v28, %v4554_v10 }
 0x107   :  { %v1400_v49 = vmul.f32 %v4574_v52, %v4646_v14  ;;  %v4654_v20 = vmul.f32 0.999995, %v775_v6  ;;  %v1583_v57 = vpack.c.bf16 %v1522_v44, %v1521_v24  ;;  %v1461_v63 = vadd.f32 %v1397_v21, %v1331_v13 }
 0x108   :  { %v3696_v15 = vpop.f32.mrf.mxu0  ;;  %v1206_v13 = vmul.f32 %v3959_v27, %v4554_v10  ;;  %v1272_v26 = vmul.f32 %v3959_v27, %v4556_v54  ;;  %v1338_v38 = vadd.f32 %v1274_v50, %v1208_v8 }
 0x109   :  { %v1464_v53 = vadd.f32 %v1400_v49, %v1334_v40  ;;  %v1398_v1 = vmul.f32 %v4574_v52, %v4654_v20  ;;  %3754 = vmatprep.mubr.msk.bf16.mxu1 %vm609_vm0, %v1583_v57  ;;  %v4667_v19 = vmul.f32 0.999995, %v3696_v15  ;;  %v1525_v55 = vmax.f32 %v1461_v63, 0.0 }
 0x10a   :  { %v788_v22 = vpop.f32.mrf.mxu0  ;;  %3755 = vmatmul.mubr.msk.bf16.gmra.mxu1 %vm609_vm0, %v1584_v47  ;;  %v1335_v49 = vadd.f32 %v1271_v7, %v1205_v34  ;;  %v1527_v15 = vmax.f32 %v1463_v39, 0.0  ;;  %v1337_v57 = vadd.f32 %v1273_v29, %v1207_v9  ;;  %v1212_v34 = vmul.f32 %v3971_v33, %v4554_v10 }
 0x10b   :  { %v1462_v40 = vadd.f32 %v1398_v1, %v1332_v11  ;;  %v4674_v24 = vmul.f32 0.999995, %v788_v22  ;;  %v1528_v21 = vmax.f32 %v1464_v53, 0.0  ;;  %v1403_v47 = vmul.f32 %v4574_v52, %v4667_v19 }
 0x10c   :  { %v3697_v44 = vpop.f32.mrf.mxu0  ;;  %v1336_v53 = vadd.f32 %v1272_v26, %v1206_v13  ;;  %v1278_v7 = vmul.f32 %v3971_v33, %v4556_v54  ;;  %v1277_v33 = vmul.f32 %v3969_v32, %v4556_v54 }
 0x10d   :  { %v4680_v6 = vmul.f32 0.999995, %v3697_v44  ;;  %v1526_v60 = vmax.f32 %v1462_v40, 0.0  ;;  %v1401_v28 = vmul.f32 %v4574_v52, %v4674_v24  ;;  %v1586_v63 = vpack.c.bf16 %v1528_v21, %v1527_v15 }
 0x10e   :  { %v791_v11 = vpop.f32.mrf.mxu0  ;;  %v1209_v40 = vmul.f32 %v3965_v30, %v4554_v10  ;;  %v1275_v44 = vmul.f32 %v3965_v30, %v4556_v54  ;;  %v1467_v13 = vadd.f32 %v1403_v47, %v1337_v57  ;;  %v1211_v21 = vmul.f32 %v3969_v32, %v4554_v10 }
 0x10f   :  { %v1404_v1 = vmul.f32 %v4574_v52, %v4680_v6  ;;  %v4688_v27 = vmul.f32 0.999995, %v791_v11  ;;  %v1585_v8 = vpack.c.bf16 %v1526_v60, %v1525_v55  ;;  %v1465_v39 = vadd.f32 %v1401_v28, %v1335_v49 }
 0x110   :  { %v3700_v22 = vpop.f32.mrf.mxu0  ;;  %v1210_v49 = vmul.f32 %v3967_v31, %v4554_v10  ;;  %v1276_v30 = vmul.f32 %v3967_v31, %v4556_v54  ;;  %v1342_v15 = vadd.f32 %v1278_v7, %v1212_v34 }
 0x111   :  { %v1468_v50 = vadd.f32 %v1404_v1, %v1338_v38  ;;  %v1402_v9 = vmul.f32 %v4574_v52, %v4688_v27  ;;  %3758 = vmatprep.mubr.msk.bf16.mxu1 %vm609_vm0, %v1585_v8  ;;  %v4701_v26 = vmul.f32 0.999995, %v3700_v22  ;;  %v1529_v57 = vmax.f32 %v1465_v39, 0.0 }
 0x112   :  { %v804_v29 = vpop.f32.mrf.mxu0  ;;  %3759 = vmatmul.mubr.msk.bf16.gmra.mxu1 %vm609_vm0, %v1586_v63  ;;  %v1339_v1 = vadd.f32 %v1275_v44, %v1209_v40  ;;  %v1531_v22 = vmax.f32 %v1467_v13, 0.0  ;;  %v1341_v8 = vadd.f32 %v1277_v33, %v1211_v21  ;;  %v1216_v40 = vmul.f32 %v4129_v62, %v4554_v10 }
 0x113   :  { %v1466_v38 = vadd.f32 %v1402_v9, %v1336_v53  ;;  %v4708_v55 = vmul.f32 0.999995, %v804_v29  ;;  %v1532_v28 = vmax.f32 %v1468_v50, 0.0  ;;  %v1407_v63 = vmul.f32 %v4574_v52, %v4701_v26 }
 0x114   :  { %v3701_v60 = vpop.f32.mrf.mxu0  ;;  %v1340_v50 = vadd.f32 %v1276_v30, %v1210_v49  ;;  %v1282_v44 = vmul.f32 %v4129_v62, %v4556_v54  ;;  %v1281_v62 = vmul.f32 %v3981_v37, %v4556_v54 }
 0x115   :  { %v4714_v11 = vmul.f32 0.999995, %v3701_v60  ;;  %v1530_v47 = vmax.f32 %v1466_v38, 0.0  ;;  %v1405_v32 = vmul.f32 %v4574_v52, %v4708_v55  ;;  %v1588_v39 = vpack.c.bf16 %v1532_v28, %v1531_v22 }
 0x116   :  { %v807_v53 = vpop.f32.mrf.mxu0  ;;  %v1213_v38 = vmul.f32 %v3976_v35, %v4554_v10  ;;  %v1279_v60 = vmul.f32 %v3976_v35, %v4556_v54  ;;  %v1471_v49 = vadd.f32 %v1407_v63, %v1341_v8  ;;  %v1215_v28 = vmul.f32 %v3981_v37, %v4554_v10 }
 0x117   :  { %v1408_v9 = vmul.f32 %v4574_v52, %v4714_v11  ;;  %v4722_v31 = vmul.f32 0.999995, %v807_v53  ;;  %v1587_v34 = vpack.c.bf16 %v1530_v47, %v1529_v57  ;;  %v1469_v13 = vadd.f32 %v1405_v32, %v1339_v1 }
 0x118   :  { %v3704_v29 = vpop.f32.mrf.mxu0  ;;  %v1214_v1 = vmul.f32 %v3978_v36, %v4554_v10  ;;  %v1280_v35 = vmul.f32 %v3978_v36, %v4556_v54  ;;  %v1346_v22 = vadd.f32 %v1282_v44, %v1216_v40 }
 0x119   :  { %v1472_v7 = vadd.f32 %v1408_v9, %v1342_v15  ;;  %v1406_v21 = vmul.f32 %v4574_v52, %v4722_v31  ;;  %3762 = vmatprep.mubr.msk.bf16.mxu1 %vm609_vm0, %v1587_v34  ;;  %v4735_v30 = vmul.f32 0.999995, %v3704_v29  ;;  %v1533_v8 = vmax.f32 %v1469_v13, 0.0 }
 0x11a   :  { %v820_v33 = vpop.f32.mrf.mxu0  ;;  %3763 = vmatmul.mubr.msk.bf16.gmra.mxu1 %vm609_vm0, %v1588_v39  ;;  %v1343_v9 = vadd.f32 %v1279_v60, %v1213_v38  ;;  %v1535_v29 = vmax.f32 %v1471_v49, 0.0  ;;  %v1345_v34 = vadd.f32 %v1281_v62, %v1215_v28  ;;  %v1220_v38 = vmul.f32 %v4172_v61, %v4554_v10 }
 0x11b   :  { %v1470_v15 = vadd.f32 %v1406_v21, %v1340_v50  ;;  %v4742_v57 = vmul.f32 0.999995, %v820_v33  ;;  %v1536_v32 = vmax.f32 %v1472_v7, 0.0  ;;  %v1411_v39 = vmul.f32 %v4574_v52, %v4735_v30 }
 0x11c   :  { %v3705_v47 = vpop.f32.mrf.mxu0  ;;  %v1344_v7 = vadd.f32 %v1280_v35, %v1214_v1  ;;  %v1286_v60 = vmul.f32 %v4172_v61, %v4556_v54  ;;  %v1285_v61 = vmul.f32 %v4155_v46, %v4556_v54 }
 0x11d   :  { %v4748_v53 = vmul.f32 0.999995, %v3705_v47  ;;  %v1534_v63 = vmax.f32 %v1470_v15, 0.0  ;;  %v1409_v37 = vmul.f32 %v4574_v52, %v4742_v57  ;;  %v1590_v13 = vpack.c.bf16 %v1536_v32, %v1535_v29 }
 0x11e   :  { %v823_v50 = vpop.f32.mrf.mxu0  ;;  %v1217_v15 = vmul.f32 %v4151_v41, %v4554_v10  ;;  %v1283_v47 = vmul.f32 %v4151_v41, %v4556_v54  ;;  %v1475_v1 = vadd.f32 %v1411_v39, %v1345_v34  ;;  %v1219_v32 = vmul.f32 %v4155_v46, %v4554_v10 }
 0x11f   :  { %v1412_v21 = vmul.f32 %v4574_v52, %v4748_v53  ;;  %v4756_v36 = vmul.f32 0.999995, %v823_v50  ;;  %v1589_v40 = vpack.c.bf16 %v1534_v63, %v1533_v8  ;;  %v1473_v49 = vadd.f32 %v1409_v37, %v1343_v9 }
 0x120   :  { %v3708_v33 = vpop.f32.mrf.mxu0  ;;  %v1218_v9 = vmul.f32 %v4153_v45, %v4554_v10  ;;  %v1284_v41 = vmul.f32 %v4153_v45, %v4556_v54  ;;  %v1350_v29 = vadd.f32 %v1286_v60, %v1220_v38 }
 0x121   :  { %v1476_v44 = vadd.f32 %v1412_v21, %v1346_v22  ;;  %v1410_v28 = vmul.f32 %v4574_v52, %v4756_v36  ;;  %3766 = vmatprep.mubr.msk.bf16.mxu1 %vm609_vm0, %v1589_v40  ;;  %v4769_v35 = vmul.f32 0.999995, %v3708_v33  ;;  %v1537_v34 = vmax.f32 %v1473_v49, 0.0 }
 0x122   :  { %v836_v62 = vpop.f32.mrf.mxu0  ;;  %3767 = vmatmul.mubr.msk.bf16.gmra.mxu1 %vm609_vm0, %v1590_v13  ;;  %v1347_v21 = vadd.f32 %v1283_v47, %v1217_v15  ;;  %v1539_v33 = vmax.f32 %v1475_v1, 0.0  ;;  %v1349_v40 = vadd.f32 %v1285_v61, %v1219_v32  ;;  %v1224_v15 = vmul.f32 %v4215_v59, %v4554_v10 }
 0x123   :  { %v1474_v22 = vadd.f32 %v1410_v28, %v1344_v7  ;;  %v4776_v8 = vmul.f32 0.999995, %v836_v62  ;;  %v1540_v37 = vmax.f32 %v1476_v44, 0.0  ;;  %v1415_v13 = vmul.f32 %v4574_v52, %v4769_v35 }
 0x124   :  { %v3709_v63 = vpop.f32.mrf.mxu0  ;;  %v1348_v44 = vadd.f32 %v1284_v41, %v1218_v9  ;;  %v1290_v47 = vmul.f32 %v4215_v59, %v4556_v54  ;;  %v1289_v59 = vmul.f32 %v4213_v58, %v4556_v54 }
 0x125   :  { %v4782_v50 = vmul.f32 0.999995, %v3709_v63  ;;  %v1538_v39 = vmax.f32 %v1474_v22, 0.0  ;;  %v1413_v46 = vmul.f32 %v4574_v52, %v4776_v8  ;;  %v1592_v49 = vpack.c.bf16 %v1540_v37, %v1539_v33 }
 0x126   :  { %v839_v7 = vpop.f32.mrf.mxu0  ;;  %v1221_v22 = vmul.f32 %v4180_v4, %v4554_v10  ;;  %v1287_v63 = vmul.f32 %v4180_v4, %v4556_v54  ;;  %v1479_v9 = vadd.f32 %v1415_v13, %v1349_v40  ;;  %v1223_v37 = vmul.f32 %v4213_v58, %v4554_v10 }
 0x127   :  { %v1416_v28 = vmul.f32 %v4574_v52, %v4782_v50  ;;  %v4790_v45 = vmul.f32 0.999995, %v839_v7  ;;  %v1591_v38 = vpack.c.bf16 %v1538_v39, %v1537_v34  ;;  %v1477_v1 = vadd.f32 %v1413_v46, %v1347_v21 }
 0x128   :  { %v3712_v62 = vpop.f32.mrf.mxu0  ;;  %v1222_v21 = vmul.f32 %v4190_v18, %v4554_v10  ;;  %v1288_v4 = vmul.f32 %v4190_v18, %v4556_v54  ;;  %v1354_v33 = vadd.f32 %v1290_v47, %v1224_v15 }
 0x129   :  { %v1480_v60 = vadd.f32 %v1416_v28, %v1350_v29  ;;  %v1414_v32 = vmul.f32 %v4574_v52, %v4790_v45  ;;  %3770 = vmatprep.mubr.msk.bf16.mxu1 %vm609_vm0, %v1591_v38  ;;  %v4803_v41 = vmul.f32 0.999995, %v3712_v62  ;;  %v1541_v40 = vmax.f32 %v1477_v1, 0.0 }
 0x12a   :  { %v852_v61 = vpop.f32.mrf.mxu0  ;;  %3771 = vmatmul.mubr.msk.bf16.gmra.mxu1 %vm609_vm0, %v1592_v49  ;;  %v1351_v28 = vadd.f32 %v1287_v63, %v1221_v22  ;;  %v1543_v62 = vmax.f32 %v1479_v9, 0.0  ;;  %v1353_v38 = vadd.f32 %v1289_v59, %v1223_v37  ;;  %v6585_v22 = vld [vmem:[#allocation11_spill] sm:$0xff] }
 0x12b   :  { %v1478_v29 = vadd.f32 %v1414_v32, %v1348_v44  ;;  %v4810_v34 = vmul.f32 0.999995, %v852_v61  ;;  %v1544_v46 = vmax.f32 %v1480_v60, 0.0  ;;  %v1419_v49 = vmul.f32 %v4574_v52, %v4803_v41 }
 0x12c   :  { %v3713_v39 = vpop.f32.mrf.mxu0  ;;  %v1352_v60 = vadd.f32 %v1288_v4, %v1222_v21  ;;  %v1228_v63 = vmul.f32 %v6585_v22, %v4554_v10  ;;  %v1294_v9 = vmul.f32 %v6585_v22, %v4556_v54 }
 0x12d   :  { %6582 = vst [vmem:[#allocation36_spill] sm:$0xff] %v4810_v34  ;;  %v4816_v7 = vmul.f32 0.999995, %v3713_v39  ;;  %v1542_v13 = vmax.f32 %v1478_v29, 0.0  ;;  %v1417_v58 = vmul.f32 %v4574_v52, %v4810_v34  ;;  %v1594_v1 = vpack.c.bf16 %v1544_v46, %v1543_v62  ;;  %v6586_v39 = vld [vmem:[#allocation8_spill] sm:$0xff] }
 0x12e   :  { %v855_v44 = vpop.f32.mrf.mxu0  ;;  %v1225_v21 = vmul.f32 %v6586_v39, %v4554_v10  ;;  %v1291_v4 = vmul.f32 %v6586_v39, %v4556_v54  ;;  %v1483_v46 = vadd.f32 %v1419_v49, %v1353_v38  ;;  %v1358_v22 = vadd.f32 %v1294_v9, %v1228_v63 }
 0x12f   :  { %6583 = vst [vmem:[#allocation37_spill] sm:$0xff] %v4816_v7  ;;  %v1420_v32 = vmul.f32 %v4574_v52, %v4816_v7  ;;  %v4824_v18 = vmul.f32 0.999995, %v855_v44  ;;  %v1593_v15 = vpack.c.bf16 %v1542_v13, %v1541_v40  ;;  %v1481_v37 = vadd.f32 %v1417_v58, %v1351_v28  ;;  %v6588_v40 = vld [vmem:[#allocation10_spill] sm:$0xff] }
 0x130   :  { %v3716_v61 = vpop.f32.mrf.mxu0  ;;  %v1227_v13 = vmul.f32 %v6588_v40, %v4554_v10  ;;  %v1293_v28 = vmul.f32 %v6588_v40, %v4556_v54  ;;  %v1355_v7 = vadd.f32 %v1291_v4, %v1225_v21  ;;  %v6593_v21 = vld [vmem:[#allocation15_spill] sm:$0xff] }
 0x131   :  { %6584 = vst [vmem:[#allocation38_spill] sm:$0xff] %v4824_v18  ;;  %v1484_v47 = vadd.f32 %v1420_v32, %v1354_v33  ;;  %v1418_v59 = vmul.f32 %v4574_v52, %v4824_v18  ;;  %3774 = vmatprep.mubr.msk.bf16.mxu1 %vm609_vm0, %v1593_v15  ;;  %v4837_v33 = vmul.f32 0.999995, %v3716_v61  ;;  %v6590_v32 = vld [vmem:[#allocation9_spill] sm:$0xff]  ;;  %v1545_v39 = vmax.f32 %v1481_v37, 0.0 }
 0x132   :  { %v868_v29 = vpop.f32.mrf.mxu0  ;;  %3775 = vmatmul.mubr.msk.bf16.gmra.mxu1 %vm609_vm0, %v1594_v1  ;;  %v1226_v15 = vmul.f32 %v6590_v32, %v4554_v10  ;;  %v1292_v38 = vmul.f32 %v6590_v32, %v4556_v54  ;;  %v1232_v4 = vmul.f32 %v6593_v21, %v4554_v10 }
 0x133   :  { %6587 = vst [vmem:[#allocation11_spill] sm:$0xff] %v4837_v33  ;;  %v1482_v58 = vadd.f32 %v1418_v59, %v1352_v60  ;;  %v4844_v44 = vmul.f32 0.999995, %v868_v29  ;;  %v1548_v49 = vmax.f32 %v1484_v47, 0.0  ;;  %v1547_v59 = vmax.f32 %v1483_v46, 0.0 }
 0x134   :  { %v3717_v62 = vpop.f32.mrf.mxu0  ;;  %v1357_v29 = vadd.f32 %v1293_v28, %v1227_v13  ;;  %v1423_v40 = vmul.f32 %v4574_v52, %v4837_v33  ;;  %v1356_v47 = vadd.f32 %v1292_v38, %v1226_v15  ;;  %v1298_v46 = vmul.f32 %v6593_v21, %v4556_v54 }
 0x135   :  { %6589 = vst [vmem:[#allocation8_spill] sm:$0xff] %v4844_v44  ;;  %v4850_v61 = vmul.f32 0.999995, %v3717_v62  ;;  %v1546_v18 = vmax.f32 %v1482_v58, 0.0  ;;  %v1421_v1 = vmul.f32 %v4574_v52, %v4844_v44  ;;  %v1596_v37 = vpack.c.bf16 %v1548_v49, %v1547_v59  ;;  %v6596_v49 = vld [vmem:[#allocation14_spill] sm:$0xff] }
 0x136   :  { %v871_v60 = vpop.f32.mrf.mxu0 }
 0x137   :  { %6591 = vst [vmem:[#allocation10_spill] sm:$0xff] %v4850_v61  ;;  %v1424_v34 = vmul.f32 %v4574_v52, %v4850_v61  ;;  %v4858_v32 = vmul.f32 0.999995, %v871_v60  ;;  %v1595_v63 = vpack.c.bf16 %v1546_v18, %v1545_v39  ;;  %v1485_v13 = vadd.f32 %v1421_v1, %v1355_v7  ;;  %v6594_v60 = vld [vmem:[#allocation12_spill] sm:$0xff] }
 0x138   :  { %v3720_v62 = vpop.f32.mrf.mxu0  ;;  %v1229_v15 = vmul.f32 %v6594_v60, %v4554_v10  ;;  %v1487_v18 = vadd.f32 %v1423_v40, %v1357_v29  ;;  %v1297_v7 = vmul.f32 %v6596_v49, %v4556_v54 }
 0x139   :  { %6592 = vst [vmem:[#allocation9_spill] sm:$0xff] %v4858_v32  ;;  %v1488_v9 = vadd.f32 %v1424_v34, %v1358_v22  ;;  %v1422_v28 = vmul.f32 %v4574_v52, %v4858_v32  ;;  %3778 = vmatprep.mubr.msk.bf16.mxu1 %vm609_vm0, %v1595_v63  ;;  %v1295_v34 = vmul.f32 %v6594_v60, %v4556_v54  ;;  %v4871_v38 = vmul.f32 0.999995, %v3720_v62  ;;  %v6598_v63 = vld [vmem:[#allocation13_spill] sm:$0xff] }
 0x13a   :  { %v884_v58 = vpop.f32.mrf.mxu0  ;;  %v1231_v22 = vmul.f32 %v6596_v49, %v4554_v10  ;;  %3779 = vmatmul.mubr.msk.bf16.gmra.mxu1 %vm609_vm0, %v1596_v37  ;;  %v1230_v21 = vmul.f32 %v6598_v63, %v4554_v10  ;;  %v1296_v29 = vmul.f32 %v6598_v63, %v4556_v54  ;;  %v1362_v60 = vadd.f32 %v1298_v46, %v1232_v4 }
 0x13b   :  { %6595 = vst [vmem:[#allocation15_spill] sm:$0xff] %v4871_v38  ;;  %v1486_v39 = vadd.f32 %v1422_v28, %v1356_v47  ;;  %v4878_v1 = vmul.f32 0.999995, %v884_v58  ;;  %v1552_v40 = vmax.f32 %v1488_v9, 0.0  ;;  %v1549_v32 = vmax.f32 %v1485_v13, 0.0 }
 0x13c   :  { %v3721_v59 = vpop.f32.mrf.mxu0  ;;  %v1359_v44 = vadd.f32 %v1295_v34, %v1229_v15  ;;  %v1551_v28 = vmax.f32 %v1487_v18, 0.0  ;;  %v1361_v58 = vadd.f32 %v1297_v7, %v1231_v22  ;;  %v1427_v49 = vmul.f32 %v4574_v52, %v4871_v38  ;;  %v6601_v15 = vld [vmem:[#allocation19_spill] sm:$0xff] }
 0x13d   :  { %6597 = vst [vmem:[#allocation12_spill] sm:$0xff] %v4878_v1  ;;  %v4884_v62 = vmul.f32 0.999995, %v3721_v59  ;;  %v1550_v61 = vmax.f32 %v1486_v39, 0.0  ;;  %v1425_v37 = vmul.f32 %v4574_v52, %v4878_v1  ;;  %v1360_v9 = vadd.f32 %v1296_v29, %v1230_v21  ;;  %v6604_v29 = vld [vmem:[#allocation18_spill] sm:$0xff] }
 0x13e   :  { %v887_v47 = vpop.f32.mrf.mxu0  ;;  %v1598_v13 = vpack.c.bf16 %v1552_v40, %v1551_v28  ;;  %v1236_v34 = vmul.f32 %v6601_v15, %v4554_v10  ;;  %v1302_v18 = vmul.f32 %v6601_v15, %v4556_v54  ;;  %v1235_v40 = vmul.f32 %v6604_v29, %v4554_v10 }
 0x13f   :  { %6599 = vst [vmem:[#allocation14_spill] sm:$0xff] %v4884_v62  ;;  %v1428_v33 = vmul.f32 %v4574_v52, %v4884_v62  ;;  %v4892_v63 = vmul.f32 0.999995, %v887_v47  ;;  %v1597_v4 = vpack.c.bf16 %v1550_v61, %v1549_v32  ;;  %v1489_v22 = vadd.f32 %v1425_v37, %v1359_v44  ;;  %v6602_v47 = vld [vmem:[#allocation16_spill] sm:$0xff] }
 0x140   :  { %v3724_v59 = vpop.f32.mrf.mxu0  ;;  %v1233_v21 = vmul.f32 %v6602_v47, %v4554_v10  ;;  %v1491_v61 = vadd.f32 %v1427_v49, %v1361_v58  ;;  %v1301_v44 = vmul.f32 %v6604_v29, %v4556_v54 }
 0x141   :  { %6600 = vst [vmem:[#allocation13_spill] sm:$0xff] %v4892_v63  ;;  %v1492_v46 = vadd.f32 %v1428_v33, %v1362_v60  ;;  %v1426_v7 = vmul.f32 %v4574_v52, %v4892_v63  ;;  %3782 = vmatprep.mubr.msk.bf16.mxu1 %vm609_vm0, %v1597_v4  ;;  %v1299_v33 = vmul.f32 %v6602_v47, %v4556_v54  ;;  %v4905_v32 = vmul.f32 0.999995, %v3724_v59  ;;  %v6606_v4 = vld [vmem:[#allocation17_spill] sm:$0xff] }
 0x142   :  { %v900_v39 = vpop.f32.mrf.mxu0  ;;  %3783 = vmatmul.mubr.msk.bf16.gmra.mxu1 %vm609_vm0, %v1598_v13  ;;  %v1234_v15 = vmul.f32 %v6606_v4, %v4554_v10  ;;  %v1300_v58 = vmul.f32 %v6606_v4, %v4556_v54  ;;  %v1366_v47 = vadd.f32 %v1302_v18, %v1236_v34  ;;  %v1553_v63 = vmax.f32 %v1489_v22, 0.0 }
 0x143   :  { %6603 = vst [vmem:[#allocation19_spill] sm:$0xff] %v4905_v32  ;;  %v1490_v60 = vadd.f32 %v1426_v7, %v1360_v9  ;;  %v4912_v37 = vmul.f32 0.999995, %v900_v39  ;;  %v1556_v49 = vmax.f32 %v1492_v46, 0.0  ;;  %v1363_v1 = vadd.f32 %v1299_v33, %v1233_v21  ;;  %v6609_v21 = vld [vmem:[#allocation23_spill] sm:$0xff] }
 0x144   :  { %v3725_v28 = vpop.f32.mrf.mxu0  ;;  %v1555_v7 = vmax.f32 %v1491_v61, 0.0  ;;  %v1365_v39 = vadd.f32 %v1301_v44, %v1235_v40  ;;  %v1431_v29 = vmul.f32 %v4574_v52, %v4905_v32  ;;  %v1364_v46 = vadd.f32 %v1300_v58, %v1234_v15  ;;  %v6612_v58 = vld [vmem:[#allocation22_spill] sm:$0xff] }
 0x145   :  { %6605 = vst [vmem:[#allocation16_spill] sm:$0xff] %v4912_v37  ;;  %v4918_v59 = vmul.f32 0.999995, %v3725_v28  ;;  %v1554_v62 = vmax.f32 %v1490_v60, 0.0  ;;  %v1429_v13 = vmul.f32 %v4574_v52, %v4912_v37  ;;  %v1240_v33 = vmul.f32 %v6609_v21, %v4554_v10 }
 0x146   :  { %v903_v9 = vpop.f32.mrf.mxu0  ;;  %v1600_v22 = vpack.c.bf16 %v1556_v49, %v1555_v7  ;;  %v1306_v61 = vmul.f32 %v6609_v21, %v4556_v54  ;;  %v1239_v49 = vmul.f32 %v6612_v58, %v4554_v10 }
 0x147   :  { %6607 = vst [vmem:[#allocation18_spill] sm:$0xff] %v4918_v59  ;;  %v1432_v38 = vmul.f32 %v4574_v52, %v4918_v59  ;;  %v4926_v4 = vmul.f32 0.999995, %v903_v9  ;;  %v1599_v34 = vpack.c.bf16 %v1554_v62, %v1553_v63  ;;  %v1493_v40 = vadd.f32 %v1429_v13, %v1363_v1  ;;  %v6610_v9 = vld [vmem:[#allocation20_spill] sm:$0xff] }
 0x148   :  { %v3728_v28 = vpop.f32.mrf.mxu0  ;;  %v1237_v15 = vmul.f32 %v6610_v9, %v4554_v10  ;;  %v1495_v62 = vadd.f32 %v1431_v29, %v1365_v39  ;;  %v1305_v1 = vmul.f32 %v6612_v58, %v4556_v54 }
 0x149   :  { %6608 = vst [vmem:[#allocation17_spill] sm:$0xff] %v4926_v4  ;;  %v1496_v18 = vadd.f32 %v1432_v38, %v1366_v47  ;;  %v1430_v44 = vmul.f32 %v4574_v52, %v4926_v4  ;;  %3786 = vmatprep.mubr.msk.bf16.mxu1 %vm609_vm0, %v1599_v34  ;;  %v1303_v38 = vmul.f32 %v6610_v9, %v4556_v54  ;;  %v4939_v63 = vmul.f32 0.999995, %v3728_v28  ;;  %v6614_v34 = vld [vmem:[#allocation21_spill] sm:$0xff] }
 0x14a   :  { %v916_v60 = vpop.f32.mrf.mxu0  ;;  %3787 = vmatmul.mubr.msk.bf16.gmra.mxu1 %vm609_vm0, %v1600_v22  ;;  %v1238_v21 = vmul.f32 %v6614_v34, %v4554_v10  ;;  %v1304_v39 = vmul.f32 %v6614_v34, %v4556_v54  ;;  %v1370_v9 = vadd.f32 %v1306_v61, %v1240_v33  ;;  %v1557_v4 = vmax.f32 %v1493_v40, 0.0 }
 0x14b   :  { %6611 = vst [vmem:[#allocation23_spill] sm:$0xff] %v4939_v63  ;;  %v1494_v47 = vadd.f32 %v1430_v44, %v1364_v46  ;;  %v4946_v13 = vmul.f32 0.999995, %v916_v60  ;;  %v1560_v29 = vmax.f32 %v1496_v18, 0.0  ;;  %v1367_v37 = vadd.f32 %v1303_v38, %v1237_v15  ;;  %v6617_v15 = vld [vmem:[#allocation27_spill] sm:$0xff] }
 0x14c   :  { %v3729_v7 = vpop.f32.mrf.mxu0  ;;  %v1559_v44 = vmax.f32 %v1495_v62, 0.0  ;;  %v1369_v60 = vadd.f32 %v1305_v1, %v1239_v49  ;;  %v1435_v58 = vmul.f32 %v4574_v52, %v4939_v63  ;;  %v1368_v18 = vadd.f32 %v1304_v39, %v1238_v21  ;;  %v6620_v39 = vld [vmem:[#allocation26_spill] sm:$0xff] }
 0x14d   :  { %6613 = vst [vmem:[#allocation20_spill] sm:$0xff] %v4946_v13  ;;  %v4952_v28 = vmul.f32 0.999995, %v3729_v7  ;;  %v1558_v59 = vmax.f32 %v1494_v47, 0.0  ;;  %v1433_v22 = vmul.f32 %v4574_v52, %v4946_v13  ;;  %v1244_v38 = vmul.f32 %v6617_v15, %v4554_v10 }
 0x14e   :  { %v919_v46 = vpop.f32.mrf.mxu0  ;;  %v1602_v40 = vpack.c.bf16 %v1560_v29, %v1559_v44  ;;  %v1310_v62 = vmul.f32 %v6617_v15, %v4556_v54  ;;  %v1243_v29 = vmul.f32 %v6620_v39, %v4554_v10 }
 0x14f   :  { %6615 = vst [vmem:[#allocation22_spill] sm:$0xff] %v4952_v28  ;;  %v1436_v32 = vmul.f32 %v4574_v52, %v4952_v28  ;;  %v4960_v34 = vmul.f32 0.999995, %v919_v46  ;;  %v1601_v33 = vpack.c.bf16 %v1558_v59, %v1557_v4  ;;  %v1497_v49 = vadd.f32 %v1433_v22, %v1367_v37  ;;  %v6618_v46 = vld [vmem:[#allocation24_spill] sm:$0xff] }
 0x150   :  { %v3732_v7 = vpop.f32.mrf.mxu0  ;;  %v1241_v21 = vmul.f32 %v6618_v46, %v4554_v10  ;;  %v1499_v59 = vadd.f32 %v1435_v58, %v1369_v60  ;;  %v1309_v37 = vmul.f32 %v6620_v39, %v4556_v54 }
 0x151   :  { %6616 = vst [vmem:[#allocation21_spill] sm:$0xff] %v4960_v34  ;;  %v1500_v61 = vadd.f32 %v1436_v32, %v1370_v9  ;;  %v1434_v1 = vmul.f32 %v4574_v52, %v4960_v34  ;;  %3790 = vmatprep.mubr.msk.bf16.mxu1 %vm609_vm0, %v1601_v33  ;;  %v1307_v32 = vmul.f32 %v6618_v46, %v4556_v54  ;;  %v4973_v4 = vmul.f32 0.999995, %v3732_v7  ;;  %v6622_v33 = vld [vmem:[#allocation25_spill] sm:$0xff] }
 0x152   :  { %v932_v47 = vpop.f32.mrf.mxu0  ;;  %3791 = vmatmul.mubr.msk.bf16.gmra.mxu1 %vm609_vm0, %v1602_v40  ;;  %v1242_v15 = vmul.f32 %v6622_v33, %v4554_v10  ;;  %v1308_v60 = vmul.f32 %v6622_v33, %v4556_v54  ;;  %v1374_v46 = vadd.f32 %v1310_v62, %v1244_v38  ;;  %v1561_v34 = vmax.f32 %v1497_v49, 0.0 }
 0x153   :  { %6619 = vst [vmem:[#allocation27_spill] sm:$0xff] %v4973_v4  ;;  %v1498_v9 = vadd.f32 %v1434_v1, %v1368_v18  ;;  %v4980_v22 = vmul.f32 0.999995, %v932_v47  ;;  %v1564_v58 = vmax.f32 %v1500_v61, 0.0  ;;  %v1371_v13 = vadd.f32 %v1307_v32, %v1241_v21 }
 0x154   :  { %v3733_v44 = vpop.f32.mrf.mxu0  ;;  %v1563_v1 = vmax.f32 %v1499_v59, 0.0  ;;  %v1373_v47 = vadd.f32 %v1309_v37, %v1243_v29  ;;  %v1439_v39 = vmul.f32 %v4574_v52, %v4973_v4  ;;  %v1372_v61 = vadd.f32 %v1308_v60, %v1242_v15  ;;  %v6627_v60 = vld [vmem:[#allocation30_spill] sm:$0xff] }
 0x155   :  { %6621 = vst [vmem:[#allocation24_spill] sm:$0xff] %v4980_v22  ;;  %v4986_v7 = vmul.f32 0.999995, %v3733_v44  ;;  %v1562_v28 = vmax.f32 %v1498_v9, 0.0  ;;  %v1437_v40 = vmul.f32 %v4574_v52, %v4980_v22  ;;  %v1248_v21 = vmul.f32 %v4458_v0, %v4554_v10  ;;  %v6625_v9 = vld [vmem:[#allocation28_spill] sm:$0xff] }
 0x156   :  { %v935_v18 = vpop.f32.mrf.mxu0  ;;  %v1604_v49 = vpack.c.bf16 %v1564_v58, %v1563_v1  ;;  %v1314_v32 = vmul.f32 %v4458_v0, %v4556_v54  ;;  %v1245_v15 = vmul.f32 %v6625_v9, %v4554_v10  ;;  %v1247_v58 = vmul.f32 %v6627_v60, %v4554_v10 }
 0x157   :  { %6623 = vst [vmem:[#allocation26_spill] sm:$0xff] %v4986_v7  ;;  %v1440_v63 = vmul.f32 %v4574_v52, %v4986_v7  ;;  %v4994_v33 = vmul.f32 0.999995, %v935_v18  ;;  %v1603_v38 = vpack.c.bf16 %v1562_v28, %v1561_v34  ;;  %v1501_v59 = vadd.f32 %v1437_v40, %v1371_v13  ;;  %v6629_v18 = vld [vmem:[#allocation29_spill] sm:$0xff] }
 0x158   :  { %v3736_v44 = vpop.f32.mrf.mxu0  ;;  %v1503_v28 = vadd.f32 %v1439_v39, %v1373_v47  ;;  %v1313_v0 = vmul.f32 %v6627_v60, %v4556_v54  ;;  %v1246_v1 = vmul.f32 %v6629_v18, %v4554_v10  ;;  %v1312_v47 = vmul.f32 %v6629_v18, %v4556_v54 }
 0x159   :  { %6624 = vst [vmem:[#allocation25_spill] sm:$0xff] %v4994_v33  ;;  %v1504_v62 = vadd.f32 %v1440_v63, %v1374_v46  ;;  %v1438_v29 = vmul.f32 %v4574_v52, %v4994_v33  ;;  %3794 = vmatprep.mubr.msk.bf16.mxu1 %vm609_vm0, %v1603_v38  ;;  %v1311_v63 = vmul.f32 %v6625_v9, %v4556_v54  ;;  %v5007_v34 = vmul.f32 0.999995, %v3736_v44 }
 0x15a   :  { %v948_v37 = vpop.f32.mrf.mxu0  ;;  %3795 = vmatmul.mubr.msk.bf16.gmra.mxu1 %vm609_vm0, %v1604_v49  ;;  %v1378_v38 = vadd.f32 %v1314_v32, %v1248_v21  ;;  %v1565_v9 = vmax.f32 %v1501_v59, 0.0 }
 0x15b   :  { %6626 = vst [vmem:[#allocation28_spill] sm:$0xff] %v5007_v34  ;;  %v1502_v13 = vadd.f32 %v1438_v29, %v1372_v61  ;;  %v5014_v46 = vmul.f32 0.999995, %v948_v37  ;;  %v1568_v39 = vmax.f32 %v1504_v62, 0.0  ;;  %v1375_v7 = vadd.f32 %v1311_v63, %v1245_v15  ;;  %v6632_v15 = vld [vmem:[#allocation34_spill] sm:$0xff] }
 0x15c   :  { %v3737_v40 = vpop.f32.mrf.mxu0  ;;  %v1567_v29 = vmax.f32 %v1503_v28, 0.0  ;;  %v1377_v37 = vadd.f32 %v1313_v0, %v1247_v58  ;;  %v1443_v60 = vmul.f32 %v4574_v52, %v5007_v34  ;;  %v1376_v62 = vadd.f32 %v1312_v47, %v1246_v1 }
 0x15d   :  { %6628 = vst [vmem:[#allocation30_spill] sm:$0xff] %v5014_v46  ;;  %v5020_v44 = vmul.f32 0.999995, %v3737_v40  ;;  %v1566_v33 = vmax.f32 %v1502_v13, 0.0  ;;  %v1441_v49 = vmul.f32 %v4574_v52, %v5014_v46  ;;  %v1252_v63 = vmul.f32 %v6632_v15, %v4554_v10 }
 0x15e   :  { %v951_v61 = vpop.f32.mrf.mxu0  ;;  %v1606_v59 = vpack.c.bf16 %v1568_v39, %v1567_v29  ;;  %v1318_v28 = vmul.f32 %v6632_v15, %v4556_v54  ;;  %v6635_v39 = vld [vmem:[#allocation33_spill] sm:$0xff] }
 0x15f   :  { %6630 = vst [vmem:[#allocation29_spill] sm:$0xff] %v5020_v44  ;;  %v1444_v22 = vmul.f32 %v4574_v52, %v5020_v44  ;;  %v5028_v18 = vmul.f32 0.999995, %v951_v61  ;;  %v1605_v21 = vpack.c.bf16 %v1566_v33, %v1565_v9  ;;  %v1505_v58 = vadd.f32 %v1441_v49, %v1375_v7  ;;  %v6633_v61 = vld [vmem:[#allocation31_spill] sm:$0xff] }
 0x160   :  { %v3740_v40 = vpop.f32.mrf.mxu0  ;;  %v1249_v1 = vmul.f32 %v6633_v61, %v4554_v10  ;;  %v1507_v33 = vadd.f32 %v1443_v60, %v1377_v37  ;;  %v1317_v7 = vmul.f32 %v6635_v39, %v4556_v54 }
 0x161   :  { %6631 = vst [vmem:[#allocation39_spill] sm:$0xff] %v5028_v18  ;;  %v1508_v32 = vadd.f32 %v1444_v22, %v1378_v38  ;;  %v1442_v0 = vmul.f32 %v4574_v52, %v5028_v18  ;;  %3798 = vmatprep.mubr.msk.bf16.mxu1 %vm609_vm0, %v1605_v21  ;;  %v1315_v22 = vmul.f32 %v6633_v61, %v4556_v54  ;;  %v5041_v47 = vmul.f32 0.999995, %v3740_v40  ;;  %v6637_v21 = vld [vmem:[#allocation32_spill] sm:$0xff] }
 0x162   :  { %v964_v13 = vpop.f32.mrf.mxu0  ;;  %v1251_v38 = vmul.f32 %v6635_v39, %v4554_v10  ;;  %3799 = vmatmul.mubr.msk.bf16.gmra.mxu1 %vm609_vm0, %v1606_v59  ;;  %v1250_v15 = vmul.f32 %v6637_v21, %v4554_v10  ;;  %v1316_v37 = vmul.f32 %v6637_v21, %v4556_v54  ;;  %v1382_v61 = vadd.f32 %v1318_v28, %v1252_v63 }
 0x163   :  { %6634 = vst [vmem:[#allocation34_spill] sm:$0xff] %v5041_v47  ;;  %v1506_v9 = vadd.f32 %v1442_v0, %v1376_v62  ;;  %v5048_v49 = vmul.f32 0.999995, %v964_v13  ;;  %v1572_v60 = vmax.f32 %v1508_v32, 0.0  ;;  %v1569_v18 = vmax.f32 %v1505_v58, 0.0 }
 0x164   :  { %v3741_v29 = vpop.f32.mrf.mxu0  ;;  %v1379_v46 = vadd.f32 %v1315_v22, %v1249_v1  ;;  %v1571_v0 = vmax.f32 %v1507_v33, 0.0  ;;  %v1381_v13 = vadd.f32 %v1317_v7, %v1251_v38  ;;  %v1447_v39 = vmul.f32 %v4574_v52, %v5041_v47 }
 0x165   :  { %6636 = vst [vmem:[#allocation31_spill] sm:$0xff] %v5048_v49  ;;  %v5054_v40 = vmul.f32 0.999995, %v3741_v29  ;;  %v1570_v44 = vmax.f32 %v1506_v9, 0.0  ;;  %v1445_v59 = vmul.f32 %v4574_v52, %v5048_v49  ;;  %v1380_v32 = vadd.f32 %v1316_v37, %v1250_v15 }
 0x166   :  { %v967_v62 = vpop.f32.mrf.mxu0  ;;  %v1608_v58 = vpack.c.bf16 %v1572_v60, %v1571_v0  ;;  %v1256_v1 = vmul.f32 %v4535_v16, %v4554_v10  ;;  %v1322_v22 = vmul.f32 %v4535_v16, %v4556_v54  ;;  %v1253_v9 = vmul.f32 %v4508_v23, %v4554_v10 }
 0x167   :  { %6638 = vst [vmem:[#allocation33_spill] sm:$0xff] %v5054_v40  ;;  %v1448_v34 = vmul.f32 %v4574_v52, %v5054_v40  ;;  %v5062_v21 = vmul.f32 0.999995, %v967_v62  ;;  %v1607_v63 = vpack.c.bf16 %v1570_v44, %v1569_v18  ;;  %v1509_v33 = vadd.f32 %v1445_v59, %v1379_v46 }
 0x168   :  { %v3744_v29 = vpop.f32.mrf.mxu0  ;;  %v1511_v44 = vadd.f32 %v1447_v39, %v1381_v13  ;;  %v1255_v15 = vmul.f32 %v4533_v2, %v4554_v10  ;;  %v1321_v16 = vmul.f32 %v4533_v2, %v4556_v54  ;;  %v1386_v0 = vadd.f32 %v1322_v22, %v1256_v1 }
 0x169   :  { %6639 = vst [vmem:[#allocation32_spill] sm:$0xff] %v5062_v21  ;;  %v1512_v28 = vadd.f32 %v1448_v34, %v1382_v61  ;;  %v1446_v38 = vmul.f32 %v4574_v52, %v5062_v21  ;;  %3802 = vmatprep.mubr.msk.bf16.mxu1 %vm609_vm0, %v1607_v63  ;;  %v1319_v34 = vmul.f32 %v4508_v23, %v4556_v54  ;;  %v5075_v18 = vmul.f32 0.999995, %v3744_v29 }
 0x16a   :  { %v980_v7 = vpop.f32.mrf.mxu0  ;;  %3803 = vmatmul.mubr.msk.bf16.gmra.mxu1 %vm609_vm0, %v1608_v58  ;;  %v1254_v61 = vmul.f32 %v4512_v56, %v4554_v10  ;;  %v1320_v23 = vmul.f32 %v4512_v56, %v4556_v54  ;;  %v1573_v13 = vmax.f32 %v1509_v33, 0.0  ;;  %v1575_v63 = vmax.f32 %v1511_v44, 0.0 }
 0x16b   :  { %6640 = vst [vmem:[#allocation40_spill] sm:$0xff] %v5075_v18  ;;  %v1510_v46 = vadd.f32 %v1446_v38, %v1380_v32  ;;  %v5082_v37 = vmul.f32 0.999995, %v980_v7  ;;  %v1576_v59 = vmax.f32 %v1512_v28, 0.0  ;;  %v1383_v29 = vadd.f32 %v1319_v34, %v1253_v9 }
 0x16c   :  { %v3745_v60 = vpop.f32.mrf.mxu0  ;;  %v1385_v58 = vadd.f32 %v1321_v16, %v1255_v15  ;;  %v1451_v38 = vmul.f32 %v4574_v52, %v5075_v18  ;;  %v1384_v54 = vadd.f32 %v1320_v23, %v1254_v61  ;;  %v5104_v61 = vstv %s1059_s17 }
 0x16d   :  { %6641 = vst [vmem:[#allocation41_spill] sm:$0xff] %v5082_v37  ;;  %v5088_v62 = vmul.f32 0.999995, %v3745_v60  ;;  %v1574_v39 = vmax.f32 %v1510_v46, 0.0  ;;  %v1449_v2 = vmul.f32 %v4574_v52, %v5082_v37  ;;  %v1610_v22 = vpack.c.bf16 %v1576_v59, %v1575_v63 }
 0x16e   :  { %v983_v32 = vpop.f32.mrf.mxu0  ;;  %v1515_v9 = vadd.f32 %v1451_v38, %v1385_v58  ;;  %v5110_v23 = vmul.f32 %v5104_v61, %v4566_v3  ;;  %v5114_v59 = vmul.f32 %v5104_v61, %v4572_v48  ;;  %v5142_v58 = vmul.f32 %v5104_v61, %v4600_v17 }
 0x16f   :  { %6642 = vst [vmem:[#allocation42_spill] sm:$0xff] %v5088_v62  ;;  %v1452_v10 = vmul.f32 %v4574_v52, %v5088_v62  ;;  %v5096_v56 = vmul.f32 0.999995, %v983_v32  ;;  %v1609_v28 = vpack.c.bf16 %v1574_v39, %v1573_v13  ;;  %v1513_v33 = vadd.f32 %v1449_v2, %v1383_v29  ;;  %v6644_v29 = vld [vmem:[#allocation35_spill] sm:$0xff] }
 0x170   :  { %v1579_v46 = vmax.f32 %v1515_v9, 0.0  ;;  %v5122_v13 = vmul.f32 %v5104_v61, %v4580_v5  ;;  %v5130_v2 = vmul.f32 %v5104_v61, %v6644_v29  ;;  %v5150_v38 = vmul.f32 %v5104_v61, %v4606_v25 }
 0x171   :  { %6643 = vst [vmem:[#allocation43_spill] sm:$0xff] %v5096_v56  ;;  %v1516_v1 = vadd.f32 %v1452_v10, %v1386_v0  ;;  %v1450_v7 = vmul.f32 %v4574_v52, %v5096_v56  ;;  %3806 = vmatprep.mubr.msk.bf16.mxu1 %vm609_vm0, %v1609_v28  ;;  %v1577_v15 = vmax.f32 %v1513_v33, 0.0  ;;  %v5106_v52 = vstv %s3151_s18 }
 0x172   :  { %3807 = vmatmul.mubr.msk.bf16.gmra.mxu1 %vm609_vm0, %v1610_v22  ;;  %v5118_v0 = vmul.f32 %v5106_v52, %v4566_v3  ;;  %v5126_v39 = vmul.f32 %v5106_v52, %v4580_v5  ;;  %v5134_v63 = vmul.f32 %v5106_v52, %v4572_v48  ;;  %v5138_v3 = vmul.f32 %v5106_v52, %v6644_v29 }
 0x173   :  { %v1514_v34 = vadd.f32 %v1450_v7, %v1384_v54  ;;  %v1580_v44 = vmax.f32 %v1516_v1, 0.0  ;;  %v5146_v5 = vmul.f32 %v5106_v52, %v4600_v17  ;;  %v5154_v48 = vmul.f32 %v5106_v52, %v4606_v25 }
 0x174   :  { %v5158_v10 = vmul.f32 %v5104_v61, %v4612_v43  ;;  %v5162_v54 = vmul.f32 %v5106_v52, %v4612_v43  ;;  %v5166_v17 = vmul.f32 %v5104_v61, %v4620_v42  ;;  %v5172_v28 = vmul.f32 %v5106_v52, %v4620_v42 }
 0x175   :  { %v1578_v16 = vmax.f32 %v1514_v34, 0.0  ;;  %v1612_v32 = vpack.c.bf16 %v1580_v44, %v1579_v46  ;;  %v5176_v25 = vmul.f32 %v5104_v61, %v4633_v12  ;;  %v5180_v1 = vmul.f32 %v5106_v52, %v4633_v12 }
 0x176   :  { %v5184_v43 = vmul.f32 %v5104_v61, %v4640_v51  ;;  %v5190_v22 = vmul.f32 %v5106_v52, %v4640_v51  ;;  %v5194_v42 = vmul.f32 %v5104_v61, %v4646_v14  ;;  %v5198_v33 = vmul.f32 %v5106_v52, %v4646_v14 }
 0x177   :  { %v1611_v60 = vpack.c.bf16 %v1578_v16, %v1577_v15  ;;  %v5202_v12 = vmul.f32 %v5104_v61, %v4654_v20  ;;  %v5206_v7 = vmul.f32 %v5106_v52, %v4654_v20  ;;  %v5210_v51 = vmul.f32 %v5104_v61, %v4667_v19 }
 0x178   :  { %v5214_v9 = vmul.f32 %v5106_v52, %v4667_v19  ;;  %v5218_v14 = vmul.f32 %v5104_v61, %v4674_v24  ;;  %v5222_v34 = vmul.f32 %v5106_v52, %v4674_v24  ;;  %v5226_v20 = vmul.f32 %v5104_v61, %v4680_v6 }
 0x179   :  { %3810 = vmatprep.mubr.msk.bf16.mxu1 %vm609_vm0, %v1611_v60  ;;  %v5230_v44 = vmul.f32 %v5106_v52, %v4680_v6  ;;  %v5234_v19 = vmul.f32 %v5104_v61, %v4688_v27  ;;  %v5238_v15 = vmul.f32 %v5106_v52, %v4688_v27  ;;  %v5242_v24 = vmul.f32 %v5104_v61, %v4701_v26 }
 0x17a   :  { %3811 = vmatmul.mubr.msk.bf16.gmra.mxu1 %vm609_vm0, %v1612_v32  ;;  %v5246_v16 = vmul.f32 %v5106_v52, %v4701_v26  ;;  %v5250_v6 = vmul.f32 %v5104_v61, %v4708_v55  ;;  %v5254_v46 = vmul.f32 %v5106_v52, %v4708_v55  ;;  %v5258_v27 = vmul.f32 %v5104_v61, %v4714_v11 }
 0x17b   :  { %v5262_v60 = vmul.f32 %v5106_v52, %v4714_v11  ;;  %v5266_v26 = vmul.f32 %v5104_v61, %v4722_v31  ;;  %v5270_v32 = vmul.f32 %v5106_v52, %v4722_v31  ;;  %v5274_v55 = vmul.f32 %v5104_v61, %v4735_v30 }
 0x17c   :  { %v5278_v29 = vmul.f32 %v5106_v52, %v4735_v30  ;;  %v5282_v11 = vmul.f32 %v5104_v61, %v4742_v57  ;;  %v5286_v56 = vmul.f32 %v5106_v52, %v4742_v57  ;;  %v5290_v31 = vmul.f32 %v5104_v61, %v4748_v53 }
 0x17d   :  { %v5294_v62 = vmul.f32 %v5106_v52, %v4748_v53  ;;  %v5298_v30 = vmul.f32 %v5104_v61, %v4756_v36  ;;  %v5302_v37 = vmul.f32 %v5106_v52, %v4756_v36  ;;  %v5306_v57 = vmul.f32 %v5104_v61, %v4769_v35 }
 0x17e   :  { %6645 = vst [vmem:[#allocation35_spill] sm:$0xff] %v5286_v56  ;;  %6646 = vst [vmem:[#allocation44_spill] sm:$0xff] %v5290_v31  ;;  %v5309_v21 = vstv %s5168_s19  ;;  %v5312_v40 = vstv %s5186_s20  ;;  %v5316_v53 = vmul.f32 %v5106_v52, %v4769_v35  ;;  %v5320_v49 = vmul.f32 %v5104_v61, %v4776_v8 }
 0x17f   :  { %6647 = vst [vmem:[#allocation45_spill] sm:$0xff] %v5294_v62  ;;  %6648 = vst [vmem:[#allocation46_spill] sm:$0xff] %v5298_v30  ;;  %v5324_v36 = vmul.f32 %v5106_v52, %v4776_v8  ;;  %v5328_v4 = vmul.f32 %v5104_v61, %v4782_v50  ;;  %v5336_v35 = vmul.f32 %v5104_v61, %v4790_v45 }
 0x180   :  { %6649 = vst [vmem:[#allocation47_spill] sm:$0xff] %v5302_v37  ;;  %6650 = vst [vmem:[#allocation48_spill] sm:$0xff] %v5306_v57  ;;  %v5332_v57 = vmul.f32 %v5106_v52, %v4782_v50  ;;  %v5344_v8 = vmul.f32 %v5104_v61, %v4803_v41  ;;  %v5350_v50 = vmul.f32 %v5106_v52, %v4803_v41 }
 0x181   :  { %6651 = vst [vmem:[#allocation49_spill] sm:$0xff] %v5316_v53  ;;  %6652 = vst [vmem:[#allocation50_spill] sm:$0xff] %v5320_v49  ;;  %v5340_v49 = vmul.f32 %v5106_v52, %v4790_v45 }
 0x182   :  { %6653 = vst [vmem:[#allocation51_spill] sm:$0xff] %v5324_v36  ;;  %6654 = vst [vmem:[#allocation52_spill] sm:$0xff] %v5328_v4 }
 0x183   :  { %6655 = vst [vmem:[#allocation53_spill] sm:$0xff] %v5332_v57  ;;  %6656 = vst [vmem:[#allocation54_spill] sm:$0xff] %v5336_v35  ;;  %v6660_v57 = vld [vmem:[#allocation36_spill] sm:$0xff] }
 0x184   :  { %6657 = vst [vmem:[#allocation55_spill] sm:$0xff] %v5340_v49  ;;  %6658 = vst [vmem:[#allocation56_spill] sm:$0xff] %v5344_v8  ;;  %v5354_v35 = vmul.f32 %v5104_v61, %v6660_v57  ;;  %v5358_v45 = vmul.f32 %v5106_v52, %v6660_v57  ;;  %v6663_v49 = vld [vmem:[#allocation37_spill] sm:$0xff] }
 0x185   :  { %6659 = vst [vmem:[#allocation57_spill] sm:$0xff] %v5350_v50  ;;  %v5362_v8 = vmul.f32 %v5104_v61, %v6663_v49  ;;  %v5369_v30 = vmul.f32 %v5106_v52, %v6663_v49 }
 0x186   :  { %6661 = vst [vmem:[#allocation36_spill] sm:$0xff] %v5354_v35  ;;  %6662 = vst [vmem:[#allocation58_spill] sm:$0xff] %v5358_v45  ;;  %v6666_v35 = vld [vmem:[#allocation38_spill] sm:$0xff] }
 0x187   :  { %6664 = vst [vmem:[#allocation37_spill] sm:$0xff] %v5362_v8  ;;  %6665 = vst [vmem:[#allocation59_spill] sm:$0xff] %v5369_v30  ;;  %v5373_v57 = vmul.f32 %v5104_v61, %v6666_v35 }
 0x189   :  { %6667 = vst [vmem:[#allocation38_spill] sm:$0xff] %v5373_v57 }
 0x1c2   :  { %v3752_v18 = vpop.f32.mrf.mxu1 }
 0x1c3   :  { %v2017_v47 = vmul.f32 0.999995, %v3752_v18 }
 0x1c4   :  { %v1760_v53 = vpop.f32.mrf.mxu1 }
 0x1c5   :  { %v2083_v18 = vmul.f32 %v5309_v21, %v2017_v47  ;;  %v2213_v36 = vmul.f32 %v5312_v40, %v2017_v47  ;;  %v2015_v4 = vmul.f32 0.999995, %v1760_v53 }
 0x1c6   :  { %v3753_v37 = vpop.f32.mrf.mxu1 }
 0x1c7   :  { %v2147_v47 = vadd.f32 %v2083_v18, %v5110_v23  ;;  %v2081_v53 = vmul.f32 %v5309_v21, %v2015_v4  ;;  %v2211_v41 = vmul.f32 %v5312_v40, %v2015_v4  ;;  %v2018_v50 = vmul.f32 0.999995, %v3753_v37 }
 0x1c8   :  { %v1763_v45 = vpop.f32.mrf.mxu1  ;;  %v2277_v56 = vadd.f32 %v2213_v36, %v5118_v0  ;;  %v5381_v37 = vmul.f32 %v5106_v52, %v6666_v35 }
 0x1c9   :  { %v3325_v8 = vpack.c.bf16 %v2147_v47, %v2147_v47  ;;  %v2145_v23 = vadd.f32 %v2081_v53, %v5114_v59  ;;  %v2084_v18 = vmul.f32 %v5309_v21, %v2018_v50  ;;  %v2214_v4 = vmul.f32 %v5312_v40, %v2018_v50  ;;  %v6668_v59 = vld [vmem:[#allocation11_spill] sm:$0xff] }
 0x1ca   :  { %v2016_v49 = vmul.f32 0.999995, %v1763_v45  ;;  %v3756_v30 = vpop.f32.mrf.mxu1  ;;  %v3389_v62 = vpack.c.bf16 %v2277_v56, %v2277_v56  ;;  %v2275_v57 = vadd.f32 %v2211_v41, %v5134_v63  ;;  %v5392_v35 = vmul.f32 %v5104_v61, %v6668_v59 }
 0x1cb   :  { %v3323_v31 = vpack.c.bf16 %v2145_v23, %v2145_v23  ;;  %v2148_v0 = vadd.f32 %v2084_v18, %v5122_v13  ;;  %v2021_v36 = vmul.f32 0.999995, %v3756_v30  ;;  %v2278_v47 = vadd.f32 %v2214_v4, %v5126_v39  ;;  %2598 = vst.msk [vmem:[%s6427_s4 + $0x8] sm:$0xf] %vm2595_vm1, %v3325_v8  ;;  %v6669_v18 = vld [vmem:[#allocation8_spill] sm:$0xff] }
 0x1cc   :  { %v2082_v50 = vmul.f32 %v5309_v21, %v2016_v49  ;;  %v2212_v56 = vmul.f32 %v5312_v40, %v2016_v49  ;;  %2856 = vrot.lane.b32.xlu1 %v3389_v62, %s3851_s23  ;;  %v1776_v13 = vpop.f32.mrf.mxu1  ;;  %v3387_v63 = vpack.c.bf16 %v2275_v57, %v2275_v57  ;;  %v5405_v8 = vmul.f32 %v5106_v52, %v6668_v59 }
 0x1cd   :  { %v3326_v30 = vpack.c.bf16 %v2148_v0, %v2148_v0  ;;  %v2087_v39 = vmul.f32 %v5309_v21, %v2021_v36  ;;  %v2217_v45 = vmul.f32 %v5312_v40, %v2021_v36  ;;  %v2019_v53 = vmul.f32 0.999995, %v1776_v13  ;;  %2596 = vst.msk [vmem:[%s6427_s4] sm:$0xf] %vm2595_vm1, %v3323_v31 }
 0x1ce   :  { %v2146_v41 = vadd.f32 %v2082_v50, %v5130_v2  ;;  %2852 = vrot.lane.b32.xlu0 %v3387_v63, %s3851_s23  ;;  %v3757_v62 = vpop.f32.mrf.mxu1  ;;  %v3390_v57 = vpack.c.bf16 %v2278_v47, %v2278_v47  ;;  %v2276_v23 = vadd.f32 %v2212_v56, %v5138_v3  ;;  %v5412_v4 = vmul.f32 %v5104_v61, %v6669_v18 }
 0x1cf   :  { %v2151_v49 = vadd.f32 %v2087_v39, %v5142_v58  ;;  %v2085_v31 = vmul.f32 %v5309_v21, %v2019_v53  ;;  %v2022_v0 = vmul.f32 0.999995, %v3757_v62  ;;  %2599 = vst.msk [vmem:[%s6427_s4 + $0xc] sm:$0xf] %vm2595_vm1, %v3326_v30  ;;  %v2215_v36 = vmul.f32 %v5312_v40, %v2019_v53  ;;  %v6670_v30 = vld [vmem:[#allocation10_spill] sm:$0xff] }
 0x1d0   :  { %v3324_v2 = vpack.c.bf16 %v2146_v41, %v2146_v41  ;;  %2858 = vrot.lane.b32.xlu1 %v3390_v57, %s3851_s23  ;;  %v1779_v3 = vpop.f32.mrf.mxu1  ;;  %v3388_v47 = vpack.c.bf16 %v2276_v23, %v2276_v23  ;;  %v2281_v59 = vadd.f32 %v2217_v45, %v5146_v5  ;;  %v5428_v63 = vmul.f32 %v5106_v52, %v6669_v18 }
 0x1d1   :  { %v3329_v50 = vpack.c.bf16 %v2151_v49, %v2151_v49  ;;  %v2149_v58 = vadd.f32 %v2085_v31, %v5150_v38  ;;  %v2088_v56 = vmul.f32 %v5309_v21, %v2022_v0  ;;  %v2218_v13 = vmul.f32 %v5312_v40, %v2022_v0 }
 0x1d2   :  { %v5432_v39 = vmul.f32 %v5104_v61, %v6670_v30  ;;  %v5436_v53 = vmul.f32 %v5106_v52, %v6670_v30  ;;  %v2020_v5 = vmul.f32 0.999995, %v1779_v3  ;;  %2854 = vrot.lane.b32.xlu0 %v3388_v47, %s3851_s23  ;;  %v3760_v38 = vpop.f32.mrf.mxu1  ;;  %2597 = vst.msk [vmem:[%s6427_s4 + $0x4] sm:$0xf] %vm2595_vm1, %v3324_v2  ;;  %v3393_v31 = vpack.c.bf16 %v2281_v59, %v2281_v59 }
 0x1d3   :  { %v3327_v45 = vpack.c.bf16 %v2149_v58, %v2149_v58  ;;  %v2152_v41 = vadd.f32 %v2088_v56, %v5158_v10  ;;  %v2025_v62 = vmul.f32 0.999995, %v3760_v38  ;;  %v2282_v57 = vadd.f32 %v2218_v13, %v5162_v54  ;;  %2602 = vst.msk [vmem:[%s6427_s4 + $0x18] sm:$0xf] %vm2595_vm1, %v3329_v50  ;;  %v6671_v54 = vld [vmem:[#allocation9_spill] sm:$0xff] }
 0x1d4   :  { %v2086_v23 = vmul.f32 %v5309_v21, %v2020_v5  ;;  %v2216_v18 = vmul.f32 %v5312_v40, %v2020_v5  ;;  %v1792_v49 = vpop.f32.mrf.mxu1  ;;  %v2279_v0 = vadd.f32 %v2215_v36, %v5154_v48  ;;  %v5460_v50 = vmul.f32 %v5104_v61, %v6671_v54 }
 0x1d5   :  { %v3330_v2 = vpack.c.bf16 %v2152_v41, %v2152_v41  ;;  %v2091_v3 = vmul.f32 %v5309_v21, %v2025_v62  ;;  %v2221_v10 = vmul.f32 %v5312_v40, %v2025_v62  ;;  %v2023_v47 = vmul.f32 0.999995, %v1792_v49  ;;  %2600 = vst.msk [vmem:[%s6427_s4 + $0x10] sm:$0xf] %vm2595_vm1, %v3327_v45 }
 0x1d6   :  { %v2150_v58 = vadd.f32 %v2086_v23, %v5166_v17  ;;  %2864 = vrot.lane.b32.xlu0 %v3393_v31, %s3851_s23  ;;  %v3761_v48 = vpop.f32.mrf.mxu1  ;;  %v3394_v36 = vpack.c.bf16 %v2282_v57, %v2282_v57  ;;  %v2280_v59 = vadd.f32 %v2216_v18, %v5172_v28  ;;  %v5467_v56 = vmul.f32 %v5106_v52, %v6671_v54  ;;  %v6672_v18 = vld [vmem:[#allocation15_spill] sm:$0xff] }
 0x1d7   :  { %v2155_v13 = vadd.f32 %v2091_v3, %v5176_v25  ;;  %v2089_v30 = vmul.f32 %v5309_v21, %v2023_v47  ;;  %v2026_v5 = vmul.f32 0.999995, %v3761_v48  ;;  %2603 = vst.msk [vmem:[%s6427_s4 + $0x1c] sm:$0xf] %vm2595_vm1, %v3330_v2  ;;  %v2219_v38 = vmul.f32 %v5312_v40, %v2023_v47 }
 0x1d8   :  { %v3328_v17 = vpack.c.bf16 %v2150_v58, %v2150_v58  ;;  %2866 = vrot.lane.b32.xlu1 %v3394_v36, %s3851_s23  ;;  %v1795_v28 = vpop.f32.mrf.mxu1  ;;  %v3391_v45 = vpack.c.bf16 %v2279_v0, %v2279_v0  ;;  %v2285_v41 = vadd.f32 %v2221_v10, %v5180_v1  ;;  %v5483_v49 = vmul.f32 %v5104_v61, %v6672_v18 }
 0x1d9   :  { %v3333_v62 = vpack.c.bf16 %v2155_v13, %v2155_v13  ;;  %v2153_v25 = vadd.f32 %v2089_v30, %v5184_v43  ;;  %v2092_v57 = vmul.f32 %v5309_v21, %v2026_v5  ;;  %v2222_v23 = vmul.f32 %v5312_v40, %v2026_v5  ;;  %v6673_v5 = vld [vmem:[#allocation12_spill] sm:$0xff] }
 0x1da   :  { %v5487_v31 = vmul.f32 %v5106_v52, %v6672_v18  ;;  %v2024_v2 = vmul.f32 0.999995, %v1795_v28  ;;  %2860 = vrot.lane.b32.xlu0 %v3391_v45, %s3851_s23  ;;  %v3764_v0 = vpop.f32.mrf.mxu1  ;;  %v3392_v1 = vpack.c.bf16 %v2280_v59, %v2280_v59  ;;  %2601 = vst.msk [vmem:[%s6427_s4 + $0x14] sm:$0xf] %vm2595_vm1, %v3328_v17  ;;  %v3397_v36 = vpack.c.bf16 %v2285_v41, %v2285_v41 }
 0x1db   :  { %v3331_v43 = vpack.c.bf16 %v2153_v25, %v2153_v25  ;;  %v2156_v3 = vadd.f32 %v2092_v57, %v5194_v42  ;;  %v2029_v10 = vmul.f32 0.999995, %v3764_v0  ;;  %v2286_v47 = vadd.f32 %v2222_v23, %v5198_v33  ;;  %2606 = vst.msk [vmem:[%s6427_s4 + $0x28] sm:$0xf] %vm2595_vm1, %v3333_v62 }
 0x1dc   :  { %v2090_v54 = vmul.f32 %v5309_v21, %v2024_v2  ;;  %v2220_v58 = vmul.f32 %v5312_v40, %v2024_v2  ;;  %2862 = vrot.lane.b32.xlu1 %v3392_v1, %s3851_s23  ;;  %v1808_v48 = vpop.f32.mrf.mxu1  ;;  %v2283_v59 = vadd.f32 %v2219_v38, %v5190_v22  ;;  %v5512_v17 = vmul.f32 %v5104_v61, %v6673_v5 }
 0x1dd   :  { %v3334_v13 = vpack.c.bf16 %v2156_v3, %v2156_v3  ;;  %v2095_v42 = vmul.f32 %v5309_v21, %v2029_v10  ;;  %v2225_v33 = vmul.f32 %v5312_v40, %v2029_v10  ;;  %v2027_v30 = vmul.f32 0.999995, %v1808_v48  ;;  %2604 = vst.msk [vmem:[%s6427_s4 + $0x20] sm:$0xf] %vm2595_vm1, %v3331_v43  ;;  %v6674_v3 = vld [vmem:[#allocation14_spill] sm:$0xff] }
 0x1de   :  { %v2154_v28 = vadd.f32 %v2090_v54, %v5202_v12  ;;  %2872 = vrot.lane.b32.xlu0 %v3397_v36, %s3851_s23  ;;  %v3765_v22 = vpop.f32.mrf.mxu1  ;;  %v3398_v38 = vpack.c.bf16 %v2286_v47, %v2286_v47  ;;  %v2284_v45 = vadd.f32 %v2220_v58, %v5206_v7  ;;  %v5519_v41 = vmul.f32 %v5106_v52, %v6673_v5 }
 0x1df   :  { %v2159_v62 = vadd.f32 %v2095_v42, %v5210_v51  ;;  %v2093_v25 = vmul.f32 %v5309_v21, %v2027_v30  ;;  %v2030_v57 = vmul.f32 0.999995, %v3765_v22  ;;  %2607 = vst.msk [vmem:[%s6427_s4 + $0x2c] sm:$0xf] %vm2595_vm1, %v3334_v13  ;;  %v2223_v23 = vmul.f32 %v5312_v40, %v2027_v30 }
 0x1e0   :  { %v3332_v12 = vpack.c.bf16 %v2154_v28, %v2154_v28  ;;  %2874 = vrot.lane.b32.xlu1 %v3398_v38, %s3851_s23  ;;  %v1811_v7 = vpop.f32.mrf.mxu1  ;;  %v3395_v18 = vpack.c.bf16 %v2283_v59, %v2283_v59  ;;  %v2289_v2 = vadd.f32 %v2225_v33, %v5214_v9  ;;  %v5535_v10 = vmul.f32 %v5104_v61, %v6674_v3  ;;  %v6675_v38 = vld [vmem:[#allocation13_spill] sm:$0xff] }
 0x1e1   :  { %v3337_v0 = vpack.c.bf16 %v2159_v62, %v2159_v62  ;;  %v2157_v51 = vadd.f32 %v2093_v25, %v5218_v14  ;;  %v2096_v1 = vmul.f32 %v5309_v21, %v2030_v57  ;;  %v2226_v43 = vmul.f32 %v5312_v40, %v2030_v57 }
 0x1e2   :  { %v5539_v47 = vmul.f32 %v5106_v52, %v6674_v3  ;;  %v2028_v54 = vmul.f32 0.999995, %v1811_v7  ;;  %2868 = vrot.lane.b32.xlu0 %v3395_v18, %s3851_s23  ;;  %v3768_v58 = vpop.f32.mrf.mxu1  ;;  %v3396_v9 = vpack.c.bf16 %v2284_v45, %v2284_v45  ;;  %2605 = vst.msk [vmem:[%s6427_s4 + $0x24] sm:$0xf] %vm2595_vm1, %v3332_v12  ;;  %v3401_v30 = vpack.c.bf16 %v2289_v2, %v2289_v2 }
 0x1e3   :  { %v3335_v14 = vpack.c.bf16 %v2157_v51, %v2157_v51  ;;  %v2160_v48 = vadd.f32 %v2096_v1, %v5226_v20  ;;  %v2033_v36 = vmul.f32 0.999995, %v3768_v58  ;;  %v2290_v59 = vadd.f32 %v2226_v43, %v5230_v44  ;;  %2610 = vst.msk [vmem:[%s6427_s4 + $0x38] sm:$0xf] %vm2595_vm1, %v3337_v0 }
 0x1e4   :  { %v2094_v13 = vmul.f32 %v5309_v21, %v2028_v54  ;;  %v2224_v42 = vmul.f32 %v5312_v40, %v2028_v54  ;;  %2870 = vrot.lane.b32.xlu1 %v3396_v9, %s3851_s23  ;;  %v1824_v33 = vpop.f32.mrf.mxu1  ;;  %v2287_v5 = vadd.f32 %v2223_v23, %v5222_v34  ;;  %v5564_v45 = vmul.f32 %v5104_v61, %v6675_v38  ;;  %v6676_v54 = vld [vmem:[#allocation19_spill] sm:$0xff] }
 0x1e5   :  { %v3338_v28 = vpack.c.bf16 %v2160_v48, %v2160_v48  ;;  %v2099_v20 = vmul.f32 %v5309_v21, %v2033_v36  ;;  %v2229_v44 = vmul.f32 %v5312_v40, %v2033_v36  ;;  %v2031_v22 = vmul.f32 0.999995, %v1824_v33  ;;  %2608 = vst.msk [vmem:[%s6427_s4 + $0x30] sm:$0xf] %vm2595_vm1, %v3335_v14 }
 0x1e6   :  { %v2158_v62 = vadd.f32 %v2094_v13, %v5234_v19  ;;  %2880 = vrot.lane.b32.xlu0 %v3401_v30, %s3851_s23  ;;  %v3769_v34 = vpop.f32.mrf.mxu1  ;;  %v3402_v25 = vpack.c.bf16 %v2290_v59, %v2290_v59  ;;  %v2288_v57 = vadd.f32 %v2224_v42, %v5238_v15  ;;  %v5571_v12 = vmul.f32 %v5106_v52, %v6675_v38 }
 0x1e7   :  { %v2163_v23 = vadd.f32 %v2099_v20, %v5242_v24  ;;  %v2097_v7 = vmul.f32 %v5309_v21, %v2031_v22  ;;  %v2034_v18 = vmul.f32 0.999995, %v3769_v34  ;;  %2611 = vst.msk [vmem:[%s6427_s4 + $0x3c] sm:$0xf] %vm2595_vm1, %v3338_v28  ;;  %v2227_v2 = vmul.f32 %v5312_v40, %v2031_v22  ;;  %v6677_v22 = vld [vmem:[#allocation16_spill] sm:$0xff] }
 0x1e8   :  { %v3336_v19 = vpack.c.bf16 %v2158_v62, %v2158_v62  ;;  %2882 = vrot.lane.b32.xlu1 %v3402_v25, %s3851_s23  ;;  %v1827_v15 = vpop.f32.mrf.mxu1  ;;  %v3399_v0 = vpack.c.bf16 %v2287_v5, %v2287_v5  ;;  %v2293_v51 = vadd.f32 %v2229_v44, %v5246_v16  ;;  %v5587_v58 = vmul.f32 %v5104_v61, %v6676_v54 }
 0x1e9   :  { %v3341_v1 = vpack.c.bf16 %v2163_v23, %v2163_v23  ;;  %v2161_v24 = vadd.f32 %v2097_v7, %v5250_v6  ;;  %v2100_v43 = vmul.f32 %v5309_v21, %v2034_v18  ;;  %v2230_v3 = vmul.f32 %v5312_v40, %v2034_v18 }
 0x1ea   :  { %v5591_v9 = vmul.f32 %v5106_v52, %v6676_v54  ;;  %v2032_v14 = vmul.f32 0.999995, %v1827_v15  ;;  %2876 = vrot.lane.b32.xlu0 %v3399_v0, %s3851_s23  ;;  %v3772_v48 = vpop.f32.mrf.mxu1  ;;  %v3400_v16 = vpack.c.bf16 %v2288_v57, %v2288_v57  ;;  %2609 = vst.msk [vmem:[%s6427_s4 + $0x34] sm:$0xf] %vm2595_vm1, %v3336_v19  ;;  %v3405_v5 = vpack.c.bf16 %v2293_v51, %v2293_v51 }
 0x1eb   :  { %v3339_v6 = vpack.c.bf16 %v2161_v24, %v2161_v24  ;;  %v2164_v36 = vadd.f32 %v2100_v43, %v5258_v27  ;;  %v2037_v59 = vmul.f32 0.999995, %v3772_v48  ;;  %v2294_v13 = vadd.f32 %v2230_v3, %v5262_v60  ;;  %2614 = vst.msk [vmem:[%s6427_s4 + $0x48] sm:$0xf] %vm2595_vm1, %v3341_v1  ;;  %v6678_v24 = vld [vmem:[#allocation18_spill] sm:$0xff]  ;;  %v6679_v48 = vld [vmem:[#allocation44_spill] sm:$0xff] }
 0x1ec   :  { %v2098_v42 = vmul.f32 %v5309_v21, %v2032_v14  ;;  %v2228_v33 = vmul.f32 %v5312_v40, %v2032_v14  ;;  %2878 = vrot.lane.b32.xlu1 %v3400_v16, %s3851_s23  ;;  %v1840_v30 = vpop.f32.mrf.mxu1  ;;  %v2291_v28 = vadd.f32 %v2227_v2, %v5254_v46  ;;  %v5616_v38 = vmul.f32 %v5104_v61, %v6677_v22 }
 0x1ed   :  { %v3342_v20 = vpack.c.bf16 %v2164_v36, %v2164_v36  ;;  %v2103_v27 = vmul.f32 %v5309_v21, %v2037_v59  ;;  %v2233_v60 = vmul.f32 %v5312_v40, %v2037_v59  ;;  %v2035_v44 = vmul.f32 0.999995, %v1840_v30  ;;  %2612 = vst.msk [vmem:[%s6427_s4 + $0x40] sm:$0xf] %vm2595_vm1, %v3339_v6  ;;  %v6680_v36 = vld [vmem:[#allocation45_spill] sm:$0xff] }
 0x1ee   :  { %v2162_v62 = vadd.f32 %v2098_v42, %v5266_v26  ;;  %2888 = vrot.lane.b32.xlu0 %v3405_v5, %s3851_s23  ;;  %v3773_v46 = vpop.f32.mrf.mxu1  ;;  %v3406_v34 = vpack.c.bf16 %v2294_v13, %v2294_v13  ;;  %v2292_v25 = vadd.f32 %v2228_v33, %v5270_v32  ;;  %v5623_v57 = vmul.f32 %v5106_v52, %v6677_v22  ;;  %v6681_v5 = vld [vmem:[#allocation35_spill] sm:$0xff]  ;;  %v6682_v22 = vld [vmem:[#allocation17_spill] sm:$0xff] }
 0x1ef   :  { %v2167_v23 = vadd.f32 %v2103_v27, %v5274_v55  ;;  %v2101_v7 = vmul.f32 %v5309_v21, %v2035_v44  ;;  %v2038_v18 = vmul.f32 0.999995, %v3773_v46  ;;  %2615 = vst.msk [vmem:[%s6427_s4 + $0x4c] sm:$0xf] %vm2595_vm1, %v3342_v20  ;;  %v2231_v19 = vmul.f32 %v5312_v40, %v2035_v44  ;;  %v6683_v46 = vld [vmem:[#allocation46_spill] sm:$0xff] }
 0x1f0   :  { %v3340_v26 = vpack.c.bf16 %v2162_v62, %v2162_v62  ;;  %2890 = vrot.lane.b32.xlu1 %v3406_v34, %s3851_s23  ;;  %v1843_v32 = vpop.f32.mrf.mxu1  ;;  %v3403_v2 = vpack.c.bf16 %v2291_v28, %v2291_v28  ;;  %v2297_v15 = vadd.f32 %v2233_v60, %v5278_v29  ;;  %v5639_v43 = vmul.f32 %v5104_v61, %v6678_v24 }
 0x1f1   :  { %v3345_v0 = vpack.c.bf16 %v2167_v23, %v2167_v23  ;;  %v2165_v55 = vadd.f32 %v2101_v7, %v5282_v11  ;;  %v2104_v51 = vmul.f32 %v5309_v21, %v2038_v18  ;;  %v2234_v1 = vmul.f32 %v5312_v40, %v2038_v18  ;;  %v6684_v7 = vld [vmem:[#allocation47_spill] sm:$0xff] }
 0x1f2   :  { %v5643_v3 = vmul.f32 %v5106_v52, %v6678_v24  ;;  %v2036_v54 = vmul.f32 0.999995, %v1843_v32  ;;  %2884 = vrot.lane.b32.xlu0 %v3403_v2, %s3851_s23  ;;  %v3776_v14 = vpop.f32.mrf.mxu1  ;;  %v3404_v29 = vpack.c.bf16 %v2292_v25, %v2292_v25  ;;  %2613 = vst.msk [vmem:[%s6427_s4 + $0x44] sm:$0xf] %vm2595_vm1, %v3340_v26  ;;  %v3409_v30 = vpack.c.bf16 %v2297_v15, %v2297_v15  ;;  %v6686_v24 = vld [vmem:[#allocation49_spill] sm:$0xff] }
 0x1f3   :  { %v3343_v11 = vpack.c.bf16 %v2165_v55, %v2165_v55  ;;  %v2168_v16 = vadd.f32 %v2104_v51, %v6679_v48  ;;  %v2041_v6 = vmul.f32 0.999995, %v3776_v14  ;;  %v2298_v59 = vadd.f32 %v2234_v1, %v6680_v36  ;;  %2618 = vst.msk [vmem:[%s6427_s4 + $0x58] sm:$0xf] %vm2595_vm1, %v3345_v0 }
 0x1f4   :  { %v2102_v13 = vmul.f32 %v5309_v21, %v2036_v54  ;;  %v2232_v42 = vmul.f32 %v5312_v40, %v2036_v54  ;;  %2886 = vrot.lane.b32.xlu1 %v3404_v29, %s3851_s23  ;;  %v1856_v33 = vpop.f32.mrf.mxu1  ;;  %v2295_v28 = vadd.f32 %v2231_v19, %v6681_v5  ;;  %v5668_v62 = vmul.f32 %v5104_v61, %v6682_v22  ;;  %v6685_v19 = vld [vmem:[#allocation48_spill] sm:$0xff]  ;;  %v6687_v29 = vld [vmem:[#allocation50_spill] sm:$0xff] }
 0x1f5   :  { %v3346_v20 = vpack.c.bf16 %v2168_v16, %v2168_v16  ;;  %v2107_v27 = vmul.f32 %v5309_v21, %v2041_v6  ;;  %v2237_v60 = vmul.f32 %v5312_v40, %v2041_v6  ;;  %v2039_v44 = vmul.f32 0.999995, %v1856_v33  ;;  %2616 = vst.msk [vmem:[%s6427_s4 + $0x50] sm:$0xf] %vm2595_vm1, %v3343_v11  ;;  %v6688_v6 = vld [vmem:[#allocation23_spill] sm:$0xff]  ;;  %v6689_v5 = vld [vmem:[#allocation52_spill] sm:$0xff] }
 0x1f6   :  { %v2166_v34 = vadd.f32 %v2102_v13, %v6683_v46  ;;  %2896 = vrot.lane.b32.xlu0 %v3409_v30, %s3851_s23  ;;  %v3777_v25 = vpop.f32.mrf.mxu1  ;;  %v3410_v23 = vpack.c.bf16 %v2298_v59, %v2298_v59  ;;  %v2296_v18 = vadd.f32 %v2232_v42, %v6684_v7  ;;  %v5675_v26 = vmul.f32 %v5106_v52, %v6682_v22 }
 0x1f7   :  { %v2171_v32 = vadd.f32 %v2107_v27, %v6685_v19  ;;  %v2105_v2 = vmul.f32 %v5309_v21, %v2039_v44  ;;  %v2042_v15 = vmul.f32 0.999995, %v3777_v25  ;;  %2619 = vst.msk [vmem:[%s6427_s4 + $0x5c] sm:$0xf] %vm2595_vm1, %v3346_v20  ;;  %v2235_v55 = vmul.f32 %v5312_v40, %v2039_v44  ;;  %v6690_v27 = vld [vmem:[#allocation53_spill] sm:$0xff]  ;;  %v6691_v25 = vld [vmem:[#allocation51_spill] sm:$0xff] }
 0x1f8   :  { %v3344_v0 = vpack.c.bf16 %v2166_v34, %v2166_v34  ;;  %2898 = vrot.lane.b32.xlu1 %v3410_v23, %s3851_s23  ;;  %v1859_v51 = vpop.f32.mrf.mxu1  ;;  %v3407_v1 = vpack.c.bf16 %v2295_v28, %v2295_v28  ;;  %v2301_v54 = vadd.f32 %v2237_v60, %v6686_v24  ;;  %v5691_v36 = vmul.f32 %v5104_v61, %v6688_v6  ;;  %v6694_v24 = vld [vmem:[#allocation55_spill] sm:$0xff] }
 0x1f9   :  { %v3349_v14 = vpack.c.bf16 %v2171_v32, %v2171_v32  ;;  %v2169_v11 = vadd.f32 %v2105_v2, %v6687_v29  ;;  %v2108_v48 = vmul.f32 %v5309_v21, %v2042_v15  ;;  %v2238_v16 = vmul.f32 %v5312_v40, %v2042_v15  ;;  %v6692_v2 = vld [vmem:[#allocation20_spill] sm:$0xff] }
 0x1fa   :  { %v5695_v59 = vmul.f32 %v5106_v52, %v6688_v6  ;;  %v2040_v13 = vmul.f32 0.999995, %v1859_v51  ;;  %2892 = vrot.lane.b32.xlu0 %v3407_v1, %s3851_s23  ;;  %v3780_v42 = vpop.f32.mrf.mxu1  ;;  %v3408_v33 = vpack.c.bf16 %v2296_v18, %v2296_v18  ;;  %2617 = vst.msk [vmem:[%s6427_s4 + $0x54] sm:$0xf] %vm2595_vm1, %v3344_v0  ;;  %v3413_v34 = vpack.c.bf16 %v2301_v54, %v2301_v54  ;;  %v6693_v0 = vld [vmem:[#allocation54_spill] sm:$0xff]  ;;  %v6695_v29 = vld [vmem:[#allocation56_spill] sm:$0xff] }
 0x1fb   :  { %v3347_v30 = vpack.c.bf16 %v2169_v11, %v2169_v11  ;;  %v2172_v28 = vadd.f32 %v2108_v48, %v6689_v5  ;;  %v2045_v20 = vmul.f32 0.999995, %v3780_v42  ;;  %v2302_v60 = vadd.f32 %v2238_v16, %v6690_v27  ;;  %2622 = vst.msk [vmem:[%s6427_s4 + $0x68] sm:$0xf] %vm2595_vm1, %v3349_v14 }
 0x1fc   :  { %v2106_v44 = vmul.f32 %v5309_v21, %v2040_v13  ;;  %v2236_v22 = vmul.f32 %v5312_v40, %v2040_v13  ;;  %2894 = vrot.lane.b32.xlu1 %v3408_v33, %s3851_s23  ;;  %v1872_v46 = vpop.f32.mrf.mxu1  ;;  %v2299_v23 = vadd.f32 %v2235_v55, %v6691_v25  ;;  %v5720_v15 = vmul.f32 %v5104_v61, %v6692_v2 }
 0x1fd   :  { %v3350_v7 = vpack.c.bf16 %v2172_v28, %v2172_v28  ;;  %v2111_v18 = vmul.f32 %v5309_v21, %v2045_v20  ;;  %v2241_v19 = vmul.f32 %v5312_v40, %v2045_v20  ;;  %v2043_v32 = vmul.f32 0.999995, %v1872_v46  ;;  %2620 = vst.msk [vmem:[%s6427_s4 + $0x60] sm:$0xf] %vm2595_vm1, %v3347_v30  ;;  %v6696_v30 = vld [vmem:[#allocation57_spill] sm:$0xff]  ;;  %v6697_v20 = vld [vmem:[#allocation36_spill] sm:$0xff] }
 0x1fe   :  { %v2170_v51 = vadd.f32 %v2106_v44, %v6693_v0  ;;  %2904 = vrot.lane.b32.xlu0 %v3413_v34, %s3851_s23  ;;  %v3781_v55 = vpop.f32.mrf.mxu1  ;;  %v3414_v1 = vpack.c.bf16 %v2302_v60, %v2302_v60  ;;  %v2300_v54 = vadd.f32 %v2236_v22, %v6694_v24  ;;  %v5727_v14 = vmul.f32 %v5106_v52, %v6692_v2  ;;  %v6698_v22 = vld [vmem:[#allocation22_spill] sm:$0xff]  ;;  %v6700_v0 = vld [vmem:[#allocation59_spill] sm:$0xff] }
 0x1ff   :  { %v2175_v11 = vadd.f32 %v2111_v18, %v6695_v29  ;;  %v2109_v48 = vmul.f32 %v5309_v21, %v2043_v32  ;;  %v2046_v16 = vmul.f32 0.999995, %v3781_v55  ;;  %2623 = vst.msk [vmem:[%s6427_s4 + $0x6c] sm:$0xf] %vm2595_vm1, %v3350_v7  ;;  %v2239_v13 = vmul.f32 %v5312_v40, %v2043_v32  ;;  %v6701_v29 = vld [vmem:[#allocation58_spill] sm:$0xff] }
 0x200   :  { %v3348_v6 = vpack.c.bf16 %v2170_v51, %v2170_v51  ;;  %2906 = vrot.lane.b32.xlu1 %v3414_v1, %s3851_s23  ;;  %v1875_v42 = vpop.f32.mrf.mxu1  ;;  %v3411_v33 = vpack.c.bf16 %v2299_v23, %v2299_v23  ;;  %v2305_v5 = vadd.f32 %v2241_v19, %v6696_v30  ;;  %v5743_v46 = vmul.f32 %v5104_v61, %v6698_v22  ;;  %v6699_v19 = vld [vmem:[#allocation37_spill] sm:$0xff] }
 0x201   :  { %v3353_v28 = vpack.c.bf16 %v2175_v11, %v2175_v11  ;;  %v2173_v27 = vadd.f32 %v2109_v48, %v6697_v20  ;;  %v2112_v60 = vmul.f32 %v5309_v21, %v2046_v16  ;;  %v2242_v44 = vmul.f32 %v5312_v40, %v2046_v16 }
 0x202   :  { %v5747_v34 = vmul.f32 %v5106_v52, %v6698_v22  ;;  %v2044_v25 = vmul.f32 0.999995, %v1875_v42  ;;  %2900 = vrot.lane.b32.xlu0 %v3411_v33, %s3851_s23  ;;  %v3784_v23 = vpop.f32.mrf.mxu1  ;;  %v3412_v7 = vpack.c.bf16 %v2300_v54, %v2300_v54  ;;  %2621 = vst.msk [vmem:[%s6427_s4 + $0x64] sm:$0xf] %vm2595_vm1, %v3348_v6  ;;  %v3417_v54 = vpack.c.bf16 %v2305_v5, %v2305_v5  ;;  %v6702_v33 = vld [vmem:[#allocation21_spill] sm:$0xff] }
 0x203   :  { %v3351_v18 = vpack.c.bf16 %v2173_v27, %v2173_v27  ;;  %v2176_v32 = vadd.f32 %v2112_v60, %v6699_v19  ;;  %v2049_v2 = vmul.f32 0.999995, %v3784_v23  ;;  %v2306_v51 = vadd.f32 %v2242_v44, %v6700_v0  ;;  %2626 = vst.msk [vmem:[%s6427_s4 + $0x78] sm:$0xf] %vm2595_vm1, %v3353_v28  ;;  %v6703_v28 = vld [vmem:[#allocation38_spill] sm:$0xff] }
 0x204   :  { %v2110_v55 = vmul.f32 %v5309_v21, %v2044_v25  ;;  %v2240_v1 = vmul.f32 %v5312_v40, %v2044_v25  ;;  %2902 = vrot.lane.b32.xlu1 %v3412_v7, %s3851_s23  ;;  %v1888_v24 = vpop.f32.mrf.mxu1  ;;  %v2303_v11 = vadd.f32 %v2239_v13, %v6701_v29  ;;  %v5772_v30 = vmul.f32 %v5104_v61, %v6702_v33 }
 0x205   :  { %v3354_v48 = vpack.c.bf16 %v2176_v32, %v2176_v32  ;;  %v2115_v16 = vmul.f32 %v5309_v21, %v2049_v2  ;;  %v2245_v6 = vmul.f32 %v5312_v40, %v2049_v2  ;;  %v2047_v42 = vmul.f32 0.999995, %v1888_v24  ;;  %2624 = vst.msk [vmem:[%s6427_s4 + $0x70] sm:$0xf] %vm2595_vm1, %v3351_v18 }
 0x206   :  { %v2174_v20 = vadd.f32 %v2110_v55, %v6703_v28  ;;  %2912 = vrot.lane.b32.xlu0 %v3417_v54, %s3851_s23  ;;  %v3785_v13 = vpop.f32.mrf.mxu1  ;;  %v3418_v5 = vpack.c.bf16 %v2306_v51, %v2306_v51  ;;  %v2304_v27 = vadd.f32 %v2240_v1, %v5381_v37  ;;  %v5779_v60 = vmul.f32 %v5106_v52, %v6702_v33  ;;  %v6704_v51 = vld [vmem:[#allocation27_spill] sm:$0xff] }
 0x207   :  { %v2179_v44 = vadd.f32 %v2115_v16, %v5392_v35  ;;  %v2113_v22 = vmul.f32 %v5309_v21, %v2047_v42  ;;  %v2050_v25 = vmul.f32 0.999995, %v3785_v13  ;;  %2627 = vst.msk [vmem:[%s6427_s4 + $0x7c] sm:$0xf] %vm2595_vm1, %v3354_v48  ;;  %v2243_v7 = vmul.f32 %v5312_v40, %v2047_v42 }
 0x208   :  { %v3352_v23 = vpack.c.bf16 %v2174_v20, %v2174_v20  ;;  %2914 = vrot.lane.b32.xlu1 %v3418_v5, %s3851_s23  ;;  %v1891_v37 = vpop.f32.mrf.mxu1  ;;  %v3415_v18 = vpack.c.bf16 %v2303_v11, %v2303_v11  ;;  %v2309_v19 = vadd.f32 %v2245_v6, %v5405_v8  ;;  %v5795_v55 = vmul.f32 %v5104_v61, %v6704_v51  ;;  %v6705_v5 = vld [vmem:[#allocation24_spill] sm:$0xff] }
 0x209   :  { %v3357_v32 = vpack.c.bf16 %v2179_v44, %v2179_v44  ;;  %v2177_v35 = vadd.f32 %v2113_v22, %v5412_v4  ;;  %v2116_v2 = vmul.f32 %v5309_v21, %v2050_v25  ;;  %v2246_v0 = vmul.f32 %v5312_v40, %v2050_v25 }
 0x20a   :  { %v5799_v1 = vmul.f32 %v5106_v52, %v6704_v51  ;;  %v2048_v24 = vmul.f32 0.999995, %v1891_v37  ;;  %2908 = vrot.lane.b32.xlu0 %v3415_v18, %s3851_s23  ;;  %v3788_v54 = vpop.f32.mrf.mxu1  ;;  %v3416_v8 = vpack.c.bf16 %v2304_v27, %v2304_v27  ;;  %2625 = vst.msk [vmem:[%s6427_s4 + $0x74] sm:$0xf] %vm2595_vm1, %v3352_v23  ;;  %v3421_v33 = vpack.c.bf16 %v2309_v19, %v2309_v19 }
 0x20b   :  { %v3355_v4 = vpack.c.bf16 %v2177_v35, %v2177_v35  ;;  %v2180_v29 = vadd.f32 %v2116_v2, %v5432_v39  ;;  %v2053_v11 = vmul.f32 0.999995, %v3788_v54  ;;  %v2310_v48 = vadd.f32 %v2246_v0, %v5436_v53  ;;  %2630 = vst.msk [vmem:[%s6427_s4 + $0x88] sm:$0xf] %vm2595_vm1, %v3357_v32 }
 0x20c   :  { %v2114_v16 = vmul.f32 %v5309_v21, %v2048_v24  ;;  %v2244_v6 = vmul.f32 %v5312_v40, %v2048_v24  ;;  %2910 = vrot.lane.b32.xlu1 %v3416_v8, %s3851_s23  ;;  %v1904_v42 = vpop.f32.mrf.mxu1  ;;  %v2307_v28 = vadd.f32 %v2243_v7, %v5428_v63  ;;  %v5824_v27 = vmul.f32 %v5104_v61, %v6705_v5  ;;  %v6706_v24 = vld [vmem:[#allocation26_spill] sm:$0xff] }
 0x20d   :  { %v3358_v20 = vpack.c.bf16 %v2180_v29, %v2180_v29  ;;  %v2119_v39 = vmul.f32 %v5309_v21, %v2053_v11  ;;  %v2249_v53 = vmul.f32 %v5312_v40, %v2053_v11  ;;  %v2051_v13 = vmul.f32 0.999995, %v1904_v42  ;;  %2628 = vst.msk [vmem:[%s6427_s4 + $0x80] sm:$0xf] %vm2595_vm1, %v3355_v4 }
 0x20e   :  { %v2178_v44 = vadd.f32 %v2114_v16, %v5460_v50  ;;  %2920 = vrot.lane.b32.xlu0 %v3421_v33, %s3851_s23  ;;  %v3789_v63 = vpop.f32.mrf.mxu1  ;;  %v3422_v22 = vpack.c.bf16 %v2310_v48, %v2310_v48  ;;  %v2308_v25 = vadd.f32 %v2244_v6, %v5467_v56  ;;  %v5831_v23 = vmul.f32 %v5106_v52, %v6705_v5 }
 0x20f   :  { %v2183_v7 = vadd.f32 %v2119_v39, %v5483_v49  ;;  %v2117_v37 = vmul.f32 %v5309_v21, %v2051_v13  ;;  %v2054_v18 = vmul.f32 0.999995, %v3789_v63  ;;  %2631 = vst.msk [vmem:[%s6427_s4 + $0x8c] sm:$0xf] %vm2595_vm1, %v3358_v20  ;;  %v2247_v19 = vmul.f32 %v5312_v40, %v2051_v13  ;;  %v6707_v13 = vld [vmem:[#allocation25_spill] sm:$0xff] }
 0x210   :  { %v3356_v50 = vpack.c.bf16 %v2178_v44, %v2178_v44  ;;  %2922 = vrot.lane.b32.xlu1 %v3422_v22, %s3851_s23  ;;  %v1907_v56 = vpop.f32.mrf.mxu1  ;;  %v3419_v32 = vpack.c.bf16 %v2307_v28, %v2307_v28  ;;  %v2313_v35 = vadd.f32 %v2249_v53, %v5487_v31  ;;  %v5847_v54 = vmul.f32 %v5104_v61, %v6706_v24 }
 0x211   :  { %v3361_v2 = vpack.c.bf16 %v2183_v7, %v2183_v7  ;;  %v2181_v49 = vadd.f32 %v2117_v37, %v5512_v17  ;;  %v2120_v0 = vmul.f32 %v5309_v21, %v2054_v18  ;;  %v2250_v51 = vmul.f32 %v5312_v40, %v2054_v18 }
 0x212   :  { %v5851_v8 = vmul.f32 %v5106_v52, %v6706_v24  ;;  %v2052_v4 = vmul.f32 0.999995, %v1907_v56  ;;  %2916 = vrot.lane.b32.xlu0 %v3419_v32, %s3851_s23  ;;  %v3792_v29 = vpop.f32.mrf.mxu1  ;;  %v3420_v31 = vpack.c.bf16 %v2308_v25, %v2308_v25  ;;  %2629 = vst.msk [vmem:[%s6427_s4 + $0x84] sm:$0xf] %vm2595_vm1, %v3356_v50  ;;  %v3425_v28 = vpack.c.bf16 %v2313_v35, %v2313_v35 }
 0x213   :  { %v3359_v17 = vpack.c.bf16 %v2181_v49, %v2181_v49  ;;  %v2184_v11 = vadd.f32 %v2120_v0, %v5535_v10  ;;  %v2057_v48 = vmul.f32 0.999995, %v3792_v29  ;;  %v2314_v16 = vadd.f32 %v2250_v51, %v5539_v47  ;;  %2634 = vst.msk [vmem:[%s6427_s4 + $0x98] sm:$0xf] %vm2595_vm1, %v3361_v2  ;;  %v6708_v49 = vld [vmem:[#allocation28_spill] sm:$0xff] }
 0x214   :  { %v2118_v6 = vmul.f32 %v5309_v21, %v2052_v4  ;;  %v2248_v42 = vmul.f32 %v5312_v40, %v2052_v4  ;;  %2918 = vrot.lane.b32.xlu1 %v3420_v31, %s3851_s23  ;;  %v1920_v33 = vpop.f32.mrf.mxu1  ;;  %v2311_v20 = vadd.f32 %v2247_v19, %v5519_v41  ;;  %v5876_v5 = vmul.f32 %v5104_v61, %v6707_v13 }
 0x215   :  { %v3362_v39 = vpack.c.bf16 %v2184_v11, %v2184_v11  ;;  %v2123_v10 = vmul.f32 %v5309_v21, %v2057_v48  ;;  %v2253_v47 = vmul.f32 %v5312_v40, %v2057_v48  ;;  %v2055_v53 = vmul.f32 0.999995, %v1920_v33  ;;  %2632 = vst.msk [vmem:[%s6427_s4 + $0x90] sm:$0xf] %vm2595_vm1, %v3359_v17 }
 0x216   :  { %v2182_v44 = vadd.f32 %v2118_v6, %v5564_v45  ;;  %2928 = vrot.lane.b32.xlu0 %v3425_v28, %s3851_s23  ;;  %v3793_v41 = vpop.f32.mrf.mxu1  ;;  %v3426_v63 = vpack.c.bf16 %v2314_v16, %v2314_v16  ;;  %v2312_v22 = vadd.f32 %v2248_v42, %v5571_v12  ;;  %v5883_v25 = vmul.f32 %v5106_v52, %v6707_v13 }
 0x217   :  { %v2187_v7 = vadd.f32 %v2123_v10, %v5587_v58  ;;  %v2121_v37 = vmul.f32 %v5309_v21, %v2055_v53  ;;  %v2058_v18 = vmul.f32 0.999995, %v3793_v41  ;;  %2635 = vst.msk [vmem:[%s6427_s4 + $0x9c] sm:$0xf] %vm2595_vm1, %v3362_v39  ;;  %v2251_v50 = vmul.f32 %v5312_v40, %v2055_v53 }
 0x218   :  { %v3360_v45 = vpack.c.bf16 %v2182_v44, %v2182_v44  ;;  %2930 = vrot.lane.b32.xlu1 %v3426_v63, %s3851_s23  ;;  %v1923_v12 = vpop.f32.mrf.mxu1  ;;  %v3423_v19 = vpack.c.bf16 %v2311_v20, %v2311_v20  ;;  %v2317_v56 = vadd.f32 %v2253_v47, %v5591_v9  ;;  %v5899_v0 = vmul.f32 %v5104_v61, %v6708_v49  ;;  %v6709_v20 = vld [vmem:[#allocation30_spill] sm:$0xff] }
 0x219   :  { %v3365_v32 = vpack.c.bf16 %v2187_v7, %v2187_v7  ;;  %v2185_v58 = vadd.f32 %v2121_v37, %v5616_v38  ;;  %v2124_v35 = vmul.f32 %v5309_v21, %v2058_v18  ;;  %v2254_v2 = vmul.f32 %v5312_v40, %v2058_v18 }
 0x21a   :  { %v5903_v51 = vmul.f32 %v5106_v52, %v6708_v49  ;;  %v2056_v24 = vmul.f32 0.999995, %v1923_v12  ;;  %2924 = vrot.lane.b32.xlu0 %v3423_v19, %s3851_s23  ;;  %v3796_v4 = vpop.f32.mrf.mxu1  ;;  %v3424_v9 = vpack.c.bf16 %v2312_v22, %v2312_v22  ;;  %2633 = vst.msk [vmem:[%s6427_s4 + $0x94] sm:$0xf] %vm2595_vm1, %v3360_v45  ;;  %v3429_v6 = vpack.c.bf16 %v2317_v56, %v2317_v56  ;;  %v6710_v12 = vld [vmem:[#allocation29_spill] sm:$0xff] }
 0x21b   :  { %v3363_v38 = vpack.c.bf16 %v2185_v58, %v2185_v58  ;;  %v2188_v29 = vadd.f32 %v2124_v35, %v5639_v43  ;;  %v2061_v31 = vmul.f32 0.999995, %v3796_v4  ;;  %v2318_v17 = vadd.f32 %v2254_v2, %v5643_v3  ;;  %2638 = vst.msk [vmem:[%s6427_s4 + $0xa8] sm:$0xf] %vm2595_vm1, %v3365_v32 }
 0x21c   :  { %v2122_v11 = vmul.f32 %v5309_v21, %v2056_v24  ;;  %v2252_v48 = vmul.f32 %v5312_v40, %v2056_v24  ;;  %2926 = vrot.lane.b32.xlu1 %v3424_v9, %s3851_s23  ;;  %v1936_v16 = vpop.f32.mrf.mxu1  ;;  %v2315_v42 = vadd.f32 %v2251_v50, %v5623_v57  ;;  %v5928_v39 = vmul.f32 %v5104_v61, %v6709_v20 }
 0x21d   :  { %v3366_v33 = vpack.c.bf16 %v2188_v29, %v2188_v29  ;;  %v2127_v43 = vmul.f32 %v5309_v21, %v2061_v31  ;;  %v2257_v3 = vmul.f32 %v5312_v40, %v2061_v31  ;;  %v2059_v28 = vmul.f32 0.999995, %v1936_v16  ;;  %2636 = vst.msk [vmem:[%s6427_s4 + $0xa0] sm:$0xf] %vm2595_vm1, %v3363_v38 }
 0x21e   :  { %v2186_v10 = vadd.f32 %v2122_v11, %v5668_v62  ;;  %2936 = vrot.lane.b32.xlu0 %v3429_v6, %s3851_s23  ;;  %v3797_v57 = vpop.f32.mrf.mxu1  ;;  %v3430_v47 = vpack.c.bf16 %v2318_v17, %v2318_v17  ;;  %v2316_v53 = vadd.f32 %v2252_v48, %v5675_v26  ;;  %v5935_v13 = vmul.f32 %v5106_v52, %v6709_v20  ;;  %v6711_v11 = vld [vmem:[#allocation39_spill] sm:$0xff] }
 0x21f   :  { %v2191_v44 = vadd.f32 %v2127_v43, %v5691_v36  ;;  %v2125_v41 = vmul.f32 %v5309_v21, %v2059_v28  ;;  %v2062_v63 = vmul.f32 0.999995, %v3797_v57  ;;  %2639 = vst.msk [vmem:[%s6427_s4 + $0xac] sm:$0xf] %vm2595_vm1, %v3366_v33  ;;  %v2255_v22 = vmul.f32 %v5312_v40, %v2059_v28 }
 0x220   :  { %v3364_v62 = vpack.c.bf16 %v2186_v10, %v2186_v10  ;;  %2938 = vrot.lane.b32.xlu1 %v3430_v47, %s3851_s23  ;;  %v1939_v26 = vpop.f32.mrf.mxu1  ;;  %v3427_v7 = vpack.c.bf16 %v2315_v42, %v2315_v42  ;;  %v2321_v37 = vadd.f32 %v2257_v3, %v5695_v59  ;;  %v5951_v19 = vmul.f32 %v5104_v61, %v6710_v12 }
 0x221   :  { %v3369_v18 = vpack.c.bf16 %v2191_v44, %v2191_v44  ;;  %v2189_v36 = vadd.f32 %v2125_v41, %v5720_v15  ;;  %v2128_v45 = vmul.f32 %v5309_v21, %v2062_v63  ;;  %v2258_v50 = vmul.f32 %v5312_v40, %v2062_v63  ;;  %v6712_v41 = vld [vmem:[#allocation34_spill] sm:$0xff] }
 0x222   :  { %v5955_v56 = vmul.f32 %v5106_v52, %v6710_v12  ;;  %v2060_v32 = vmul.f32 0.999995, %v1939_v26  ;;  %2932 = vrot.lane.b32.xlu0 %v3427_v7, %s3851_s23  ;;  %v3800_v58 = vpop.f32.mrf.mxu1  ;;  %v3428_v59 = vpack.c.bf16 %v2316_v53, %v2316_v53  ;;  %2637 = vst.msk [vmem:[%s6427_s4 + $0xa4] sm:$0xf] %vm2595_vm1, %v3364_v62  ;;  %v3433_v38 = vpack.c.bf16 %v2321_v37, %v2321_v37 }
 0x223   :  { %v3367_v15 = vpack.c.bf16 %v2189_v36, %v2189_v36  ;;  %v2192_v35 = vadd.f32 %v2128_v45, %v5743_v46  ;;  %v2065_v2 = vmul.f32 0.999995, %v3800_v58  ;;  %v2322_v49 = vadd.f32 %v2258_v50, %v5747_v34  ;;  %2642 = vst.msk [vmem:[%s6427_s4 + $0xb8] sm:$0xf] %vm2595_vm1, %v3369_v18 }
 0x224   :  { %v2126_v24 = vmul.f32 %v5309_v21, %v2060_v32  ;;  %v2256_v4 = vmul.f32 %v5312_v40, %v2060_v32  ;;  %2934 = vrot.lane.b32.xlu1 %v3428_v59, %s3851_s23  ;;  %v1952_v9 = vpop.f32.mrf.mxu1  ;;  %v2319_v29 = vadd.f32 %v2255_v22, %v5727_v14  ;;  %v5980_v48 = vmul.f32 %v5104_v61, %v6711_v11 }
 0x225   :  { %v3370_v31 = vpack.c.bf16 %v2192_v35, %v2192_v35  ;;  %v2131_v46 = vmul.f32 %v5309_v21, %v2065_v2  ;;  %v2261_v34 = vmul.f32 %v5312_v40, %v2065_v2  ;;  %v2063_v17 = vmul.f32 0.999995, %v1952_v9  ;;  %2640 = vst.msk [vmem:[%s6427_s4 + $0xb0] sm:$0xf] %vm2595_vm1, %v3367_v15  ;;  %v6713_v15 = vld [vmem:[#allocation31_spill] sm:$0xff] }
 0x226   :  { %v2190_v16 = vadd.f32 %v2126_v24, %v5772_v30  ;;  %2944 = vrot.lane.b32.xlu0 %v3433_v38, %s3851_s23  ;;  %v3801_v14 = vpop.f32.mrf.mxu1  ;;  %v3434_v6 = vpack.c.bf16 %v2322_v49, %v2322_v49  ;;  %v2320_v42 = vadd.f32 %v2256_v4, %v5779_v60  ;;  %v5987_v33 = vmul.f32 %v5106_v52, %v6711_v11 }
 0x227   :  { %v2195_v43 = vadd.f32 %v2131_v46, %v5795_v55  ;;  %v2129_v3 = vmul.f32 %v5309_v21, %v2063_v17  ;;  %v2066_v28 = vmul.f32 0.999995, %v3801_v14  ;;  %2643 = vst.msk [vmem:[%s6427_s4 + $0xbc] sm:$0xf] %vm2595_vm1, %v3370_v31  ;;  %v2259_v20 = vmul.f32 %v5312_v40, %v2063_v17  ;;  %v6714_v14 = vld [vmem:[#allocation33_spill] sm:$0xff] }
 0x228   :  { %v3368_v30 = vpack.c.bf16 %v2190_v16, %v2190_v16  ;;  %2946 = vrot.lane.b32.xlu1 %v3434_v6, %s3851_s23  ;;  %v1955_v60 = vpop.f32.mrf.mxu1  ;;  %v3431_v10 = vpack.c.bf16 %v2319_v29, %v2319_v29  ;;  %v2325_v57 = vadd.f32 %v2261_v34, %v5799_v1  ;;  %v6003_v63 = vmul.f32 %v5104_v61, %v6712_v41 }
 0x229   :  { %v3373_v47 = vpack.c.bf16 %v2195_v43, %v2195_v43  ;;  %v2193_v55 = vadd.f32 %v2129_v3, %v5824_v27  ;;  %v2132_v53 = vmul.f32 %v5309_v21, %v2066_v28  ;;  %v2262_v44 = vmul.f32 %v5312_v40, %v2066_v28 }
 0x22a   :  { %v6007_v62 = vmul.f32 %v5106_v52, %v6712_v41  ;;  %v2064_v22 = vmul.f32 0.999995, %v1955_v60  ;;  %2940 = vrot.lane.b32.xlu0 %v3431_v10, %s3851_s23  ;;  %v3804_v26 = vpop.f32.mrf.mxu1  ;;  %v3432_v1 = vpack.c.bf16 %v2320_v42, %v2320_v42  ;;  %2641 = vst.msk [vmem:[%s6427_s4 + $0xb4] sm:$0xf] %vm2595_vm1, %v3368_v30  ;;  %v3437_v12 = vpack.c.bf16 %v2325_v57, %v2325_v57  ;;  %v6715_v41 = vld [vmem:[#allocation32_spill] sm:$0xff] }
 0x22b   :  { %v3371_v27 = vpack.c.bf16 %v2193_v55, %v2193_v55  ;;  %v2196_v7 = vadd.f32 %v2132_v53, %v5847_v54  ;;  %v2069_v37 = vmul.f32 0.999995, %v3804_v26  ;;  %v2326_v18 = vadd.f32 %v2262_v44, %v5851_v8  ;;  %2646 = vst.msk [vmem:[%s6427_s4 + $0xc8] sm:$0xf] %vm2595_vm1, %v3373_v47 }
 0x22c   :  { %v2130_v36 = vmul.f32 %v5309_v21, %v2064_v22  ;;  %v2260_v45 = vmul.f32 %v5312_v40, %v2064_v22  ;;  %2942 = vrot.lane.b32.xlu1 %v3432_v1, %s3851_s23  ;;  %v1968_v50 = vpop.f32.mrf.mxu1  ;;  %v2323_v32 = vadd.f32 %v2259_v20, %v5831_v23  ;;  %v1117_v35 = vmul.f32 %v5104_v61, %v6713_v15 }
 0x22d   :  { %v3374_v58 = vpack.c.bf16 %v2196_v7, %v2196_v7  ;;  %v2135_v54 = vmul.f32 %v5309_v21, %v2069_v37  ;;  %v2265_v8 = vmul.f32 %v5312_v40, %v2069_v37  ;;  %v2067_v59 = vmul.f32 0.999995, %v1968_v50  ;;  %2644 = vst.msk [vmem:[%s6427_s4 + $0xc0] sm:$0xf] %vm2595_vm1, %v3371_v27 }
 0x22e   :  { %v2194_v2 = vadd.f32 %v2130_v36, %v5876_v5  ;;  %2952 = vrot.lane.b32.xlu0 %v3437_v12, %s3851_s23  ;;  %v3805_v49 = vpop.f32.mrf.mxu1  ;;  %v3438_v23 = vpack.c.bf16 %v2326_v18, %v2326_v18  ;;  %v2324_v24 = vadd.f32 %v2260_v45, %v5883_v25  ;;  %v6037_v4 = vmul.f32 %v5106_v52, %v6713_v15 }
 0x22f   :  { %v2199_v9 = vadd.f32 %v2135_v54, %v5899_v0  ;;  %v2133_v38 = vmul.f32 %v5309_v21, %v2067_v59  ;;  %v2070_v29 = vmul.f32 0.999995, %v3805_v49  ;;  %2647 = vst.msk [vmem:[%s6427_s4 + $0xcc] sm:$0xf] %vm2595_vm1, %v3374_v58  ;;  %v2263_v31 = vmul.f32 %v5312_v40, %v2067_v59 }
 0x230   :  { %v3372_v5 = vpack.c.bf16 %v2194_v2, %v2194_v2  ;;  %2954 = vrot.lane.b32.xlu1 %v3438_v23, %s3851_s23  ;;  %v1971_v25 = vpop.f32.mrf.mxu1  ;;  %v3435_v46 = vpack.c.bf16 %v2323_v32, %v2323_v32  ;;  %v2329_v34 = vadd.f32 %v2265_v8, %v5903_v51  ;;  %v1120_v6 = vmul.f32 %v5104_v61, %v6714_v14  ;;  %v6716_v8 = vld [vmem:[#allocation40_spill] sm:$0xff] }
 0x231   :  { %v3377_v17 = vpack.c.bf16 %v2199_v9, %v2199_v9  ;;  %v2197_v0 = vadd.f32 %v2133_v38, %v5928_v39  ;;  %v2136_v11 = vmul.f32 %v5309_v21, %v2070_v29  ;;  %v2266_v16 = vmul.f32 %v5312_v40, %v2070_v29 }
 0x232   :  { %v1186_v42 = vmul.f32 %v5106_v52, %v6714_v14  ;;  %v2068_v43 = vmul.f32 0.999995, %v1971_v25  ;;  %2948 = vrot.lane.b32.xlu0 %v3435_v46, %s3851_s23  ;;  %v3808_v3 = vpop.f32.mrf.mxu1  ;;  %v3436_v28 = vpack.c.bf16 %v2324_v24, %v2324_v24  ;;  %2645 = vst.msk [vmem:[%s6427_s4 + $0xc4] sm:$0xf] %vm2595_vm1, %v3372_v5  ;;  %v3441_v47 = vpack.c.bf16 %v2329_v34, %v2329_v34  ;;  %v6717_v25 = vld [vmem:[#allocation41_spill] sm:$0xff] }
 0x233   :  { %v3375_v51 = vpack.c.bf16 %v2197_v0, %v2197_v0  ;;  %v2200_v39 = vadd.f32 %v2136_v11, %v5951_v19  ;;  %v2073_v30 = vmul.f32 0.999995, %v3808_v3  ;;  %v2330_v20 = vadd.f32 %v2266_v16, %v5955_v56  ;;  %2650 = vst.msk [vmem:[%s6427_s4 + $0xd8] sm:$0xf] %vm2595_vm1, %v3377_v17 }
 0x234   :  { %v2134_v60 = vmul.f32 %v5309_v21, %v2068_v43  ;;  %v2264_v10 = vmul.f32 %v5312_v40, %v2068_v43  ;;  %2950 = vrot.lane.b32.xlu1 %v3436_v28, %s3851_s23  ;;  %v1984_v57 = vpop.f32.mrf.mxu1  ;;  %v2327_v55 = vadd.f32 %v2263_v31, %v5935_v13  ;;  %v1118_v22 = vmul.f32 %v5104_v61, %v6715_v41 }
 0x235   :  { %v3378_v53 = vpack.c.bf16 %v2200_v39, %v2200_v39  ;;  %v2139_v19 = vmul.f32 %v5309_v21, %v2073_v30  ;;  %v2269_v56 = vmul.f32 %v5312_v40, %v2073_v30  ;;  %v2071_v44 = vmul.f32 0.999995, %v1984_v57  ;;  %2648 = vst.msk [vmem:[%s6427_s4 + $0xd0] sm:$0xf] %vm2595_vm1, %v3375_v51 }
 0x236   :  { %v2198_v26 = vadd.f32 %v2134_v60, %v5980_v48  ;;  %2960 = vrot.lane.b32.xlu0 %v3441_v47, %s3851_s23  ;;  %v3809_v1 = vpop.f32.mrf.mxu1  ;;  %v3442_v13 = vpack.c.bf16 %v2330_v20, %v2330_v20  ;;  %v2328_v27 = vadd.f32 %v2264_v10, %v5987_v33  ;;  %v1184_v7 = vmul.f32 %v5106_v52, %v6715_v41  ;;  %v6718_v47 = vld [vmem:[#allocation42_spill] sm:$0xff] }
 0x237   :  { %v2203_v37 = vadd.f32 %v2139_v19, %v6003_v63  ;;  %v2137_v18 = vmul.f32 %v5309_v21, %v2071_v44  ;;  %v2074_v36 = vmul.f32 0.999995, %v3809_v1  ;;  %2651 = vst.msk [vmem:[%s6427_s4 + $0xdc] sm:$0xf] %vm2595_vm1, %v3378_v53  ;;  %v2267_v45 = vmul.f32 %v5312_v40, %v2071_v44  ;;  %v6719_v44 = vld [vmem:[#allocation43_spill] sm:$0xff] }
 0x238   :  { %v3376_v48 = vpack.c.bf16 %v2198_v26, %v2198_v26  ;;  %2962 = vrot.lane.b32.xlu1 %v3442_v13, %s3851_s23  ;;  %v1987_v50 = vpop.f32.mrf.mxu1  ;;  %v3439_v33 = vpack.c.bf16 %v2327_v55, %v2327_v55  ;;  %v2333_v12 = vadd.f32 %v2269_v56, %v6007_v62  ;;  %v1123_v59 = vmul.f32 %v5104_v61, %v6716_v8 }
 0x239   :  { %v3381_v32 = vpack.c.bf16 %v2203_v37, %v2203_v37  ;;  %v2201_v58 = vadd.f32 %v2137_v18, %v1117_v35  ;;  %v2140_v63 = vmul.f32 %v5309_v21, %v2074_v36  ;;  %v2270_v54 = vmul.f32 %v5312_v40, %v2074_v36 }
 0x23a   :  { %v2072_v15 = vmul.f32 0.999995, %v1987_v50  ;;  %2956 = vrot.lane.b32.xlu0 %v3439_v33, %s3851_s23  ;;  %v3812_v2 = vpop.f32.mrf.mxu1  ;;  %v3440_v49 = vpack.c.bf16 %v2328_v27, %v2328_v27  ;;  %2649 = vst.msk [vmem:[%s6427_s4 + $0xd4] sm:$0xf] %vm2595_vm1, %v3376_v48  ;;  %v3445_v5 = vpack.c.bf16 %v2333_v12, %v2333_v12  ;;  %v2331_v31 = vadd.f32 %v2267_v45, %v6037_v4 }
 0x23b   :  { %v3379_v62 = vpack.c.bf16 %v2201_v58, %v2201_v58  ;;  %v2204_v35 = vadd.f32 %v2140_v63, %v1120_v6  ;;  %v2077_v23 = vmul.f32 0.999995, %v3812_v2  ;;  %2654 = vst.msk [vmem:[%s6427_s4 + $0xe8] sm:$0xf] %vm2595_vm1, %v3381_v32  ;;  %v2334_v24 = vadd.f32 %v2270_v54, %v1186_v42 }
 0x23c   :  { %v2138_v9 = vmul.f32 %v5309_v21, %v2072_v15  ;;  %v2268_v38 = vmul.f32 %v5312_v40, %v2072_v15  ;;  %2958 = vrot.lane.b32.xlu1 %v3440_v49, %s3851_s23  ;;  %v2000_v29 = vpop.f32.mrf.mxu1  ;;  %v1121_v46 = vmul.f32 %v5104_v61, %v6717_v25  ;;  %v1189_v39 = vmul.f32 %v5106_v52, %v6716_v8 }
 0x23d   :  { %v3382_v34 = vpack.c.bf16 %v2204_v35, %v2204_v35  ;;  %v2143_v17 = vmul.f32 %v5309_v21, %v2077_v23  ;;  %v2075_v0 = vmul.f32 0.999995, %v2000_v29  ;;  %2652 = vst.msk [vmem:[%s6427_s4 + $0xe0] sm:$0xf] %vm2595_vm1, %v3379_v62  ;;  %v2273_v16 = vmul.f32 %v5312_v40, %v2077_v23 }
 0x23e   :  { %v2202_v11 = vadd.f32 %v2138_v9, %v1118_v22  ;;  %v2857_v14 = vpop.permute.xlu1 %2856  ;;  %2968 = vrot.lane.b32.xlu0 %v3445_v5, %s3851_s23  ;;  %v3813_v6 = vpop.f32.mrf.mxu1  ;;  %v3446_v4 = vpack.c.bf16 %v2334_v24, %v2334_v24  ;;  %v2332_v42 = vadd.f32 %v2268_v38, %v1184_v7  ;;  %v1187_v30 = vmul.f32 %v5106_v52, %v6717_v25 }
 0x23f   :  { %v2207_v43 = vadd.f32 %v2143_v17, %v1123_v59  ;;  %v2141_v3 = vmul.f32 %v5309_v21, %v2075_v0  ;;  %v2271_v28 = vmul.f32 %v5312_v40, %v2075_v0  ;;  %3047 = vst.msk [vmem:[%s6427_s4 + $0x8] sm:$0xf] %vm3044_vm2, %v2857_v14  ;;  %v2078_v51 = vmul.f32 0.999995, %v3813_v6 }
 0x240   :  { %2655 = vst.msk [vmem:[%s6427_s4 + $0xec] sm:$0xf] %vm2595_vm1, %v3382_v34  ;;  %v3380_v20 = vpack.c.bf16 %v2202_v11, %v2202_v11  ;;  %v2853_v60 = vpop.permute.xlu0 %2852  ;;  %2970 = vrot.lane.b32.xlu1 %v3446_v4, %s3851_s23  ;;  %v2003_v10 = vpop.f32.mrf.mxu1  ;;  %v3443_v57 = vpack.c.bf16 %v2331_v31, %v2331_v31  ;;  %v1124_v55 = vmul.f32 %v5104_v61, %v6718_v47 }
 0x241   :  { %v3385_v53 = vpack.c.bf16 %v2207_v43, %v2207_v43  ;;  %v2205_v19 = vadd.f32 %v2141_v3, %v1121_v46  ;;  %v2144_v56 = vmul.f32 %v5309_v21, %v2078_v51  ;;  %3045 = vst.msk [vmem:[%s6427_s4] sm:$0xf] %vm3044_vm2, %v2853_v60  ;;  %v1122_v41 = vmul.f32 %v5104_v61, %v6719_v44 }
 0x242   :  { %2653 = vst.msk [vmem:[%s6427_s4 + $0xe4] sm:$0xf] %vm2595_vm1, %v3380_v20  ;;  %v2076_v22 = vmul.f32 0.999995, %v2003_v10  ;;  %v2859_v26 = vpop.permute.xlu1 %2858  ;;  %2964 = vrot.lane.b32.xlu0 %v3443_v57, %s3851_s23  ;;  %v3444_v1 = vpack.c.bf16 %v2332_v42, %v2332_v42  ;;  %v2335_v13 = vadd.f32 %v2271_v28, %v1187_v30  ;;  %v1188_v27 = vmul.f32 %v5106_v52, %v6719_v44 }
 0x243   :  { %v3383_v7 = vpack.c.bf16 %v2205_v19, %v2205_v19  ;;  %2658 = vst.msk [vmem:[%s6427_s4 + $0xf8] sm:$0xf] %vm2595_vm1, %v3385_v53  ;;  %v2208_v61 = vadd.f32 %v2144_v56, %v1124_v55  ;;  %v2337_v37 = vadd.f32 %v2273_v16, %v1189_v39  ;;  %v2274_v18 = vmul.f32 %v5312_v40, %v2078_v51 }
 0x244   :  { %3048 = vst.msk [vmem:[%s6427_s4 + $0xc] sm:$0xf] %vm3044_vm2, %v2859_v26  ;;  %v2142_v36 = vmul.f32 %v5309_v21, %v2076_v22  ;;  %v2272_v48 = vmul.f32 %v5312_v40, %v2076_v22  ;;  %v2855_v45 = vpop.permute.xlu0 %2854  ;;  %2966 = vrot.lane.b32.xlu1 %v3444_v1, %s3851_s23  ;;  %v3447_v50 = vpack.c.bf16 %v2335_v13, %v2335_v13 }
 0x245   :  { %2656 = vst.msk [vmem:[%s6427_s4 + $0xf0] sm:$0xf] %vm2595_vm1, %v3383_v7  ;;  %v3386_v33 = vpack.c.bf16 %v2208_v61, %v2208_v61  ;;  %v1190_v21 = vmul.f32 %v5106_v52, %v6718_v47  ;;  %v3449_v63 = vpack.c.bf16 %v2337_v37, %v2337_v37 }
 0x246   :  { %3046 = vst.msk [vmem:[%s6427_s4 + $0x4] sm:$0xf] %vm3044_vm2, %v2855_v45  ;;  %v2206_v12 = vadd.f32 %v2142_v36, %v1122_v41  ;;  %v2336_v40 = vadd.f32 %v2272_v48, %v1188_v27  ;;  %2972 = vrot.lane.b32.xlu0 %v3447_v50, %s3851_s23 }
 0x247   :  { %2659 = vst.msk [vmem:[%s6427_s4 + $0xfc] sm:$0xf] %vm2595_vm1, %v3386_v33  ;;  %v2338_v8 = vadd.f32 %v2274_v18, %v1190_v21 }
 0x248   :  { %v3384_v32 = vpack.c.bf16 %v2206_v12, %v2206_v12  ;;  %v2865_v58 = vpop.permute.xlu0 %2864  ;;  %v3448_v54 = vpack.c.bf16 %v2336_v40, %v2336_v40 }
 0x249   :  { %3051 = vst.msk [vmem:[%s6427_s4 + $0x18] sm:$0xf] %vm3044_vm2, %v2865_v58  ;;  %v3450_v15 = vpack.c.bf16 %v2338_v8, %v2338_v8 }
 0x24a   :  { %2657 = vst.msk [vmem:[%s6427_s4 + $0xf4] sm:$0xf] %vm2595_vm1, %v3384_v32  ;;  %v2867_v52 = vpop.permute.xlu1 %2866  ;;  %2976 = vrot.lane.b32.xlu0 %v3449_v63, %s3851_s23  ;;  %2974 = vrot.lane.b32.xlu1 %v3448_v54, %s3851_s23 }
 0x24b   :  { %3052 = vst.msk [vmem:[%s6427_s4 + $0x1c] sm:$0xf] %vm3044_vm2, %v2867_v52 }
 0x24c   :  { %v2861_v59 = vpop.permute.xlu0 %2860 }
 0x24d   :  { %3049 = vst.msk [vmem:[%s6427_s4 + $0x10] sm:$0xf] %vm3044_vm2, %v2861_v59 }
 0x24e   :  { %v2863_v2 = vpop.permute.xlu1 %2862  ;;  %2978 = vrot.lane.b32.xlu1 %v3450_v15, %s3851_s23 }
 0x24f   :  { %3050 = vst.msk [vmem:[%s6427_s4 + $0x14] sm:$0xf] %vm3044_vm2, %v2863_v2 }
 0x250   :  { %v2873_v49 = vpop.permute.xlu0 %2872 }
 0x251   :  { %3055 = vst.msk [vmem:[%s6427_s4 + $0x28] sm:$0xf] %vm3044_vm2, %v2873_v49 }
 0x252   :  { %v2875_v62 = vpop.permute.xlu1 %2874 }
 0x253   :  { %3056 = vst.msk [vmem:[%s6427_s4 + $0x2c] sm:$0xf] %vm3044_vm2, %v2875_v62 }
 0x254   :  { %v2869_v35 = vpop.permute.xlu0 %2868 }
 0x255   :  { %3053 = vst.msk [vmem:[%s6427_s4 + $0x20] sm:$0xf] %vm3044_vm2, %v2869_v35 }
 0x256   :  { %v2871_v23 = vpop.permute.xlu1 %2870 }
 0x257   :  { %3054 = vst.msk [vmem:[%s6427_s4 + $0x24] sm:$0xf] %vm3044_vm2, %v2871_v23 }
 0x258   :  { %v2881_v24 = vpop.permute.xlu0 %2880 }
 0x259   :  { %3059 = vst.msk [vmem:[%s6427_s4 + $0x38] sm:$0xf] %vm3044_vm2, %v2881_v24 }
 0x25a   :  { %v2883_v9 = vpop.permute.xlu1 %2882 }
 0x25b   :  { %3060 = vst.msk [vmem:[%s6427_s4 + $0x3c] sm:$0xf] %vm3044_vm2, %v2883_v9 }
 0x25c   :  { %v2877_v38 = vpop.permute.xlu0 %2876 }
 0x25d   :  { %3057 = vst.msk [vmem:[%s6427_s4 + $0x30] sm:$0xf] %vm3044_vm2, %v2877_v38 }
 0x25e   :  { %v2879_v29 = vpop.permute.xlu1 %2878 }
 0x25f   :  { %3058 = vst.msk [vmem:[%s6427_s4 + $0x34] sm:$0xf] %vm3044_vm2, %v2879_v29 }
 0x260   :  { %v2889_v5 = vpop.permute.xlu0 %2888 }
 0x261   :  { %3063 = vst.msk [vmem:[%s6427_s4 + $0x48] sm:$0xf] %vm3044_vm2, %v2889_v5 }
 0x262   :  { %v2891_v31 = vpop.permute.xlu1 %2890 }
 0x263   :  { %3064 = vst.msk [vmem:[%s6427_s4 + $0x4c] sm:$0xf] %vm3044_vm2, %v2891_v31 }
 0x264   :  { %v2885_v25 = vpop.permute.xlu0 %2884 }
 0x265   :  { %3061 = vst.msk [vmem:[%s6427_s4 + $0x40] sm:$0xf] %vm3044_vm2, %v2885_v25 }
 0x266   :  { %v2887_v46 = vpop.permute.xlu1 %2886 }
 0x267   :  { %3062 = vst.msk [vmem:[%s6427_s4 + $0x44] sm:$0xf] %vm3044_vm2, %v2887_v46 }
 0x268   :  { %v2897_v34 = vpop.permute.xlu0 %2896 }
 0x269   :  { %3067 = vst.msk [vmem:[%s6427_s4 + $0x58] sm:$0xf] %vm3044_vm2, %v2897_v34 }
 0x26a   :  { %v2899_v17 = vpop.permute.xlu1 %2898 }
 0x26b   :  { %3068 = vst.msk [vmem:[%s6427_s4 + $0x5c] sm:$0xf] %vm3044_vm2, %v2899_v17 }
 0x26c   :  { %v2893_v0 = vpop.permute.xlu0 %2892 }
 0x26d   :  { %3065 = vst.msk [vmem:[%s6427_s4 + $0x50] sm:$0xf] %vm3044_vm2, %v2893_v0 }
 0x26e   :  { %v2895_v11 = vpop.permute.xlu1 %2894 }
 0x26f   :  { %3066 = vst.msk [vmem:[%s6427_s4 + $0x54] sm:$0xf] %vm3044_vm2, %v2895_v11 }
 0x270   :  { %v2905_v16 = vpop.permute.xlu0 %2904 }
 0x271   :  { %3071 = vst.msk [vmem:[%s6427_s4 + $0x68] sm:$0xf] %vm3044_vm2, %v2905_v16 }
 0x272   :  { %v2907_v14 = vpop.permute.xlu1 %2906 }
 0x273   :  { %3072 = vst.msk [vmem:[%s6427_s4 + $0x6c] sm:$0xf] %vm3044_vm2, %v2907_v14 }
 0x274   :  { %v2901_v6 = vpop.permute.xlu0 %2900 }
 0x275   :  { %3069 = vst.msk [vmem:[%s6427_s4 + $0x60] sm:$0xf] %vm3044_vm2, %v2901_v6 }
 0x276   :  { %v2903_v4 = vpop.permute.xlu1 %2902 }
 0x277   :  { %3070 = vst.msk [vmem:[%s6427_s4 + $0x64] sm:$0xf] %vm3044_vm2, %v2903_v4 }
 0x278   :  { %v2913_v42 = vpop.permute.xlu0 %2912 }
 0x279   :  { %3075 = vst.msk [vmem:[%s6427_s4 + $0x78] sm:$0xf] %vm3044_vm2, %v2913_v42 }
 0x27a   :  { %v2915_v43 = vpop.permute.xlu1 %2914 }
 0x27b   :  { %3076 = vst.msk [vmem:[%s6427_s4 + $0x7c] sm:$0xf] %vm3044_vm2, %v2915_v43 }
 0x27c   :  { %v2909_v3 = vpop.permute.xlu0 %2908 }
 0x27d   :  { %3073 = vst.msk [vmem:[%s6427_s4 + $0x70] sm:$0xf] %vm3044_vm2, %v2909_v3 }
 0x27e   :  { %v2911_v28 = vpop.permute.xlu1 %2910 }
 0x27f   :  { %3074 = vst.msk [vmem:[%s6427_s4 + $0x74] sm:$0xf] %vm3044_vm2, %v2911_v28 }
 0x280   :  { %v2921_v51 = vpop.permute.xlu0 %2920 }
 0x281   :  { %3079 = vst.msk [vmem:[%s6427_s4 + $0x88] sm:$0xf] %vm3044_vm2, %v2921_v51 }
 0x282   :  { %v2923_v39 = vpop.permute.xlu1 %2922 }
 0x283   :  { %3080 = vst.msk [vmem:[%s6427_s4 + $0x8c] sm:$0xf] %vm3044_vm2, %v2923_v39 }
 0x284   :  { %v2917_v30 = vpop.permute.xlu0 %2916 }
 0x285   :  { %3077 = vst.msk [vmem:[%s6427_s4 + $0x80] sm:$0xf] %vm3044_vm2, %v2917_v30 }
 0x286   :  { %v2919_v20 = vpop.permute.xlu1 %2918 }
 0x287   :  { %3078 = vst.msk [vmem:[%s6427_s4 + $0x84] sm:$0xf] %vm3044_vm2, %v2919_v20 }
 0x288   :  { %v2929_v60 = vpop.permute.xlu0 %2928 }
 0x289   :  { %3083 = vst.msk [vmem:[%s6427_s4 + $0x98] sm:$0xf] %vm3044_vm2, %v2929_v60 }
 0x28a   :  { %v2931_v10 = vpop.permute.xlu1 %2930 }
 0x28b   :  { %3084 = vst.msk [vmem:[%s6427_s4 + $0x9c] sm:$0xf] %vm3044_vm2, %v2931_v10 }
 0x28c   :  { %v2925_v57 = vpop.permute.xlu0 %2924 }
 0x28d   :  { %3081 = vst.msk [vmem:[%s6427_s4 + $0x90] sm:$0xf] %vm3044_vm2, %v2925_v57 }
 0x28e   :  { %v2927_v47 = vpop.permute.xlu1 %2926 }
 0x28f   :  { %3082 = vst.msk [vmem:[%s6427_s4 + $0x94] sm:$0xf] %vm3044_vm2, %v2927_v47 }
 0x290   :  { %v2937_v55 = vpop.permute.xlu0 %2936 }
 0x291   :  { %3087 = vst.msk [vmem:[%s6427_s4 + $0xa8] sm:$0xf] %vm3044_vm2, %v2937_v55 }
 0x292   :  { %v2939_v53 = vpop.permute.xlu1 %2938 }
 0x293   :  { %3088 = vst.msk [vmem:[%s6427_s4 + $0xac] sm:$0xf] %vm3044_vm2, %v2939_v53 }
 0x294   :  { %v2933_v19 = vpop.permute.xlu0 %2932 }
 0x295   :  { %3085 = vst.msk [vmem:[%s6427_s4 + $0xa0] sm:$0xf] %vm3044_vm2, %v2933_v19 }
 0x296   :  { %v2935_v56 = vpop.permute.xlu1 %2934 }
 0x297   :  { %3086 = vst.msk [vmem:[%s6427_s4 + $0xa4] sm:$0xf] %vm3044_vm2, %v2935_v56 }
 0x298   :  { %v2945_v44 = vpop.permute.xlu0 %2944 }
 0x299   :  { %3091 = vst.msk [vmem:[%s6427_s4 + $0xb8] sm:$0xf] %vm3044_vm2, %v2945_v44 }
 0x29a   :  { %v2947_v41 = vpop.permute.xlu1 %2946 }
 0x29b   :  { %3092 = vst.msk [vmem:[%s6427_s4 + $0xbc] sm:$0xf] %vm3044_vm2, %v2947_v41 }
 0x29c   :  { %v2941_v22 = vpop.permute.xlu0 %2940 }
 0x29d   :  { %3089 = vst.msk [vmem:[%s6427_s4 + $0xb0] sm:$0xf] %vm3044_vm2, %v2941_v22 }
 0x29e   :  { %v2943_v26 = vpop.permute.xlu1 %2942 }
 0x29f   :  { %3090 = vst.msk [vmem:[%s6427_s4 + $0xb4] sm:$0xf] %vm3044_vm2, %v2943_v26 }
 0x2a0   :  { %v2953_v1 = vpop.permute.xlu0 %2952 }
 0x2a1   :  { %3095 = vst.msk [vmem:[%s6427_s4 + $0xc8] sm:$0xf] %vm3044_vm2, %v2953_v1 }
 0x2a2   :  { %v2955_v13 = vpop.permute.xlu1 %2954 }
 0x2a3   :  { %3096 = vst.msk [vmem:[%s6427_s4 + $0xcc] sm:$0xf] %vm3044_vm2, %v2955_v13 }
 0x2a4   :  { %v2949_v27 = vpop.permute.xlu0 %2948 }
 0x2a5   :  { %3093 = vst.msk [vmem:[%s6427_s4 + $0xc0] sm:$0xf] %vm3044_vm2, %v2949_v27 }
 0x2a6   :  { %v2951_v7 = vpop.permute.xlu1 %2950 }
 0x2a7   :  { %3094 = vst.msk [vmem:[%s6427_s4 + $0xc4] sm:$0xf] %vm3044_vm2, %v2951_v7 }
 0x2a8   :  { %v2961_v61 = vpop.permute.xlu0 %2960 }
 0x2a9   :  { %3099 = vst.msk [vmem:[%s6427_s4 + $0xd8] sm:$0xf] %vm3044_vm2, %v2961_v61 }
 0x2aa   :  { %v2963_v37 = vpop.permute.xlu1 %2962 }
 0x2ab   :  { %3100 = vst.msk [vmem:[%s6427_s4 + $0xdc] sm:$0xf] %vm3044_vm2, %v2963_v37 }
 0x2ac   :  { %v2957_v18 = vpop.permute.xlu0 %2956 }
 0x2ad   :  { %3097 = vst.msk [vmem:[%s6427_s4 + $0xd0] sm:$0xf] %vm3044_vm2, %v2957_v18 }
 0x2ae   :  { %v2959_v36 = vpop.permute.xlu1 %2958 }
 0x2af   :  { %3098 = vst.msk [vmem:[%s6427_s4 + $0xd4] sm:$0xf] %vm3044_vm2, %v2959_v36 }
 0x2b0   :  { %v2969_v48 = vpop.permute.xlu0 %2968 }
 0x2b1   :  { %3103 = vst.msk [vmem:[%s6427_s4 + $0xe8] sm:$0xf] %vm3044_vm2, %v2969_v48 }
 0x2b2   :  { %v2971_v45 = vpop.permute.xlu1 %2970 }
 0x2b3   :  { %3104 = vst.msk [vmem:[%s6427_s4 + $0xec] sm:$0xf] %vm3044_vm2, %v2971_v45 }
 0x2b4   :  { %v2965_v50 = vpop.permute.xlu0 %2964 }
 0x2b5   :  { %3101 = vst.msk [vmem:[%s6427_s4 + $0xe0] sm:$0xf] %vm3044_vm2, %v2965_v50 }
 0x2b6   :  { %v2967_v33 = vpop.permute.xlu1 %2966 }
 0x2b7   :  { %3102 = vst.msk [vmem:[%s6427_s4 + $0xe4] sm:$0xf] %vm3044_vm2, %v2967_v33 }
 0x2b8   :  { %v2973_v21 = vpop.permute.xlu0 %2972 }
 0x2b9   :  { %3105 = vst.msk [vmem:[%s6427_s4 + $0xf0] sm:$0xf] %vm3044_vm2, %v2973_v21 }
 0x2bc   :  { %v2977_v12 = vpop.permute.xlu0 %2976  ;;  %v2975_v40 = vpop.permute.xlu1 %2974 }
 0x2bd   :  { %3107 = vst.msk [vmem:[%s6427_s4 + $0xf8] sm:$0xf] %vm3044_vm2, %v2977_v12  ;;  %3106 = vst.msk [vmem:[%s6427_s4 + $0xf4] sm:$0xf] %vm3044_vm2, %v2975_v40 }
 0x2c0   :  { %v2979_v32 = vpop.permute.xlu1 %2978 }
 0x2c1   :  { %3108 = vst.msk [vmem:[%s6427_s4 + $0xfc] sm:$0xf] %vm3044_vm2, %v2979_v32 }
 0x2c2   :  { %3113 = vsyncpa [#allocation3], 1 }
 0x2c3   :  { %3114 = vsyncpa [#allocation5], 1 }

// kernel: _lambda_.12
= control target key start
LH: loop header
LB: loop body
LE: loop exit
PB: predicated region body
PF: predicated region fallthrough
CT: control target
= control target key end

     0   :  { %9 = vsyncpa [#allocation3], 0  ;;  %s738_s0 = inlined_call_operand.vmem [shape: f32[2,3], index: 0, kind: input, shape index: {}]   ;;  %s739_s1 = inlined_call_operand.vmem [shape: f32[2,2], index: 1, kind: input, shape index: {}]   ;;  %s740_s2 = inlined_call_operand.vmem [shape: bf16[32,128], index: 2, kind: input, shape index: {}]   ;;  %s741_s3 = inlined_call_operand.vmem [shape: bf16[2,128,128], index: 3, kind: input, shape index: {}]   ;;  %s742_s4 = inlined_call_operand.vmem [shape: bf16[32,256], index: 4, kind: output, shape index: {}]  }
   0x1   :  { %s17_s17 = sshll.u32 %s738_s0, 4  ;;  %s18_s17 = int_to_ptr.vmem [resolvable:$true] %s17_s17 }
   0x2   :  { %10 = vsyncpa [#allocation5], 0  ;;  %s27_s20 = sshll.u32 %s739_s1, 4  ;;  %s571_s21 = scalar_lea.vmem %s18_s17, 32  ;;  %s28_s20 = int_to_ptr.vmem [resolvable:$true] %s27_s20 }
   0x3   :  { %p572_p0 = scmp.ne.s32.totalorder %s18_s17, %s571_s21  ;;  %p576_p1 = scmp.lt.s32.totalorder %s18_s17, %s18_s17 }
   0x4   :  { %p577_p2 = scmp.lt.s32.totalorder %s571_s21, %s571_s21 }
   0x6   :  { %p578_p3 = por %p577_p2, %p576_p1 }
   0x8   :  { %p579_p4 = pnand %p578_p3, %p572_p0 }
   0xa   :  { %582 = shalt.err (!%p579_p4)
}
   0xb   :  { %s599_s22 = smov [#allocation2]   ;;  %s583_s23 = scalar_lea.vmem %s28_s20, 32 }
   0xc   :  { %20 = dma.vmem_to_smem %s18_s17, 32, %s599_s22, [#allocation3]  }
   0xd   :  { %p584_p5 = scmp.ne.s32.totalorder %s28_s20, %s583_s23  ;;  %p588_p6 = scmp.lt.s32.totalorder %s28_s20, %s28_s20 }
   0xe   :  { %p589_p7 = scmp.lt.s32.totalorder %s583_s23, %s583_s23 }
  0x10   :  { %p590_p8 = por %p589_p7, %p588_p6 }
  0x12   :  { %p591_p9 = pnand %p590_p8, %p584_p5 }
  0x14   :  { %594 = shalt.err (!%p591_p9)
}
  0x15   :  { %s600_s0 = smov [#allocation4]  }
  0x16   :  { %30 = dma.vmem_to_smem %s28_s20, 32, %s600_s0, [#allocation5]  }
  0x17   :  { %595 = dma.done.wait [#allocation3], 32  }
  0x18   :  { %596 = vsyncadd [#allocation3], 4294967264 }
  0x19   :  { %597 = dma.done.wait [#allocation5], 32  }
  0x1a   :  { %598 = vsyncadd [#allocation5], 4294967264 }
  0x1b   :  { %41 = sfence }
  0x1c   :  { %v555_v0 = vld [vmem:[%s741_s3 + $0x38] sm:$0xff]   ;;  %v556_v1 = vld [vmem:[%s741_s3 + $0x30] sm:$0xff]   ;;  %v557_v2 = vld [vmem:[%s741_s3 + $0x28] sm:$0xff]   ;;  %s51_s7 = sld [smem:[#allocation2]] }
  0x1d   :  { %513 = vmatprep.subr.bf16.mxu0 %v555_v0  ;;  %v558_v3 = vld [vmem:[%s741_s3 + $0x20] sm:$0xff]   ;;  %v492_v5 = vld [vmem:[%s740_s2 + $0x8] sm:$0xff]   ;;  %s428_s10 = sld [smem:[#allocation2 + $0x1]]  ;;  %v563_v6 = vld [vmem:[%s741_s3 + $0x78] sm:$0xff]  }
  0x1e   :  { %514 = vmatpush3.bf16.msra.mxu0 %v555_v0  ;;  %v485_v4 = vld [vmem:[%s740_s2] sm:$0xff]   ;;  %v564_v7 = vld [vmem:[%s741_s3 + $0x70] sm:$0xff]   ;;  %s429_s15 = sld [smem:[#allocation2 + $0x2]]  ;;  %v559_v8 = vld [vmem:[%s741_s3 + $0x18] sm:$0xff]   ;;  %v663_v11 = vunpack.c.l.bf16 %v492_v5  ;;  %533 = vmatprep.subr.bf16.mxu1 %v563_v6  ;;  %v665_v12 = vunpack.c.h.bf16 %v492_v5 }
  0x1f   :  { %515 = vmatprep.subr.bf16.mxu0 %v556_v1  ;;  %v659_v9 = vunpack.c.l.bf16 %v485_v4  ;;  %v661_v10 = vunpack.c.h.bf16 %v485_v4  ;;  %534 = vmatpush3.bf16.msra.mxu1 %v563_v6  ;;  %v565_v13 = vld [vmem:[%s741_s3 + $0x68] sm:$0xff]   ;;  %v560_v19 = vld [vmem:[%s741_s3 + $0x10] sm:$0xff]   ;;  %v566_v28 = vld [vmem:[%s741_s3 + $0x60] sm:$0xff]   ;;  %s440_s8 = sld [smem:[#allocation2 + $0x81]] }
  0x20   :  { %535 = vmatprep.subr.bf16.mxu1 %v564_v7  ;;  %v561_v35 = vld [vmem:[%s741_s3 + $0x8] sm:$0xff]   ;;  %v562_v42 = vld [vmem:[%s741_s3] sm:$0xff]   ;;  %v567_v47 = vld [vmem:[%s741_s3 + $0x58] sm:$0xff]   ;;  %s441_s9 = sld [smem:[#allocation2 + $0x82]] }
  0x21   :  { %v568_v48 = vld [vmem:[%s741_s3 + $0x50] sm:$0xff]   ;;  %v569_v49 = vld [vmem:[%s741_s3 + $0x48] sm:$0xff]   ;;  %v570_v50 = vld [vmem:[%s741_s3 + $0x40] sm:$0xff]   ;;  %s200_s3 = sld [smem:[#allocation4]] }
  0x22   :  { %516 = vmatpush3.bf16.msra.mxu0 %v556_v1  ;;  %v52_v14 = vstv %s51_s7  ;;  %s439_s7 = sld [smem:[#allocation2 + $0x80]] }
  0x23   :  { %517 = vmatprep.subr.bf16.mxu0 %v557_v2  ;;  %v53_v15 = vmul.f32 %v659_v9, %v52_v14  ;;  %v54_v16 = vmul.f32 %v661_v10, %v52_v14  ;;  %v58_v17 = vstv %s428_s10  ;;  %v55_v18 = vmul.f32 %v663_v11, %v52_v14  ;;  %536 = vmatpush3.bf16.msra.mxu1 %v564_v7  ;;  %s438_s10 = sld [smem:[#allocation4 + $0x80]] }
  0x24   :  { %v59_v20 = vmul.f32 %v659_v9, %v58_v17  ;;  %v60_v21 = vmul.f32 %v661_v10, %v58_v17  ;;  %v68_v22 = vstv %s429_s15  ;;  %v56_v23 = vmul.f32 %v665_v12, %v52_v14  ;;  %537 = vmatprep.subr.bf16.mxu1 %v565_v13  ;;  %s466_s11 = sld [smem:[#allocation4 + $0x1]] }
  0x25   :  { %v69_v24 = vmul.f32 %v659_v9, %v68_v22  ;;  %v70_v25 = vmul.f32 %v661_v10, %v68_v22  ;;  %v61_v26 = vmul.f32 %v663_v11, %v58_v17  ;;  %v62_v27 = vmul.f32 %v665_v12, %v58_v17  ;;  %s467_s12 = sld [smem:[#allocation4 + $0x81]] }
  0x26   :  { %518 = vmatpush3.bf16.msra.mxu0 %v557_v2  ;;  %v63_v29 = vadd.f32 %v59_v20, %v53_v15  ;;  %v64_v30 = vadd.f32 %v60_v21, %v54_v16  ;;  %v71_v31 = vmul.f32 %v663_v11, %v68_v22  ;;  %v72_v32 = vmul.f32 %v665_v12, %v68_v22 }
  0x27   :  { %519 = vmatprep.subr.bf16.mxu0 %v558_v3  ;;  %v65_v33 = vadd.f32 %v61_v26, %v55_v18  ;;  %v66_v34 = vadd.f32 %v62_v27, %v56_v23  ;;  %538 = vmatpush3.bf16.msra.mxu1 %v565_v13  ;;  %v219_v52 = vstv %s440_s8  ;;  %v229_v62 = vstv %s441_s9 }
  0x28   :  { %v73_v36 = vadd.f32 %v69_v24, %v63_v29  ;;  %v74_v37 = vadd.f32 %v70_v25, %v64_v30  ;;  %539 = vmatprep.subr.bf16.mxu1 %v566_v28  ;;  %v213_v51 = vstv %s439_s7  ;;  %v220_v55 = vmul.f32 %v659_v9, %v219_v52 }
  0x29   :  { %v75_v40 = vadd.f32 %v71_v31, %v65_v33  ;;  %v76_v41 = vadd.f32 %v72_v32, %v66_v34  ;;  %v214_v54 = vmul.f32 %v659_v9, %v213_v51  ;;  %v217_v56 = vmul.f32 %v665_v12, %v213_v51 }
  0x2a   :  { %520 = vmatpush3.bf16.msra.mxu0 %v558_v3  ;;  %v77_v38 = vmax.f32 %v73_v36, 0.0  ;;  %v78_v39 = vmax.f32 %v74_v37, 0.0  ;;  %v223_v57 = vmul.f32 %v665_v12, %v219_v52  ;;  %v216_v60 = vmul.f32 %v663_v11, %v213_v51 }
  0x2b   :  { %521 = vmatprep.subr.bf16.mxu0 %v559_v8  ;;  %540 = vmatpush3.bf16.msra.mxu1 %v566_v28  ;;  %v79_v44 = vmax.f32 %v75_v40, 0.0  ;;  %v80_v45 = vmax.f32 %v76_v41, 0.0  ;;  %v222_v61 = vmul.f32 %v663_v11, %v219_v52  ;;  %v215_v0 = vmul.f32 %v661_v10, %v213_v51 }
  0x2c   :  { %v81_v43 = vpack.c.bf16 %v78_v39, %v77_v38  ;;  %541 = vmatprep.subr.bf16.mxu1 %v567_v47  ;;  %v221_v1 = vmul.f32 %v661_v10, %v219_v52  ;;  %v224_v4 = vadd.f32 %v220_v55, %v214_v54  ;;  %v227_v6 = vadd.f32 %v223_v57, %v217_v56 }
  0x2d   :  { %v82_v46 = vpack.c.bf16 %v80_v45, %v79_v44  ;;  %v226_v9 = vadd.f32 %v222_v61, %v216_v60  ;;  %v201_v24 = vstv %s200_s3  ;;  %v207_v25 = vstv %s438_s10 }
  0x2e   :  { %522 = vmatpush3.bf16.msra.mxu0 %v559_v8  ;;  %529 = vmatprep.mubr.bf16.mxu0 %v81_v43  ;;  %v225_v14 = vadd.f32 %v221_v1, %v215_v0  ;;  %v363_v27 = vstv %s466_s11  ;;  %v373_v28 = vstv %s467_s12 }
  0x2f   :  { %523 = vmatprep.subr.bf16.mxu0 %v560_v19  ;;  %542 = vmatpush3.bf16.msra.mxu1 %v567_v47 }
  0x30   :  { %543 = vmatprep.subr.bf16.mxu1 %v568_v48 }
  0x32   :  { %524 = vmatpush3.bf16.msra.mxu0 %v560_v19 }
  0x33   :  { %525 = vmatprep.subr.bf16.mxu0 %v561_v35  ;;  %544 = vmatpush3.bf16.msra.mxu1 %v568_v48 }
  0x34   :  { %545 = vmatprep.subr.bf16.mxu1 %v569_v49 }
  0x36   :  { %526 = vmatpush3.bf16.msra.mxu0 %v561_v35 }
  0x37   :  { %527 = vmatprep.subr.bf16.mxu0 %v562_v42  ;;  %546 = vmatpush3.bf16.msra.mxu1 %v569_v49 }
  0x38   :  { %547 = vmatprep.subr.bf16.mxu1 %v570_v50 }
  0x3a   :  { %528 = vmatpush3.bf16.msra.mxu0 %v562_v42 }
  0x3b   :  { %548 = vmatpush3.bf16.msra.mxu1 %v570_v50 }
  0x3d   :  { %530 = vmatmul.mubr.bf16.vlgmr.msra.gmra.mxu0 %v82_v46 }
  0xfd   :  { %v531_v53 = vpop.f32.mrf.mxu0 }
  0xfe   :  { %v198_v58 = vmul.f32 0.999995, %v531_v53 }
  0xff   :  { %v181_v59 = vpop.f32.mrf.mxu0 }
 0x100   :  { %v196_v63 = vmul.f32 0.999995, %v181_v59  ;;  %v232_v7 = vmul.f32 %v229_v62, %v198_v58  ;;  %v204_v30 = vmul.f32 %v201_v24, %v198_v58  ;;  %v210_v32 = vmul.f32 %v207_v25, %v198_v58 }
 0x101   :  { %v532_v2 = vpop.f32.mrf.mxu0 }
 0x102   :  { %v199_v3 = vmul.f32 0.999995, %v532_v2  ;;  %v230_v5 = vmul.f32 %v229_v62, %v196_v63  ;;  %v236_v17 = vadd.f32 %v232_v7, %v226_v9  ;;  %v202_v36 = vmul.f32 %v201_v24, %v196_v63 }
 0x103   :  { %v184_v8 = vpop.f32.mrf.mxu0  ;;  %v208_v37 = vmul.f32 %v207_v25, %v196_v63 }
 0x104   :  { %v233_v12 = vmul.f32 %v229_v62, %v199_v3  ;;  %v197_v13 = vmul.f32 0.999995, %v184_v8  ;;  %v234_v16 = vadd.f32 %v230_v5, %v224_v4  ;;  %v240_v10 = vmax.f32 %v236_v17, 0.0 }
 0x105   :  { %v205_v43 = vmul.f32 %v201_v24, %v199_v3  ;;  %v211_v50 = vmul.f32 %v207_v25, %v199_v3 }
 0x106   :  { %v231_v15 = vmul.f32 %v229_v62, %v197_v13  ;;  %v237_v11 = vadd.f32 %v233_v12, %v227_v6  ;;  %v238_v20 = vmax.f32 %v234_v16, 0.0  ;;  %v203_v54 = vmul.f32 %v201_v24, %v197_v13 }
 0x107   :  { %v209_v55 = vmul.f32 %v207_v25, %v197_v13 }
 0x108   :  { %v235_v18 = vadd.f32 %v231_v15, %v225_v14  ;;  %v241_v19 = vmax.f32 %v237_v11, 0.0 }
 0x10a   :  { %v239_v21 = vmax.f32 %v235_v18, 0.0  ;;  %v243_v23 = vpack.c.bf16 %v241_v19, %v240_v10 }
 0x10c   :  { %v242_v22 = vpack.c.bf16 %v239_v21, %v238_v20 }
 0x10e   :  { %549 = vmatprep.mubr.bf16.mxu1 %v242_v22 }
 0x10f   :  { %550 = vmatmul.mubr.bf16.vlgmr.msra.gmra.mxu1 %v243_v23 }
 0x1cf   :  { %v551_v26 = vpop.f32.mrf.mxu1 }
 0x1d0   :  { %v360_v29 = vmul.f32 0.999995, %v551_v26 }
 0x1d1   :  { %v343_v31 = vpop.f32.mrf.mxu1 }
 0x1d2   :  { %v366_v33 = vmul.f32 %v363_v27, %v360_v29  ;;  %v376_v34 = vmul.f32 %v373_v28, %v360_v29  ;;  %v358_v35 = vmul.f32 0.999995, %v343_v31 }
 0x1d3   :  { %v552_v38 = vpop.f32.mrf.mxu1 }
 0x1d4   :  { %v370_v39 = vadd.f32 %v366_v33, %v204_v30  ;;  %v380_v40 = vadd.f32 %v376_v34, %v210_v32  ;;  %v364_v41 = vmul.f32 %v363_v27, %v358_v35  ;;  %v374_v42 = vmul.f32 %v373_v28, %v358_v35 }
 0x1d5   :  { %v361_v44 = vmul.f32 0.999995, %v552_v38  ;;  %v346_v45 = vpop.f32.mrf.mxu1 }
 0x1d6   :  { %v478_v46 = vpack.c.bf16 %v370_v39, %v370_v39  ;;  %v482_v47 = vpack.c.bf16 %v380_v40, %v380_v40  ;;  %v368_v48 = vadd.f32 %v364_v41, %v202_v36  ;;  %v378_v49 = vadd.f32 %v374_v42, %v208_v37 }
 0x1d7   :  { %v367_v51 = vmul.f32 %v363_v27, %v361_v44  ;;  %v377_v52 = vmul.f32 %v373_v28, %v361_v44  ;;  %v359_v53 = vmul.f32 0.999995, %v346_v45 }
 0x1d8   :  { %400 = vst [vmem:[%s742_s4 + $0x10] sm:$0xf] %v478_v46  ;;  %420 = vst [vmem:[%s742_s4 + $0x14] sm:$0xf] %v482_v47  ;;  %v476_v56 = vpack.c.bf16 %v368_v48, %v368_v48  ;;  %v480_v57 = vpack.c.bf16 %v378_v49, %v378_v49 }
 0x1d9   :  { %v371_v58 = vadd.f32 %v367_v51, %v205_v43  ;;  %v381_v59 = vadd.f32 %v377_v52, %v211_v50  ;;  %v365_v60 = vmul.f32 %v363_v27, %v359_v53  ;;  %v375_v61 = vmul.f32 %v373_v28, %v359_v53 }
 0x1da   :  { %398 = vst [vmem:[%s742_s4] sm:$0xf] %v476_v56  ;;  %418 = vst [vmem:[%s742_s4 + $0x4] sm:$0xf] %v480_v57 }
 0x1db   :  { %v479_v62 = vpack.c.bf16 %v371_v58, %v371_v58  ;;  %v483_v63 = vpack.c.bf16 %v381_v59, %v381_v59  ;;  %v369_v0 = vadd.f32 %v365_v60, %v203_v54  ;;  %v379_v1 = vadd.f32 %v375_v61, %v209_v55 }
 0x1dd   :  { %401 = vst [vmem:[%s742_s4 + $0x18] sm:$0xf] %v479_v62  ;;  %421 = vst [vmem:[%s742_s4 + $0x1c] sm:$0xf] %v483_v63  ;;  %v477_v2 = vpack.c.bf16 %v369_v0, %v369_v0  ;;  %v481_v3 = vpack.c.bf16 %v379_v1, %v379_v1 }
 0x1df   :  { %399 = vst [vmem:[%s742_s4 + $0x8] sm:$0xf] %v477_v2  ;;  %419 = vst [vmem:[%s742_s4 + $0xc] sm:$0xf] %v481_v3 }
 0x1e0   :  { %426 = vsyncpa [#allocation3], 1 }
 0x1e1   :  { %427 = vsyncpa [#allocation5], 1 }

// kernel: _lambda_.10
= control target key start
LH: loop header
LB: loop body
LE: loop exit
PB: predicated region body
PF: predicated region fallthrough
CT: control target
= control target key end

     0   :  { %9 = vsyncpa [#allocation3], 0  ;;  %s1813_s0 = inlined_call_operand.vmem [shape: f32[2,3], index: 0, kind: input, shape index: {}]   ;;  %s1814_s1 = inlined_call_operand.vmem [shape: f32[2,2], index: 1, kind: input, shape index: {}]   ;;  %s1815_s2 = inlined_call_operand.vmem [shape: bf16[128,64], index: 2, kind: input, shape index: {}]   ;;  %s1816_s3 = inlined_call_operand.vmem [shape: bf16[2,64,64], index: 3, kind: input, shape index: {}]   ;;  %s1817_s4 = inlined_call_operand.vmem [shape: bf16[128,128], index: 4, kind: output, shape index: {}]  }
   0x1   :  { %s17_s17 = sshll.u32 %s1813_s0, 4  ;;  %s18_s17 = int_to_ptr.vmem [resolvable:$true] %s17_s17 }
   0x2   :  { %10 = vsyncpa [#allocation5], 0  ;;  %s27_s20 = sshll.u32 %s1814_s1, 4  ;;  %s1165_s21 = scalar_lea.vmem %s18_s17, 32  ;;  %s28_s20 = int_to_ptr.vmem [resolvable:$true] %s27_s20 }
   0x3   :  { %p1166_p0 = scmp.ne.s32.totalorder %s18_s17, %s1165_s21  ;;  %p1170_p1 = scmp.lt.s32.totalorder %s18_s17, %s18_s17 }
   0x4   :  { %p1171_p2 = scmp.lt.s32.totalorder %s1165_s21, %s1165_s21 }
   0x6   :  { %p1172_p3 = por %p1171_p2, %p1170_p1 }
   0x8   :  { %p1173_p4 = pnand %p1172_p3, %p1166_p0 }
   0xa   :  { %1176 = shalt.err (!%p1173_p4)
}
   0xb   :  { %s1193_s22 = smov [#allocation2]   ;;  %s1177_s23 = scalar_lea.vmem %s28_s20, 32 }
   0xc   :  { %20 = dma.vmem_to_smem %s18_s17, 32, %s1193_s22, [#allocation3]  }
   0xd   :  { %p1178_p5 = scmp.ne.s32.totalorder %s28_s20, %s1177_s23  ;;  %p1182_p6 = scmp.lt.s32.totalorder %s28_s20, %s28_s20 }
   0xe   :  { %p1183_p7 = scmp.lt.s32.totalorder %s1177_s23, %s1177_s23 }
  0x10   :  { %p1184_p8 = por %p1183_p7, %p1182_p6 }
  0x12   :  { %p1185_p9 = pnand %p1184_p8, %p1178_p5 }
  0x14   :  { %1188 = shalt.err (!%p1185_p9)
}
  0x15   :  { %s1194_s0 = smov [#allocation4]  }
  0x16   :  { %30 = dma.vmem_to_smem %s28_s20, 32, %s1194_s0, [#allocation5]  }
  0x17   :  { %1189 = dma.done.wait [#allocation3], 32  }
  0x18   :  { %1190 = vsyncadd [#allocation3], 4294967264 }
  0x19   :  { %1191 = dma.done.wait [#allocation5], 32  }
  0x1a   :  { %1192 = vsyncadd [#allocation5], 4294967264 }
  0x1b   :  { %41 = sfence }
  0x1c   :  { %v1157_v0 = vld [vmem:[%s1816_s3 + $0x18] sm:$0xff]   ;;  %v1158_v1 = vld [vmem:[%s1816_s3 + $0x10] sm:$0xff]   ;;  %v1159_v2 = vld [vmem:[%s1816_s3 + $0x8] sm:$0xff]   ;;  %s75_s5 = sld [smem:[#allocation2]]  ;;  %vm217_vm0 = vcmask 523264   ;;  %vm803_vm1 = vcmask 519168  }
  0x1d   :  { %1106 = vmatprep.subr.bf16.mxu0 %v1157_v0  ;;  %v1044_v3 = vld [vmem:[%s1815_s2] sm:$0xff]   ;;  %v1075_v4 = vld [vmem:[%s1815_s2 + $0x8] sm:$0xff]   ;;  %v1076_v5 = vld [vmem:[%s1815_s2 + $0x10] sm:$0xff]   ;;  %s939_s10 = sld [smem:[#allocation2 + $0x1]]  ;;  %s1195_s11 = smov 64   ;;  %vm916_vm2 = vcmask 1043968  }
  0x1e   :  { %1107 = vmatpush3.bf16.msra.mxu0 %v1157_v0  ;;  %v1077_v6 = vld [vmem:[%s1815_s2 + $0x18] sm:$0xff]   ;;  %v1078_v7 = vld [vmem:[%s1815_s2 + $0x20] sm:$0xff]   ;;  %v1079_v8 = vld [vmem:[%s1815_s2 + $0x28] sm:$0xff]   ;;  %v1257_v10 = vunpack.c.l.bf16 %v1044_v3  ;;  %s940_s19 = sld [smem:[#allocation2 + $0x2]]  ;;  %v1265_v13 = vunpack.c.h.bf16 %v1044_v3  ;;  %v1267_v14 = vunpack.c.l.bf16 %v1075_v4  ;;  %v1269_v15 = vunpack.c.h.bf16 %v1075_v4 }
  0x1f   :  { %1108 = vmatprep.subr.bf16.mxu0 %v1158_v1  ;;  %v1160_v9 = vld [vmem:[%s1816_s3] sm:$0xff]   ;;  %v1080_v11 = vld [vmem:[%s1815_s2 + $0x30] sm:$0xff]   ;;  %v1081_v12 = vld [vmem:[%s1815_s2 + $0x38] sm:$0xff]   ;;  %v1271_v16 = vunpack.c.l.bf16 %v1076_v5  ;;  %v1273_v17 = vunpack.c.h.bf16 %v1076_v5  ;;  %v1275_v18 = vunpack.c.l.bf16 %v1077_v6  ;;  %v1277_v19 = vunpack.c.h.bf16 %v1077_v6  ;;  %s954_s29 = sld [smem:[#allocation2 + $0x80]] }
  0x20   :  { %v1279_v20 = vunpack.c.l.bf16 %v1078_v7  ;;  %v1281_v21 = vunpack.c.h.bf16 %v1078_v7  ;;  %v1283_v22 = vunpack.c.l.bf16 %v1079_v8  ;;  %v1285_v23 = vunpack.c.h.bf16 %v1079_v8  ;;  %s955_s30 = sld [smem:[#allocation2 + $0x81]] }
  0x21   :  { %v1287_v24 = vunpack.c.l.bf16 %v1080_v11  ;;  %v1291_v26 = vunpack.c.h.bf16 %v1080_v11  ;;  %v1293_v27 = vunpack.c.l.bf16 %v1081_v12  ;;  %v1295_v28 = vunpack.c.h.bf16 %v1081_v12  ;;  %s953_s6 = sld [smem:[#allocation4 + $0x80]] }
  0x22   :  { %1109 = vmatpush3.bf16.msra.mxu0 %v1158_v1  ;;  %v1289_v25 = vstv %s75_s5  ;;  %s956_s5 = sld [smem:[#allocation2 + $0x82]] }
  0x23   :  { %1110 = vmatprep.subr.bf16.mxu0 %v1159_v2  ;;  %v77_v29 = vmul.f32 %v1257_v10, %v1289_v25  ;;  %v78_v30 = vmul.f32 %v1265_v13, %v1289_v25  ;;  %v1301_v31 = vstv %s939_s10  ;;  %v79_v32 = vmul.f32 %v1267_v14, %v1289_v25  ;;  %s977_s7 = sld [smem:[#allocation4 + $0x1]] }
  0x24   :  { %v95_v33 = vmul.f32 %v1257_v10, %v1301_v31  ;;  %v96_v34 = vmul.f32 %v1265_v13, %v1301_v31  ;;  %v1309_v35 = vstv %s940_s19  ;;  %v80_v36 = vmul.f32 %v1269_v15, %v1289_v25  ;;  %s978_s8 = sld [smem:[#allocation4 + $0x81]] }
  0x25   :  { %v129_v37 = vmul.f32 %v1257_v10, %v1309_v35  ;;  %v130_v38 = vmul.f32 %v1265_v13, %v1309_v35  ;;  %v97_v39 = vmul.f32 %v1267_v14, %v1301_v31  ;;  %v98_v40 = vmul.f32 %v1269_v15, %v1301_v31 }
  0x26   :  { %1111 = vmatpush3.bf16.msra.mxu0 %v1159_v2  ;;  %v111_v41 = vadd.f32 %v95_v33, %v77_v29  ;;  %v112_v42 = vadd.f32 %v96_v34, %v78_v30  ;;  %v131_v43 = vmul.f32 %v1267_v14, %v1309_v35  ;;  %v132_v44 = vmul.f32 %v1269_v15, %v1309_v35 }
  0x27   :  { %1112 = vmatprep.subr.bf16.mxu0 %v1160_v9  ;;  %v113_v45 = vadd.f32 %v97_v39, %v79_v32  ;;  %v114_v46 = vadd.f32 %v98_v40, %v80_v36  ;;  %v81_v47 = vmul.f32 %v1271_v16, %v1289_v25  ;;  %v82_v48 = vmul.f32 %v1273_v17, %v1289_v25 }
  0x28   :  { %v145_v49 = vadd.f32 %v129_v37, %v111_v41  ;;  %v146_v50 = vadd.f32 %v130_v38, %v112_v42  ;;  %v99_v51 = vmul.f32 %v1271_v16, %v1301_v31  ;;  %v100_v52 = vmul.f32 %v1273_v17, %v1301_v31 }
  0x29   :  { %v147_v53 = vadd.f32 %v131_v43, %v113_v45  ;;  %v148_v54 = vadd.f32 %v132_v44, %v114_v46  ;;  %v133_v55 = vmul.f32 %v1271_v16, %v1309_v35  ;;  %v134_v56 = vmul.f32 %v1273_v17, %v1309_v35 }
  0x2a   :  { %1113 = vmatpush3.bf16.msra.mxu0 %v1160_v9  ;;  %v161_v57 = vmax.f32 %v145_v49, 0.0  ;;  %v162_v58 = vmax.f32 %v146_v50, 0.0  ;;  %v115_v59 = vadd.f32 %v99_v51, %v81_v47  ;;  %v116_v60 = vadd.f32 %v100_v52, %v82_v48 }
  0x2b   :  { %v163_v61 = vmax.f32 %v147_v53, 0.0  ;;  %v164_v62 = vmax.f32 %v148_v54, 0.0  ;;  %v83_v63 = vmul.f32 %v1275_v18, %v1289_v25  ;;  %v84_v0 = vmul.f32 %v1277_v19, %v1289_v25 }
  0x2c   :  { %v177_v1 = vpack.c.bf16 %v162_v58, %v161_v57  ;;  %v149_v2 = vadd.f32 %v133_v55, %v115_v59  ;;  %v150_v3 = vadd.f32 %v134_v56, %v116_v60  ;;  %v101_v4 = vmul.f32 %v1275_v18, %v1301_v31 }
  0x2d   :  { %v178_v5 = vpack.c.bf16 %v164_v62, %v163_v61  ;;  %v102_v6 = vmul.f32 %v1277_v19, %v1301_v31  ;;  %v135_v7 = vmul.f32 %v1275_v18, %v1309_v35  ;;  %v136_v8 = vmul.f32 %v1277_v19, %v1309_v35 }
  0x2e   :  { %1114 = vmatprep.mubr.msk.bf16.mxu0 %vm217_vm0, %v177_v1  ;;  %v165_v9 = vmax.f32 %v149_v2, 0.0  ;;  %v166_v11 = vmax.f32 %v150_v3, 0.0  ;;  %v117_v12 = vadd.f32 %v101_v4, %v83_v63  ;;  %v85_v29 = vmul.f32 %v1279_v20, %v1289_v25 }
  0x2f   :  { %1115 = vmatmul.mubr.msk.bf16.vlgmr.msra.gmra.mxu0 %vm217_vm0, %v178_v5  ;;  %v118_v30 = vadd.f32 %v102_v6, %v84_v0  ;;  %v86_v32 = vmul.f32 %v1281_v21, %v1289_v25  ;;  %v103_v33 = vmul.f32 %v1279_v20, %v1301_v31  ;;  %v104_v34 = vmul.f32 %v1281_v21, %v1301_v31 }
  0x30   :  { %v179_v36 = vpack.c.bf16 %v166_v11, %v165_v9  ;;  %v151_v37 = vadd.f32 %v135_v7, %v117_v12  ;;  %v137_v38 = vmul.f32 %v1279_v20, %v1309_v35  ;;  %v138_v39 = vmul.f32 %v1281_v21, %v1309_v35 }
  0x31   :  { %v152_v40 = vadd.f32 %v136_v8, %v118_v30  ;;  %v119_v41 = vadd.f32 %v103_v33, %v85_v29  ;;  %v120_v42 = vadd.f32 %v104_v34, %v86_v32  ;;  %v87_v43 = vmul.f32 %v1283_v22, %v1289_v25 }
  0x32   :  { %1118 = vmatprep.mubr.msk.bf16.mxu0 %vm217_vm0, %v179_v36  ;;  %v167_v44 = vmax.f32 %v151_v37, 0.0  ;;  %v88_v45 = vmul.f32 %v1285_v23, %v1289_v25  ;;  %v105_v46 = vmul.f32 %v1283_v22, %v1301_v31  ;;  %v106_v47 = vmul.f32 %v1285_v23, %v1301_v31 }
  0x33   :  { %v168_v48 = vmax.f32 %v152_v40, 0.0  ;;  %v153_v49 = vadd.f32 %v137_v38, %v119_v41  ;;  %v154_v50 = vadd.f32 %v138_v39, %v120_v42  ;;  %v139_v51 = vmul.f32 %v1283_v22, %v1309_v35 }
  0x34   :  { %v121_v52 = vadd.f32 %v105_v46, %v87_v43  ;;  %v122_v53 = vadd.f32 %v106_v47, %v88_v45  ;;  %v140_v54 = vmul.f32 %v1285_v23, %v1309_v35  ;;  %v89_v55 = vmul.f32 %v1287_v24, %v1289_v25  ;;  %v1162_v43 = vld [vmem:[%s1816_s3 + $0x30] sm:$0xff]   ;;  %v1164_v45 = vld [vmem:[%s1816_s3 + $0x20] sm:$0xff]  }
  0x35   :  { %v180_v56 = vpack.c.bf16 %v168_v48, %v167_v44  ;;  %v169_v57 = vmax.f32 %v153_v49, 0.0  ;;  %v170_v58 = vmax.f32 %v154_v50, 0.0  ;;  %v90_v59 = vmul.f32 %v1291_v26, %v1289_v25  ;;  %v1163_v44 = vld [vmem:[%s1816_s3 + $0x28] sm:$0xff]  }
  0x36   :  { %v155_v60 = vadd.f32 %v139_v51, %v121_v52  ;;  %v156_v61 = vadd.f32 %v140_v54, %v122_v53  ;;  %v107_v62 = vmul.f32 %v1287_v24, %v1301_v31  ;;  %v108_v63 = vmul.f32 %v1291_v26, %v1301_v31 }
  0x37   :  { %1119 = vmatmul.mubr.msk.bf16.gmra.mxu0 %vm217_vm0, %v180_v56  ;;  %v181_v0 = vpack.c.bf16 %v170_v58, %v169_v57  ;;  %v141_v1 = vmul.f32 %v1287_v24, %v1309_v35  ;;  %v142_v2 = vmul.f32 %v1291_v26, %v1309_v35  ;;  %v91_v3 = vmul.f32 %v1293_v27, %v1289_v25 }
  0x38   :  { %v171_v4 = vmax.f32 %v155_v60, 0.0  ;;  %v172_v5 = vmax.f32 %v156_v61, 0.0  ;;  %v123_v6 = vadd.f32 %v107_v62, %v89_v55  ;;  %v124_v7 = vadd.f32 %v108_v63, %v90_v59 }
  0x39   :  { %1122 = vmatprep.mubr.msk.bf16.mxu0 %vm217_vm0, %v181_v0  ;;  %v92_v8 = vmul.f32 %v1295_v28, %v1289_v25  ;;  %v109_v9 = vmul.f32 %v1293_v27, %v1301_v31  ;;  %v110_v11 = vmul.f32 %v1295_v28, %v1301_v31  ;;  %v143_v12 = vmul.f32 %v1293_v27, %v1309_v35 }
  0x3a   :  { %v157_v29 = vadd.f32 %v141_v1, %v123_v6  ;;  %v158_v30 = vadd.f32 %v142_v2, %v124_v7  ;;  %v144_v32 = vmul.f32 %v1295_v28, %v1309_v35  ;;  %v182_v33 = vpack.c.bf16 %v172_v5, %v171_v4  ;;  %v1161_v35 = vld [vmem:[%s1816_s3 + $0x38] sm:$0xff]   ;;  %s355_s3 = sld [smem:[#allocation4]] }
  0x3b   :  { %v125_v34 = vadd.f32 %v109_v9, %v91_v3  ;;  %v126_v36 = vadd.f32 %v110_v11, %v92_v8  ;;  %1130 = vmatprep.subr.bf16.mxu1 %v1161_v35  ;;  %v1417_v47 = vstv %s954_s29  ;;  %v1419_v48 = vstv %s955_s30 }
  0x3c   :  { %v173_v37 = vmax.f32 %v157_v29, 0.0  ;;  %v174_v38 = vmax.f32 %v158_v30, 0.0  ;;  %1131 = vmatpush3.bf16.msra.mxu1 %v1161_v35  ;;  %v396_v49 = vmul.f32 %v1269_v15, %v1417_v47  ;;  %v414_v50 = vmul.f32 %v1269_v15, %v1419_v48 }
  0x3d   :  { %v159_v25 = vadd.f32 %v143_v12, %v125_v34  ;;  %v160_v39 = vadd.f32 %v144_v32, %v126_v36  ;;  %1132 = vmatprep.subr.bf16.mxu1 %v1162_v43  ;;  %v393_v52 = vmul.f32 %v1257_v10, %v1417_v47  ;;  %v411_v53 = vmul.f32 %v1257_v10, %v1419_v48 }
  0x3e   :  { %v183_v40 = vpack.c.bf16 %v174_v38, %v173_v37  ;;  %v395_v55 = vmul.f32 %v1267_v14, %v1417_v47  ;;  %v413_v56 = vmul.f32 %v1267_v14, %v1419_v48  ;;  %v1437_v58 = vstv %s956_s5 }
  0x3f   :  { %1123 = vmatmul.mubr.msk.bf16.gmra.mxu0 %vm217_vm0, %v182_v33  ;;  %v175_v41 = vmax.f32 %v159_v25, 0.0  ;;  %v176_v31 = vmax.f32 %v160_v39, 0.0  ;;  %v394_v59 = vmul.f32 %v1265_v13, %v1417_v47  ;;  %v412_v60 = vmul.f32 %v1265_v13, %v1419_v48 }
  0x40   :  { %1126 = vmatprep.mubr.msk.bf16.mxu0 %vm217_vm0, %v183_v40  ;;  %1133 = vmatpush3.bf16.msra.mxu1 %v1162_v43  ;;  %v430_v61 = vadd.f32 %v414_v50, %v396_v49  ;;  %v427_v0 = vadd.f32 %v411_v53, %v393_v52  ;;  %v429_v14 = vadd.f32 %v413_v56, %v395_v55 }
  0x41   :  { %v184_v42 = vpack.c.bf16 %v176_v31, %v175_v41  ;;  %1134 = vmatprep.subr.bf16.mxu1 %v1163_v44  ;;  %v428_v5 = vadd.f32 %v412_v60, %v394_v59  ;;  %v400_v6 = vmul.f32 %v1277_v19, %v1417_v47  ;;  %v418_v7 = vmul.f32 %v1277_v19, %v1419_v48 }
  0x42   :  { %v397_v11 = vmul.f32 %v1271_v16, %v1417_v47  ;;  %v415_v12 = vmul.f32 %v1271_v16, %v1419_v48  ;;  %v399_v33 = vmul.f32 %v1275_v18, %v1417_v47  ;;  %v417_v19 = vmul.f32 %v1275_v18, %v1419_v48 }
  0x43   :  { %v398_v37 = vmul.f32 %v1273_v17, %v1417_v47  ;;  %v416_v38 = vmul.f32 %v1273_v17, %v1419_v48  ;;  %v434_v40 = vadd.f32 %v418_v7, %v400_v6  ;;  %v404_v55 = vmul.f32 %v1285_v23, %v1417_v47 }
  0x44   :  { %1135 = vmatpush3.bf16.msra.mxu1 %v1163_v44  ;;  %v431_v41 = vadd.f32 %v415_v12, %v397_v11  ;;  %v433_v44 = vadd.f32 %v417_v19, %v399_v33  ;;  %v422_v56 = vmul.f32 %v1285_v23, %v1419_v48  ;;  %v421_v23 = vmul.f32 %v1283_v22, %v1419_v48 }
  0x45   :  { %1136 = vmatprep.subr.bf16.mxu1 %v1164_v45  ;;  %v432_v49 = vadd.f32 %v416_v38, %v398_v37 }
  0x46   :  { %v438_v7 = vadd.f32 %v422_v56, %v404_v55 }
  0x47   :  { %1127 = vmatmul.mubr.msk.bf16.gmra.mxu0 %vm217_vm0, %v184_v42 }
  0x48   :  { %1137 = vmatpush3.bf16.msra.mxu1 %v1164_v45 }
  0xef   :  { %v1116_v46 = vpop.f32.mrf.mxu0 }
  0xf0   :  { %v1429_v54 = vmul.f32 0.999995, %v1116_v46 }
  0xf1   :  { %v276_v51 = vpop.f32.mrf.mxu0 }
  0xf2   :  { %v1435_v57 = vmul.f32 0.999995, %v276_v51  ;;  %v447_v1 = vmul.f32 %v1437_v58, %v1429_v54 }
  0xf3   :  { %v1117_v15 = vpop.f32.mrf.mxu0 }
  0xf4   :  { %v1443_v10 = vmul.f32 0.999995, %v1117_v15  ;;  %v445_v62 = vmul.f32 %v1437_v58, %v1435_v57  ;;  %v463_v30 = vadd.f32 %v447_v1, %v429_v14  ;;  %v403_v14 = vmul.f32 %v1283_v22, %v1417_v47 }
  0xf5   :  { %v279_v63 = vpop.f32.mrf.mxu0 }
  0xf6   :  { %v448_v2 = vmul.f32 %v1437_v58, %v1443_v10  ;;  %v1451_v3 = vmul.f32 0.999995, %v279_v63  ;;  %v461_v29 = vadd.f32 %v445_v62, %v427_v0  ;;  %v479_v43 = vmax.f32 %v463_v30, 0.0 }
  0xf7   :  { %v1120_v4 = vpop.f32.mrf.mxu0  ;;  %v419_v62 = vmul.f32 %v1279_v20, %v1419_v48  ;;  %v437_v30 = vadd.f32 %v421_v23, %v403_v14 }
  0xf8   :  { %v464_v13 = vadd.f32 %v448_v2, %v430_v61  ;;  %v446_v8 = vmul.f32 %v1437_v58, %v1451_v3  ;;  %v1463_v32 = vmul.f32 0.999995, %v1120_v4  ;;  %v477_v18 = vmax.f32 %v461_v29, 0.0 }
  0xf9   :  { %v292_v9 = vpop.f32.mrf.mxu0  ;;  %v401_v61 = vmul.f32 %v1279_v20, %v1417_v47  ;;  %v420_v20 = vmul.f32 %v1281_v21, %v1419_v48 }
  0xfa   :  { %v1469_v34 = vmul.f32 0.999995, %v292_v9  ;;  %v462_v16 = vadd.f32 %v446_v8, %v428_v5  ;;  %v480_v25 = vmax.f32 %v464_v13, 0.0  ;;  %v451_v45 = vmul.f32 %v1437_v58, %v1463_v32 }
  0xfb   :  { %v1121_v36 = vpop.f32.mrf.mxu0  ;;  %v402_v5 = vmul.f32 %v1281_v21, %v1417_v47  ;;  %v435_v11 = vadd.f32 %v419_v62, %v401_v61 }
  0xfc   :  { %v1475_v39 = vmul.f32 0.999995, %v1121_v36  ;;  %v449_v31 = vmul.f32 %v1437_v58, %v1469_v34  ;;  %v478_v35 = vmax.f32 %v462_v16, 0.0  ;;  %v494_v53 = vpack.c.bf16 %v480_v25, %v479_v43 }
  0xfd   :  { %v295_v42 = vpop.f32.mrf.mxu0  ;;  %v467_v63 = vadd.f32 %v451_v45, %v433_v44  ;;  %v436_v36 = vadd.f32 %v420_v20, %v402_v5  ;;  %v423_v43 = vmul.f32 %v1287_v24, %v1419_v48 }
  0xfe   :  { %v452_v17 = vmul.f32 %v1437_v58, %v1475_v39  ;;  %v1483_v46 = vmul.f32 0.999995, %v295_v42  ;;  %v493_v51 = vpack.c.bf16 %v478_v35, %v477_v18  ;;  %v465_v15 = vadd.f32 %v449_v31, %v431_v41 }
  0xff   :  { %v1124_v50 = vpop.f32.mrf.mxu0  ;;  %v483_v29 = vmax.f32 %v467_v63, 0.0  ;;  %v426_v41 = vmul.f32 %v1295_v28, %v1419_v48  ;;  %v405_v35 = vmul.f32 %v1287_v24, %v1417_v47  ;;  %v424_v24 = vmul.f32 %v1291_v26, %v1419_v48 }
 0x100   :  { %v468_v52 = vadd.f32 %v452_v17, %v434_v40  ;;  %v450_v59 = vmul.f32 %v1437_v58, %v1483_v46  ;;  %1138 = vmatprep.mubr.msk.bf16.mxu1 %vm217_vm0, %v493_v51  ;;  %v1496_v0 = vmul.f32 0.999995, %v1124_v50  ;;  %v481_v8 = vmax.f32 %v465_v15, 0.0 }
 0x101   :  { %v308_v60 = vpop.f32.mrf.mxu0  ;;  %1139 = vmatmul.mubr.msk.bf16.vlgmr.msra.gmra.mxu1 %vm217_vm0, %v494_v53  ;;  %v408_v40 = vmul.f32 %v1295_v28, %v1417_v47  ;;  %v407_v17 = vmul.f32 %v1293_v27, %v1417_v47  ;;  %v425_v28 = vmul.f32 %v1293_v27, %v1419_v48 }
 0x102   :  { %v466_v1 = vadd.f32 %v450_v59, %v432_v49  ;;  %v1503_v2 = vmul.f32 0.999995, %v308_v60  ;;  %v484_v13 = vmax.f32 %v468_v52, 0.0  ;;  %v455_v33 = vmul.f32 %v1437_v58, %v1496_v0 }
 0x103   :  { %v1125_v4 = vpop.f32.mrf.mxu0  ;;  %v406_v52 = vmul.f32 %v1291_v26, %v1417_v47  ;;  %v442_v56 = vadd.f32 %v426_v41, %v408_v40  ;;  %v439_v60 = vadd.f32 %v423_v43, %v405_v35  ;;  %v441_v63 = vadd.f32 %v425_v28, %v407_v17 }
 0x104   :  { %v1509_v6 = vmul.f32 0.999995, %v1125_v4  ;;  %v482_v9 = vmax.f32 %v466_v1, 0.0  ;;  %v453_v22 = vmul.f32 %v1437_v58, %v1503_v2  ;;  %v496_v25 = vpack.c.bf16 %v484_v13, %v483_v29 }
 0x105   :  { %v311_v12 = vpop.f32.mrf.mxu0  ;;  %v471_v44 = vadd.f32 %v455_v33, %v437_v30  ;;  %v440_v48 = vadd.f32 %v424_v24, %v406_v52  ;;  %v1561_v30 = vstv %s953_s6 }
 0x106   :  { %v456_v19 = vmul.f32 %v1437_v58, %v1509_v6  ;;  %v1517_v21 = vmul.f32 0.999995, %v311_v12  ;;  %v495_v38 = vpack.c.bf16 %v482_v9, %v481_v8  ;;  %v469_v31 = vadd.f32 %v453_v22, %v435_v11 }
 0x107   :  { %v1128_v37 = vpop.f32.mrf.mxu0  ;;  %v487_v62 = vmax.f32 %v471_v44, 0.0  ;;  %v378_v41 = vmul.f32 %v1561_v30, %v1443_v10  ;;  %v376_v35 = vmul.f32 %v1561_v30, %v1451_v3 }
 0x108   :  { %v472_v16 = vadd.f32 %v456_v19, %v438_v7  ;;  %v454_v42 = vmul.f32 %v1437_v58, %v1517_v21  ;;  %1142 = vmatprep.mubr.msk.bf16.mxu1 %vm217_vm0, %v495_v38  ;;  %v1530_v45 = vmul.f32 0.999995, %v1128_v37  ;;  %v485_v15 = vmax.f32 %v469_v31, 0.0 }
 0x109   :  { %v324_v18 = vpop.f32.mrf.mxu0  ;;  %1143 = vmatmul.mubr.msk.bf16.gmra.mxu1 %vm217_vm0, %v496_v25  ;;  %v1563_v19 = vstv %s977_s7  ;;  %v377_v25 = vmul.f32 %v1561_v30, %v1429_v54 }
 0x10a   :  { %v470_v49 = vadd.f32 %v454_v42, %v436_v36  ;;  %v1537_v50 = vmul.f32 0.999995, %v324_v18  ;;  %v488_v53 = vmax.f32 %v472_v16, 0.0  ;;  %v459_v14 = vmul.f32 %v1437_v58, %v1530_v45 }
 0x10b   :  { %v1129_v51 = vpop.f32.mrf.mxu0  ;;  %v1565_v36 = vstv %s978_s8  ;;  %v375_v18 = vmul.f32 %v1561_v30, %v1435_v57 }
 0x10c   :  { %v1543_v55 = vmul.f32 0.999995, %v1129_v51  ;;  %v486_v59 = vmax.f32 %v470_v49, 0.0  ;;  %v457_v27 = vmul.f32 %v1437_v58, %v1537_v50  ;;  %v498_v4 = vpack.c.bf16 %v488_v53, %v487_v62 }
 0x10d   :  { %v327_v61 = vpop.f32.mrf.mxu0  ;;  %v475_v13 = vadd.f32 %v459_v14, %v441_v63 }
 0x10e   :  { %v460_v47 = vmul.f32 %v1437_v58, %v1543_v55  ;;  %v1551_v26 = vmul.f32 0.999995, %v327_v61  ;;  %v497_v23 = vpack.c.bf16 %v486_v59, %v485_v15  ;;  %v473_v5 = vadd.f32 %v457_v27, %v439_v60 }
 0x10f   :  { %v491_v22 = vmax.f32 %v475_v13, 0.0 }
 0x110   :  { %v476_v1 = vadd.f32 %v460_v47, %v442_v56  ;;  %v458_v20 = vmul.f32 %v1437_v58, %v1551_v26  ;;  %1146 = vmatprep.mubr.msk.bf16.mxu1 %vm217_vm0, %v497_v23  ;;  %v489_v9 = vmax.f32 %v473_v5, 0.0  ;;  %v1559_v58 = vstv %s355_s3 }
 0x111   :  { %1147 = vmatmul.mubr.msk.bf16.gmra.mxu1 %vm217_vm0, %v498_v4  ;;  %v359_v37 = vmul.f32 %v1559_v58, %v1429_v54  ;;  %v357_v38 = vmul.f32 %v1559_v58, %v1435_v57  ;;  %v360_v40 = vmul.f32 %v1559_v58, %v1443_v10  ;;  %v358_v31 = vmul.f32 %v1559_v58, %v1451_v3 }
 0x112   :  { %v474_v7 = vadd.f32 %v458_v20, %v440_v48  ;;  %v492_v8 = vmax.f32 %v476_v1, 0.0  ;;  %v363_v17 = vmul.f32 %v1559_v58, %v1463_v32  ;;  %v381_v10 = vmul.f32 %v1561_v30, %v1463_v32 }
 0x113   :  { %v361_v28 = vmul.f32 %v1559_v58, %v1469_v34  ;;  %v1593_v57 = vmul.f32 %v1561_v30, %v1469_v34  ;;  %v364_v53 = vmul.f32 %v1559_v58, %v1475_v39  ;;  %v382_v32 = vmul.f32 %v1561_v30, %v1475_v39 }
 0x114   :  { %v490_v11 = vmax.f32 %v474_v7, 0.0  ;;  %v500_v29 = vpack.c.bf16 %v492_v8, %v491_v22  ;;  %v1605_v61 = vmul.f32 %v1559_v58, %v1483_v46  ;;  %v380_v4 = vmul.f32 %v1561_v30, %v1483_v46 }
 0x115   :  { %v367_v46 = vmul.f32 %v1559_v58, %v1496_v0 }
 0x116   :  { %v499_v12 = vpack.c.bf16 %v490_v11, %v489_v9 }
 0x118   :  { %1150 = vmatprep.mubr.msk.bf16.mxu1 %vm217_vm0, %v499_v12 }
 0x119   :  { %1151 = vmatmul.mubr.msk.bf16.gmra.mxu1 %vm217_vm0, %v500_v29 }
 0x1c1   :  { %v1140_v33 = vpop.f32.mrf.mxu1 }
 0x1c2   :  { %v657_v16 = vmul.f32 0.999995, %v1140_v33 }
 0x1c3   :  { %v592_v42 = vpop.f32.mrf.mxu1 }
 0x1c4   :  { %v675_v43 = vmul.f32 %v1563_v19, %v657_v16  ;;  %v709_v54 = vmul.f32 %v1565_v36, %v657_v16  ;;  %v655_v44 = vmul.f32 0.999995, %v592_v42 }
 0x1c5   :  { %v1141_v49 = vpop.f32.mrf.mxu1 }
 0x1c6   :  { %v691_v3 = vadd.f32 %v675_v43, %v359_v37  ;;  %v673_v51 = vmul.f32 %v1563_v19, %v655_v44  ;;  %v707_v52 = vmul.f32 %v1565_v36, %v655_v44  ;;  %v658_v24 = vmul.f32 0.999995, %v1141_v49 }
 0x1c7   :  { %v595_v56 = vpop.f32.mrf.mxu1  ;;  %v725_v15 = vadd.f32 %v709_v54, %v377_v25  ;;  %v383_v49 = vmul.f32 %v1561_v30, %v1503_v2 }
 0x1c8   :  { %v1013_v59 = vpack.c.bf16 %v691_v3, %v691_v3  ;;  %v689_v60 = vadd.f32 %v673_v51, %v357_v38  ;;  %v676_v34 = vmul.f32 %v1563_v19, %v658_v24  ;;  %v710_v27 = vmul.f32 %v1565_v36, %v658_v24 }
 0x1c9   :  { %v656_v62 = vmul.f32 0.999995, %v595_v56  ;;  %v1144_v63 = vpop.f32.mrf.mxu1  ;;  %v1029_v14 = vpack.c.bf16 %v725_v15, %v725_v15  ;;  %v723_v47 = vadd.f32 %v707_v52, %v375_v18  ;;  %v385_v38 = vmul.f32 %v1561_v30, %v1496_v0 }
 0x1ca   :  { %v1011_v48 = vpack.c.bf16 %v689_v60, %v689_v60  ;;  %v692_v23 = vadd.f32 %v676_v34, %v360_v40  ;;  %v661_v39 = vmul.f32 0.999995, %v1144_v63  ;;  %v726_v1 = vadd.f32 %v710_v27, %v378_v41  ;;  %806 = vst.msk [vmem:[%s1817_s4 + $0x8] sm:$0xf] %vm803_vm1, %v1013_v59 }
 0x1cb   :  { %v674_v5 = vmul.f32 %v1563_v19, %v656_v62  ;;  %v708_v20 = vmul.f32 %v1565_v36, %v656_v62  ;;  %872 = vrot.lane.b32.xlu1 %v1029_v14, %s1195_s11  ;;  %v608_v13 = vpop.f32.mrf.mxu1  ;;  %v1027_v7 = vpack.c.bf16 %v723_v47, %v723_v47  ;;  %v368_v3 = vmul.f32 %v1559_v58, %v1509_v6 }
 0x1cc   :  { %v1014_v8 = vpack.c.bf16 %v692_v23, %v692_v23  ;;  %v679_v9 = vmul.f32 %v1563_v19, %v661_v39  ;;  %v713_v11 = vmul.f32 %v1565_v36, %v661_v39  ;;  %v659_v22 = vmul.f32 0.999995, %v608_v13  ;;  %804 = vst.msk [vmem:[%s1817_s4] sm:$0xf] %vm803_vm1, %v1011_v48 }
 0x1cd   :  { %v690_v12 = vadd.f32 %v674_v5, %v358_v31  ;;  %868 = vrot.lane.b32.xlu0 %v1027_v7, %s1195_s11  ;;  %v1145_v29 = vpop.f32.mrf.mxu1  ;;  %v1030_v33 = vpack.c.bf16 %v726_v1, %v726_v1  ;;  %v724_v37 = vadd.f32 %v708_v20, %v376_v35  ;;  %v366_v23 = vmul.f32 %v1559_v58, %v1517_v21 }
 0x1ce   :  { %v695_v16 = vadd.f32 %v679_v9, %v363_v17  ;;  %v677_v25 = vmul.f32 %v1563_v19, %v659_v22  ;;  %v662_v40 = vmul.f32 0.999995, %v1145_v29  ;;  %807 = vst.msk [vmem:[%s1817_s4 + $0xc] sm:$0xf] %vm803_vm1, %v1014_v8  ;;  %v711_v31 = vmul.f32 %v1565_v36, %v659_v22 }
 0x1cf   :  { %v1012_v41 = vpack.c.bf16 %v690_v12, %v690_v12  ;;  %874 = vrot.lane.b32.xlu1 %v1030_v33, %s1195_s11  ;;  %v611_v42 = vpop.f32.mrf.mxu1  ;;  %v1028_v18 = vpack.c.bf16 %v724_v37, %v724_v37  ;;  %v729_v35 = vadd.f32 %v713_v11, %v381_v10  ;;  %v365_v17 = vmul.f32 %v1559_v58, %v1503_v2 }
 0x1d0   :  { %v1017_v43 = vpack.c.bf16 %v695_v16, %v695_v16  ;;  %v693_v54 = vadd.f32 %v677_v25, %v361_v28  ;;  %v680_v0 = vmul.f32 %v1563_v19, %v662_v40  ;;  %v714_v44 = vmul.f32 %v1565_v36, %v662_v40 }
 0x1d1   :  { %v660_v51 = vmul.f32 0.999995, %v611_v42  ;;  %870 = vrot.lane.b32.xlu0 %v1028_v18, %s1195_s11  ;;  %v1148_v52 = vpop.f32.mrf.mxu1  ;;  %805 = vst.msk [vmem:[%s1817_s4 + $0x4] sm:$0xf] %vm803_vm1, %v1012_v41  ;;  %v1033_v60 = vpack.c.bf16 %v729_v35, %v729_v35  ;;  %v727_v34 = vadd.f32 %v711_v31, %v1593_v57  ;;  %v384_v22 = vmul.f32 %v1561_v30, %v1517_v21 }
 0x1d2   :  { %v1015_v10 = vpack.c.bf16 %v693_v54, %v693_v54  ;;  %v696_v28 = vadd.f32 %v680_v0, %v364_v53  ;;  %v665_v24 = vmul.f32 0.999995, %v1148_v52  ;;  %v730_v56 = vadd.f32 %v714_v44, %v382_v32  ;;  %810 = vst.msk [vmem:[%s1817_s4 + $0x18] sm:$0xf] %vm803_vm1, %v1017_v43 }
 0x1d3   :  { %v678_v2 = vmul.f32 %v1563_v19, %v660_v51  ;;  %v712_v15 = vmul.f32 %v1565_v36, %v660_v51  ;;  %v624_v59 = vpop.f32.mrf.mxu1  ;;  %v386_v32 = vmul.f32 %v1561_v30, %v1509_v6  ;;  %v1031_v13 = vpack.c.bf16 %v727_v34, %v727_v34 }
 0x1d4   :  { %v1018_v27 = vpack.c.bf16 %v696_v28, %v696_v28  ;;  %v683_v62 = vmul.f32 %v1563_v19, %v665_v24  ;;  %v717_v53 = vmul.f32 %v1565_v36, %v665_v24  ;;  %v663_v63 = vmul.f32 0.999995, %v624_v59  ;;  %808 = vst.msk [vmem:[%s1817_s4 + $0x10] sm:$0xf] %vm803_vm1, %v1015_v10 }
 0x1d5   :  { %v694_v14 = vadd.f32 %v678_v2, %v1605_v61  ;;  %880 = vrot.lane.b32.xlu0 %v1033_v60, %s1195_s11  ;;  %v1149_v47 = vpop.f32.mrf.mxu1  ;;  %v1034_v57 = vpack.c.bf16 %v730_v56, %v730_v56  ;;  %v728_v48 = vadd.f32 %v712_v15, %v380_v4  ;;  %v369_v18 = vmul.f32 %v1559_v58, %v1537_v50 }
 0x1d6   :  { %v699_v39 = vadd.f32 %v683_v62, %v367_v46  ;;  %v681_v1 = vmul.f32 %v1563_v19, %v663_v63  ;;  %v666_v5 = vmul.f32 0.999995, %v1149_v47  ;;  %811 = vst.msk [vmem:[%s1817_s4 + $0x1c] sm:$0xf] %vm803_vm1, %v1018_v27  ;;  %v715_v61 = vmul.f32 %v1565_v36, %v663_v63 }
 0x1d7   :  { %v1016_v6 = vpack.c.bf16 %v694_v14, %v694_v14  ;;  %882 = vrot.lane.b32.xlu1 %v1034_v57, %s1195_s11  ;;  %v627_v20 = vpop.f32.mrf.mxu1  ;;  %v733_v4 = vadd.f32 %v717_v53, %v385_v38  ;;  %v371_v46 = vmul.f32 %v1559_v58, %v1530_v45  ;;  %v1032_v33 = vpack.c.bf16 %v728_v48, %v728_v48 }
 0x1d8   :  { %v1021_v7 = vpack.c.bf16 %v699_v39, %v699_v39  ;;  %v697_v8 = vadd.f32 %v681_v1, %v365_v17  ;;  %v684_v9 = vmul.f32 %v1563_v19, %v666_v5  ;;  %v718_v11 = vmul.f32 %v1565_v36, %v666_v5 }
 0x1d9   :  { %v664_v12 = vmul.f32 0.999995, %v627_v20  ;;  %876 = vrot.lane.b32.xlu0 %v1031_v13, %s1195_s11  ;;  %v1152_v29 = vpop.f32.mrf.mxu1  ;;  %809 = vst.msk [vmem:[%s1817_s4 + $0x14] sm:$0xf] %vm803_vm1, %v1016_v6  ;;  %v1037_v31 = vpack.c.bf16 %v733_v4, %v733_v4  ;;  %v731_v42 = vadd.f32 %v715_v61, %v383_v49  ;;  %v389_v24 = vmul.f32 %v1561_v30, %v1530_v45 }
 0x1da   :  { %v1019_v37 = vpack.c.bf16 %v697_v8, %v697_v8  ;;  %v700_v38 = vadd.f32 %v684_v9, %v368_v3  ;;  %v669_v16 = vmul.f32 0.999995, %v1152_v29  ;;  %v734_v25 = vadd.f32 %v718_v11, %v386_v32  ;;  %814 = vst.msk [vmem:[%s1817_s4 + $0x28] sm:$0xf] %vm803_vm1, %v1021_v7 }
 0x1db   :  { %v682_v21 = vmul.f32 %v1563_v19, %v664_v12  ;;  %v716_v40 = vmul.f32 %v1565_v36, %v664_v12  ;;  %878 = vrot.lane.b32.xlu1 %v1032_v33, %s1195_s11  ;;  %v640_v41 = vpop.f32.mrf.mxu1  ;;  %v387_v56 = vmul.f32 %v1561_v30, %v1537_v50  ;;  %v1035_v59 = vpack.c.bf16 %v731_v42, %v731_v42 }
 0x1dc   :  { %v1022_v35 = vpack.c.bf16 %v700_v38, %v700_v38  ;;  %v687_v43 = vmul.f32 %v1563_v19, %v669_v16  ;;  %v667_v54 = vmul.f32 0.999995, %v640_v41  ;;  %812 = vst.msk [vmem:[%s1817_s4 + $0x20] sm:$0xf] %vm803_vm1, %v1019_v37  ;;  %v721_v44 = vmul.f32 %v1565_v36, %v669_v16 }
 0x1dd   :  { %v698_v0 = vadd.f32 %v682_v21, %v366_v23  ;;  %888 = vrot.lane.b32.xlu0 %v1037_v31, %s1195_s11  ;;  %v1153_v17 = vpop.f32.mrf.mxu1  ;;  %v1038_v3 = vpack.c.bf16 %v734_v25, %v734_v25  ;;  %v732_v49 = vadd.f32 %v716_v40, %v384_v22  ;;  %v372_v60 = vmul.f32 %v1559_v58, %v1543_v55 }
 0x1de   :  { %v703_v51 = vadd.f32 %v687_v43, %v371_v46  ;;  %v685_v52 = vmul.f32 %v1563_v19, %v667_v54  ;;  %v719_v10 = vmul.f32 %v1565_v36, %v667_v54  ;;  %v670_v28 = vmul.f32 0.999995, %v1153_v17  ;;  %815 = vst.msk [vmem:[%s1817_s4 + $0x2c] sm:$0xf] %vm803_vm1, %v1022_v35 }
 0x1df   :  { %v1020_v2 = vpack.c.bf16 %v698_v0, %v698_v0  ;;  %890 = vrot.lane.b32.xlu1 %v1038_v3, %s1195_s11  ;;  %v643_v15 = vpop.f32.mrf.mxu1  ;;  %v370_v53 = vmul.f32 %v1559_v58, %v1551_v26  ;;  %v1036_v45 = vpack.c.bf16 %v732_v49, %v732_v49  ;;  %v388_v32 = vmul.f32 %v1561_v30, %v1551_v26 }
 0x1e0   :  { %v1025_v34 = vpack.c.bf16 %v703_v51, %v703_v51  ;;  %v701_v27 = vadd.f32 %v685_v52, %v369_v18  ;;  %v688_v62 = vmul.f32 %v1563_v19, %v670_v28  ;;  %v668_v63 = vmul.f32 0.999995, %v643_v15 }
 0x1e1   :  { %884 = vrot.lane.b32.xlu0 %v1035_v59, %s1195_s11  ;;  %v735_v50 = vadd.f32 %v719_v10, %v387_v56  ;;  %813 = vst.msk [vmem:[%s1817_s4 + $0x24] sm:$0xf] %vm803_vm1, %v1020_v2  ;;  %v737_v57 = vadd.f32 %v721_v44, %v389_v24  ;;  %v722_v58 = vmul.f32 %v1565_v36, %v670_v28 }
 0x1e2   :  { %v1023_v14 = vpack.c.bf16 %v701_v27, %v701_v27  ;;  %v704_v47 = vadd.f32 %v688_v62, %v372_v60  ;;  %818 = vst.msk [vmem:[%s1817_s4 + $0x38] sm:$0xf] %vm803_vm1, %v1025_v34  ;;  %v686_v48 = vmul.f32 %v1563_v19, %v668_v63  ;;  %v720_v23 = vmul.f32 %v1565_v36, %v668_v63 }
 0x1e3   :  { %886 = vrot.lane.b32.xlu1 %v1036_v45, %s1195_s11  ;;  %v1039_v39 = vpack.c.bf16 %v735_v50, %v735_v50  ;;  %v390_v26 = vmul.f32 %v1561_v30, %v1543_v55  ;;  %v1041_v36 = vpack.c.bf16 %v737_v57, %v737_v57 }
 0x1e4   :  { %v1026_v1 = vpack.c.bf16 %v704_v47, %v704_v47  ;;  %816 = vst.msk [vmem:[%s1817_s4 + $0x30] sm:$0xf] %vm803_vm1, %v1023_v14  ;;  %v702_v5 = vadd.f32 %v686_v48, %v370_v53  ;;  %v736_v6 = vadd.f32 %v720_v23, %v388_v32 }
 0x1e5   :  { %892 = vrot.lane.b32.xlu0 %v1039_v39, %s1195_s11  ;;  %v738_v20 = vadd.f32 %v722_v58, %v390_v26 }
 0x1e6   :  { %819 = vst.msk [vmem:[%s1817_s4 + $0x3c] sm:$0xf] %vm803_vm1, %v1026_v1  ;;  %v1024_v19 = vpack.c.bf16 %v702_v5, %v702_v5  ;;  %v1040_v61 = vpack.c.bf16 %v736_v6, %v736_v6 }
 0x1e7   :  { %v1042_v55 = vpack.c.bf16 %v738_v20, %v738_v20 }
 0x1e8   :  { %894 = vrot.lane.b32.xlu1 %v1040_v61, %s1195_s11  ;;  %817 = vst.msk [vmem:[%s1817_s4 + $0x34] sm:$0xf] %vm803_vm1, %v1024_v19 }
 0x1e9   :  { %896 = vrot.lane.b32.xlu0 %v1041_v36, %s1195_s11 }
 0x1ec   :  { %898 = vrot.lane.b32.xlu1 %v1042_v55, %s1195_s11 }
 0x23d   :  { %v873_v30 = vpop.permute.xlu1 %872 }
 0x23e   :  { %919 = vst.msk [vmem:[%s1817_s4 + $0x8] sm:$0xf] %vm916_vm2, %v873_v30 }
 0x23f   :  { %v869_v13 = vpop.permute.xlu0 %868 }
 0x240   :  { %917 = vst.msk [vmem:[%s1817_s4] sm:$0xf] %vm916_vm2, %v869_v13 }
 0x241   :  { %v875_v4 = vpop.permute.xlu1 %874 }
 0x242   :  { %920 = vst.msk [vmem:[%s1817_s4 + $0xc] sm:$0xf] %vm916_vm2, %v875_v4 }
 0x243   :  { %v871_v7 = vpop.permute.xlu0 %870 }
 0x244   :  { %918 = vst.msk [vmem:[%s1817_s4 + $0x4] sm:$0xf] %vm916_vm2, %v871_v7 }
 0x247   :  { %v881_v8 = vpop.permute.xlu0 %880 }
 0x248   :  { %923 = vst.msk [vmem:[%s1817_s4 + $0x18] sm:$0xf] %vm916_vm2, %v881_v8 }
 0x249   :  { %v883_v9 = vpop.permute.xlu1 %882 }
 0x24a   :  { %924 = vst.msk [vmem:[%s1817_s4 + $0x1c] sm:$0xf] %vm916_vm2, %v883_v9 }
 0x24b   :  { %v877_v11 = vpop.permute.xlu0 %876 }
 0x24c   :  { %921 = vst.msk [vmem:[%s1817_s4 + $0x10] sm:$0xf] %vm916_vm2, %v877_v11 }
 0x24d   :  { %v879_v22 = vpop.permute.xlu1 %878 }
 0x24e   :  { %922 = vst.msk [vmem:[%s1817_s4 + $0x14] sm:$0xf] %vm916_vm2, %v879_v22 }
 0x24f   :  { %v889_v46 = vpop.permute.xlu0 %888 }
 0x250   :  { %927 = vst.msk [vmem:[%s1817_s4 + $0x28] sm:$0xf] %vm916_vm2, %v889_v46 }
 0x251   :  { %v891_v12 = vpop.permute.xlu1 %890 }
 0x252   :  { %928 = vst.msk [vmem:[%s1817_s4 + $0x2c] sm:$0xf] %vm916_vm2, %v891_v12 }
 0x253   :  { %v885_v29 = vpop.permute.xlu0 %884 }
 0x254   :  { %925 = vst.msk [vmem:[%s1817_s4 + $0x20] sm:$0xf] %vm916_vm2, %v885_v29 }
 0x255   :  { %v887_v33 = vpop.permute.xlu1 %886 }
 0x256   :  { %926 = vst.msk [vmem:[%s1817_s4 + $0x24] sm:$0xf] %vm916_vm2, %v887_v33 }
 0x257   :  { %v893_v37 = vpop.permute.xlu0 %892 }
 0x258   :  { %929 = vst.msk [vmem:[%s1817_s4 + $0x30] sm:$0xf] %vm916_vm2, %v893_v37 }
 0x25a   :  { %v895_v16 = vpop.permute.xlu1 %894 }
 0x25b   :  { %v897_v38 = vpop.permute.xlu0 %896  ;;  %930 = vst.msk [vmem:[%s1817_s4 + $0x34] sm:$0xf] %vm916_vm2, %v895_v16 }
 0x25c   :  { %931 = vst.msk [vmem:[%s1817_s4 + $0x38] sm:$0xf] %vm916_vm2, %v897_v38 }
 0x25e   :  { %v899_v25 = vpop.permute.xlu1 %898 }
 0x25f   :  { %932 = vst.msk [vmem:[%s1817_s4 + $0x3c] sm:$0xf] %vm916_vm2, %v899_v25 }
 0x260   :  { %937 = vsyncpa [#allocation3], 1 }
 0x261   :  { %938 = vsyncpa [#allocation5], 1 }

// kernel: _lambda_.13
= control target key start
LH: loop header
LB: loop body
LE: loop exit
PB: predicated region body
PF: predicated region fallthrough
CT: control target
= control target key end

     0   :  { %s388_s0 = inlined_call_operand.vmem [shape: bf16[2,16,256], index: 0, kind: input, shape index: {}]   ;;  %s389_s1 = inlined_call_operand.vmem [shape: f32[256,10], index: 1, kind: input, shape index: {}]   ;;  %s390_s2 = inlined_call_operand.vmem [shape: f32[1,10], index: 2, kind: input, shape index: {}]   ;;  %s391_s3 = inlined_call_operand.hbm [shape: f32[2,10], index: 3, kind: output, shape index: {}]  }
   0x1   :  { %v91_v0 = vld [vmem:[%s389_s1 + $0xf8] sm:$0xff]  ;;  %v90_v2 = vld [vmem:[%s389_s1 + $0xf0] sm:$0xff]  ;;  %v89_v4 = vld [vmem:[%s389_s1 + $0xe8] sm:$0xff] }
   0x2   :  { %v75_v1 = vld [vmem:[%s389_s1 + $0x78] sm:$0xff]  ;;  %195 = vmatprep.subr.mxu0 %v91_v0  ;;  %v74_v3 = vld [vmem:[%s389_s1 + $0x70] sm:$0xff]  ;;  %v73_v5 = vld [vmem:[%s389_s1 + $0x68] sm:$0xff] }
   0x3   :  { %196 = vmatpush3.msra.mxu0 %v75_v1  ;;  %v88_v6 = vld [vmem:[%s389_s1 + $0xe0] sm:$0xff]  ;;  %v87_v8 = vld [vmem:[%s389_s1 + $0xd8] sm:$0xff]  ;;  %v86_v10 = vld [vmem:[%s389_s1 + $0xd0] sm:$0xff] }
   0x4   :  { %197 = vmatprep.subr.mxu0 %v90_v2  ;;  %v72_v7 = vld [vmem:[%s389_s1 + $0x60] sm:$0xff]  ;;  %v71_v9 = vld [vmem:[%s389_s1 + $0x58] sm:$0xff]  ;;  %v70_v11 = vld [vmem:[%s389_s1 + $0x50] sm:$0xff] }
   0x5   :  { %198 = vmatpush3.msra.mxu0 %v74_v3  ;;  %v85_v12 = vld [vmem:[%s389_s1 + $0xc8] sm:$0xff]  ;;  %v15_v14 = vld [vmem:[%s388_s0] sm:$0xff]  ;;  %v17_v16 = vld [vmem:[%s388_s0 + $0x10] sm:$0xff] }
   0x6   :  { %199 = vmatprep.subr.mxu0 %v89_v4  ;;  %v69_v13 = vld [vmem:[%s389_s1 + $0x48] sm:$0xff]  ;;  %v18_v17 = vld [vmem:[%s388_s0 + $0x18] sm:$0xff]  ;;  %v20_v18 = vunpack.c.h.bf16 %v15_v14  ;;  %v19_v19 = vunpack.c.l.bf16 %v15_v14  ;;  %v84_v20 = vld [vmem:[%s389_s1 + $0xc0] sm:$0xff]  ;;  %v24_v22 = vunpack.c.h.bf16 %v17_v16 }
   0x7   :  { %200 = vmatpush3.msra.mxu0 %v73_v5  ;;  %v16_v15 = vld [vmem:[%s388_s0 + $0x8] sm:$0xff]  ;;  %v26_v23 = vunpack.c.h.bf16 %v18_v17 }
   0x8   :  { %201 = vmatprep.subr.mxu0 %v88_v6  ;;  %v22_v21 = vunpack.c.h.bf16 %v16_v15  ;;  %v21_v24 = vunpack.c.l.bf16 %v16_v15 }
   0x9   :  { %202 = vmatpush3.msra.mxu0 %v72_v7 }
   0xa   :  { %203 = vmatprep.subr.mxu0 %v87_v8 }
   0xb   :  { %204 = vmatpush3.msra.mxu0 %v71_v9 }
   0xc   :  { %205 = vmatprep.subr.mxu0 %v86_v10 }
   0xd   :  { %206 = vmatpush3.msra.mxu0 %v70_v11 }
   0xe   :  { %8 = vsyncpa [#allocation3], 0  ;;  %207 = vmatprep.subr.mxu0 %v85_v12  ;;  %v68_v25 = vld [vmem:[%s389_s1 + $0x40] sm:$0xff]  ;;  %v23_v26 = vunpack.c.l.bf16 %v17_v16  ;;  %v25_v27 = vunpack.c.l.bf16 %v18_v17  ;;  %v83_v28 = vld [vmem:[%s389_s1 + $0xb8] sm:$0xff]  ;;  %v34_v29 = vadd.f32 %v22_v21, %v20_v18  ;;  %v48_v30 = vadd.f32 %v26_v23, %v24_v22  ;;  %s253_s30 = smov [#allocation2]  }
   0xf   :  { %208 = vmatpush3.msra.mxu0 %v69_v13  ;;  %v27_v31 = vadd.f32 %v21_v24, %v19_v19  ;;  %v67_v32 = vld [vmem:[%s389_s1 + $0x38] sm:$0xff]  ;;  %v82_v34 = vld [vmem:[%s389_s1 + $0xb0] sm:$0xff]  ;;  %v81_v40 = vld [vmem:[%s389_s1 + $0xa8] sm:$0xff]  ;;  %vm103_vm0 = vcmask 1041409   ;;  %s186_s4 = sshll.u32 %s253_s30, 4  ;;  %vm178_vm1 = vcmask 74752   ;;  %s187_s4 = int_to_ptr.vmem [resolvable:$true] %s186_s4 }
  0x10   :  { %209 = vmatprep.subr.mxu0 %v84_v20  ;;  %v41_v33 = vadd.f32 %v25_v27, %v23_v26  ;;  %v35_v35 = vrot.slane %v34_v29, 4  ;;  %v49_v36 = vrot.slane %v48_v30, 4  ;;  %v66_v38 = vld [vmem:[%s389_s1 + $0x30] sm:$0xff]  ;;  %v65_v44 = vld [vmem:[%s389_s1 + $0x28] sm:$0xff]  ;;  %v80_v46 = vld [vmem:[%s389_s1 + $0xa0] sm:$0xff]  ;;  %p236_p1 = scmp.lt.s32.totalorder %s187_s4, %s187_s4 }
  0x11   :  { %210 = vmatpush3.msra.mxu0 %v68_v25  ;;  %v28_v37 = vrot.slane %v27_v31, 4  ;;  %v64_v50 = vld [vmem:[%s389_s1 + $0x20] sm:$0xff]  ;;  %v79_v52 = vld [vmem:[%s389_s1 + $0x98] sm:$0xff]  ;;  %v78_v58 = vld [vmem:[%s389_s1 + $0x90] sm:$0xff] }
  0x12   :  { %211 = vmatprep.subr.mxu0 %v83_v28  ;;  %v42_v39 = vrot.slane %v41_v33, 4  ;;  %v36_v41 = vadd.f32 %v35_v35, %v34_v29  ;;  %v50_v42 = vadd.f32 %v49_v36, %v48_v30  ;;  %v63_v56 = vld [vmem:[%s389_s1 + $0x18] sm:$0xff]  ;;  %v62_v62 = vld [vmem:[%s389_s1 + $0x10] sm:$0xff]  ;;  %v77_v0 = vld [vmem:[%s389_s1 + $0x88] sm:$0xff] }
  0x13   :  { %212 = vmatpush3.msra.mxu0 %v67_v32  ;;  %v29_v43 = vadd.f32 %v28_v37, %v27_v31  ;;  %v61_v4 = vld [vmem:[%s389_s1 + $0x8] sm:$0xff]  ;;  %v76_v6 = vld [vmem:[%s389_s1 + $0x80] sm:$0xff] }
  0x14   :  { %213 = vmatprep.subr.mxu0 %v82_v34  ;;  %v43_v45 = vadd.f32 %v42_v39, %v41_v33  ;;  %v37_v47 = vrot.slane %v36_v41, 2  ;;  %v51_v48 = vrot.slane %v50_v42, 2  ;;  %v60_v10 = vld [vmem:[%s389_s1] sm:$0xff]  ;;  %s231_s1 = scalar_lea.vmem %s187_s4, 32 }
  0x15   :  { %214 = vmatpush3.msra.mxu0 %v66_v38  ;;  %v30_v49 = vrot.slane %v29_v43, 2  ;;  %v194_v15 = vld [vmem:[%s390_s2] ss:$0 sm:$0xff]  ;;  %p232_p0 = scmp.ne.s32.totalorder %s187_s4, %s231_s1  ;;  %p237_p2 = scmp.lt.s32.totalorder %s231_s1, %s231_s1 }
  0x16   :  { %215 = vmatprep.subr.mxu0 %v81_v40  ;;  %v44_v51 = vrot.slane %v43_v45, 2  ;;  %v38_v53 = vadd.f32 %v37_v47, %v36_v41  ;;  %v52_v54 = vadd.f32 %v51_v48, %v50_v42 }
  0x17   :  { %216 = vmatpush3.msra.mxu0 %v65_v44  ;;  %v31_v55 = vadd.f32 %v30_v49, %v29_v43  ;;  %p238_p3 = por %p237_p2, %p236_p1 }
  0x18   :  { %217 = vmatprep.subr.mxu0 %v80_v46  ;;  %v45_v57 = vadd.f32 %v44_v51, %v43_v45  ;;  %v39_v59 = vrot.slane %v38_v53, 1  ;;  %v53_v60 = vrot.slane %v52_v54, 1 }
  0x19   :  { %218 = vmatpush3.msra.mxu0 %v64_v50  ;;  %v32_v61 = vrot.slane %v31_v55, 1  ;;  %p239_p4 = pnand %p238_p3, %p232_p0 }
  0x1a   :  { %219 = vmatprep.subr.mxu0 %v79_v52  ;;  %v46_v63 = vrot.slane %v45_v57, 1  ;;  %v40_v1 = vadd.f32 %v39_v59, %v38_v53  ;;  %v54_v2 = vadd.f32 %v53_v60, %v52_v54 }
  0x1b   :  { %220 = vmatpush3.msra.mxu0 %v63_v56  ;;  %v33_v3 = vadd.f32 %v32_v61, %v31_v55 }
  0x1c   :  { %221 = vmatprep.subr.mxu0 %v78_v58  ;;  %v47_v5 = vadd.f32 %v46_v63, %v45_v57  ;;  %v57_v7 = vmul.f32 0.0625, %v40_v1  ;;  %v59_v8 = vmul.f32 0.0625, %v54_v2 }
  0x1d   :  { %222 = vmatpush3.msra.mxu0 %v62_v62  ;;  %v56_v9 = vmul.f32 0.0625, %v33_v3 }
  0x1e   :  { %223 = vmatprep.subr.mxu0 %v77_v0  ;;  %v58_v11 = vmul.f32 0.0625, %v47_v5  ;;  %v105_v12 = vsel %vm103_vm0, %v59_v8, %v57_v7 }
  0x1f   :  { %224 = vmatpush3.msra.mxu0 %v61_v4  ;;  %172 = vmatprep.mubr.f32.mxu0 %v105_v12 }
  0x20   :  { %225 = vmatprep.subr.mxu0 %v76_v6  ;;  %v104_v13 = vsel %vm103_vm0, %v58_v11, %v56_v9 }
  0x21   :  { %226 = vmatpush3.msra.mxu0 %v60_v10 }
  0x22   :  { %173 = vmatmul.mubr.f32.vlgmr.msra.gmra.mxu0 %v104_v13 }
  0xe2   :  { %v227_v14 = vpop.f32.mrf.mxu0 }
  0xe4   :  { %v228_v16 = vpop.f32.mrf.mxu0 }
  0xe5   :  { %v229_v17 = vadd.f32 %v228_v16, %v227_v14 }
  0xe7   :  { %v175_v18 = vadd.f32 %v229_v17, %v194_v15 }
  0xe9   :  { %179 = vst.msk [vmem:[#allocation2] sm:$0x3] %vm178_vm1, %v175_v18 }
  0xea   :  { %242 = shalt.err (!%p239_p4)
}
  0xeb   :  { %189 = dma.vmem_to_hbm [thread:$0]  %s187_s4, 32, %s391_s3, [#allocation3]  }
  0xec   :  { %251 = dma.done.wait [#allocation3], 32  }
  0xed   :  { %252 = vsyncadd [#allocation3], 4294967264 }
  0xee   :  { %193 = vsyncpa [#allocation3], 1 }

</bundles_post_ra>
